<compile_context>
chip_gen: v7x
topology: tpu7x:2x2x1
jax: 0.10.0
libtpu: 0.0.40
codegen_flags: <defaults>
</compile_context>

<pallas_src>
import numpy as np
import jax
import jax.numpy as jnp
from jax.experimental import pallas as pl
from jax.experimental.pallas import tpu as pltpu


# ----------------------------------------------------------------------------
# In-kernel building blocks
# ----------------------------------------------------------------------------
def _conv3x3(x_hwc, w_ref, b_ref, pad_ref):
    """3x3 conv (stride 1, pad 1) with folded-BN affine + ReLU.

    x_hwc  : (H, W, Cin)  f32 value (current activation)
    w_ref  : (3, 3, Cin, Cout) HWIO weight with BN scale already folded in
    b_ref  : (1, Cout)    folded BN bias
    pad_ref: (H+2, W+2, Cin) f32 VMEM scratch used for in-kernel zero padding
    returns: (H*W, Cout) f32
    """
    H, W, Cin = x_hwc.shape
    Cout = w_ref.shape[-1]

    # In-kernel zero padding (replaces the wrapper-side jnp.pad of the old
    # version: no extra HBM array, no extra XLA op).
    pad_ref[...] = jnp.zeros_like(pad_ref)
    pad_ref[1:H + 1, 1:W + 1, :] = x_hwc
    xp = pad_ref[...]                                   # (H+2, W+2, Cin)

    acc = jnp.zeros((H * W, Cout), jnp.float32)
    # 3x3 conv as 9 shifted (H*W, Cin) x (Cin, Cout) MXU matmuls.
    for dy in range(3):
        for dx in range(3):
            patch = xp[dy:dy + H, dx:dx + W, :].reshape(H * W, Cin)
            acc = acc + jnp.dot(patch, w_ref[dy, dx],
                                preferred_element_type=jnp.float32)
    # Folded-BN bias + ReLU (scale already folded into w_ref).
    return jnp.maximum(acc + b_ref[...], 0.0)            # (H*W, Cout)


def _fused_spatial_kernel(x_ref,
                          w1, b1, w2, b2, w3, b3, w4, b4, w5, b5, w6, b6,
                          r1_ref, r2_ref,
                          o_ref,
                          p1, p2, p3, p4, p5, p6):
    # x_ref: (1, H, W, nf) NHWC block, one batch element per grid step.
    # o_ref: (1, H//4, W//4, 8*nf)
    _, H, W, _ = x_ref.shape
    H2, W2 = H // 2, W // 2
    H4, W4 = H // 4, W // 4

    x = x_ref[0].astype(jnp.float32)                             # (H, W, nf)
    y = _conv3x3(x, w1, b1, p1)                                  # (H*W,   nf)
    y = _conv3x3(y.reshape(H, W, -1), w2, b2, p2)                # (H*W,  2nf)
    # Upsample(size=(H/2, W/2), bilinear, align_corners=True) as ONE matmul
    # against a precomputed kron(rh, rw) interpolation matrix.
    y = jnp.dot(r1_ref[...], y, preferred_element_type=jnp.float32)  # (H2*W2, 2nf)
    y = _conv3x3(y.reshape(H2, W2, -1), w3, b3, p3)              # (H2*W2, 2nf)
    y = _conv3x3(y.reshape(H2, W2, -1), w4, b4, p4)              # (H2*W2, 4nf)
    y = jnp.dot(r2_ref[...], y, preferred_element_type=jnp.float32)  # (H4*W4, 4nf)
    y = _conv3x3(y.reshape(H4, W4, -1), w5, b5, p5)              # (H4*W4, 4nf)
    y = _conv3x3(y.reshape(H4, W4, -1), w6, b6, p6)              # (H4*W4, 8nf)

    o_ref[0] = y.reshape(H4, W4, o_ref.shape[-1]).astype(o_ref.dtype)


# ----------------------------------------------------------------------------
# Host-side parameter preparation (done once, outside the jitted forward)
# ----------------------------------------------------------------------------
def _interp_matrix(out_size, in_size):
    # Bilinear, align_corners=True (matches nn.Upsample(..., align_corners=True)).
    m = np.zeros((out_size, in_size), dtype=np.float32)
    if out_size == 1:
        m[0, 0] = 1.0
        return m
    scale = (in_size - 1) / (out_size - 1)
    for o in range(out_size):
        src = o * scale
        i0 = min(int(np.floor(src)), in_size - 1)
        i1 = min(i0 + 1, in_size - 1)
        f = src - i0
        m[o, i0] += 1.0 - f
        m[o, i1] += f
    return m


def _resize_matrix(out_h, out_w, in_h, in_w):
    rh = _interp_matrix(out_h, in_h)                     # (out_h, in_h)
    rw = _interp_matrix(out_w, in_w)                     # (out_w, in_w)
    # R[oh*out_w + ow, h*in_w + w] = rh[oh, h] * rw[ow, w]
    return jnp.asarray(np.kron(rh, rw))                  # (out_h*out_w, in_h*in_w)


def init_block_params(key, cin, cout, eps=1e-5):
    k1, k2, k3, k4, k5 = jax.random.split(key, 5)
    fan_in = cin * 9
    w = jax.random.normal(k1, (3, 3, cin, cout), jnp.float32) * np.sqrt(2.0 / fan_in)
    gamma = 1.0 + 0.1 * jax.random.normal(k2, (cout,), jnp.float32)
    beta = 0.1 * jax.random.normal(k3, (cout,), jnp.float32)
    rmean = 0.1 * jax.random.normal(k4, (cout,), jnp.float32)
    rvar = jnp.abs(1.0 + 0.1 * jax.random.normal(k5, (cout,), jnp.float32))
    # Fold eval-mode BatchNorm: scale into the conv weight, bias kept separate.
    scale = gamma / jnp.sqrt(rvar + eps)
    bias = beta - rmean * scale
    w_folded = w * scale[None, None, None, :]            # (3, 3, Cin, Cout)
    return w_folded, bias.reshape(1, cout)


def init_spatial_model2_params(key, num_filters, heatmap_size):
    nf, H = num_filters, heatmap_size
    plan = [(nf, nf), (nf, 2 * nf),
            (2 * nf, 2 * nf), (2 * nf, 4 * nf),
            (4 * nf, 4 * nf), (4 * nf, 8 * nf)]
    keys = jax.random.split(key, len(plan))
    flat = []
    for k, (ci, co) in zip(keys, plan):
        flat.extend(init_block_params(k, ci, co))
    flat.append(_resize_matrix(H // 2, H // 2, H, H))          # (H/2*W/2, H*W)
    flat.append(_resize_matrix(H // 4, H // 4, H // 2, H // 2))  # (H/4*W/4, H/2*W/2)
    return tuple(flat)


# ----------------------------------------------------------------------------
# Forward pass: one fused pallas_call
# ----------------------------------------------------------------------------
def spatial_model2_forward(x_nchw, params):
    (w1, b1, w2, b2, w3, b3, w4, b4, w5, b5, w6, b6, r1, r2) = params
    N, C0, H, W = x_nchw.shape
    H2, W2, H4, W4 = H // 2, W // 2, H // 4, W // 4
    c_final = w6.shape[3]

    # Single tiny boundary relayout (16 KB); all per-layer work is in-kernel.
    x = jnp.transpose(x_nchw, (0, 2, 3, 1))                    # NCHW -> NHWC

    weight_args = (w1, b1, w2, b2, w3, b3, w4, b4, w5, b5, w6, b6, r1, r2)
    weight_specs = [
        pl.BlockSpec(a.shape, (lambda n, nd=a.ndim: (0,) * nd))
        for a in weight_args
    ]

    # Per-conv-stage padded-activation scratch (Cin taken from each weight).
    conv_ws = (w1, w2, w3, w4, w5, w6)
    spatials = ((H, W), (H, W), (H2, W2), (H2, W2), (H4, W4), (H4, W4))
    pad_scratch = [
        pltpu.VMEM((h + 2, w_ + 2, wt.shape[2]), jnp.float32)
        for (h, w_), wt in zip(spatials, conv_ws)
    ]

    out_nhwc = pl.pallas_call(
        _fused_spatial_kernel,
        out_shape=jax.ShapeDtypeStruct((N, H4, W4, c_final), jnp.float32),
        grid=(N,),
        in_specs=[pl.BlockSpec((1, H, W, C0), lambda n: (n, 0, 0, 0))]
                 + weight_specs,
        out_specs=pl.BlockSpec((1, H4, W4, c_final), lambda n: (n, 0, 0, 0)),
        scratch_shapes=pad_scratch,
        compiler_params=pltpu.CompilerParams(
            dimension_semantics=("parallel",)),   # v7x: one batch elem per TC
    )(x, *weight_args)

    return jnp.transpose(out_nhwc, (0, 3, 1, 2))               # NHWC -> NCHW


if __name__ == "__main__":
    # Small cfg-consistent shapes: numFilters=8, heatmapSize=16, batch=2.
    batch, num_filters, heatmap_size = 2, 8, 16

    key = jax.random.PRNGKey(0)
    kx, kp = jax.random.split(key)
    x = jax.random.normal(
        kx, (batch, num_filters, heatmap_size, heatmap_size), jnp.float32)
    params = init_spatial_model2_params(kp, num_filters, heatmap_size)

    fwd = jax.jit(spatial_model2_forward)
    out = jax.block_until_ready(fwd(x, params))

    expected = (batch, num_filters * 8, heatmap_size // 4, heatmap_size // 4)
    assert out.shape == expected, (out.shape, expected)
    assert out.dtype == jnp.float32
    assert bool(jnp.all(jnp.isfinite(out)))
    print("KERNEL_OK")
</pallas_src>

<mosaic_0001>
module attributes {stable_mosaic.version = 11 : i64} {
  func.func @_fused_spatial_kernel(%arg0: i32, %arg1: memref<1x16x16x8xf32, #tpu.memory_space<vmem>>, %arg2: memref<3x3x8x8xf32, #tpu.memory_space<vmem>>, %arg3: memref<1x8xf32, #tpu.memory_space<vmem>>, %arg4: memref<3x3x8x16xf32, #tpu.memory_space<vmem>>, %arg5: memref<1x16xf32, #tpu.memory_space<vmem>>, %arg6: memref<3x3x16x16xf32, #tpu.memory_space<vmem>>, %arg7: memref<1x16xf32, #tpu.memory_space<vmem>>, %arg8: memref<3x3x16x32xf32, #tpu.memory_space<vmem>>, %arg9: memref<1x32xf32, #tpu.memory_space<vmem>>, %arg10: memref<3x3x32x32xf32, #tpu.memory_space<vmem>>, %arg11: memref<1x32xf32, #tpu.memory_space<vmem>>, %arg12: memref<3x3x32x64xf32, #tpu.memory_space<vmem>>, %arg13: memref<1x64xf32, #tpu.memory_space<vmem>>, %arg14: memref<64x256xf32, #tpu.memory_space<vmem>>, %arg15: memref<16x64xf32, #tpu.memory_space<vmem>>, %arg16: memref<1x4x4x64xf32, #tpu.memory_space<vmem>>, %arg17: memref<18x18x8xf32, #tpu.memory_space<vmem>>, %arg18: memref<18x18x8xf32, #tpu.memory_space<vmem>>, %arg19: memref<10x10x16xf32, #tpu.memory_space<vmem>>, %arg20: memref<10x10x16xf32, #tpu.memory_space<vmem>>, %arg21: memref<6x6x32xf32, #tpu.memory_space<vmem>>, %arg22: memref<6x6x32xf32, #tpu.memory_space<vmem>>) attributes {dimension_semantics = [#tpu.dimension_semantics<parallel>], iteration_bounds = array<i64: 2>, scalar_prefetch = 0 : i64, scratch_operands = 6 : i64, tpu.core_type = #tpu.core_type<tc>, window_params = [{transform_indices = @transform_0, window_bounds = array<i64: 1, 16, 16, 8>}, {pipeline_mode = #tpu.pipeline_mode<synchronous>, transform_indices = @transform_1, window_bounds = array<i64: 3, 3, 8, 8>}, {pipeline_mode = #tpu.pipeline_mode<synchronous>, transform_indices = @transform_2, window_bounds = array<i64: 1, 8>}, {pipeline_mode = #tpu.pipeline_mode<synchronous>, transform_indices = @transform_3, window_bounds = array<i64: 3, 3, 8, 16>}, {pipeline_mode = #tpu.pipeline_mode<synchronous>, transform_indices = @transform_4, window_bounds = array<i64: 1, 16>}, {pipeline_mode = #tpu.pipeline_mode<synchronous>, transform_indices = @transform_5, window_bounds = array<i64: 3, 3, 16, 16>}, {pipeline_mode = #tpu.pipeline_mode<synchronous>, transform_indices = @transform_6, window_bounds = array<i64: 1, 16>}, {pipeline_mode = #tpu.pipeline_mode<synchronous>, transform_indices = @transform_7, window_bounds = array<i64: 3, 3, 16, 32>}, {pipeline_mode = #tpu.pipeline_mode<synchronous>, transform_indices = @transform_8, window_bounds = array<i64: 1, 32>}, {pipeline_mode = #tpu.pipeline_mode<synchronous>, transform_indices = @transform_9, window_bounds = array<i64: 3, 3, 32, 32>}, {pipeline_mode = #tpu.pipeline_mode<synchronous>, transform_indices = @transform_10, window_bounds = array<i64: 1, 32>}, {pipeline_mode = #tpu.pipeline_mode<synchronous>, transform_indices = @transform_11, window_bounds = array<i64: 3, 3, 32, 64>}, {pipeline_mode = #tpu.pipeline_mode<synchronous>, transform_indices = @transform_12, window_bounds = array<i64: 1, 64>}, {pipeline_mode = #tpu.pipeline_mode<synchronous>, transform_indices = @transform_13, window_bounds = array<i64: 64, 256>}, {pipeline_mode = #tpu.pipeline_mode<synchronous>, transform_indices = @transform_14, window_bounds = array<i64: 16, 64>}, {transform_indices = @transform_15, window_bounds = array<i64: 1, 4, 4, 64>}]} {
    %c0 = arith.constant 0 : index
    %c0_0 = arith.constant 0 : index
    %c0_1 = arith.constant 0 : index
    %c0_2 = arith.constant 0 : index
    %0 = vector.load %arg1[%c0, %c0_0, %c0_1, %c0_2] : memref<1x16x16x8xf32, #tpu.memory_space<vmem>>, vector<1x16x16x8xf32>
    %1 = vector.shape_cast %0 : vector<1x16x16x8xf32> to vector<16x16x8xf32>
    %cst = arith.constant 0.000000e+00 : f32
    %2 = vector.broadcast %cst : f32 to vector<18x18x8xf32>
    %c0_3 = arith.constant 0 : index
    %c0_4 = arith.constant 0 : index
    %c0_5 = arith.constant 0 : index
    %3 = vector.load %arg17[%c0_3, %c0_4, %c0_5] : memref<18x18x8xf32, #tpu.memory_space<vmem>>, vector<18x18x8xf32>
    tpu.vector_store %arg17[%c0_3, %c0_4, %c0_5], %2 {strides = array<i32>} : memref<18x18x8xf32, #tpu.memory_space<vmem>>, vector<18x18x8xf32>,
    %c1 = arith.constant 1 : index
    %c1_6 = arith.constant 1 : index
    %c0_7 = arith.constant 0 : index
    %4 = vector.load %arg17[%c1, %c1_6, %c0_7] : memref<18x18x8xf32, #tpu.memory_space<vmem>>, vector<16x16x8xf32>
    tpu.vector_store %arg17[%c1, %c1_6, %c0_7], %1 {strides = array<i32>} : memref<18x18x8xf32, #tpu.memory_space<vmem>>, vector<16x16x8xf32>,
    %c0_8 = arith.constant 0 : index
    %c0_9 = arith.constant 0 : index
    %c0_10 = arith.constant 0 : index
    %5 = vector.load %arg17[%c0_8, %c0_9, %c0_10] : memref<18x18x8xf32, #tpu.memory_space<vmem>>, vector<18x18x8xf32>
    %cst_11 = arith.constant 0.000000e+00 : f32
    %6 = vector.broadcast %cst_11 : f32 to vector<256x8xf32>
    %7 = vector.extract_strided_slice %5 {offsets = [0, 0, 0], sizes = [16, 16, 8], strides = [1, 1, 1]} : vector<18x18x8xf32> to vector<16x16x8xf32>
    %8 = vector.shape_cast %7 : vector<16x16x8xf32> to vector<256x8xf32>
    %c0_12 = arith.constant 0 : index
    %c0_13 = arith.constant 0 : index
    %c0_14 = arith.constant 0 : index
    %c0_15 = arith.constant 0 : index
    %9 = vector.load %arg2[%c0_12, %c0_13, %c0_14, %c0_15] : memref<3x3x8x8xf32, #tpu.memory_space<vmem>>, vector<1x1x8x8xf32>
    %10 = vector.shape_cast %9 : vector<1x1x8x8xf32> to vector<8x8xf32>
    %cst_16 = arith.constant dense<0.000000e+00> : vector<256x8xf32>
    %11 = tpu.matmul %8, %10, %cst_16 {dimension_numbers = #tpu.dot_dimension_numbers<[1], [0], [0], [1], [0, 0, 1, 1], [], []>} : vector<256x8xf32>, vector<8x8xf32>, vector<256x8xf32> -> vector<256x8xf32>
    %12 = arith.addf %6, %11 : vector<256x8xf32>
    %13 = vector.extract_strided_slice %5 {offsets = [0, 1, 0], sizes = [16, 16, 8], strides = [1, 1, 1]} : vector<18x18x8xf32> to vector<16x16x8xf32>
    %14 = vector.shape_cast %13 : vector<16x16x8xf32> to vector<256x8xf32>
    %c0_17 = arith.constant 0 : index
    %c1_18 = arith.constant 1 : index
    %c0_19 = arith.constant 0 : index
    %c0_20 = arith.constant 0 : index
    %15 = vector.load %arg2[%c0_17, %c1_18, %c0_19, %c0_20] : memref<3x3x8x8xf32, #tpu.memory_space<vmem>>, vector<1x1x8x8xf32>
    %16 = vector.shape_cast %15 : vector<1x1x8x8xf32> to vector<8x8xf32>
    %cst_21 = arith.constant dense<0.000000e+00> : vector<256x8xf32>
    %17 = tpu.matmul %14, %16, %cst_21 {dimension_numbers = #tpu.dot_dimension_numbers<[1], [0], [0], [1], [0, 0, 1, 1], [], []>} : vector<256x8xf32>, vector<8x8xf32>, vector<256x8xf32> -> vector<256x8xf32>
    %18 = arith.addf %12, %17 : vector<256x8xf32>
    %19 = vector.extract_strided_slice %5 {offsets = [0, 2, 0], sizes = [16, 16, 8], strides = [1, 1, 1]} : vector<18x18x8xf32> to vector<16x16x8xf32>
    %20 = vector.shape_cast %19 : vector<16x16x8xf32> to vector<256x8xf32>
    %c0_22 = arith.constant 0 : index
    %c2 = arith.constant 2 : index
    %c0_23 = arith.constant 0 : index
    %c0_24 = arith.constant 0 : index
    %21 = vector.load %arg2[%c0_22, %c2, %c0_23, %c0_24] : memref<3x3x8x8xf32, #tpu.memory_space<vmem>>, vector<1x1x8x8xf32>
    %22 = vector.shape_cast %21 : vector<1x1x8x8xf32> to vector<8x8xf32>
    %cst_25 = arith.constant dense<0.000000e+00> : vector<256x8xf32>
    %23 = tpu.matmul %20, %22, %cst_25 {dimension_numbers = #tpu.dot_dimension_numbers<[1], [0], [0], [1], [0, 0, 1, 1], [], []>} : vector<256x8xf32>, vector<8x8xf32>, vector<256x8xf32> -> vector<256x8xf32>
    %24 = arith.addf %18, %23 : vector<256x8xf32>
    %25 = vector.extract_strided_slice %5 {offsets = [1, 0, 0], sizes = [16, 16, 8], strides = [1, 1, 1]} : vector<18x18x8xf32> to vector<16x16x8xf32>
    %26 = vector.shape_cast %25 : vector<16x16x8xf32> to vector<256x8xf32>
    %c1_26 = arith.constant 1 : index
    %c0_27 = arith.constant 0 : index
    %c0_28 = arith.constant 0 : index
    %c0_29 = arith.constant 0 : index
    %27 = vector.load %arg2[%c1_26, %c0_27, %c0_28, %c0_29] : memref<3x3x8x8xf32, #tpu.memory_space<vmem>>, vector<1x1x8x8xf32>
    %28 = vector.shape_cast %27 : vector<1x1x8x8xf32> to vector<8x8xf32>
    %cst_30 = arith.constant dense<0.000000e+00> : vector<256x8xf32>
    %29 = tpu.matmul %26, %28, %cst_30 {dimension_numbers = #tpu.dot_dimension_numbers<[1], [0], [0], [1], [0, 0, 1, 1], [], []>} : vector<256x8xf32>, vector<8x8xf32>, vector<256x8xf32> -> vector<256x8xf32>
    %30 = arith.addf %24, %29 : vector<256x8xf32>
    %31 = vector.extract_strided_slice %5 {offsets = [1, 1, 0], sizes = [16, 16, 8], strides = [1, 1, 1]} : vector<18x18x8xf32> to vector<16x16x8xf32>
    %32 = vector.shape_cast %31 : vector<16x16x8xf32> to vector<256x8xf32>
    %c1_31 = arith.constant 1 : index
    %c1_32 = arith.constant 1 : index
    %c0_33 = arith.constant 0 : index
    %c0_34 = arith.constant 0 : index
    %33 = vector.load %arg2[%c1_31, %c1_32, %c0_33, %c0_34] : memref<3x3x8x8xf32, #tpu.memory_space<vmem>>, vector<1x1x8x8xf32>
    %34 = vector.shape_cast %33 : vector<1x1x8x8xf32> to vector<8x8xf32>
    %cst_35 = arith.constant dense<0.000000e+00> : vector<256x8xf32>
    %35 = tpu.matmul %32, %34, %cst_35 {dimension_numbers = #tpu.dot_dimension_numbers<[1], [0], [0], [1], [0, 0, 1, 1], [], []>} : vector<256x8xf32>, vector<8x8xf32>, vector<256x8xf32> -> vector<256x8xf32>
    %36 = arith.addf %30, %35 : vector<256x8xf32>
    %37 = vector.extract_strided_slice %5 {offsets = [1, 2, 0], sizes = [16, 16, 8], strides = [1, 1, 1]} : vector<18x18x8xf32> to vector<16x16x8xf32>
    %38 = vector.shape_cast %37 : vector<16x16x8xf32> to vector<256x8xf32>
    %c1_36 = arith.constant 1 : index
    %c2_37 = arith.constant 2 : index
    %c0_38 = arith.constant 0 : index
    %c0_39 = arith.constant 0 : index
    %39 = vector.load %arg2[%c1_36, %c2_37, %c0_38, %c0_39] : memref<3x3x8x8xf32, #tpu.memory_space<vmem>>, vector<1x1x8x8xf32>
    %40 = vector.shape_cast %39 : vector<1x1x8x8xf32> to vector<8x8xf32>
    %cst_40 = arith.constant dense<0.000000e+00> : vector<256x8xf32>
    %41 = tpu.matmul %38, %40, %cst_40 {dimension_numbers = #tpu.dot_dimension_numbers<[1], [0], [0], [1], [0, 0, 1, 1], [], []>} : vector<256x8xf32>, vector<8x8xf32>, vector<256x8xf32> -> vector<256x8xf32>
    %42 = arith.addf %36, %41 : vector<256x8xf32>
    %43 = vector.extract_strided_slice %5 {offsets = [2, 0, 0], sizes = [16, 16, 8], strides = [1, 1, 1]} : vector<18x18x8xf32> to vector<16x16x8xf32>
    %44 = vector.shape_cast %43 : vector<16x16x8xf32> to vector<256x8xf32>
    %c2_41 = arith.constant 2 : index
    %c0_42 = arith.constant 0 : index
    %c0_43 = arith.constant 0 : index
    %c0_44 = arith.constant 0 : index
    %45 = vector.load %arg2[%c2_41, %c0_42, %c0_43, %c0_44] : memref<3x3x8x8xf32, #tpu.memory_space<vmem>>, vector<1x1x8x8xf32>
    %46 = vector.shape_cast %45 : vector<1x1x8x8xf32> to vector<8x8xf32>
    %cst_45 = arith.constant dense<0.000000e+00> : vector<256x8xf32>
    %47 = tpu.matmul %44, %46, %cst_45 {dimension_numbers = #tpu.dot_dimension_numbers<[1], [0], [0], [1], [0, 0, 1, 1], [], []>} : vector<256x8xf32>, vector<8x8xf32>, vector<256x8xf32> -> vector<256x8xf32>
    %48 = arith.addf %42, %47 : vector<256x8xf32>
    %49 = vector.extract_strided_slice %5 {offsets = [2, 1, 0], sizes = [16, 16, 8], strides = [1, 1, 1]} : vector<18x18x8xf32> to vector<16x16x8xf32>
    %50 = vector.shape_cast %49 : vector<16x16x8xf32> to vector<256x8xf32>
    %c2_46 = arith.constant 2 : index
    %c1_47 = arith.constant 1 : index
    %c0_48 = arith.constant 0 : index
    %c0_49 = arith.constant 0 : index
    %51 = vector.load %arg2[%c2_46, %c1_47, %c0_48, %c0_49] : memref<3x3x8x8xf32, #tpu.memory_space<vmem>>, vector<1x1x8x8xf32>
    %52 = vector.shape_cast %51 : vector<1x1x8x8xf32> to vector<8x8xf32>
    %cst_50 = arith.constant dense<0.000000e+00> : vector<256x8xf32>
    %53 = tpu.matmul %50, %52, %cst_50 {dimension_numbers = #tpu.dot_dimension_numbers<[1], [0], [0], [1], [0, 0, 1, 1], [], []>} : vector<256x8xf32>, vector<8x8xf32>, vector<256x8xf32> -> vector<256x8xf32>
    %54 = arith.addf %48, %53 : vector<256x8xf32>
    %55 = vector.extract_strided_slice %5 {offsets = [2, 2, 0], sizes = [16, 16, 8], strides = [1, 1, 1]} : vector<18x18x8xf32> to vector<16x16x8xf32>
    %56 = vector.shape_cast %55 : vector<16x16x8xf32> to vector<256x8xf32>
    %c2_51 = arith.constant 2 : index
    %c2_52 = arith.constant 2 : index
    %c0_53 = arith.constant 0 : index
    %c0_54 = arith.constant 0 : index
    %57 = vector.load %arg2[%c2_51, %c2_52, %c0_53, %c0_54] : memref<3x3x8x8xf32, #tpu.memory_space<vmem>>, vector<1x1x8x8xf32>
    %58 = vector.shape_cast %57 : vector<1x1x8x8xf32> to vector<8x8xf32>
    %cst_55 = arith.constant dense<0.000000e+00> : vector<256x8xf32>
    %59 = tpu.matmul %56, %58, %cst_55 {dimension_numbers = #tpu.dot_dimension_numbers<[1], [0], [0], [1], [0, 0, 1, 1], [], []>} : vector<256x8xf32>, vector<8x8xf32>, vector<256x8xf32> -> vector<256x8xf32>
    %60 = arith.addf %54, %59 : vector<256x8xf32>
    %c0_56 = arith.constant 0 : index
    %c0_57 = arith.constant 0 : index
    %61 = vector.load %arg3[%c0_56, %c0_57] : memref<1x8xf32, #tpu.memory_space<vmem>>, vector<1x8xf32>
    %62 = vector.broadcast %61 : vector<1x8xf32> to vector<256x8xf32>
    %63 = arith.addf %60, %62 : vector<256x8xf32>
    %cst_58 = arith.constant 0.000000e+00 : f32
    %64 = vector.broadcast %cst_58 : f32 to vector<256x8xf32>
    %65 = arith.maximumf %63, %64 : vector<256x8xf32>
    %66 = vector.shape_cast %65 : vector<256x8xf32> to vector<16x16x8xf32>
    %cst_59 = arith.constant 0.000000e+00 : f32
    %67 = vector.broadcast %cst_59 : f32 to vector<18x18x8xf32>
    %c0_60 = arith.constant 0 : index
    %c0_61 = arith.constant 0 : index
    %c0_62 = arith.constant 0 : index
    %68 = vector.load %arg18[%c0_60, %c0_61, %c0_62] : memref<18x18x8xf32, #tpu.memory_space<vmem>>, vector<18x18x8xf32>
    tpu.vector_store %arg18[%c0_60, %c0_61, %c0_62], %67 {strides = array<i32>} : memref<18x18x8xf32, #tpu.memory_space<vmem>>, vector<18x18x8xf32>,
    %c1_63 = arith.constant 1 : index
    %c1_64 = arith.constant 1 : index
    %c0_65 = arith.constant 0 : index
    %69 = vector.load %arg18[%c1_63, %c1_64, %c0_65] : memref<18x18x8xf32, #tpu.memory_space<vmem>>, vector<16x16x8xf32>
    tpu.vector_store %arg18[%c1_63, %c1_64, %c0_65], %66 {strides = array<i32>} : memref<18x18x8xf32, #tpu.memory_space<vmem>>, vector<16x16x8xf32>,
    %c0_66 = arith.constant 0 : index
    %c0_67 = arith.constant 0 : index
    %c0_68 = arith.constant 0 : index
    %70 = vector.load %arg18[%c0_66, %c0_67, %c0_68] : memref<18x18x8xf32, #tpu.memory_space<vmem>>, vector<18x18x8xf32>
    %cst_69 = arith.constant 0.000000e+00 : f32
    %71 = vector.broadcast %cst_69 : f32 to vector<256x16xf32>
    %72 = vector.extract_strided_slice %70 {offsets = [0, 0, 0], sizes = [16, 16, 8], strides = [1, 1, 1]} : vector<18x18x8xf32> to vector<16x16x8xf32>
    %73 = vector.shape_cast %72 : vector<16x16x8xf32> to vector<256x8xf32>
    %c0_70 = arith.constant 0 : index
    %c0_71 = arith.constant 0 : index
    %c0_72 = arith.constant 0 : index
    %c0_73 = arith.constant 0 : index
    %74 = vector.load %arg4[%c0_70, %c0_71, %c0_72, %c0_73] : memref<3x3x8x16xf32, #tpu.memory_space<vmem>>, vector<1x1x8x16xf32>
    %75 = vector.shape_cast %74 : vector<1x1x8x16xf32> to vector<8x16xf32>
    %cst_74 = arith.constant dense<0.000000e+00> : vector<256x16xf32>
    %76 = tpu.matmul %73, %75, %cst_74 {dimension_numbers = #tpu.dot_dimension_numbers<[1], [0], [0], [1], [0, 0, 1, 1], [], []>} : vector<256x8xf32>, vector<8x16xf32>, vector<256x16xf32> -> vector<256x16xf32>
    %77 = arith.addf %71, %76 : vector<256x16xf32>
    %78 = vector.extract_strided_slice %70 {offsets = [0, 1, 0], sizes = [16, 16, 8], strides = [1, 1, 1]} : vector<18x18x8xf32> to vector<16x16x8xf32>
    %79 = vector.shape_cast %78 : vector<16x16x8xf32> to vector<256x8xf32>
    %c0_75 = arith.constant 0 : index
    %c1_76 = arith.constant 1 : index
    %c0_77 = arith.constant 0 : index
    %c0_78 = arith.constant 0 : index
    %80 = vector.load %arg4[%c0_75, %c1_76, %c0_77, %c0_78] : memref<3x3x8x16xf32, #tpu.memory_space<vmem>>, vector<1x1x8x16xf32>
    %81 = vector.shape_cast %80 : vector<1x1x8x16xf32> to vector<8x16xf32>
    %cst_79 = arith.constant dense<0.000000e+00> : vector<256x16xf32>
    %82 = tpu.matmul %79, %81, %cst_79 {dimension_numbers = #tpu.dot_dimension_numbers<[1], [0], [0], [1], [0, 0, 1, 1], [], []>} : vector<256x8xf32>, vector<8x16xf32>, vector<256x16xf32> -> vector<256x16xf32>
    %83 = arith.addf %77, %82 : vector<256x16xf32>
    %84 = vector.extract_strided_slice %70 {offsets = [0, 2, 0], sizes = [16, 16, 8], strides = [1, 1, 1]} : vector<18x18x8xf32> to vector<16x16x8xf32>
    %85 = vector.shape_cast %84 : vector<16x16x8xf32> to vector<256x8xf32>
    %c0_80 = arith.constant 0 : index
    %c2_81 = arith.constant 2 : index
    %c0_82 = arith.constant 0 : index
    %c0_83 = arith.constant 0 : index
    %86 = vector.load %arg4[%c0_80, %c2_81, %c0_82, %c0_83] : memref<3x3x8x16xf32, #tpu.memory_space<vmem>>, vector<1x1x8x16xf32>
    %87 = vector.shape_cast %86 : vector<1x1x8x16xf32> to vector<8x16xf32>
    %cst_84 = arith.constant dense<0.000000e+00> : vector<256x16xf32>
    %88 = tpu.matmul %85, %87, %cst_84 {dimension_numbers = #tpu.dot_dimension_numbers<[1], [0], [0], [1], [0, 0, 1, 1], [], []>} : vector<256x8xf32>, vector<8x16xf32>, vector<256x16xf32> -> vector<256x16xf32>
    %89 = arith.addf %83, %88 : vector<256x16xf32>
    %90 = vector.extract_strided_slice %70 {offsets = [1, 0, 0], sizes = [16, 16, 8], strides = [1, 1, 1]} : vector<18x18x8xf32> to vector<16x16x8xf32>
    %91 = vector.shape_cast %90 : vector<16x16x8xf32> to vector<256x8xf32>
    %c1_85 = arith.constant 1 : index
    %c0_86 = arith.constant 0 : index
    %c0_87 = arith.constant 0 : index
    %c0_88 = arith.constant 0 : index
    %92 = vector.load %arg4[%c1_85, %c0_86, %c0_87, %c0_88] : memref<3x3x8x16xf32, #tpu.memory_space<vmem>>, vector<1x1x8x16xf32>
    %93 = vector.shape_cast %92 : vector<1x1x8x16xf32> to vector<8x16xf32>
    %cst_89 = arith.constant dense<0.000000e+00> : vector<256x16xf32>
    %94 = tpu.matmul %91, %93, %cst_89 {dimension_numbers = #tpu.dot_dimension_numbers<[1], [0], [0], [1], [0, 0, 1, 1], [], []>} : vector<256x8xf32>, vector<8x16xf32>, vector<256x16xf32> -> vector<256x16xf32>
    %95 = arith.addf %89, %94 : vector<256x16xf32>
    %96 = vector.extract_strided_slice %70 {offsets = [1, 1, 0], sizes = [16, 16, 8], strides = [1, 1, 1]} : vector<18x18x8xf32> to vector<16x16x8xf32>
    %97 = vector.shape_cast %96 : vector<16x16x8xf32> to vector<256x8xf32>
    %c1_90 = arith.constant 1 : index
    %c1_91 = arith.constant 1 : index
    %c0_92 = arith.constant 0 : index
    %c0_93 = arith.constant 0 : index
    %98 = vector.load %arg4[%c1_90, %c1_91, %c0_92, %c0_93] : memref<3x3x8x16xf32, #tpu.memory_space<vmem>>, vector<1x1x8x16xf32>
    %99 = vector.shape_cast %98 : vector<1x1x8x16xf32> to vector<8x16xf32>
    %cst_94 = arith.constant dense<0.000000e+00> : vector<256x16xf32>
    %100 = tpu.matmul %97, %99, %cst_94 {dimension_numbers = #tpu.dot_dimension_numbers<[1], [0], [0], [1], [0, 0, 1, 1], [], []>} : vector<256x8xf32>, vector<8x16xf32>, vector<256x16xf32> -> vector<256x16xf32>
    %101 = arith.addf %95, %100 : vector<256x16xf32>
    %102 = vector.extract_strided_slice %70 {offsets = [1, 2, 0], sizes = [16, 16, 8], strides = [1, 1, 1]} : vector<18x18x8xf32> to vector<16x16x8xf32>
    %103 = vector.shape_cast %102 : vector<16x16x8xf32> to vector<256x8xf32>
    %c1_95 = arith.constant 1 : index
    %c2_96 = arith.constant 2 : index
    %c0_97 = arith.constant 0 : index
    %c0_98 = arith.constant 0 : index
    %104 = vector.load %arg4[%c1_95, %c2_96, %c0_97, %c0_98] : memref<3x3x8x16xf32, #tpu.memory_space<vmem>>, vector<1x1x8x16xf32>
    %105 = vector.shape_cast %104 : vector<1x1x8x16xf32> to vector<8x16xf32>
    %cst_99 = arith.constant dense<0.000000e+00> : vector<256x16xf32>
    %106 = tpu.matmul %103, %105, %cst_99 {dimension_numbers = #tpu.dot_dimension_numbers<[1], [0], [0], [1], [0, 0, 1, 1], [], []>} : vector<256x8xf32>, vector<8x16xf32>, vector<256x16xf32> -> vector<256x16xf32>
    %107 = arith.addf %101, %106 : vector<256x16xf32>
    %108 = vector.extract_strided_slice %70 {offsets = [2, 0, 0], sizes = [16, 16, 8], strides = [1, 1, 1]} : vector<18x18x8xf32> to vector<16x16x8xf32>
    %109 = vector.shape_cast %108 : vector<16x16x8xf32> to vector<256x8xf32>
    %c2_100 = arith.constant 2 : index
    %c0_101 = arith.constant 0 : index
    %c0_102 = arith.constant 0 : index
    %c0_103 = arith.constant 0 : index
    %110 = vector.load %arg4[%c2_100, %c0_101, %c0_102, %c0_103] : memref<3x3x8x16xf32, #tpu.memory_space<vmem>>, vector<1x1x8x16xf32>
    %111 = vector.shape_cast %110 : vector<1x1x8x16xf32> to vector<8x16xf32>
    %cst_104 = arith.constant dense<0.000000e+00> : vector<256x16xf32>
    %112 = tpu.matmul %109, %111, %cst_104 {dimension_numbers = #tpu.dot_dimension_numbers<[1], [0], [0], [1], [0, 0, 1, 1], [], []>} : vector<256x8xf32>, vector<8x16xf32>, vector<256x16xf32> -> vector<256x16xf32>
    %113 = arith.addf %107, %112 : vector<256x16xf32>
    %114 = vector.extract_strided_slice %70 {offsets = [2, 1, 0], sizes = [16, 16, 8], strides = [1, 1, 1]} : vector<18x18x8xf32> to vector<16x16x8xf32>
    %115 = vector.shape_cast %114 : vector<16x16x8xf32> to vector<256x8xf32>
    %c2_105 = arith.constant 2 : index
    %c1_106 = arith.constant 1 : index
    %c0_107 = arith.constant 0 : index
    %c0_108 = arith.constant 0 : index
    %116 = vector.load %arg4[%c2_105, %c1_106, %c0_107, %c0_108] : memref<3x3x8x16xf32, #tpu.memory_space<vmem>>, vector<1x1x8x16xf32>
    %117 = vector.shape_cast %116 : vector<1x1x8x16xf32> to vector<8x16xf32>
    %cst_109 = arith.constant dense<0.000000e+00> : vector<256x16xf32>
    %118 = tpu.matmul %115, %117, %cst_109 {dimension_numbers = #tpu.dot_dimension_numbers<[1], [0], [0], [1], [0, 0, 1, 1], [], []>} : vector<256x8xf32>, vector<8x16xf32>, vector<256x16xf32> -> vector<256x16xf32>
    %119 = arith.addf %113, %118 : vector<256x16xf32>
    %120 = vector.extract_strided_slice %70 {offsets = [2, 2, 0], sizes = [16, 16, 8], strides = [1, 1, 1]} : vector<18x18x8xf32> to vector<16x16x8xf32>
    %121 = vector.shape_cast %120 : vector<16x16x8xf32> to vector<256x8xf32>
    %c2_110 = arith.constant 2 : index
    %c2_111 = arith.constant 2 : index
    %c0_112 = arith.constant 0 : index
    %c0_113 = arith.constant 0 : index
    %122 = vector.load %arg4[%c2_110, %c2_111, %c0_112, %c0_113] : memref<3x3x8x16xf32, #tpu.memory_space<vmem>>, vector<1x1x8x16xf32>
    %123 = vector.shape_cast %122 : vector<1x1x8x16xf32> to vector<8x16xf32>
    %cst_114 = arith.constant dense<0.000000e+00> : vector<256x16xf32>
    %124 = tpu.matmul %121, %123, %cst_114 {dimension_numbers = #tpu.dot_dimension_numbers<[1], [0], [0], [1], [0, 0, 1, 1], [], []>} : vector<256x8xf32>, vector<8x16xf32>, vector<256x16xf32> -> vector<256x16xf32>
    %125 = arith.addf %119, %124 : vector<256x16xf32>
    %c0_115 = arith.constant 0 : index
    %c0_116 = arith.constant 0 : index
    %126 = vector.load %arg5[%c0_115, %c0_116] : memref<1x16xf32, #tpu.memory_space<vmem>>, vector<1x16xf32>
    %127 = vector.broadcast %126 : vector<1x16xf32> to vector<256x16xf32>
    %128 = arith.addf %125, %127 : vector<256x16xf32>
    %cst_117 = arith.constant 0.000000e+00 : f32
    %129 = vector.broadcast %cst_117 : f32 to vector<256x16xf32>
    %130 = arith.maximumf %128, %129 : vector<256x16xf32>
    %c0_118 = arith.constant 0 : index
    %c0_119 = arith.constant 0 : index
    %131 = vector.load %arg14[%c0_118, %c0_119] : memref<64x256xf32, #tpu.memory_space<vmem>>, vector<64x256xf32>
    %cst_120 = arith.constant dense<0.000000e+00> : vector<64x16xf32>
    %132 = tpu.matmul %131, %130, %cst_120 {dimension_numbers = #tpu.dot_dimension_numbers<[1], [0], [0], [1], [0, 0, 1, 1], [], []>} : vector<64x256xf32>, vector<256x16xf32>, vector<64x16xf32> -> vector<64x16xf32>
    %133 = vector.shape_cast %132 : vector<64x16xf32> to vector<8x8x16xf32>
    %cst_121 = arith.constant 0.000000e+00 : f32
    %134 = vector.broadcast %cst_121 : f32 to vector<10x10x16xf32>
    %c0_122 = arith.constant 0 : index
    %c0_123 = arith.constant 0 : index
    %c0_124 = arith.constant 0 : index
    %135 = vector.load %arg19[%c0_122, %c0_123, %c0_124] : memref<10x10x16xf32, #tpu.memory_space<vmem>>, vector<10x10x16xf32>
    tpu.vector_store %arg19[%c0_122, %c0_123, %c0_124], %134 {strides = array<i32>} : memref<10x10x16xf32, #tpu.memory_space<vmem>>, vector<10x10x16xf32>,
    %c1_125 = arith.constant 1 : index
    %c1_126 = arith.constant 1 : index
    %c0_127 = arith.constant 0 : index
    %136 = vector.load %arg19[%c1_125, %c1_126, %c0_127] : memref<10x10x16xf32, #tpu.memory_space<vmem>>, vector<8x8x16xf32>
    tpu.vector_store %arg19[%c1_125, %c1_126, %c0_127], %133 {strides = array<i32>} : memref<10x10x16xf32, #tpu.memory_space<vmem>>, vector<8x8x16xf32>,
    %c0_128 = arith.constant 0 : index
    %c0_129 = arith.constant 0 : index
    %c0_130 = arith.constant 0 : index
    %137 = vector.load %arg19[%c0_128, %c0_129, %c0_130] : memref<10x10x16xf32, #tpu.memory_space<vmem>>, vector<10x10x16xf32>
    %cst_131 = arith.constant 0.000000e+00 : f32
    %138 = vector.broadcast %cst_131 : f32 to vector<64x16xf32>
    %139 = vector.extract_strided_slice %137 {offsets = [0, 0, 0], sizes = [8, 8, 16], strides = [1, 1, 1]} : vector<10x10x16xf32> to vector<8x8x16xf32>
    %140 = vector.shape_cast %139 : vector<8x8x16xf32> to vector<64x16xf32>
    %c0_132 = arith.constant 0 : index
    %c0_133 = arith.constant 0 : index
    %c0_134 = arith.constant 0 : index
    %c0_135 = arith.constant 0 : index
    %141 = vector.load %arg6[%c0_132, %c0_133, %c0_134, %c0_135] : memref<3x3x16x16xf32, #tpu.memory_space<vmem>>, vector<1x1x16x16xf32>
    %142 = vector.shape_cast %141 : vector<1x1x16x16xf32> to vector<16x16xf32>
    %cst_136 = arith.constant dense<0.000000e+00> : vector<64x16xf32>
    %143 = tpu.matmul %140, %142, %cst_136 {dimension_numbers = #tpu.dot_dimension_numbers<[1], [0], [0], [1], [0, 0, 1, 1], [], []>} : vector<64x16xf32>, vector<16x16xf32>, vector<64x16xf32> -> vector<64x16xf32>
    %144 = arith.addf %138, %143 : vector<64x16xf32>
    %145 = vector.extract_strided_slice %137 {offsets = [0, 1, 0], sizes = [8, 8, 16], strides = [1, 1, 1]} : vector<10x10x16xf32> to vector<8x8x16xf32>
    %146 = vector.shape_cast %145 : vector<8x8x16xf32> to vector<64x16xf32>
    %c0_137 = arith.constant 0 : index
    %c1_138 = arith.constant 1 : index
    %c0_139 = arith.constant 0 : index
    %c0_140 = arith.constant 0 : index
    %147 = vector.load %arg6[%c0_137, %c1_138, %c0_139, %c0_140] : memref<3x3x16x16xf32, #tpu.memory_space<vmem>>, vector<1x1x16x16xf32>
    %148 = vector.shape_cast %147 : vector<1x1x16x16xf32> to vector<16x16xf32>
    %cst_141 = arith.constant dense<0.000000e+00> : vector<64x16xf32>
    %149 = tpu.matmul %146, %148, %cst_141 {dimension_numbers = #tpu.dot_dimension_numbers<[1], [0], [0], [1], [0, 0, 1, 1], [], []>} : vector<64x16xf32>, vector<16x16xf32>, vector<64x16xf32> -> vector<64x16xf32>
    %150 = arith.addf %144, %149 : vector<64x16xf32>
    %151 = vector.extract_strided_slice %137 {offsets = [0, 2, 0], sizes = [8, 8, 16], strides = [1, 1, 1]} : vector<10x10x16xf32> to vector<8x8x16xf32>
    %152 = vector.shape_cast %151 : vector<8x8x16xf32> to vector<64x16xf32>
    %c0_142 = arith.constant 0 : index
    %c2_143 = arith.constant 2 : index
    %c0_144 = arith.constant 0 : index
    %c0_145 = arith.constant 0 : index
    %153 = vector.load %arg6[%c0_142, %c2_143, %c0_144, %c0_145] : memref<3x3x16x16xf32, #tpu.memory_space<vmem>>, vector<1x1x16x16xf32>
    %154 = vector.shape_cast %153 : vector<1x1x16x16xf32> to vector<16x16xf32>
    %cst_146 = arith.constant dense<0.000000e+00> : vector<64x16xf32>
    %155 = tpu.matmul %152, %154, %cst_146 {dimension_numbers = #tpu.dot_dimension_numbers<[1], [0], [0], [1], [0, 0, 1, 1], [], []>} : vector<64x16xf32>, vector<16x16xf32>, vector<64x16xf32> -> vector<64x16xf32>
    %156 = arith.addf %150, %155 : vector<64x16xf32>
    %157 = vector.extract_strided_slice %137 {offsets = [1, 0, 0], sizes = [8, 8, 16], strides = [1, 1, 1]} : vector<10x10x16xf32> to vector<8x8x16xf32>
    %158 = vector.shape_cast %157 : vector<8x8x16xf32> to vector<64x16xf32>
    %c1_147 = arith.constant 1 : index
    %c0_148 = arith.constant 0 : index
    %c0_149 = arith.constant 0 : index
    %c0_150 = arith.constant 0 : index
    %159 = vector.load %arg6[%c1_147, %c0_148, %c0_149, %c0_150] : memref<3x3x16x16xf32, #tpu.memory_space<vmem>>, vector<1x1x16x16xf32>
    %160 = vector.shape_cast %159 : vector<1x1x16x16xf32> to vector<16x16xf32>
    %cst_151 = arith.constant dense<0.000000e+00> : vector<64x16xf32>
    %161 = tpu.matmul %158, %160, %cst_151 {dimension_numbers = #tpu.dot_dimension_numbers<[1], [0], [0], [1], [0, 0, 1, 1], [], []>} : vector<64x16xf32>, vector<16x16xf32>, vector<64x16xf32> -> vector<64x16xf32>
    %162 = arith.addf %156, %161 : vector<64x16xf32>
    %163 = vector.extract_strided_slice %137 {offsets = [1, 1, 0], sizes = [8, 8, 16], strides = [1, 1, 1]} : vector<10x10x16xf32> to vector<8x8x16xf32>
    %164 = vector.shape_cast %163 : vector<8x8x16xf32> to vector<64x16xf32>
    %c1_152 = arith.constant 1 : index
    %c1_153 = arith.constant 1 : index
    %c0_154 = arith.constant 0 : index
    %c0_155 = arith.constant 0 : index
    %165 = vector.load %arg6[%c1_152, %c1_153, %c0_154, %c0_155] : memref<3x3x16x16xf32, #tpu.memory_space<vmem>>, vector<1x1x16x16xf32>
    %166 = vector.shape_cast %165 : vector<1x1x16x16xf32> to vector<16x16xf32>
    %cst_156 = arith.constant dense<0.000000e+00> : vector<64x16xf32>
    %167 = tpu.matmul %164, %166, %cst_156 {dimension_numbers = #tpu.dot_dimension_numbers<[1], [0], [0], [1], [0, 0, 1, 1], [], []>} : vector<64x16xf32>, vector<16x16xf32>, vector<64x16xf32> -> vector<64x16xf32>
    %168 = arith.addf %162, %167 : vector<64x16xf32>
    %169 = vector.extract_strided_slice %137 {offsets = [1, 2, 0], sizes = [8, 8, 16], strides = [1, 1, 1]} : vector<10x10x16xf32> to vector<8x8x16xf32>
    %170 = vector.shape_cast %169 : vector<8x8x16xf32> to vector<64x16xf32>
    %c1_157 = arith.constant 1 : index
    %c2_158 = arith.constant 2 : index
    %c0_159 = arith.constant 0 : index
    %c0_160 = arith.constant 0 : index
    %171 = vector.load %arg6[%c1_157, %c2_158, %c0_159, %c0_160] : memref<3x3x16x16xf32, #tpu.memory_space<vmem>>, vector<1x1x16x16xf32>
    %172 = vector.shape_cast %171 : vector<1x1x16x16xf32> to vector<16x16xf32>
    %cst_161 = arith.constant dense<0.000000e+00> : vector<64x16xf32>
    %173 = tpu.matmul %170, %172, %cst_161 {dimension_numbers = #tpu.dot_dimension_numbers<[1], [0], [0], [1], [0, 0, 1, 1], [], []>} : vector<64x16xf32>, vector<16x16xf32>, vector<64x16xf32> -> vector<64x16xf32>
    %174 = arith.addf %168, %173 : vector<64x16xf32>
    %175 = vector.extract_strided_slice %137 {offsets = [2, 0, 0], sizes = [8, 8, 16], strides = [1, 1, 1]} : vector<10x10x16xf32> to vector<8x8x16xf32>
    %176 = vector.shape_cast %175 : vector<8x8x16xf32> to vector<64x16xf32>
    %c2_162 = arith.constant 2 : index
    %c0_163 = arith.constant 0 : index
    %c0_164 = arith.constant 0 : index
    %c0_165 = arith.constant 0 : index
    %177 = vector.load %arg6[%c2_162, %c0_163, %c0_164, %c0_165] : memref<3x3x16x16xf32, #tpu.memory_space<vmem>>, vector<1x1x16x16xf32>
    %178 = vector.shape_cast %177 : vector<1x1x16x16xf32> to vector<16x16xf32>
    %cst_166 = arith.constant dense<0.000000e+00> : vector<64x16xf32>
    %179 = tpu.matmul %176, %178, %cst_166 {dimension_numbers = #tpu.dot_dimension_numbers<[1], [0], [0], [1], [0, 0, 1, 1], [], []>} : vector<64x16xf32>, vector<16x16xf32>, vector<64x16xf32> -> vector<64x16xf32>
    %180 = arith.addf %174, %179 : vector<64x16xf32>
    %181 = vector.extract_strided_slice %137 {offsets = [2, 1, 0], sizes = [8, 8, 16], strides = [1, 1, 1]} : vector<10x10x16xf32> to vector<8x8x16xf32>
    %182 = vector.shape_cast %181 : vector<8x8x16xf32> to vector<64x16xf32>
    %c2_167 = arith.constant 2 : index
    %c1_168 = arith.constant 1 : index
    %c0_169 = arith.constant 0 : index
    %c0_170 = arith.constant 0 : index
    %183 = vector.load %arg6[%c2_167, %c1_168, %c0_169, %c0_170] : memref<3x3x16x16xf32, #tpu.memory_space<vmem>>, vector<1x1x16x16xf32>
    %184 = vector.shape_cast %183 : vector<1x1x16x16xf32> to vector<16x16xf32>
    %cst_171 = arith.constant dense<0.000000e+00> : vector<64x16xf32>
    %185 = tpu.matmul %182, %184, %cst_171 {dimension_numbers = #tpu.dot_dimension_numbers<[1], [0], [0], [1], [0, 0, 1, 1], [], []>} : vector<64x16xf32>, vector<16x16xf32>, vector<64x16xf32> -> vector<64x16xf32>
    %186 = arith.addf %180, %185 : vector<64x16xf32>
    %187 = vector.extract_strided_slice %137 {offsets = [2, 2, 0], sizes = [8, 8, 16], strides = [1, 1, 1]} : vector<10x10x16xf32> to vector<8x8x16xf32>
    %188 = vector.shape_cast %187 : vector<8x8x16xf32> to vector<64x16xf32>
    %c2_172 = arith.constant 2 : index
    %c2_173 = arith.constant 2 : index
    %c0_174 = arith.constant 0 : index
    %c0_175 = arith.constant 0 : index
    %189 = vector.load %arg6[%c2_172, %c2_173, %c0_174, %c0_175] : memref<3x3x16x16xf32, #tpu.memory_space<vmem>>, vector<1x1x16x16xf32>
    %190 = vector.shape_cast %189 : vector<1x1x16x16xf32> to vector<16x16xf32>
    %cst_176 = arith.constant dense<0.000000e+00> : vector<64x16xf32>
    %191 = tpu.matmul %188, %190, %cst_176 {dimension_numbers = #tpu.dot_dimension_numbers<[1], [0], [0], [1], [0, 0, 1, 1], [], []>} : vector<64x16xf32>, vector<16x16xf32>, vector<64x16xf32> -> vector<64x16xf32>
    %192 = arith.addf %186, %191 : vector<64x16xf32>
    %c0_177 = arith.constant 0 : index
    %c0_178 = arith.constant 0 : index
    %193 = vector.load %arg7[%c0_177, %c0_178] : memref<1x16xf32, #tpu.memory_space<vmem>>, vector<1x16xf32>
    %194 = vector.broadcast %193 : vector<1x16xf32> to vector<64x16xf32>
    %195 = arith.addf %192, %194 : vector<64x16xf32>
    %cst_179 = arith.constant 0.000000e+00 : f32
    %196 = vector.broadcast %cst_179 : f32 to vector<64x16xf32>
    %197 = arith.maximumf %195, %196 : vector<64x16xf32>
    %198 = vector.shape_cast %197 : vector<64x16xf32> to vector<8x8x16xf32>
    %cst_180 = arith.constant 0.000000e+00 : f32
    %199 = vector.broadcast %cst_180 : f32 to vector<10x10x16xf32>
    %c0_181 = arith.constant 0 : index
    %c0_182 = arith.constant 0 : index
    %c0_183 = arith.constant 0 : index
    %200 = vector.load %arg20[%c0_181, %c0_182, %c0_183] : memref<10x10x16xf32, #tpu.memory_space<vmem>>, vector<10x10x16xf32>
    tpu.vector_store %arg20[%c0_181, %c0_182, %c0_183], %199 {strides = array<i32>} : memref<10x10x16xf32, #tpu.memory_space<vmem>>, vector<10x10x16xf32>,
    %c1_184 = arith.constant 1 : index
    %c1_185 = arith.constant 1 : index
    %c0_186 = arith.constant 0 : index
    %201 = vector.load %arg20[%c1_184, %c1_185, %c0_186] : memref<10x10x16xf32, #tpu.memory_space<vmem>>, vector<8x8x16xf32>
    tpu.vector_store %arg20[%c1_184, %c1_185, %c0_186], %198 {strides = array<i32>} : memref<10x10x16xf32, #tpu.memory_space<vmem>>, vector<8x8x16xf32>,
    %c0_187 = arith.constant 0 : index
    %c0_188 = arith.constant 0 : index
    %c0_189 = arith.constant 0 : index
    %202 = vector.load %arg20[%c0_187, %c0_188, %c0_189] : memref<10x10x16xf32, #tpu.memory_space<vmem>>, vector<10x10x16xf32>
    %cst_190 = arith.constant 0.000000e+00 : f32
    %203 = vector.broadcast %cst_190 : f32 to vector<64x32xf32>
    %204 = vector.extract_strided_slice %202 {offsets = [0, 0, 0], sizes = [8, 8, 16], strides = [1, 1, 1]} : vector<10x10x16xf32> to vector<8x8x16xf32>
    %205 = vector.shape_cast %204 : vector<8x8x16xf32> to vector<64x16xf32>
    %c0_191 = arith.constant 0 : index
    %c0_192 = arith.constant 0 : index
    %c0_193 = arith.constant 0 : index
    %c0_194 = arith.constant 0 : index
    %206 = vector.load %arg8[%c0_191, %c0_192, %c0_193, %c0_194] : memref<3x3x16x32xf32, #tpu.memory_space<vmem>>, vector<1x1x16x32xf32>
    %207 = vector.shape_cast %206 : vector<1x1x16x32xf32> to vector<16x32xf32>
    %cst_195 = arith.constant dense<0.000000e+00> : vector<64x32xf32>
    %208 = tpu.matmul %205, %207, %cst_195 {dimension_numbers = #tpu.dot_dimension_numbers<[1], [0], [0], [1], [0, 0, 1, 1], [], []>} : vector<64x16xf32>, vector<16x32xf32>, vector<64x32xf32> -> vector<64x32xf32>
    %209 = arith.addf %203, %208 : vector<64x32xf32>
    %210 = vector.extract_strided_slice %202 {offsets = [0, 1, 0], sizes = [8, 8, 16], strides = [1, 1, 1]} : vector<10x10x16xf32> to vector<8x8x16xf32>
    %211 = vector.shape_cast %210 : vector<8x8x16xf32> to vector<64x16xf32>
    %c0_196 = arith.constant 0 : index
    %c1_197 = arith.constant 1 : index
    %c0_198 = arith.constant 0 : index
    %c0_199 = arith.constant 0 : index
    %212 = vector.load %arg8[%c0_196, %c1_197, %c0_198, %c0_199] : memref<3x3x16x32xf32, #tpu.memory_space<vmem>>, vector<1x1x16x32xf32>
    %213 = vector.shape_cast %212 : vector<1x1x16x32xf32> to vector<16x32xf32>
    %cst_200 = arith.constant dense<0.000000e+00> : vector<64x32xf32>
    %214 = tpu.matmul %211, %213, %cst_200 {dimension_numbers = #tpu.dot_dimension_numbers<[1], [0], [0], [1], [0, 0, 1, 1], [], []>} : vector<64x16xf32>, vector<16x32xf32>, vector<64x32xf32> -> vector<64x32xf32>
    %215 = arith.addf %209, %214 : vector<64x32xf32>
    %216 = vector.extract_strided_slice %202 {offsets = [0, 2, 0], sizes = [8, 8, 16], strides = [1, 1, 1]} : vector<10x10x16xf32> to vector<8x8x16xf32>
    %217 = vector.shape_cast %216 : vector<8x8x16xf32> to vector<64x16xf32>
    %c0_201 = arith.constant 0 : index
    %c2_202 = arith.constant 2 : index
    %c0_203 = arith.constant 0 : index
    %c0_204 = arith.constant 0 : index
    %218 = vector.load %arg8[%c0_201, %c2_202, %c0_203, %c0_204] : memref<3x3x16x32xf32, #tpu.memory_space<vmem>>, vector<1x1x16x32xf32>
    %219 = vector.shape_cast %218 : vector<1x1x16x32xf32> to vector<16x32xf32>
    %cst_205 = arith.constant dense<0.000000e+00> : vector<64x32xf32>
    %220 = tpu.matmul %217, %219, %cst_205 {dimension_numbers = #tpu.dot_dimension_numbers<[1], [0], [0], [1], [0, 0, 1, 1], [], []>} : vector<64x16xf32>, vector<16x32xf32>, vector<64x32xf32> -> vector<64x32xf32>
    %221 = arith.addf %215, %220 : vector<64x32xf32>
    %222 = vector.extract_strided_slice %202 {offsets = [1, 0, 0], sizes = [8, 8, 16], strides = [1, 1, 1]} : vector<10x10x16xf32> to vector<8x8x16xf32>
    %223 = vector.shape_cast %222 : vector<8x8x16xf32> to vector<64x16xf32>
    %c1_206 = arith.constant 1 : index
    %c0_207 = arith.constant 0 : index
    %c0_208 = arith.constant 0 : index
    %c0_209 = arith.constant 0 : index
    %224 = vector.load %arg8[%c1_206, %c0_207, %c0_208, %c0_209] : memref<3x3x16x32xf32, #tpu.memory_space<vmem>>, vector<1x1x16x32xf32>
    %225 = vector.shape_cast %224 : vector<1x1x16x32xf32> to vector<16x32xf32>
    %cst_210 = arith.constant dense<0.000000e+00> : vector<64x32xf32>
    %226 = tpu.matmul %223, %225, %cst_210 {dimension_numbers = #tpu.dot_dimension_numbers<[1], [0], [0], [1], [0, 0, 1, 1], [], []>} : vector<64x16xf32>, vector<16x32xf32>, vector<64x32xf32> -> vector<64x32xf32>
    %227 = arith.addf %221, %226 : vector<64x32xf32>
    %228 = vector.extract_strided_slice %202 {offsets = [1, 1, 0], sizes = [8, 8, 16], strides = [1, 1, 1]} : vector<10x10x16xf32> to vector<8x8x16xf32>
    %229 = vector.shape_cast %228 : vector<8x8x16xf32> to vector<64x16xf32>
    %c1_211 = arith.constant 1 : index
    %c1_212 = arith.constant 1 : index
    %c0_213 = arith.constant 0 : index
    %c0_214 = arith.constant 0 : index
    %230 = vector.load %arg8[%c1_211, %c1_212, %c0_213, %c0_214] : memref<3x3x16x32xf32, #tpu.memory_space<vmem>>, vector<1x1x16x32xf32>
    %231 = vector.shape_cast %230 : vector<1x1x16x32xf32> to vector<16x32xf32>
    %cst_215 = arith.constant dense<0.000000e+00> : vector<64x32xf32>
    %232 = tpu.matmul %229, %231, %cst_215 {dimension_numbers = #tpu.dot_dimension_numbers<[1], [0], [0], [1], [0, 0, 1, 1], [], []>} : vector<64x16xf32>, vector<16x32xf32>, vector<64x32xf32> -> vector<64x32xf32>
    %233 = arith.addf %227, %232 : vector<64x32xf32>
    %234 = vector.extract_strided_slice %202 {offsets = [1, 2, 0], sizes = [8, 8, 16], strides = [1, 1, 1]} : vector<10x10x16xf32> to vector<8x8x16xf32>
    %235 = vector.shape_cast %234 : vector<8x8x16xf32> to vector<64x16xf32>
    %c1_216 = arith.constant 1 : index
    %c2_217 = arith.constant 2 : index
    %c0_218 = arith.constant 0 : index
    %c0_219 = arith.constant 0 : index
    %236 = vector.load %arg8[%c1_216, %c2_217, %c0_218, %c0_219] : memref<3x3x16x32xf32, #tpu.memory_space<vmem>>, vector<1x1x16x32xf32>
    %237 = vector.shape_cast %236 : vector<1x1x16x32xf32> to vector<16x32xf32>
    %cst_220 = arith.constant dense<0.000000e+00> : vector<64x32xf32>
    %238 = tpu.matmul %235, %237, %cst_220 {dimension_numbers = #tpu.dot_dimension_numbers<[1], [0], [0], [1], [0, 0, 1, 1], [], []>} : vector<64x16xf32>, vector<16x32xf32>, vector<64x32xf32> -> vector<64x32xf32>
    %239 = arith.addf %233, %238 : vector<64x32xf32>
    %240 = vector.extract_strided_slice %202 {offsets = [2, 0, 0], sizes = [8, 8, 16], strides = [1, 1, 1]} : vector<10x10x16xf32> to vector<8x8x16xf32>
    %241 = vector.shape_cast %240 : vector<8x8x16xf32> to vector<64x16xf32>
    %c2_221 = arith.constant 2 : index
    %c0_222 = arith.constant 0 : index
    %c0_223 = arith.constant 0 : index
    %c0_224 = arith.constant 0 : index
    %242 = vector.load %arg8[%c2_221, %c0_222, %c0_223, %c0_224] : memref<3x3x16x32xf32, #tpu.memory_space<vmem>>, vector<1x1x16x32xf32>
    %243 = vector.shape_cast %242 : vector<1x1x16x32xf32> to vector<16x32xf32>
    %cst_225 = arith.constant dense<0.000000e+00> : vector<64x32xf32>
    %244 = tpu.matmul %241, %243, %cst_225 {dimension_numbers = #tpu.dot_dimension_numbers<[1], [0], [0], [1], [0, 0, 1, 1], [], []>} : vector<64x16xf32>, vector<16x32xf32>, vector<64x32xf32> -> vector<64x32xf32>
    %245 = arith.addf %239, %244 : vector<64x32xf32>
    %246 = vector.extract_strided_slice %202 {offsets = [2, 1, 0], sizes = [8, 8, 16], strides = [1, 1, 1]} : vector<10x10x16xf32> to vector<8x8x16xf32>
    %247 = vector.shape_cast %246 : vector<8x8x16xf32> to vector<64x16xf32>
    %c2_226 = arith.constant 2 : index
    %c1_227 = arith.constant 1 : index
    %c0_228 = arith.constant 0 : index
    %c0_229 = arith.constant 0 : index
    %248 = vector.load %arg8[%c2_226, %c1_227, %c0_228, %c0_229] : memref<3x3x16x32xf32, #tpu.memory_space<vmem>>, vector<1x1x16x32xf32>
    %249 = vector.shape_cast %248 : vector<1x1x16x32xf32> to vector<16x32xf32>
    %cst_230 = arith.constant dense<0.000000e+00> : vector<64x32xf32>
    %250 = tpu.matmul %247, %249, %cst_230 {dimension_numbers = #tpu.dot_dimension_numbers<[1], [0], [0], [1], [0, 0, 1, 1], [], []>} : vector<64x16xf32>, vector<16x32xf32>, vector<64x32xf32> -> vector<64x32xf32>
    %251 = arith.addf %245, %250 : vector<64x32xf32>
    %252 = vector.extract_strided_slice %202 {offsets = [2, 2, 0], sizes = [8, 8, 16], strides = [1, 1, 1]} : vector<10x10x16xf32> to vector<8x8x16xf32>
    %253 = vector.shape_cast %252 : vector<8x8x16xf32> to vector<64x16xf32>
    %c2_231 = arith.constant 2 : index
    %c2_232 = arith.constant 2 : index
    %c0_233 = arith.constant 0 : index
    %c0_234 = arith.constant 0 : index
    %254 = vector.load %arg8[%c2_231, %c2_232, %c0_233, %c0_234] : memref<3x3x16x32xf32, #tpu.memory_space<vmem>>, vector<1x1x16x32xf32>
    %255 = vector.shape_cast %254 : vector<1x1x16x32xf32> to vector<16x32xf32>
    %cst_235 = arith.constant dense<0.000000e+00> : vector<64x32xf32>
    %256 = tpu.matmul %253, %255, %cst_235 {dimension_numbers = #tpu.dot_dimension_numbers<[1], [0], [0], [1], [0, 0, 1, 1], [], []>} : vector<64x16xf32>, vector<16x32xf32>, vector<64x32xf32> -> vector<64x32xf32>
    %257 = arith.addf %251, %256 : vector<64x32xf32>
    %c0_236 = arith.constant 0 : index
    %c0_237 = arith.constant 0 : index
    %258 = vector.load %arg9[%c0_236, %c0_237] : memref<1x32xf32, #tpu.memory_space<vmem>>, vector<1x32xf32>
    %259 = vector.broadcast %258 : vector<1x32xf32> to vector<64x32xf32>
    %260 = arith.addf %257, %259 : vector<64x32xf32>
    %cst_238 = arith.constant 0.000000e+00 : f32
    %261 = vector.broadcast %cst_238 : f32 to vector<64x32xf32>
    %262 = arith.maximumf %260, %261 : vector<64x32xf32>
    %c0_239 = arith.constant 0 : index
    %c0_240 = arith.constant 0 : index
    %263 = vector.load %arg15[%c0_239, %c0_240] : memref<16x64xf32, #tpu.memory_space<vmem>>, vector<16x64xf32>
    %cst_241 = arith.constant dense<0.000000e+00> : vector<16x32xf32>
    %264 = tpu.matmul %263, %262, %cst_241 {dimension_numbers = #tpu.dot_dimension_numbers<[1], [0], [0], [1], [0, 0, 1, 1], [], []>} : vector<16x64xf32>, vector<64x32xf32>, vector<16x32xf32> -> vector<16x32xf32>
    %265 = vector.shape_cast %264 : vector<16x32xf32> to vector<4x4x32xf32>
    %cst_242 = arith.constant 0.000000e+00 : f32
    %266 = vector.broadcast %cst_242 : f32 to vector<6x6x32xf32>
    %c0_243 = arith.constant 0 : index
    %c0_244 = arith.constant 0 : index
    %c0_245 = arith.constant 0 : index
    %267 = vector.load %arg21[%c0_243, %c0_244, %c0_245] : memref<6x6x32xf32, #tpu.memory_space<vmem>>, vector<6x6x32xf32>
    tpu.vector_store %arg21[%c0_243, %c0_244, %c0_245], %266 {strides = array<i32>} : memref<6x6x32xf32, #tpu.memory_space<vmem>>, vector<6x6x32xf32>,
    %c1_246 = arith.constant 1 : index
    %c1_247 = arith.constant 1 : index
    %c0_248 = arith.constant 0 : index
    %268 = vector.load %arg21[%c1_246, %c1_247, %c0_248] : memref<6x6x32xf32, #tpu.memory_space<vmem>>, vector<4x4x32xf32>
    tpu.vector_store %arg21[%c1_246, %c1_247, %c0_248], %265 {strides = array<i32>} : memref<6x6x32xf32, #tpu.memory_space<vmem>>, vector<4x4x32xf32>,
    %c0_249 = arith.constant 0 : index
    %c0_250 = arith.constant 0 : index
    %c0_251 = arith.constant 0 : index
    %269 = vector.load %arg21[%c0_249, %c0_250, %c0_251] : memref<6x6x32xf32, #tpu.memory_space<vmem>>, vector<6x6x32xf32>
    %cst_252 = arith.constant 0.000000e+00 : f32
    %270 = vector.broadcast %cst_252 : f32 to vector<16x32xf32>
    %271 = vector.extract_strided_slice %269 {offsets = [0, 0, 0], sizes = [4, 4, 32], strides = [1, 1, 1]} : vector<6x6x32xf32> to vector<4x4x32xf32>
    %272 = vector.shape_cast %271 : vector<4x4x32xf32> to vector<16x32xf32>
    %c0_253 = arith.constant 0 : index
    %c0_254 = arith.constant 0 : index
    %c0_255 = arith.constant 0 : index
    %c0_256 = arith.constant 0 : index
    %273 = vector.load %arg10[%c0_253, %c0_254, %c0_255, %c0_256] : memref<3x3x32x32xf32, #tpu.memory_space<vmem>>, vector<1x1x32x32xf32>
    %274 = vector.shape_cast %273 : vector<1x1x32x32xf32> to vector<32x32xf32>
    %cst_257 = arith.constant dense<0.000000e+00> : vector<16x32xf32>
    %275 = tpu.matmul %272, %274, %cst_257 {dimension_numbers = #tpu.dot_dimension_numbers<[1], [0], [0], [1], [0, 0, 1, 1], [], []>} : vector<16x32xf32>, vector<32x32xf32>, vector<16x32xf32> -> vector<16x32xf32>
    %276 = arith.addf %270, %275 : vector<16x32xf32>
    %277 = vector.extract_strided_slice %269 {offsets = [0, 1, 0], sizes = [4, 4, 32], strides = [1, 1, 1]} : vector<6x6x32xf32> to vector<4x4x32xf32>
    %278 = vector.shape_cast %277 : vector<4x4x32xf32> to vector<16x32xf32>
    %c0_258 = arith.constant 0 : index
    %c1_259 = arith.constant 1 : index
    %c0_260 = arith.constant 0 : index
    %c0_261 = arith.constant 0 : index
    %279 = vector.load %arg10[%c0_258, %c1_259, %c0_260, %c0_261] : memref<3x3x32x32xf32, #tpu.memory_space<vmem>>, vector<1x1x32x32xf32>
    %280 = vector.shape_cast %279 : vector<1x1x32x32xf32> to vector<32x32xf32>
    %cst_262 = arith.constant dense<0.000000e+00> : vector<16x32xf32>
    %281 = tpu.matmul %278, %280, %cst_262 {dimension_numbers = #tpu.dot_dimension_numbers<[1], [0], [0], [1], [0, 0, 1, 1], [], []>} : vector<16x32xf32>, vector<32x32xf32>, vector<16x32xf32> -> vector<16x32xf32>
    %282 = arith.addf %276, %281 : vector<16x32xf32>
    %283 = vector.extract_strided_slice %269 {offsets = [0, 2, 0], sizes = [4, 4, 32], strides = [1, 1, 1]} : vector<6x6x32xf32> to vector<4x4x32xf32>
    %284 = vector.shape_cast %283 : vector<4x4x32xf32> to vector<16x32xf32>
    %c0_263 = arith.constant 0 : index
    %c2_264 = arith.constant 2 : index
    %c0_265 = arith.constant 0 : index
    %c0_266 = arith.constant 0 : index
    %285 = vector.load %arg10[%c0_263, %c2_264, %c0_265, %c0_266] : memref<3x3x32x32xf32, #tpu.memory_space<vmem>>, vector<1x1x32x32xf32>
    %286 = vector.shape_cast %285 : vector<1x1x32x32xf32> to vector<32x32xf32>
    %cst_267 = arith.constant dense<0.000000e+00> : vector<16x32xf32>
    %287 = tpu.matmul %284, %286, %cst_267 {dimension_numbers = #tpu.dot_dimension_numbers<[1], [0], [0], [1], [0, 0, 1, 1], [], []>} : vector<16x32xf32>, vector<32x32xf32>, vector<16x32xf32> -> vector<16x32xf32>
    %288 = arith.addf %282, %287 : vector<16x32xf32>
    %289 = vector.extract_strided_slice %269 {offsets = [1, 0, 0], sizes = [4, 4, 32], strides = [1, 1, 1]} : vector<6x6x32xf32> to vector<4x4x32xf32>
    %290 = vector.shape_cast %289 : vector<4x4x32xf32> to vector<16x32xf32>
    %c1_268 = arith.constant 1 : index
    %c0_269 = arith.constant 0 : index
    %c0_270 = arith.constant 0 : index
    %c0_271 = arith.constant 0 : index
    %291 = vector.load %arg10[%c1_268, %c0_269, %c0_270, %c0_271] : memref<3x3x32x32xf32, #tpu.memory_space<vmem>>, vector<1x1x32x32xf32>
    %292 = vector.shape_cast %291 : vector<1x1x32x32xf32> to vector<32x32xf32>
    %cst_272 = arith.constant dense<0.000000e+00> : vector<16x32xf32>
    %293 = tpu.matmul %290, %292, %cst_272 {dimension_numbers = #tpu.dot_dimension_numbers<[1], [0], [0], [1], [0, 0, 1, 1], [], []>} : vector<16x32xf32>, vector<32x32xf32>, vector<16x32xf32> -> vector<16x32xf32>
    %294 = arith.addf %288, %293 : vector<16x32xf32>
    %295 = vector.extract_strided_slice %269 {offsets = [1, 1, 0], sizes = [4, 4, 32], strides = [1, 1, 1]} : vector<6x6x32xf32> to vector<4x4x32xf32>
    %296 = vector.shape_cast %295 : vector<4x4x32xf32> to vector<16x32xf32>
    %c1_273 = arith.constant 1 : index
    %c1_274 = arith.constant 1 : index
    %c0_275 = arith.constant 0 : index
    %c0_276 = arith.constant 0 : index
    %297 = vector.load %arg10[%c1_273, %c1_274, %c0_275, %c0_276] : memref<3x3x32x32xf32, #tpu.memory_space<vmem>>, vector<1x1x32x32xf32>
    %298 = vector.shape_cast %297 : vector<1x1x32x32xf32> to vector<32x32xf32>
    %cst_277 = arith.constant dense<0.000000e+00> : vector<16x32xf32>
    %299 = tpu.matmul %296, %298, %cst_277 {dimension_numbers = #tpu.dot_dimension_numbers<[1], [0], [0], [1], [0, 0, 1, 1], [], []>} : vector<16x32xf32>, vector<32x32xf32>, vector<16x32xf32> -> vector<16x32xf32>
    %300 = arith.addf %294, %299 : vector<16x32xf32>
    %301 = vector.extract_strided_slice %269 {offsets = [1, 2, 0], sizes = [4, 4, 32], strides = [1, 1, 1]} : vector<6x6x32xf32> to vector<4x4x32xf32>
    %302 = vector.shape_cast %301 : vector<4x4x32xf32> to vector<16x32xf32>
    %c1_278 = arith.constant 1 : index
    %c2_279 = arith.constant 2 : index
    %c0_280 = arith.constant 0 : index
    %c0_281 = arith.constant 0 : index
    %303 = vector.load %arg10[%c1_278, %c2_279, %c0_280, %c0_281] : memref<3x3x32x32xf32, #tpu.memory_space<vmem>>, vector<1x1x32x32xf32>
    %304 = vector.shape_cast %303 : vector<1x1x32x32xf32> to vector<32x32xf32>
    %cst_282 = arith.constant dense<0.000000e+00> : vector<16x32xf32>
    %305 = tpu.matmul %302, %304, %cst_282 {dimension_numbers = #tpu.dot_dimension_numbers<[1], [0], [0], [1], [0, 0, 1, 1], [], []>} : vector<16x32xf32>, vector<32x32xf32>, vector<16x32xf32> -> vector<16x32xf32>
    %306 = arith.addf %300, %305 : vector<16x32xf32>
    %307 = vector.extract_strided_slice %269 {offsets = [2, 0, 0], sizes = [4, 4, 32], strides = [1, 1, 1]} : vector<6x6x32xf32> to vector<4x4x32xf32>
    %308 = vector.shape_cast %307 : vector<4x4x32xf32> to vector<16x32xf32>
    %c2_283 = arith.constant 2 : index
    %c0_284 = arith.constant 0 : index
    %c0_285 = arith.constant 0 : index
    %c0_286 = arith.constant 0 : index
    %309 = vector.load %arg10[%c2_283, %c0_284, %c0_285, %c0_286] : memref<3x3x32x32xf32, #tpu.memory_space<vmem>>, vector<1x1x32x32xf32>
    %310 = vector.shape_cast %309 : vector<1x1x32x32xf32> to vector<32x32xf32>
    %cst_287 = arith.constant dense<0.000000e+00> : vector<16x32xf32>
    %311 = tpu.matmul %308, %310, %cst_287 {dimension_numbers = #tpu.dot_dimension_numbers<[1], [0], [0], [1], [0, 0, 1, 1], [], []>} : vector<16x32xf32>, vector<32x32xf32>, vector<16x32xf32> -> vector<16x32xf32>
    %312 = arith.addf %306, %311 : vector<16x32xf32>
    %313 = vector.extract_strided_slice %269 {offsets = [2, 1, 0], sizes = [4, 4, 32], strides = [1, 1, 1]} : vector<6x6x32xf32> to vector<4x4x32xf32>
    %314 = vector.shape_cast %313 : vector<4x4x32xf32> to vector<16x32xf32>
    %c2_288 = arith.constant 2 : index
    %c1_289 = arith.constant 1 : index
    %c0_290 = arith.constant 0 : index
    %c0_291 = arith.constant 0 : index
    %315 = vector.load %arg10[%c2_288, %c1_289, %c0_290, %c0_291] : memref<3x3x32x32xf32, #tpu.memory_space<vmem>>, vector<1x1x32x32xf32>
    %316 = vector.shape_cast %315 : vector<1x1x32x32xf32> to vector<32x32xf32>
    %cst_292 = arith.constant dense<0.000000e+00> : vector<16x32xf32>
    %317 = tpu.matmul %314, %316, %cst_292 {dimension_numbers = #tpu.dot_dimension_numbers<[1], [0], [0], [1], [0, 0, 1, 1], [], []>} : vector<16x32xf32>, vector<32x32xf32>, vector<16x32xf32> -> vector<16x32xf32>
    %318 = arith.addf %312, %317 : vector<16x32xf32>
    %319 = vector.extract_strided_slice %269 {offsets = [2, 2, 0], sizes = [4, 4, 32], strides = [1, 1, 1]} : vector<6x6x32xf32> to vector<4x4x32xf32>
    %320 = vector.shape_cast %319 : vector<4x4x32xf32> to vector<16x32xf32>
    %c2_293 = arith.constant 2 : index
    %c2_294 = arith.constant 2 : index
    %c0_295 = arith.constant 0 : index
    %c0_296 = arith.constant 0 : index
    %321 = vector.load %arg10[%c2_293, %c2_294, %c0_295, %c0_296] : memref<3x3x32x32xf32, #tpu.memory_space<vmem>>, vector<1x1x32x32xf32>
    %322 = vector.shape_cast %321 : vector<1x1x32x32xf32> to vector<32x32xf32>
    %cst_297 = arith.constant dense<0.000000e+00> : vector<16x32xf32>
    %323 = tpu.matmul %320, %322, %cst_297 {dimension_numbers = #tpu.dot_dimension_numbers<[1], [0], [0], [1], [0, 0, 1, 1], [], []>} : vector<16x32xf32>, vector<32x32xf32>, vector<16x32xf32> -> vector<16x32xf32>
    %324 = arith.addf %318, %323 : vector<16x32xf32>
    %c0_298 = arith.constant 0 : index
    %c0_299 = arith.constant 0 : index
    %325 = vector.load %arg11[%c0_298, %c0_299] : memref<1x32xf32, #tpu.memory_space<vmem>>, vector<1x32xf32>
    %326 = vector.broadcast %325 : vector<1x32xf32> to vector<16x32xf32>
    %327 = arith.addf %324, %326 : vector<16x32xf32>
    %cst_300 = arith.constant 0.000000e+00 : f32
    %328 = vector.broadcast %cst_300 : f32 to vector<16x32xf32>
    %329 = arith.maximumf %327, %328 : vector<16x32xf32>
    %330 = vector.shape_cast %329 : vector<16x32xf32> to vector<4x4x32xf32>
    %cst_301 = arith.constant 0.000000e+00 : f32
    %331 = vector.broadcast %cst_301 : f32 to vector<6x6x32xf32>
    %c0_302 = arith.constant 0 : index
    %c0_303 = arith.constant 0 : index
    %c0_304 = arith.constant 0 : index
    %332 = vector.load %arg22[%c0_302, %c0_303, %c0_304] : memref<6x6x32xf32, #tpu.memory_space<vmem>>, vector<6x6x32xf32>
    tpu.vector_store %arg22[%c0_302, %c0_303, %c0_304], %331 {strides = array<i32>} : memref<6x6x32xf32, #tpu.memory_space<vmem>>, vector<6x6x32xf32>,
    %c1_305 = arith.constant 1 : index
    %c1_306 = arith.constant 1 : index
    %c0_307 = arith.constant 0 : index
    %333 = vector.load %arg22[%c1_305, %c1_306, %c0_307] : memref<6x6x32xf32, #tpu.memory_space<vmem>>, vector<4x4x32xf32>
    tpu.vector_store %arg22[%c1_305, %c1_306, %c0_307], %330 {strides = array<i32>} : memref<6x6x32xf32, #tpu.memory_space<vmem>>, vector<4x4x32xf32>,
    %c0_308 = arith.constant 0 : index
    %c0_309 = arith.constant 0 : index
    %c0_310 = arith.constant 0 : index
    %334 = vector.load %arg22[%c0_308, %c0_309, %c0_310] : memref<6x6x32xf32, #tpu.memory_space<vmem>>, vector<6x6x32xf32>
    %cst_311 = arith.constant 0.000000e+00 : f32
    %335 = vector.broadcast %cst_311 : f32 to vector<16x64xf32>
    %336 = vector.extract_strided_slice %334 {offsets = [0, 0, 0], sizes = [4, 4, 32], strides = [1, 1, 1]} : vector<6x6x32xf32> to vector<4x4x32xf32>
    %337 = vector.shape_cast %336 : vector<4x4x32xf32> to vector<16x32xf32>
    %c0_312 = arith.constant 0 : index
    %c0_313 = arith.constant 0 : index
    %c0_314 = arith.constant 0 : index
    %c0_315 = arith.constant 0 : index
    %338 = vector.load %arg12[%c0_312, %c0_313, %c0_314, %c0_315] : memref<3x3x32x64xf32, #tpu.memory_space<vmem>>, vector<1x1x32x64xf32>
    %339 = vector.shape_cast %338 : vector<1x1x32x64xf32> to vector<32x64xf32>
    %cst_316 = arith.constant dense<0.000000e+00> : vector<16x64xf32>
    %340 = tpu.matmul %337, %339, %cst_316 {dimension_numbers = #tpu.dot_dimension_numbers<[1], [0], [0], [1], [0, 0, 1, 1], [], []>} : vector<16x32xf32>, vector<32x64xf32>, vector<16x64xf32> -> vector<16x64xf32>
    %341 = arith.addf %335, %340 : vector<16x64xf32>
    %342 = vector.extract_strided_slice %334 {offsets = [0, 1, 0], sizes = [4, 4, 32], strides = [1, 1, 1]} : vector<6x6x32xf32> to vector<4x4x32xf32>
    %343 = vector.shape_cast %342 : vector<4x4x32xf32> to vector<16x32xf32>
    %c0_317 = arith.constant 0 : index
    %c1_318 = arith.constant 1 : index
    %c0_319 = arith.constant 0 : index
    %c0_320 = arith.constant 0 : index
    %344 = vector.load %arg12[%c0_317, %c1_318, %c0_319, %c0_320] : memref<3x3x32x64xf32, #tpu.memory_space<vmem>>, vector<1x1x32x64xf32>
    %345 = vector.shape_cast %344 : vector<1x1x32x64xf32> to vector<32x64xf32>
    %cst_321 = arith.constant dense<0.000000e+00> : vector<16x64xf32>
    %346 = tpu.matmul %343, %345, %cst_321 {dimension_numbers = #tpu.dot_dimension_numbers<[1], [0], [0], [1], [0, 0, 1, 1], [], []>} : vector<16x32xf32>, vector<32x64xf32>, vector<16x64xf32> -> vector<16x64xf32>
    %347 = arith.addf %341, %346 : vector<16x64xf32>
    %348 = vector.extract_strided_slice %334 {offsets = [0, 2, 0], sizes = [4, 4, 32], strides = [1, 1, 1]} : vector<6x6x32xf32> to vector<4x4x32xf32>
    %349 = vector.shape_cast %348 : vector<4x4x32xf32> to vector<16x32xf32>
    %c0_322 = arith.constant 0 : index
    %c2_323 = arith.constant 2 : index
    %c0_324 = arith.constant 0 : index
    %c0_325 = arith.constant 0 : index
    %350 = vector.load %arg12[%c0_322, %c2_323, %c0_324, %c0_325] : memref<3x3x32x64xf32, #tpu.memory_space<vmem>>, vector<1x1x32x64xf32>
    %351 = vector.shape_cast %350 : vector<1x1x32x64xf32> to vector<32x64xf32>
    %cst_326 = arith.constant dense<0.000000e+00> : vector<16x64xf32>
    %352 = tpu.matmul %349, %351, %cst_326 {dimension_numbers = #tpu.dot_dimension_numbers<[1], [0], [0], [1], [0, 0, 1, 1], [], []>} : vector<16x32xf32>, vector<32x64xf32>, vector<16x64xf32> -> vector<16x64xf32>
    %353 = arith.addf %347, %352 : vector<16x64xf32>
    %354 = vector.extract_strided_slice %334 {offsets = [1, 0, 0], sizes = [4, 4, 32], strides = [1, 1, 1]} : vector<6x6x32xf32> to vector<4x4x32xf32>
    %355 = vector.shape_cast %354 : vector<4x4x32xf32> to vector<16x32xf32>
    %c1_327 = arith.constant 1 : index
    %c0_328 = arith.constant 0 : index
    %c0_329 = arith.constant 0 : index
    %c0_330 = arith.constant 0 : index
    %356 = vector.load %arg12[%c1_327, %c0_328, %c0_329, %c0_330] : memref<3x3x32x64xf32, #tpu.memory_space<vmem>>, vector<1x1x32x64xf32>
    %357 = vector.shape_cast %356 : vector<1x1x32x64xf32> to vector<32x64xf32>
    %cst_331 = arith.constant dense<0.000000e+00> : vector<16x64xf32>
    %358 = tpu.matmul %355, %357, %cst_331 {dimension_numbers = #tpu.dot_dimension_numbers<[1], [0], [0], [1], [0, 0, 1, 1], [], []>} : vector<16x32xf32>, vector<32x64xf32>, vector<16x64xf32> -> vector<16x64xf32>
    %359 = arith.addf %353, %358 : vector<16x64xf32>
    %360 = vector.extract_strided_slice %334 {offsets = [1, 1, 0], sizes = [4, 4, 32], strides = [1, 1, 1]} : vector<6x6x32xf32> to vector<4x4x32xf32>
    %361 = vector.shape_cast %360 : vector<4x4x32xf32> to vector<16x32xf32>
    %c1_332 = arith.constant 1 : index
    %c1_333 = arith.constant 1 : index
    %c0_334 = arith.constant 0 : index
    %c0_335 = arith.constant 0 : index
    %362 = vector.load %arg12[%c1_332, %c1_333, %c0_334, %c0_335] : memref<3x3x32x64xf32, #tpu.memory_space<vmem>>, vector<1x1x32x64xf32>
    %363 = vector.shape_cast %362 : vector<1x1x32x64xf32> to vector<32x64xf32>
    %cst_336 = arith.constant dense<0.000000e+00> : vector<16x64xf32>
    %364 = tpu.matmul %361, %363, %cst_336 {dimension_numbers = #tpu.dot_dimension_numbers<[1], [0], [0], [1], [0, 0, 1, 1], [], []>} : vector<16x32xf32>, vector<32x64xf32>, vector<16x64xf32> -> vector<16x64xf32>
    %365 = arith.addf %359, %364 : vector<16x64xf32>
    %366 = vector.extract_strided_slice %334 {offsets = [1, 2, 0], sizes = [4, 4, 32], strides = [1, 1, 1]} : vector<6x6x32xf32> to vector<4x4x32xf32>
    %367 = vector.shape_cast %366 : vector<4x4x32xf32> to vector<16x32xf32>
    %c1_337 = arith.constant 1 : index
    %c2_338 = arith.constant 2 : index
    %c0_339 = arith.constant 0 : index
    %c0_340 = arith.constant 0 : index
    %368 = vector.load %arg12[%c1_337, %c2_338, %c0_339, %c0_340] : memref<3x3x32x64xf32, #tpu.memory_space<vmem>>, vector<1x1x32x64xf32>
    %369 = vector.shape_cast %368 : vector<1x1x32x64xf32> to vector<32x64xf32>
    %cst_341 = arith.constant dense<0.000000e+00> : vector<16x64xf32>
    %370 = tpu.matmul %367, %369, %cst_341 {dimension_numbers = #tpu.dot_dimension_numbers<[1], [0], [0], [1], [0, 0, 1, 1], [], []>} : vector<16x32xf32>, vector<32x64xf32>, vector<16x64xf32> -> vector<16x64xf32>
    %371 = arith.addf %365, %370 : vector<16x64xf32>
    %372 = vector.extract_strided_slice %334 {offsets = [2, 0, 0], sizes = [4, 4, 32], strides = [1, 1, 1]} : vector<6x6x32xf32> to vector<4x4x32xf32>
    %373 = vector.shape_cast %372 : vector<4x4x32xf32> to vector<16x32xf32>
    %c2_342 = arith.constant 2 : index
    %c0_343 = arith.constant 0 : index
    %c0_344 = arith.constant 0 : index
    %c0_345 = arith.constant 0 : index
    %374 = vector.load %arg12[%c2_342, %c0_343, %c0_344, %c0_345] : memref<3x3x32x64xf32, #tpu.memory_space<vmem>>, vector<1x1x32x64xf32>
    %375 = vector.shape_cast %374 : vector<1x1x32x64xf32> to vector<32x64xf32>
    %cst_346 = arith.constant dense<0.000000e+00> : vector<16x64xf32>
    %376 = tpu.matmul %373, %375, %cst_346 {dimension_numbers = #tpu.dot_dimension_numbers<[1], [0], [0], [1], [0, 0, 1, 1], [], []>} : vector<16x32xf32>, vector<32x64xf32>, vector<16x64xf32> -> vector<16x64xf32>
    %377 = arith.addf %371, %376 : vector<16x64xf32>
    %378 = vector.extract_strided_slice %334 {offsets = [2, 1, 0], sizes = [4, 4, 32], strides = [1, 1, 1]} : vector<6x6x32xf32> to vector<4x4x32xf32>
    %379 = vector.shape_cast %378 : vector<4x4x32xf32> to vector<16x32xf32>
    %c2_347 = arith.constant 2 : index
    %c1_348 = arith.constant 1 : index
    %c0_349 = arith.constant 0 : index
    %c0_350 = arith.constant 0 : index
    %380 = vector.load %arg12[%c2_347, %c1_348, %c0_349, %c0_350] : memref<3x3x32x64xf32, #tpu.memory_space<vmem>>, vector<1x1x32x64xf32>
    %381 = vector.shape_cast %380 : vector<1x1x32x64xf32> to vector<32x64xf32>
    %cst_351 = arith.constant dense<0.000000e+00> : vector<16x64xf32>
    %382 = tpu.matmul %379, %381, %cst_351 {dimension_numbers = #tpu.dot_dimension_numbers<[1], [0], [0], [1], [0, 0, 1, 1], [], []>} : vector<16x32xf32>, vector<32x64xf32>, vector<16x64xf32> -> vector<16x64xf32>
    %383 = arith.addf %377, %382 : vector<16x64xf32>
    %384 = vector.extract_strided_slice %334 {offsets = [2, 2, 0], sizes = [4, 4, 32], strides = [1, 1, 1]} : vector<6x6x32xf32> to vector<4x4x32xf32>
    %385 = vector.shape_cast %384 : vector<4x4x32xf32> to vector<16x32xf32>
    %c2_352 = arith.constant 2 : index
    %c2_353 = arith.constant 2 : index
    %c0_354 = arith.constant 0 : index
    %c0_355 = arith.constant 0 : index
    %386 = vector.load %arg12[%c2_352, %c2_353, %c0_354, %c0_355] : memref<3x3x32x64xf32, #tpu.memory_space<vmem>>, vector<1x1x32x64xf32>
    %387 = vector.shape_cast %386 : vector<1x1x32x64xf32> to vector<32x64xf32>
    %cst_356 = arith.constant dense<0.000000e+00> : vector<16x64xf32>
    %388 = tpu.matmul %385, %387, %cst_356 {dimension_numbers = #tpu.dot_dimension_numbers<[1], [0], [0], [1], [0, 0, 1, 1], [], []>} : vector<16x32xf32>, vector<32x64xf32>, vector<16x64xf32> -> vector<16x64xf32>
    %389 = arith.addf %383, %388 : vector<16x64xf32>
    %c0_357 = arith.constant 0 : index
    %c0_358 = arith.constant 0 : index
    %390 = vector.load %arg13[%c0_357, %c0_358] : memref<1x64xf32, #tpu.memory_space<vmem>>, vector<1x64xf32>
    %391 = vector.broadcast %390 : vector<1x64xf32> to vector<16x64xf32>
    %392 = arith.addf %389, %391 : vector<16x64xf32>
    %cst_359 = arith.constant 0.000000e+00 : f32
    %393 = vector.broadcast %cst_359 : f32 to vector<16x64xf32>
    %394 = arith.maximumf %392, %393 : vector<16x64xf32>
    %395 = vector.shape_cast %394 : vector<16x64xf32> to vector<4x4x64xf32>
    %c0_360 = arith.constant 0 : index
    %c0_361 = arith.constant 0 : index
    %c0_362 = arith.constant 0 : index
    %c0_363 = arith.constant 0 : index
    %396 = vector.load %arg16[%c0_360, %c0_361, %c0_362, %c0_363] : memref<1x4x4x64xf32, #tpu.memory_space<vmem>>, vector<1x4x4x64xf32>
    %397 = vector.shape_cast %396 : vector<1x4x4x64xf32> to vector<4x4x64xf32>
    %398 = vector.shape_cast %395 : vector<4x4x64xf32> to vector<1x4x4x64xf32>
    tpu.vector_store %arg16[%c0_360, %c0_361, %c0_362, %c0_363], %398 {strides = array<i32>} : memref<1x4x4x64xf32, #tpu.memory_space<vmem>>, vector<1x4x4x64xf32>,
    return
  }
  func.func @transform_0(%arg0: i32) -> (i32, i32, i32, i32) {
    %c0_i32 = arith.constant 0 : i32
    %c0_i32_0 = arith.constant 0 : i32
    %c0_i32_1 = arith.constant 0 : i32
    %c0_i32_2 = arith.constant 0 : i32
    return %arg0, %c0_i32, %c0_i32_0, %c0_i32_1 : i32, i32, i32, i32
  }
  func.func @transform_1(%arg0: i32) -> (i32, i32, i32, i32) {
    %c0_i32 = arith.constant 0 : i32
    %c0_i32_0 = arith.constant 0 : i32
    %c0_i32_1 = arith.constant 0 : i32
    %c0_i32_2 = arith.constant 0 : i32
    %c0_i32_3 = arith.constant 0 : i32
    return %c0_i32, %c0_i32_0, %c0_i32_1, %c0_i32_2 : i32, i32, i32, i32
  }
  func.func @transform_2(%arg0: i32) -> (i32, i32) {
    %c0_i32 = arith.constant 0 : i32
    %c0_i32_0 = arith.constant 0 : i32
    %c0_i32_1 = arith.constant 0 : i32
    return %c0_i32, %c0_i32_0 : i32, i32
  }
  func.func @transform_3(%arg0: i32) -> (i32, i32, i32, i32) {
    %c0_i32 = arith.constant 0 : i32
    %c0_i32_0 = arith.constant 0 : i32
    %c0_i32_1 = arith.constant 0 : i32
    %c0_i32_2 = arith.constant 0 : i32
    %c0_i32_3 = arith.constant 0 : i32
    return %c0_i32, %c0_i32_0, %c0_i32_1, %c0_i32_2 : i32, i32, i32, i32
  }
  func.func @transform_4(%arg0: i32) -> (i32, i32) {
    %c0_i32 = arith.constant 0 : i32
    %c0_i32_0 = arith.constant 0 : i32
    %c0_i32_1 = arith.constant 0 : i32
    return %c0_i32, %c0_i32_0 : i32, i32
  }
  func.func @transform_5(%arg0: i32) -> (i32, i32, i32, i32) {
    %c0_i32 = arith.constant 0 : i32
    %c0_i32_0 = arith.constant 0 : i32
    %c0_i32_1 = arith.constant 0 : i32
    %c0_i32_2 = arith.constant 0 : i32
    %c0_i32_3 = arith.constant 0 : i32
    return %c0_i32, %c0_i32_0, %c0_i32_1, %c0_i32_2 : i32, i32, i32, i32
  }
  func.func @transform_6(%arg0: i32) -> (i32, i32) {
    %c0_i32 = arith.constant 0 : i32
    %c0_i32_0 = arith.constant 0 : i32
    %c0_i32_1 = arith.constant 0 : i32
    return %c0_i32, %c0_i32_0 : i32, i32
  }
  func.func @transform_7(%arg0: i32) -> (i32, i32, i32, i32) {
    %c0_i32 = arith.constant 0 : i32
    %c0_i32_0 = arith.constant 0 : i32
    %c0_i32_1 = arith.constant 0 : i32
    %c0_i32_2 = arith.constant 0 : i32
    %c0_i32_3 = arith.constant 0 : i32
    return %c0_i32, %c0_i32_0, %c0_i32_1, %c0_i32_2 : i32, i32, i32, i32
  }
  func.func @transform_8(%arg0: i32) -> (i32, i32) {
    %c0_i32 = arith.constant 0 : i32
    %c0_i32_0 = arith.constant 0 : i32
    %c0_i32_1 = arith.constant 0 : i32
    return %c0_i32, %c0_i32_0 : i32, i32
  }
  func.func @transform_9(%arg0: i32) -> (i32, i32, i32, i32) {
    %c0_i32 = arith.constant 0 : i32
    %c0_i32_0 = arith.constant 0 : i32
    %c0_i32_1 = arith.constant 0 : i32
    %c0_i32_2 = arith.constant 0 : i32
    %c0_i32_3 = arith.constant 0 : i32
    return %c0_i32, %c0_i32_0, %c0_i32_1, %c0_i32_2 : i32, i32, i32, i32
  }
  func.func @transform_10(%arg0: i32) -> (i32, i32) {
    %c0_i32 = arith.constant 0 : i32
    %c0_i32_0 = arith.constant 0 : i32
    %c0_i32_1 = arith.constant 0 : i32
    return %c0_i32, %c0_i32_0 : i32, i32
  }
  func.func @transform_11(%arg0: i32) -> (i32, i32, i32, i32) {
    %c0_i32 = arith.constant 0 : i32
    %c0_i32_0 = arith.constant 0 : i32
    %c0_i32_1 = arith.constant 0 : i32
    %c0_i32_2 = arith.constant 0 : i32
    %c0_i32_3 = arith.constant 0 : i32
    return %c0_i32, %c0_i32_0, %c0_i32_1, %c0_i32_2 : i32, i32, i32, i32
  }
  func.func @transform_12(%arg0: i32) -> (i32, i32) {
    %c0_i32 = arith.constant 0 : i32
    %c0_i32_0 = arith.constant 0 : i32
    %c0_i32_1 = arith.constant 0 : i32
    return %c0_i32, %c0_i32_0 : i32, i32
  }
  func.func @transform_13(%arg0: i32) -> (i32, i32) {
    %c0_i32 = arith.constant 0 : i32
    %c0_i32_0 = arith.constant 0 : i32
    %c0_i32_1 = arith.constant 0 : i32
    return %c0_i32, %c0_i32_0 : i32, i32
  }
  func.func @transform_14(%arg0: i32) -> (i32, i32) {
    %c0_i32 = arith.constant 0 : i32
    %c0_i32_0 = arith.constant 0 : i32
    %c0_i32_1 = arith.constant 0 : i32
    return %c0_i32, %c0_i32_0 : i32, i32
  }
  func.func @transform_15(%arg0: i32) -> (i32, i32, i32, i32) {
    %c0_i32 = arith.constant 0 : i32
    %c0_i32_0 = arith.constant 0 : i32
    %c0_i32_1 = arith.constant 0 : i32
    %c0_i32_2 = arith.constant 0 : i32
    return %arg0, %c0_i32, %c0_i32_0, %c0_i32_1 : i32, i32, i32, i32
  }
}

</mosaic_0001>

<bundles_post_ra>
// kernel: spatial_model2_forward.1
= control target key start
LH: loop header
LB: loop body
LE: loop exit
PB: predicated region body
PF: predicated region fallthrough
CT: control target
= control target key end

     0   :  { %s19290_s0 = inlined_call_operand.vmem [shape: f32[2,16,16,8], index: 0, kind: input, shape index: {}]   ;;  %s19291_s1 = inlined_call_operand.hbm [shape: f32[3,3,8,8], index: 1, kind: input, shape index: {}]   ;;  %s19292_s2 = inlined_call_operand.vmem [shape: f32[1,8], index: 2, kind: input, shape index: {}]   ;;  %s19293_s3 = inlined_call_operand.hbm [shape: f32[3,3,8,16], index: 3, kind: input, shape index: {}]   ;;  %s19294_s4 = inlined_call_operand.vmem [shape: f32[1,16], index: 4, kind: input, shape index: {}]   ;;  %s19295_s5 = inlined_call_operand.vmem [shape: f32[3,3,16,16], index: 5, kind: input, shape index: {}]   ;;  %s19296_s6 = inlined_call_operand.vmem [shape: f32[1,16], index: 6, kind: input, shape index: {}]   ;;  %s19297_s7 = inlined_call_operand.hbm [shape: f32[3,3,16,32], index: 7, kind: input, shape index: {}]   ;;  %s19298_s8 = inlined_call_operand.vmem [shape: f32[1,32], index: 8, kind: input, shape index: {}]   ;;  %s19299_s9 = inlined_call_operand.vmem [shape: f32[3,3,32,32], index: 9, kind: input, shape index: {}]   ;;  %s19300_s10 = inlined_call_operand.vmem [shape: f32[1,32], index: 10, kind: input, shape index: {}]   ;;  %s19301_s11 = inlined_call_operand.vmem [shape: f32[3,3,32,64], index: 11, kind: input, shape index: {}]   ;;  %s19302_s12 = inlined_call_operand.vmem [shape: f32[1,64], index: 12, kind: input, shape index: {}]   ;;  %s19303_s13 = inlined_call_operand.hbm [shape: f32[64,256], index: 13, kind: input, shape index: {}]   ;;  %s19304_s14 = inlined_call_operand.vmem [shape: f32[16,64], index: 14, kind: input, shape index: {}]   ;;  %s19305_s15 = inlined_call_operand.hbm [shape: f32[2,4,4,64], index: 15, kind: output, shape index: {}]  }
   0x1   :  { %19472 = sst [smem:[#allocation71_spill]] %s19300_s10 }
   0x2   :  { %19473 = sst [smem:[#allocation72_spill]] %s19302_s12 }
   0x3   :  { %19474 = sst [smem:[#allocation73_spill]] %s19305_s15 }
   0x4   :  { %20 = vsyncpa [#allocation9], 0 }
   0x5   :  { %21 = vsyncpa [#allocation12], 0 }
   0x6   :  { %22 = vsyncpa [#allocation15], 0 }
   0x7   :  { %23 = vsyncpa [#allocation10], 0 }
   0x8   :  { %25 = vsyncpa [#allocation10 + $0x1], 0  ;;  %s15580_s18 = smov 0   ;;  %s15582_s19 = smov 0  }
   0x9   :  { %s15584_s20 = smov 0   ;;  %s15586_s21 = smov 0  }
   0xa LB: > { %19475 = sst [smem:[#allocation21_spill]] %s15474_s18  ;;  %s15601_s22 = sadd.s32 4294967295, %s15486_s21   ;;  %s15486_s21 = sphi %s15586_s21, %s19725_s21   ;;  %s15482_s20 = sphi %s15584_s20, %s19728_s20   ;;  %s15478_s19 = sphi %s15582_s19, %s19727_s19   ;;  %s15474_s18 = sphi %s15580_s18, %s19726_s18  }
   0xb   : > { %19476 = sst [smem:[#allocation22_spill]] %s15478_s19  ;;  %s11010_s23 = sadd.s32 4294967294, %s15486_s21  }
   0xc   : > { %19477 = sst [smem:[#allocation23_spill]] %s15482_s20  ;;  %s15605_s24 = sadd.s32 1, %s15486_s21  }
   0xd   : > { %19478 = sst [smem:[#allocation24_spill]] %s15486_s21  ;;  %s358_s25 = sadd.s32 1, %s15482_s20 }
   0xe   : > { %19479 = sst [smem:[#allocation25_spill]] %s15605_s24  ;;  %s355_s26 = ssub.s32 %s15486_s21, %s15605_s24 }
   0xf   : > { %p368_p0 = scmp.ne.s32.totalorder %s15482_s20, %s15478_s19  ;;  %p356_p1 = scmp.eq.s32.totalorder %s355_s26, 0 }
  0x10   : > { %p369_p2 = scmp.eq.s32.totalorder %s15601_s22, 1  ;;  %p374_p3 = scmp.ne.s32.totalorder %s15478_s19, %s15474_s18 }
  0x11   : > { %p375_p4 = scmp.eq.s32.totalorder %s11010_s23, 1  ;;  %p11011_p7 = scmp.ge.s32.totalorder %s15486_s21, 1 }
  0x12   : > { %s15616_s27 = scalar_select %p356_p1, %s15482_s20, %s358_s25  }
  0x13   : > { %p15618_p5 = por %p369_p2, %p368_p0  ;;  %p15622_p6 = por %p375_p4, %p374_p3 }
  0x14   : > { %19480 = sst [smem:[#allocation26_spill]] %s15616_s27  ;;  %p382_p8 = scmp.lt.s32.totalorder %s15486_s21, 3 }
  0x15   : > { %s19481_s28 = scalar_select %p15618_p5, 1, 0 }
  0x16   : > { %s19483_s29 = scalar_select %p15622_p6, 1, 0 }
  0x17   : > { %19482 = sst [smem:[#allocation27_spill]] %s19481_s28  ;;  %p19313_p9 = scmp.eq.s32.totalorder %s15601_s22, 0 }
  0x18   : > { %19484 = sst [smem:[#allocation28_spill]] %s19483_s29  ;;  %p15629_p10 = pnand %p11011_p7, %p382_p8 }
  0x19   : > { %s15488_s16 = smov [#allocation11]   ;;  %s15489_s25 = smov [#allocation8]  }
  0x1a   : > { %s19485_s30 = scalar_select %p15629_p10, 1, 0 }
  0x1b   : > { %p15209_p11 = pneg %p15629_p10  ;;  %s410_s17 = sshll.u32 %s15488_s16, 4  ;;  %s15635_s17 = int_to_ptr.vmem [resolvable:$true] %s410_s17 }
  0x1c   : > { %s394_s26 = sshll.u32 %s15489_s25, 4  ;;  %s15490_s27 = smov [#allocation13]   ;;  %s15643_s26 = int_to_ptr.vmem [resolvable:$true] %s394_s26 }
  0x1d   : > { %p15639_p12 = pnand %p19313_p9, %p15209_p11  ;;  %s15645_s20 = sshll.u32 %s15490_s27, 4  ;;  %s433_s20 = int_to_ptr.vmem [resolvable:$true] %s15645_s20 }
  0x1e   : > { %s15300_s18 = scalar_lea.hbm %s19293_s3, 1152 }
  0x1f   : > { %p15301_p13 = scmp.ne.s32.totalorder %s19293_s3, %s15300_s18  ;;  %p15655_p0 = pneg %p15639_p12 }
  0x20   : > { %p15307_p3 = scmp.lt.u32.totalorder %s15300_s18, %s19293_s3 }
  0x21   : > { %p15303_p1 = pnand %p15655_p0, %p15301_p13 }
  0x23   : > { %p15304_p2 = pneg %p15303_p1 }
  0x25   : > { %p15309_p4 = pnand %p15307_p3, %p15304_p2 }
  0x27   : > { %15312 = shalt.err (!%p15309_p4)
}
  0x28   : > { %s15313_s21 = scalar_lea.vmem %s15635_s17, 1152  ;;  %p15321_p9 = scmp.lt.s32.totalorder %s15635_s17, %s15635_s17 }
  0x29   : > { %p15314_p7 = scmp.ne.s32.totalorder %s15635_s17, %s15313_s21  ;;  %p15322_p6 = scmp.lt.s32.totalorder %s15313_s21, %s15313_s21 }
  0x2b   : > { %p15316_p8 = pnand %p15314_p7, %p15655_p0  ;;  %p15323_p13 = por %p15322_p6, %p15321_p9 }
  0x2d   : > { %p15317_p11 = pneg %p15316_p8 }
  0x2f   : > { %p15324_p1 = pnand %p15323_p13, %p15317_p11 }
  0x31   : > { %15327 = shalt.err (!%p15324_p1)
}
  0x32   : > { %s15491_s24 = smov 128   ;;  %s15492_s18 = smov 8  }
  0x33   : > { %15215 = dma.hbm_to_vmem [thread:$0]  (!%p15639_p12), %s19293_s3, 1152, %s15635_s17, [#allocation12], %s15491_s24, %s15491_s24, %s15492_s18  }
  0x34   : > { %s15328_s21 = scalar_lea.hbm %s19291_s1, 1152 }
  0x35   : > { %p15329_p6 = scmp.ne.s32.totalorder %s19291_s1, %s15328_s21  ;;  %p15335_p3 = scmp.lt.u32.totalorder %s15328_s21, %s19291_s1 }
  0x37   : > { %p15331_p9 = pnand %p15329_p6, %p15655_p0 }
  0x39   : > { %p15332_p2 = pneg %p15331_p9 }
  0x3b   : > { %p15337_p4 = pnand %p15335_p3, %p15332_p2 }
  0x3d   : > { %15340 = shalt.err (!%p15337_p4)
}
  0x3e   : > { %s15341_s17 = scalar_lea.vmem %s15643_s26, 1152  ;;  %p15349_p13 = scmp.lt.s32.totalorder %s15643_s26, %s15643_s26 }
  0x3f   : > { %p15342_p7 = scmp.ne.s32.totalorder %s15643_s26, %s15341_s17  ;;  %p15350_p1 = scmp.lt.s32.totalorder %s15341_s17, %s15341_s17 }
  0x41   : > { %p15344_p8 = pnand %p15342_p7, %p15655_p0  ;;  %p15351_p6 = por %p15350_p1, %p15349_p13 }
  0x43   : > { %p15345_p11 = pneg %p15344_p8 }
  0x45   : > { %p15352_p9 = pnand %p15351_p6, %p15345_p11 }
  0x47   : > { %15355 = shalt.err (!%p15352_p9)
}
  0x48   : > { %15212 = dma.hbm_to_vmem [thread:$0]  (!%p15639_p12), %s19291_s1, 1152, %s15643_s26, [#allocation9], %s15491_s24, %s15491_s24, %s15492_s18  }
  0x49   : > { %s15356_s29 = scalar_lea.hbm %s19297_s7, 2304 }
  0x4a   : > { %p15357_p2 = scmp.ne.s32.totalorder %s19297_s7, %s15356_s29  ;;  %p15363_p7 = scmp.lt.u32.totalorder %s15356_s29, %s19297_s7 }
  0x4c   : > { %p15359_p3 = pnand %p15357_p2, %p15655_p0 }
  0x4e   : > { %p15360_p4 = pneg %p15359_p3 }
  0x50   : > { %p15365_p8 = pnand %p15363_p7, %p15360_p4 }
  0x52   : > { %15368 = shalt.err (!%p15365_p8)
}
  0x53   : > { %s15369_s17 = scalar_lea.vmem %s433_s20, 2304  ;;  %p15377_p6 = scmp.lt.s32.totalorder %s433_s20, %s433_s20 }
  0x54   : > { %p15370_p11 = scmp.ne.s32.totalorder %s433_s20, %s15369_s17  ;;  %p15378_p9 = scmp.lt.s32.totalorder %s15369_s17, %s15369_s17 }
  0x56   : > { %p15372_p13 = pnand %p15370_p11, %p15655_p0  ;;  %p15379_p5 = por %p15378_p9, %p15377_p6 }
  0x58   : > { %p15373_p1 = pneg %p15372_p13 }
  0x5a   : > { %p15380_p10 = pnand %p15379_p5, %p15373_p1 }
  0x5c   : > { %15383 = shalt.err (!%p15380_p10)
}
  0x5d   : > { %15218 = dma.hbm_to_vmem [thread:$0]  (!%p15639_p12), %s19297_s7, 2304, %s433_s20, [#allocation12], %s15491_s24, %s15491_s24, %s15492_s18  }
  0x5e   : > { %s15493_s12 = smov [#allocation14]   ;;  %s15384_s16 = scalar_lea.hbm %s19303_s13, 2048 }
  0x5f   : > { %s460_s19 = sshll.u32 %s15493_s12, 4  ;;  %p15385_p5 = scmp.ne.s32.totalorder %s19303_s13, %s15384_s16  ;;  %s461_s19 = int_to_ptr.vmem [resolvable:$true] %s460_s19 }
  0x60   : > { %p15391_p3 = scmp.lt.u32.totalorder %s15384_s16, %s19303_s13 }
  0x61   : > { %p15387_p10 = pnand %p15385_p5, %p15655_p0 }
  0x63   : > { %p15388_p2 = pneg %p15387_p10 }
  0x65   : > { %p15393_p4 = pnand %p15391_p3, %p15388_p2 }
  0x67   : > { %15396 = shalt.err (!%p15393_p4)
}
  0x68   : > { %s15397_s20 = scalar_lea.vmem %s461_s19, 2048  ;;  %p15405_p13 = scmp.lt.s32.totalorder %s461_s19, %s461_s19 }
  0x69   : > { %p15398_p7 = scmp.ne.s32.totalorder %s461_s19, %s15397_s20  ;;  %p15406_p1 = scmp.lt.s32.totalorder %s15397_s20, %s15397_s20 }
  0x6b   : > { %p15400_p8 = pnand %p15398_p7, %p15655_p0  ;;  %p15407_p6 = por %p15406_p1, %p15405_p13 }
  0x6d   : > { %p15401_p11 = pneg %p15400_p8 }
  0x6f   : > { %p15408_p9 = pnand %p15407_p6, %p15401_p11 }
  0x71   : > { %15411 = shalt.err (!%p15408_p9)
}
  0x72   : > { %s15494_s24 = smov 256   ;;  %s15495_s18 = smov 16  }
  0x73   : > { %15221 = dma.hbm_to_vmem [thread:$0]  (!%p15639_p12), %s19303_s13, 2048, %s461_s19, [#allocation15], %s15494_s24, %s15494_s24, %s15495_s18  }
  0x74   : > { %p19488_p5 = scmp.ne.s32.totalorder %s19485_s30, 0 }
  0x76   : > { %487 = sbr.rel (%p19488_p5) target bundleno = 3503 (0xdaf), region = 80 }
  0x7d   : > { %p19489_p10 = scmp.eq.s32.totalorder %s15601_s22, 0 }
  0x7f   : > { %15457 = dma.done.wait (%p19489_p10), [#allocation9], 1152   ;;  %p19490_p0 = pmov %p19489_p10 }
  0x81   : > { %15459 = vsyncadd (%p19490_p0), [#allocation9], 4294966144  ;;  %p19491_p2 = pmov %p19490_p0 }
  0x82   : > { %p19492_p3 = pmov %p19490_p0 }
  0x83   : > { %15461 = dma.done.wait (%p19491_p2), [#allocation12], 3456  }
  0x84   : > { %15463 = vsyncadd (%p19492_p3), [#allocation12], 4294963840  ;;  %p19493_p4 = pmov %p19490_p0 }
  0x85   : > { %p19494_p12 = pmov %p19490_p0 }
  0x86   : > { %15465 = dma.done.wait (%p19493_p4), [#allocation15], 2048  }
  0x87   : > { %15467 = vsyncadd (%p19494_p12), [#allocation15], 4294965248  ;;  %vm584_vm0 = vcmask 64512   ;;  %vm587_vm1 = vcmask 58368   ;;  %v19319_v0 = vmov 0.0   ;;  %p547_p7 = scmp.lt.s32.totalorder %s15601_s22, 1 }
  0x88   : > { %585 = vst.msk [vmem:[#allocation2] sm:$0xff] %vm584_vm0, %v19319_v0  ;;  %586 = vst.msk [vmem:[#allocation2 + $0x8] sm:$0xff] %vm584_vm0, %v19319_v0  ;;  %v858_v1 = vld [vmem:[#allocation8 + $0x8] sm:$0xff]  ;;  %vm776_vm2 = vcmask 1046528   ;;  %vm1437_vm3 = vcmask 1045504   ;;  %v727_v31 = vld [vmem:[#allocation8] sm:$0xff] }
  0x89   : > { %589 = vst.msk [vmem:[#allocation2 + $0x18] sm:$0xff] %vm584_vm0, %v19319_v0  ;;  %590 = vst.msk [vmem:[#allocation2 + $0x20] sm:$0xff] %vm584_vm0, %v19319_v0  ;;  %s548_s15 = scalar_select %p547_p7, %s15601_s22, 1  ;;  %12848 = vmatprep.subr.mxu0 %v858_v1  ;;  %14517 = vmatprep.subr.mxu1 %v858_v1  ;;  %vm6565_vm4 = vcmask 130048   ;;  %vm6567_vm5 = vcmask 123904   ;;  %vm9047_vm6 = vcmask 523264  }
  0x8a   : > { %592 = vst.msk [vmem:[#allocation2 + $0x30] sm:$0xff] %vm584_vm0, %v19319_v0  ;;  %593 = vst.msk [vmem:[#allocation2 + $0x38] sm:$0xff] %vm584_vm0, %v19319_v0  ;;  %12849 = vmatpush3.msra.mxu0 %v858_v1  ;;  %14518 = vmatpush3.msra.mxu1 %v858_v1  ;;  %vm9135_vm7 = vcmask 259072   ;;  %vm9143_vm8 = vcmask 257024   ;;  %vm9166_vm9 = vcmask 1042432   ;;  %vm9167_vm10 = vcmask 1046532  }
  0x8b   : > { %595 = vst.msk [vmem:[#allocation2 + $0x48] sm:$0xff] %vm584_vm0, %v19319_v0  ;;  %596 = vst.msk [vmem:[#allocation2 + $0x50] sm:$0xff] %vm584_vm0, %v19319_v0  ;;  %s11898_s30 = sshll.u32 %s548_s15, 8  ;;  %12898 = vmatprep.subr.mxu0 %v727_v31  ;;  %vm9192_vm12 = vcmask 261120   ;;  %vm9353_vm13 = vcmask 1041408   ;;  %vm9354_vm14 = vcmask 1045508  }
  0x8c   : > { %598 = vst.msk [vmem:[#allocation2 + $0x60] sm:$0xff] %vm584_vm0, %v19319_v0  ;;  %599 = vst.msk [vmem:[#allocation2 + $0x68] sm:$0xff] %vm584_vm0, %v19319_v0  ;;  %s15980_s19 = scalar_lea.vmem %s19290_s0, %s11898_s30  ;;  %s19715_s12 = sld [smem:[#allocation71_spill]] }
  0x8d   : > { %601 = vst.msk [vmem:[#allocation2 + $0x78] sm:$0xff] %vm584_vm0, %v19319_v0  ;;  %602 = vst.msk [vmem:[#allocation2 + $0x80] sm:$0xff] %vm584_vm0, %v19319_v0  ;;  %v552_v2 = vld [vmem:[%s15980_s19] sm:$0xff]  ;;  %v553_v3 = vld [vmem:[%s15980_s19 + $0x8] sm:$0xff]  ;;  %s19716_s24 = sld [smem:[#allocation22_spill]]  ;;  %s19717_s30 = sld [smem:[#allocation72_spill]] }
  0x8e   : > { %604 = vst.msk [vmem:[#allocation2 + $0x90] sm:$0xff] %vm584_vm0, %v19319_v0  ;;  %605 = vst.msk [vmem:[#allocation2 + $0x98] sm:$0xff] %vm584_vm0, %v19319_v0  ;;  %v554_v11 = vld [vmem:[%s15980_s19 + $0x10] sm:$0xff]  ;;  %v555_v12 = vld [vmem:[%s15980_s19 + $0x18] sm:$0xff]  ;;  %s11899_s28 = sshll.u32 %s15601_s22, 8  ;;  %s19719_s25 = sld [smem:[#allocation73_spill]] }
  0x8f   : > { %607 = vst.msk [vmem:[#allocation2 + $0xa8] sm:$0xff] %vm584_vm0, %v19319_v0  ;;  %608 = vst.msk [vmem:[#allocation2 + $0xb0] sm:$0xff] %vm584_vm0, %v19319_v0  ;;  %v15984_v4 = vld [vmem:[#allocation2] sm:$0xff]  ;;  %v15986_v5 = vld [vmem:[#allocation2 + $0x8] sm:$0xff]  ;;  %s15497_s17 = smov [#allocation16]  }
  0x90   : > { %610 = vst.msk [vmem:[#allocation2 + $0xc0] sm:$0xff] %vm584_vm0, %v19319_v0  ;;  %611 = vst.msk [vmem:[#allocation2 + $0xc8] sm:$0xff] %vm584_vm0, %v19319_v0  ;;  %v777_v7 = vrot.slane %v15984_v4, 1  ;;  %v778_v8 = vrot.slane %v15986_v5, 1  ;;  %v556_v13 = vld [vmem:[%s15980_s19 + $0x20] sm:$0xff]  ;;  %v557_v14 = vld [vmem:[%s15980_s19 + $0x28] sm:$0xff] }
  0x91   : > { %613 = vst.msk [vmem:[#allocation2 + $0xd8] sm:$0xff] %vm584_vm0, %v19319_v0  ;;  %614 = vst.msk [vmem:[#allocation2 + $0xe0] sm:$0xff] %vm584_vm0, %v19319_v0  ;;  %v558_v15 = vld [vmem:[%s15980_s19 + $0x30] sm:$0xff]  ;;  %v1438_v16 = vrot.slane %v15984_v4, 2  ;;  %v1439_v17 = vrot.slane %v15986_v5, 2  ;;  %v559_v20 = vld [vmem:[%s15980_s19 + $0x38] sm:$0xff] }
  0x92   : > { %616 = vst.msk [vmem:[#allocation2 + $0xf0] sm:$0xff] %vm584_vm0, %v19319_v0  ;;  %617 = vst.msk [vmem:[#allocation2 + $0xf8] sm:$0xff] %vm584_vm0, %v19319_v0  ;;  %v779_v18 = vsel %vm776_vm2, %v777_v7, %v778_v8  ;;  %v560_v21 = vld [vmem:[%s15980_s19 + $0x40] sm:$0xff]  ;;  %v561_v22 = vld [vmem:[%s15980_s19 + $0x48] sm:$0xff]  ;;  %s15416_s20 = sshll.u32 %s15497_s17, 4  ;;  %s15417_s20 = int_to_ptr.vmem [resolvable:$false] %s15416_s20 }
  0x93   : > { %619 = vst.msk [vmem:[#allocation2 + $0x108] sm:$0xff] %vm584_vm0, %v19319_v0  ;;  %620 = vst.msk [vmem:[#allocation2 + $0x110] sm:$0xff] %vm584_vm0, %v19319_v0  ;;  %12850 = vmatprep.mubr.msk.f32.mxu0 %vm584_vm0, %v779_v18  ;;  %v562_v23 = vld [vmem:[%s15980_s19 + $0x50] sm:$0xff]  ;;  %v563_v24 = vld [vmem:[%s15980_s19 + $0x58] sm:$0xff]  ;;  %v16017_v26 = vsel %vm1437_vm3, %v1438_v16, %v1439_v17  ;;  %s544_s18 = sand.u32 1, %s19716_s24   ;;  %s15418_s24 = scalar_lea.vmem %s15417_s20, 512 }
  0x94   : > { %622 = vst.msk [vmem:[#allocation2 + $0x120] sm:$0xff] %vm584_vm0, %v19319_v0  ;;  %623 = vst.msk [vmem:[#allocation2 + $0x128] sm:$0xff] %vm584_vm0, %v19319_v0  ;;  %v564_v25 = vld [vmem:[%s15980_s19 + $0x60] sm:$0xff]  ;;  %v565_v28 = vld [vmem:[%s15980_s19 + $0x68] sm:$0xff]  ;;  %s11022_s26 = sshll.u32 %s544_s18, 4  ;;  %s19247_s27 = scalar_lea.hbm %s19719_s25, %s11899_s28 }
  0x95   : > { %625 = vst.msk [vmem:[#allocation2 + $0x138] sm:$0xff] %vm584_vm0, %v19319_v0  ;;  %626 = vst.msk [vmem:[#allocation2 + $0x140] sm:$0xff] %vm584_vm0, %v19319_v0  ;;  %v566_v29 = vld [vmem:[%s15980_s19 + $0x70] sm:$0xff]  ;;  %v567_v30 = vld [vmem:[%s15980_s19 + $0x78] sm:$0xff]  ;;  %s546_s23 = scalar_lea.vmem [#allocation16], %s11022_s26  ;;  %s19249_s21 = scalar_lea.sflag [#allocation10], %s544_s18 }
  0x96   : > { %628 = vst.msk [vmem:[#allocation2 + $0x150] sm:$0xff] %vm584_vm0, %v19319_v0  ;;  %629 = vst.msk [vmem:[#allocation2 + $0x158] sm:$0xff] %vm584_vm0, %v19319_v0  ;;  %v568_v32 = vld [vmem:[%s15980_s19 + $0x80] sm:$0xff]  ;;  %v569_v33 = vld [vmem:[%s15980_s19 + $0x88] sm:$0xff] }
  0x97   : > { %631 = vst.msk [vmem:[#allocation2 + $0x168] sm:$0xff] %vm584_vm0, %v19319_v0  ;;  %632 = vst.msk [vmem:[#allocation2 + $0x170] sm:$0xff] %vm584_vm0, %v19319_v0  ;;  %v570_v40 = vld [vmem:[%s15980_s19 + $0x90] sm:$0xff]  ;;  %v571_v41 = vld [vmem:[%s15980_s19 + $0x98] sm:$0xff] }
  0x98   : > { %634 = vst.msk [vmem:[#allocation2 + $0x180] sm:$0xff] %vm584_vm0, %v19319_v0  ;;  %635 = vst.msk [vmem:[#allocation2 + $0x188] sm:$0xff] %vm584_vm0, %v19319_v0  ;;  %v572_v42 = vld [vmem:[%s15980_s19 + $0xa0] sm:$0xff]  ;;  %v574_v16 = vld [vmem:[%s15980_s19 + $0xb0] sm:$0xff] }
  0x99   : > { %637 = vst.msk [vmem:[#allocation2 + $0x198] sm:$0xff] %vm584_vm0, %v19319_v0  ;;  %638 = vst.msk [vmem:[#allocation2 + $0x1a0] sm:$0xff] %vm584_vm0, %v19319_v0  ;;  %v16129_v18 = vld [vmem:[#allocation8 + $0x10] sm:$0xff] }
  0x9a   : > { %3516 = vst.msk [vmem:[#allocation3] sm:$0xff] %vm584_vm0, %v19319_v0  ;;  %3517 = vst.msk [vmem:[#allocation3 + $0x8] sm:$0xff] %vm584_vm0, %v19319_v0 }
  0x9b   : > { %3519 = vst.msk [vmem:[#allocation3 + $0x18] sm:$0xff] %vm584_vm0, %v19319_v0  ;;  %3520 = vst.msk [vmem:[#allocation3 + $0x20] sm:$0xff] %vm584_vm0, %v19319_v0 }
  0x9c   : > { %3522 = vst.msk [vmem:[#allocation3 + $0x30] sm:$0xff] %vm584_vm0, %v19319_v0  ;;  %3523 = vst.msk [vmem:[#allocation3 + $0x38] sm:$0xff] %vm584_vm0, %v19319_v0 }
  0x9d   : > { %3525 = vst.msk [vmem:[#allocation3 + $0x48] sm:$0xff] %vm584_vm0, %v19319_v0  ;;  %3526 = vst.msk [vmem:[#allocation3 + $0x50] sm:$0xff] %vm584_vm0, %v19319_v0 }
  0x9e   : > { %3528 = vst.msk [vmem:[#allocation3 + $0x60] sm:$0xff] %vm584_vm0, %v19319_v0  ;;  %3529 = vst.msk [vmem:[#allocation3 + $0x68] sm:$0xff] %vm584_vm0, %v19319_v0 }
  0x9f   : > { %3531 = vst.msk [vmem:[#allocation3 + $0x78] sm:$0xff] %vm584_vm0, %v19319_v0  ;;  %3532 = vst.msk [vmem:[#allocation3 + $0x80] sm:$0xff] %vm584_vm0, %v19319_v0 }
  0xa0   : > { %3534 = vst.msk [vmem:[#allocation3 + $0x90] sm:$0xff] %vm584_vm0, %v19319_v0  ;;  %3535 = vst.msk [vmem:[#allocation3 + $0x98] sm:$0xff] %vm584_vm0, %v19319_v0 }
  0xa1   : > { %3537 = vst.msk [vmem:[#allocation3 + $0xa8] sm:$0xff] %vm584_vm0, %v19319_v0  ;;  %3538 = vst.msk [vmem:[#allocation3 + $0xb0] sm:$0xff] %vm584_vm0, %v19319_v0 }
  0xa2   : > { %3540 = vst.msk [vmem:[#allocation3 + $0xc0] sm:$0xff] %vm584_vm0, %v19319_v0  ;;  %3541 = vst.msk [vmem:[#allocation3 + $0xc8] sm:$0xff] %vm584_vm0, %v19319_v0 }
  0xa3   : > { %3543 = vst.msk [vmem:[#allocation3 + $0xd8] sm:$0xff] %vm584_vm0, %v19319_v0  ;;  %3544 = vst.msk [vmem:[#allocation3 + $0xe0] sm:$0xff] %vm584_vm0, %v19319_v0 }
  0xa4   : > { %3546 = vst.msk [vmem:[#allocation3 + $0xf0] sm:$0xff] %vm584_vm0, %v19319_v0  ;;  %3547 = vst.msk [vmem:[#allocation3 + $0xf8] sm:$0xff] %vm584_vm0, %v19319_v0 }
  0xa5   : > { %3549 = vst.msk [vmem:[#allocation3 + $0x108] sm:$0xff] %vm584_vm0, %v19319_v0  ;;  %3550 = vst.msk [vmem:[#allocation3 + $0x110] sm:$0xff] %vm584_vm0, %v19319_v0 }
  0xa6   : > { %3552 = vst.msk [vmem:[#allocation3 + $0x120] sm:$0xff] %vm584_vm0, %v19319_v0  ;;  %3553 = vst.msk [vmem:[#allocation3 + $0x128] sm:$0xff] %vm584_vm0, %v19319_v0 }
  0xa7   : > { %3555 = vst.msk [vmem:[#allocation3 + $0x138] sm:$0xff] %vm584_vm0, %v19319_v0  ;;  %3556 = vst.msk [vmem:[#allocation3 + $0x140] sm:$0xff] %vm584_vm0, %v19319_v0 }
  0xa8   : > { %3558 = vst.msk [vmem:[#allocation3 + $0x150] sm:$0xff] %vm584_vm0, %v19319_v0  ;;  %3559 = vst.msk [vmem:[#allocation3 + $0x158] sm:$0xff] %vm584_vm0, %v19319_v0 }
  0xa9   : > { %3561 = vst.msk [vmem:[#allocation3 + $0x168] sm:$0xff] %vm584_vm0, %v19319_v0  ;;  %3562 = vst.msk [vmem:[#allocation3 + $0x170] sm:$0xff] %vm584_vm0, %v19319_v0 }
  0xaa   : > { %3564 = vst.msk [vmem:[#allocation3 + $0x180] sm:$0xff] %vm584_vm0, %v19319_v0  ;;  %3565 = vst.msk [vmem:[#allocation3 + $0x188] sm:$0xff] %vm584_vm0, %v19319_v0 }
  0xab   : > { %3567 = vst.msk [vmem:[#allocation3 + $0x198] sm:$0xff] %vm584_vm0, %v19319_v0  ;;  %3568 = vst.msk [vmem:[#allocation3 + $0x1a0] sm:$0xff] %vm584_vm0, %v19319_v0 }
  0xac   : > { %588 = vst.msk [vmem:[#allocation2 + $0x10] sm:$0x3] %vm587_vm1, %v19319_v0  ;;  %591 = vst.msk [vmem:[#allocation2 + $0x28] sm:$0x3] %vm587_vm1, %v19319_v0 }
  0xad   : > { %594 = vst.msk [vmem:[#allocation2 + $0x40] sm:$0x3] %vm587_vm1, %v19319_v0  ;;  %597 = vst.msk [vmem:[#allocation2 + $0x58] sm:$0x3] %vm587_vm1, %v19319_v0 }
  0xae   : > { %600 = vst.msk [vmem:[#allocation2 + $0x70] sm:$0x3] %vm587_vm1, %v19319_v0  ;;  %603 = vst.msk [vmem:[#allocation2 + $0x88] sm:$0x3] %vm587_vm1, %v19319_v0 }
  0xaf   : > { %606 = vst.msk [vmem:[#allocation2 + $0xa0] sm:$0x3] %vm587_vm1, %v19319_v0  ;;  %609 = vst.msk [vmem:[#allocation2 + $0xb8] sm:$0x3] %vm587_vm1, %v19319_v0 }
  0xb0   : > { %612 = vst.msk [vmem:[#allocation2 + $0xd0] sm:$0x3] %vm587_vm1, %v19319_v0  ;;  %615 = vst.msk [vmem:[#allocation2 + $0xe8] sm:$0x3] %vm587_vm1, %v19319_v0 }
  0xb1   : > { %618 = vst.msk [vmem:[#allocation2 + $0x100] sm:$0x3] %vm587_vm1, %v19319_v0  ;;  %621 = vst.msk [vmem:[#allocation2 + $0x118] sm:$0x3] %vm587_vm1, %v19319_v0 }
  0xb2   : > { %624 = vst.msk [vmem:[#allocation2 + $0x130] sm:$0x3] %vm587_vm1, %v19319_v0  ;;  %627 = vst.msk [vmem:[#allocation2 + $0x148] sm:$0x3] %vm587_vm1, %v19319_v0 }
  0xb3   : > { %630 = vst.msk [vmem:[#allocation2 + $0x160] sm:$0x3] %vm587_vm1, %v19319_v0  ;;  %633 = vst.msk [vmem:[#allocation2 + $0x178] sm:$0x3] %vm587_vm1, %v19319_v0  ;;  %v675_v6 = vld [vmem:[#allocation2 + $0x10] sm:$0x3] }
  0xb4   : > { %636 = vst.msk [vmem:[#allocation2 + $0x190] sm:$0x3] %vm587_vm1, %v19319_v0  ;;  %639 = vst.msk [vmem:[#allocation2 + $0x1a8] sm:$0x3] %vm587_vm1, %v19319_v0  ;;  %v780_v9 = vrot.slane %v675_v6, 1  ;;  %v1441_v10 = vrot.slane %v675_v6, 2 }
  0xb5   : > { %3518 = vst.msk [vmem:[#allocation3 + $0x10] sm:$0x3] %vm587_vm1, %v19319_v0  ;;  %3521 = vst.msk [vmem:[#allocation3 + $0x28] sm:$0x3] %vm587_vm1, %v19319_v0 }
  0xb6   : > { %3524 = vst.msk [vmem:[#allocation3 + $0x40] sm:$0x3] %vm587_vm1, %v19319_v0  ;;  %3527 = vst.msk [vmem:[#allocation3 + $0x58] sm:$0x3] %vm587_vm1, %v19319_v0  ;;  %v781_v19 = vsel %vm776_vm2, %v778_v8, %v780_v9  ;;  %v16020_v27 = vsel %vm1437_vm3, %v1439_v17, %v1441_v10  ;;  %v575_v17 = vld [vmem:[%s15980_s19 + $0xb8] sm:$0xff] }
  0xb7   : > { %3530 = vst.msk [vmem:[#allocation3 + $0x70] sm:$0x3] %vm587_vm1, %v19319_v0  ;;  %3533 = vst.msk [vmem:[#allocation3 + $0x88] sm:$0x3] %vm587_vm1, %v19319_v0  ;;  %12851 = vmatmul.mubr.msk.f32.vlgmr.msra.gmra.mrb[0].mxu0 %vm584_vm0, %v781_v19 }
  0xb8   : > { %3536 = vst.msk [vmem:[#allocation3 + $0xa0] sm:$0x3] %vm587_vm1, %v19319_v0  ;;  %3539 = vst.msk [vmem:[#allocation3 + $0xb8] sm:$0x3] %vm587_vm1, %v19319_v0  ;;  %12899 = vmatpush3.msra.mxu0 %v727_v31  ;;  %v581_v31 = vld [vmem:[%s15980_s19 + $0xe8] sm:$0xff] }
  0xb9   : > { %3542 = vst.msk [vmem:[#allocation3 + $0xd0] sm:$0x3] %vm587_vm1, %v19319_v0  ;;  %3545 = vst.msk [vmem:[#allocation3 + $0xe8] sm:$0x3] %vm587_vm1, %v19319_v0  ;;  %12948 = vmatprep.subr.mxu0 %v16129_v18 }
  0xba   : > { %3548 = vst.msk [vmem:[#allocation3 + $0x100] sm:$0x3] %vm587_vm1, %v19319_v0  ;;  %3551 = vst.msk [vmem:[#allocation3 + $0x118] sm:$0x3] %vm587_vm1, %v19319_v0 }
  0xbb   : > { %3554 = vst.msk [vmem:[#allocation3 + $0x130] sm:$0x3] %vm587_vm1, %v19319_v0  ;;  %3557 = vst.msk [vmem:[#allocation3 + $0x148] sm:$0x3] %vm587_vm1, %v19319_v0 }
  0xbc   : > { %3560 = vst.msk [vmem:[#allocation3 + $0x160] sm:$0x3] %vm587_vm1, %v19319_v0  ;;  %3563 = vst.msk [vmem:[#allocation3 + $0x178] sm:$0x3] %vm587_vm1, %v19319_v0 }
  0xbd   : > { %3566 = vst.msk [vmem:[#allocation3 + $0x190] sm:$0x3] %vm587_vm1, %v19319_v0  ;;  %3569 = vst.msk [vmem:[#allocation3 + $0x1a8] sm:$0x3] %vm587_vm1, %v19319_v0 }
  0xbe   : > { %641 = vst.msk [vmem:[#allocation2 + $0x19] sm:$0xff] %vm584_vm0, %v552_v2  ;;  %642 = vst.msk [vmem:[#allocation2 + $0x21] sm:$0xff] %vm584_vm0, %v553_v3 }
  0xbf   : > { %643 = vst.msk [vmem:[#allocation2 + $0x31] sm:$0xff] %vm584_vm0, %v554_v11  ;;  %644 = vst.msk [vmem:[#allocation2 + $0x39] sm:$0xff] %vm584_vm0, %v555_v12  ;;  %v573_v12 = vld [vmem:[%s15980_s19 + $0xa8] sm:$0xff] }
  0xc0   : > { %645 = vst.msk [vmem:[#allocation2 + $0x49] sm:$0xff] %vm584_vm0, %v556_v13  ;;  %646 = vst.msk [vmem:[#allocation2 + $0x51] sm:$0xff] %vm584_vm0, %v557_v14 }
  0xc1   : > { %647 = vst.msk [vmem:[#allocation2 + $0x61] sm:$0xff] %vm584_vm0, %v558_v15  ;;  %648 = vst.msk [vmem:[#allocation2 + $0x69] sm:$0xff] %vm584_vm0, %v559_v20 }
  0xc2   : > { %649 = vst.msk [vmem:[#allocation2 + $0x79] sm:$0xff] %vm584_vm0, %v560_v21  ;;  %650 = vst.msk [vmem:[#allocation2 + $0x81] sm:$0xff] %vm584_vm0, %v561_v22  ;;  %v576_v21 = vld [vmem:[%s15980_s19 + $0xc0] sm:$0xff]  ;;  %v577_v22 = vld [vmem:[%s15980_s19 + $0xc8] sm:$0xff] }
  0xc3   : > { %651 = vst.msk [vmem:[#allocation2 + $0x91] sm:$0xff] %vm584_vm0, %v562_v23  ;;  %652 = vst.msk [vmem:[#allocation2 + $0x99] sm:$0xff] %vm584_vm0, %v563_v24  ;;  %v578_v23 = vld [vmem:[%s15980_s19 + $0xd0] sm:$0xff] }
  0xc4   : > { %653 = vst.msk [vmem:[#allocation2 + $0xa9] sm:$0xff] %vm584_vm0, %v564_v25  ;;  %654 = vst.msk [vmem:[#allocation2 + $0xb1] sm:$0xff] %vm584_vm0, %v565_v28 }
  0xc5   : > { %655 = vst.msk [vmem:[#allocation2 + $0xc1] sm:$0xff] %vm584_vm0, %v566_v29  ;;  %656 = vst.msk [vmem:[#allocation2 + $0xc9] sm:$0xff] %vm584_vm0, %v567_v30  ;;  %v16034_v34 = vld [vmem:[#allocation2 + $0x18] sm:$0xff]  ;;  %v16036_v35 = vld [vmem:[#allocation2 + $0x20] sm:$0xff] }
  0xc6   : > { %v16038_v36 = vld [vmem:[#allocation2 + $0x28] sm:$0x3]  ;;  %657 = vst.msk [vmem:[#allocation2 + $0xd9] sm:$0xff] %vm584_vm0, %v568_v32  ;;  %658 = vst.msk [vmem:[#allocation2 + $0xe1] sm:$0xff] %vm584_vm0, %v569_v33  ;;  %v782_v37 = vrot.slane %v16034_v34, 1  ;;  %v783_v38 = vrot.slane %v16036_v35, 1 }
  0xc7   : > { %v785_v39 = vrot.slane %v16038_v36, 1  ;;  %v16048_v43 = vld [vmem:[#allocation2 + $0x30] sm:$0xff]  ;;  %v16050_v44 = vld [vmem:[#allocation2 + $0x38] sm:$0xff]  ;;  %v16052_v45 = vld [vmem:[#allocation2 + $0x40] sm:$0x3]  ;;  %659 = vst.msk [vmem:[#allocation2 + $0xf1] sm:$0xff] %vm584_vm0, %v570_v40 }
  0xc8   : > { %660 = vst.msk [vmem:[#allocation2 + $0xf9] sm:$0xff] %vm584_vm0, %v571_v41  ;;  %661 = vst.msk [vmem:[#allocation2 + $0x109] sm:$0xff] %vm584_vm0, %v572_v42  ;;  %v16058_v46 = vsel %vm776_vm2, %v782_v37, %v783_v38  ;;  %v787_v48 = vrot.slane %v16048_v43, 1  ;;  %v788_v49 = vrot.slane %v16050_v44, 1  ;;  %v16065_v50 = vld [vmem:[#allocation2 + $0x48] sm:$0xff]  ;;  %v16067_v51 = vld [vmem:[#allocation2 + $0x50] sm:$0xff] }
  0xc9   : > { %v16061_v47 = vsel %vm776_vm2, %v783_v38, %v785_v39  ;;  %v16069_v52 = vld [vmem:[#allocation2 + $0x58] sm:$0x3]  ;;  %12853 = vmatprep.mubr.msk.f32.mxu0 %vm584_vm0, %v16058_v46  ;;  %v790_v53 = vrot.slane %v16052_v45, 1  ;;  %v792_v54 = vrot.slane %v16065_v50, 1  ;;  %v793_v55 = vrot.slane %v16067_v51, 1  ;;  %v16076_v56 = vld [vmem:[#allocation2 + $0x60] sm:$0xff]  ;;  %vm18820_vm11 = vmor %vm9166_vm9, %vm9167_vm10 }
  0xca   : > { %v16078_v57 = vld [vmem:[#allocation2 + $0x68] sm:$0xff]  ;;  %12854 = vmatmul.mubr.msk.f32.gmra.mrb[2].mxu0 %vm584_vm0, %v16061_v47  ;;  %v16083_v58 = vsel %vm776_vm2, %v787_v48, %v788_v49  ;;  %v795_v60 = vrot.slane %v16069_v52, 1  ;;  %v797_v62 = vrot.slane %v16076_v56, 1  ;;  %v16096_v1 = vld [vmem:[#allocation2 + $0x70] sm:$0x3]  ;;  %v16098_v2 = vld [vmem:[#allocation2 + $0x78] sm:$0xff] }
  0xcb   : > { %12856 = vmatprep.mubr.msk.f32.mxu0 %vm584_vm0, %v16083_v58  ;;  %v16088_v59 = vsel %vm776_vm2, %v788_v49, %v790_v53  ;;  %v16092_v61 = vsel %vm776_vm2, %v792_v54, %v793_v55  ;;  %v798_v63 = vrot.slane %v16078_v57, 1  ;;  %v16100_v3 = vld [vmem:[#allocation2 + $0x80] sm:$0xff]  ;;  %v800_v7 = vrot.slane %v16096_v1, 1  ;;  %v16115_v11 = vld [vmem:[#allocation2 + $0x88] sm:$0x3]  ;;  %v16118_v13 = vld [vmem:[#allocation2 + $0x90] sm:$0xff] }
  0xcc   : > { %v16107_v6 = vsel %vm776_vm2, %v793_v55, %v795_v60  ;;  %v802_v9 = vrot.slane %v16098_v2, 1  ;;  %v803_v10 = vrot.slane %v16100_v3, 1  ;;  %v16120_v14 = vld [vmem:[#allocation2 + $0x98] sm:$0xff]  ;;  %662 = vst.msk [vmem:[#allocation2 + $0x111] sm:$0xff] %vm584_vm0, %v573_v12  ;;  %v16125_v15 = vld [vmem:[#allocation2 + $0xa0] sm:$0x3]  ;;  %vm18875_vm15 = vmor %vm9353_vm13, %vm9354_vm14 }
  0xcd   : > { %v16111_v8 = vsel %vm776_vm2, %v797_v62, %v798_v63  ;;  %v16134_v19 = vsel %vm776_vm2, %v798_v63, %v800_v7  ;;  %v805_v20 = vrot.slane %v16115_v11, 1  ;;  %663 = vst.msk [vmem:[#allocation2 + $0x121] sm:$0xff] %vm584_vm0, %v574_v16  ;;  %664 = vst.msk [vmem:[#allocation2 + $0x129] sm:$0xff] %vm584_vm0, %v575_v17  ;;  %v807_v25 = vrot.slane %v16118_v13, 1  ;;  %v579_v29 = vld [vmem:[%s15980_s19 + $0xd8] sm:$0xff]  ;;  %v580_v30 = vld [vmem:[%s15980_s19 + $0xe0] sm:$0xff] }
  0xce   : > { %12857 = vmatmul.mubr.msk.f32.gmra.mrb[4].mxu0 %vm584_vm0, %v16088_v59  ;;  %v16144_v24 = vsel %vm776_vm2, %v802_v9, %v803_v10  ;;  %v808_v28 = vrot.slane %v16120_v14, 1  ;;  %665 = vst.msk [vmem:[#allocation2 + $0x139] sm:$0xff] %vm584_vm0, %v576_v21  ;;  %666 = vst.msk [vmem:[#allocation2 + $0x141] sm:$0xff] %vm584_vm0, %v577_v22  ;;  %v16154_v32 = vld [vmem:[#allocation2 + $0xa8] sm:$0xff]  ;;  %v16156_v33 = vld [vmem:[#allocation2 + $0xb0] sm:$0xff]  ;;  %v810_v38 = vrot.slane %v16125_v15, 1 }
  0xcf   : > { %12859 = vmatprep.mubr.msk.f32.mxu0 %vm584_vm0, %v16092_v61  ;;  %667 = vst.msk [vmem:[#allocation2 + $0x151] sm:$0xff] %vm584_vm0, %v578_v23  ;;  %668 = vst.msk [vmem:[#allocation2 + $0x159] sm:$0xff] %vm584_vm0, %v579_v29  ;;  %v16166_v37 = vsel %vm776_vm2, %v803_v10, %v805_v20  ;;  %v812_v40 = vrot.slane %v16154_v32, 1  ;;  %v813_v41 = vrot.slane %v16156_v33, 1  ;;  %v16174_v42 = vld [vmem:[#allocation2 + $0xb8] sm:$0x3] }
  0xd0   : > { %669 = vst.msk [vmem:[#allocation2 + $0x169] sm:$0xff] %vm584_vm0, %v580_v30  ;;  %670 = vst.msk [vmem:[#allocation2 + $0x171] sm:$0xff] %vm584_vm0, %v581_v31  ;;  %v16170_v39 = vsel %vm776_vm2, %v807_v25, %v808_v28  ;;  %v16176_v48 = vld [vmem:[#allocation2 + $0xc0] sm:$0xff]  ;;  %v16178_v49 = vld [vmem:[#allocation2 + $0xc8] sm:$0xff]  ;;  %v16185_v53 = vsel %vm776_vm2, %v808_v28, %v810_v38  ;;  %v815_v54 = vrot.slane %v16174_v42, 1 }
  0xd1   : > { %19495 = vst [vmem:[#allocation29_spill] sm:$0xff] %v16170_v39  ;;  %19496 = vst [vmem:[#allocation30_spill] sm:$0xff] %v16185_v53  ;;  %v16189_v55 = vsel %vm776_vm2, %v812_v40, %v813_v41  ;;  %v817_v60 = vrot.slane %v16176_v48, 1  ;;  %v818_v62 = vrot.slane %v16178_v49, 1  ;;  %v16193_v63 = vld [vmem:[#allocation2 + $0xd0] sm:$0x3] }
  0xd2   : > { %12860 = vmatmul.mubr.msk.f32.gmra.mrb[6].mxu0 %vm584_vm0, %v16107_v6  ;;  %19497 = vst [vmem:[#allocation31_spill] sm:$0xff] %v16189_v55  ;;  %v16195_v7 = vld [vmem:[#allocation2 + $0xd8] sm:$0xff]  ;;  %v16197_v9 = vld [vmem:[#allocation2 + $0xe0] sm:$0xff]  ;;  %v16204_v10 = vsel %vm776_vm2, %v813_v41, %v815_v54  ;;  %v820_v12 = vrot.slane %v16193_v63, 1  ;;  %v16212_v21 = vld [vmem:[#allocation2 + $0xe8] sm:$0x3] }
  0xd3   : > { %12862 = vmatprep.mubr.msk.f32.mxu0 %vm584_vm0, %v16111_v8  ;;  %19498 = vst [vmem:[#allocation32_spill] sm:$0xff] %v16204_v10  ;;  %v16208_v16 = vsel %vm776_vm2, %v817_v60, %v818_v62  ;;  %v822_v17 = vrot.slane %v16195_v7, 1  ;;  %v823_v20 = vrot.slane %v16197_v9, 1  ;;  %v16214_v22 = vld [vmem:[#allocation2 + $0xf0] sm:$0xff]  ;;  %v16216_v23 = vld [vmem:[#allocation2 + $0xf8] sm:$0xff]  ;;  %v825_v28 = vrot.slane %v16212_v21, 1 }
  0xd4   : > { %19499 = vst [vmem:[#allocation33_spill] sm:$0xff] %v16208_v16  ;;  %v16223_v25 = vsel %vm776_vm2, %v818_v62, %v820_v12  ;;  %v827_v30 = vrot.slane %v16214_v22, 1  ;;  %v828_v31 = vrot.slane %v16216_v23, 1  ;;  %v16231_v38 = vld [vmem:[#allocation2 + $0x100] sm:$0x3]  ;;  %v16233_v40 = vld [vmem:[#allocation2 + $0x108] sm:$0xff] }
  0xd5   : > { %19500 = vst [vmem:[#allocation34_spill] sm:$0xff] %v16223_v25  ;;  %v16227_v29 = vsel %vm776_vm2, %v822_v17, %v823_v20  ;;  %v16235_v41 = vld [vmem:[#allocation2 + $0x110] sm:$0xff]  ;;  %v16242_v54 = vsel %vm776_vm2, %v823_v20, %v825_v28  ;;  %v830_v60 = vrot.slane %v16231_v38, 1  ;;  %v832_v12 = vrot.slane %v16233_v40, 1  ;;  %v16250_v0 = vld [vmem:[#allocation2 + $0x118] sm:$0x3] }
  0xd6   : > { %12863 = vmatmul.mubr.msk.f32.gmra.mrb[8].mxu0 %vm584_vm0, %v16134_v19  ;;  %19501 = vst [vmem:[#allocation35_spill] sm:$0xff] %v16227_v29  ;;  %19502 = vst [vmem:[#allocation36_spill] sm:$0xff] %v16242_v54  ;;  %v16246_v62 = vsel %vm776_vm2, %v827_v30, %v828_v31  ;;  %v833_v17 = vrot.slane %v16235_v41, 1  ;;  %v835_v28 = vrot.slane %v16250_v0, 1 }
  0xd7   : > { %12865 = vmatprep.mubr.msk.f32.mxu0 %vm584_vm0, %v16144_v24  ;;  %19503 = vst [vmem:[#allocation37_spill] sm:$0xff] %v16246_v62  ;;  %v16261_v20 = vsel %vm776_vm2, %v828_v31, %v830_v60 }
  0xd8   : > { %19504 = vst [vmem:[#allocation38_spill] sm:$0xff] %v16261_v20  ;;  %v16265_v30 = vsel %vm776_vm2, %v832_v12, %v833_v17  ;;  %v16276_v31 = vsel %vm776_vm2, %v833_v17, %v835_v28  ;;  %v1842_v17 = vld [vmem:[#allocation8 + $0x18] sm:$0xff] }
  0xd9   : > { %19505 = vst [vmem:[#allocation39_spill] sm:$0xff] %v16265_v30  ;;  %19506 = vst [vmem:[#allocation40_spill] sm:$0xff] %v16276_v31  ;;  %v16360_v28 = vld [vmem:[#allocation2 + $0x158] sm:$0xff] }
  0xda   : > { %12866 = vmatmul.mubr.msk.f32.gmra.mrb[10].mxu0 %vm584_vm0, %v16166_v37 }
  0xdb   : > { %12868 = vmatprep.mubr.msk.f32.mxu0 %vm584_vm0, %v16170_v39  ;;  %v1454_v39 = vrot.slane %v16067_v51, 2 }
  0xde   : > { %12869 = vmatmul.mubr.msk.f32.gmra.mrb[12].mxu0 %vm584_vm0, %v16185_v53 }
  0xdf   : > { %12871 = vmatprep.mubr.msk.f32.mxu0 %vm584_vm0, %v16189_v55  ;;  %v16269_v55 = vld [vmem:[#allocation2 + $0x130] sm:$0x3] }
  0xe0   : > { %v840_v60 = vrot.slane %v16269_v55, 1 }
  0xe2   : > { %12872 = vmatmul.mubr.msk.f32.gmra.mrb[14].mxu0 %vm584_vm0, %v16204_v10 }
  0xe3   : > { %12874 = vmatprep.mubr.msk.f32.mxu0 %vm584_vm0, %v16208_v16  ;;  %v16252_v16 = vld [vmem:[#allocation2 + $0x120] sm:$0xff] }
  0xe6   : > { %12875 = vmatmul.mubr.msk.f32.gmra.mrb[16].mxu0 %vm584_vm0, %v16223_v25  ;;  %v16254_v25 = vld [vmem:[#allocation2 + $0x128] sm:$0xff] }
  0xe7   : > { %12877 = vmatprep.mubr.msk.f32.mxu0 %vm584_vm0, %v16227_v29  ;;  %v837_v29 = vrot.slane %v16252_v16, 1  ;;  %v838_v10 = vrot.slane %v16254_v25, 1 }
  0xe9   : > { %v16280_v12 = vsel %vm776_vm2, %v837_v29, %v838_v10  ;;  %v583_v29 = vld [vmem:[%s15980_s19 + $0xf8] sm:$0xff] }
  0xea   : > { %12878 = vmatmul.mubr.msk.f32.gmra.mrb[18].mxu0 %vm584_vm0, %v16242_v54  ;;  %19507 = vst [vmem:[#allocation41_spill] sm:$0xff] %v16280_v12  ;;  %672 = vst.msk [vmem:[#allocation2 + $0x189] sm:$0xff] %vm584_vm0, %v583_v29  ;;  %v1446_v29 = vrot.slane %v16038_v36, 2  ;;  %v16382_v54 = vld [vmem:[#allocation8 + $0x20] sm:$0xff] }
  0xeb   : > { %12880 = vmatprep.mubr.msk.f32.mxu0 %vm584_vm0, %v16246_v62  ;;  %v16287_v62 = vsel %vm776_vm2, %v838_v10, %v840_v60  ;;  %v582_v10 = vld [vmem:[%s15980_s19 + $0xf0] sm:$0xff]  ;;  %v16362_v60 = vld [vmem:[#allocation2 + $0x168] sm:$0xff]  ;;  %s19718_s19 = sld [smem:[#allocation27_spill]] }
  0xec   : > { %19508 = vst [vmem:[#allocation42_spill] sm:$0xff] %v16287_v62  ;;  %671 = vst.msk [vmem:[#allocation2 + $0x181] sm:$0xff] %vm584_vm0, %v582_v10  ;;  %v16368_v10 = vld [vmem:[#allocation2 + $0x170] sm:$0xff] }
  0xee   : > { %12881 = vmatmul.mubr.msk.f32.gmra.mrb[20].mxu0 %vm584_vm0, %v16261_v20  ;;  %v1449_v20 = vrot.slane %v16050_v44, 2 }
  0xef   : > { %12883 = vmatprep.mubr.msk.f32.mxu0 %vm584_vm0, %v16265_v30  ;;  %v1448_v30 = vrot.slane %v16048_v43, 2 }
  0xf1   : > { %v16393_v36 = vsel %vm1437_vm3, %v1448_v30, %v1449_v20  ;;  %p19720_p11 = scmp.ne.s32.totalorder %s19718_s19, 0 }
  0xf2   : > { %12884 = vmatmul.mubr.msk.f32.gmra.mrb[22].mxu0 %vm584_vm0, %v16276_v31  ;;  %19509 = vst [vmem:[#allocation43_spill] sm:$0xff] %v16393_v36 }
  0xf3   : > { %12886 = vmatprep.mubr.msk.f32.mxu0 %vm584_vm0, %v16280_v12  ;;  %v1444_v12 = vrot.slane %v16036_v35, 2 }
  0xf5   : > { %v16389_v53 = vsel %vm1437_vm3, %v1444_v12, %v1446_v29 }
  0xf6   : > { %12887 = vmatmul.mubr.msk.f32.gmra.mrb[24].mxu0 %vm584_vm0, %v16287_v62  ;;  %v1443_v62 = vrot.slane %v16034_v34, 2 }
  0xf7   : > { %12900 = vmatprep.mubr.msk.f32.mxu0 %vm584_vm0, %v15984_v4  ;;  %v16342_v4 = vld [vmem:[#allocation2 + $0x138] sm:$0xff] }
  0xf8   : > { %v16378_v31 = vsel %vm1437_vm3, %v1443_v62, %v1444_v12  ;;  %v1453_v62 = vrot.slane %v16065_v50, 2  ;;  %v1458_v12 = vrot.slane %v16076_v56, 2 }
  0xfa   : > { %12901 = vmatmul.mubr.msk.f32.vlgmr.msra.gmra.mrb[0].mxu0 %vm584_vm0, %v15986_v5  ;;  %v16348_v5 = vld [vmem:[#allocation2 + $0x140] sm:$0xff]  ;;  %v16407_v30 = vsel %vm1437_vm3, %v1453_v62, %v1454_v39  ;;  %v1464_v62 = vrot.slane %v16100_v3, 2 }
  0xfb   : > { %12903 = vmatprep.mubr.msk.f32.mxu0 %vm584_vm0, %v16034_v34  ;;  %12949 = vmatpush3.msra.mxu0 %v16129_v18  ;;  %v16350_v18 = vld [vmem:[#allocation2 + $0x150] sm:$0xff]  ;;  %19511 = vst [vmem:[#allocation45_spill] sm:$0xff] %v16407_v30 }
  0xfc   : > { %12998 = vmatprep.subr.mxu0 %v1842_v17 }
  0xfe   : > { %12904 = vmatmul.mubr.msk.f32.gmra.mrb[2].mxu0 %vm584_vm0, %v16036_v35 }
  0xff   : > { %12906 = vmatprep.mubr.msk.f32.mxu0 %vm584_vm0, %v16048_v43 }
 0x102   : > { %12907 = vmatmul.mubr.msk.f32.gmra.mrb[4].mxu0 %vm584_vm0, %v16050_v44 }
 0x103   : > { %12909 = vmatprep.mubr.msk.f32.mxu0 %vm584_vm0, %v16065_v50 }
 0x106   : > { %12910 = vmatmul.mubr.msk.f32.gmra.mrb[6].mxu0 %vm584_vm0, %v16067_v51 }
 0x107   : > { %12912 = vmatprep.mubr.msk.f32.mxu0 %vm584_vm0, %v16076_v56 }
 0x10a   : > { %12913 = vmatmul.mubr.msk.f32.gmra.mrb[8].mxu0 %vm584_vm0, %v16078_v57 }
 0x10b   : > { %12915 = vmatprep.mubr.msk.f32.mxu0 %vm584_vm0, %v16098_v2 }
 0x10e   : > { %12916 = vmatmul.mubr.msk.f32.gmra.mrb[10].mxu0 %vm584_vm0, %v16100_v3 }
 0x10f   : > { %12918 = vmatprep.mubr.msk.f32.mxu0 %vm584_vm0, %v16118_v13 }
 0x112   : > { %12919 = vmatmul.mubr.msk.f32.gmra.mrb[12].mxu0 %vm584_vm0, %v16120_v14 }
 0x113   : > { %12921 = vmatprep.mubr.msk.f32.mxu0 %vm584_vm0, %v16154_v32 }
 0x116   : > { %12922 = vmatmul.mubr.msk.f32.gmra.mrb[14].mxu0 %vm584_vm0, %v16156_v33 }
 0x117   : > { %12924 = vmatprep.mubr.msk.f32.mxu0 %vm584_vm0, %v16176_v48 }
 0x11a   : > { %12925 = vmatmul.mubr.msk.f32.gmra.mrb[16].mxu0 %vm584_vm0, %v16178_v49 }
 0x11b   : > { %12927 = vmatprep.mubr.msk.f32.mxu0 %vm584_vm0, %v16195_v7 }
 0x11e   : > { %12928 = vmatmul.mubr.msk.f32.gmra.mrb[18].mxu0 %vm584_vm0, %v16197_v9 }
 0x11f   : > { %12930 = vmatprep.mubr.msk.f32.mxu0 %vm584_vm0, %v16214_v22 }
 0x122   : > { %12931 = vmatmul.mubr.msk.f32.gmra.mrb[20].mxu0 %vm584_vm0, %v16216_v23 }
 0x123   : > { %12933 = vmatprep.mubr.msk.f32.mxu0 %vm584_vm0, %v16233_v40 }
 0x126   : > { %12934 = vmatmul.mubr.msk.f32.gmra.mrb[22].mxu0 %vm584_vm0, %v16235_v41 }
 0x127   : > { %12936 = vmatprep.mubr.msk.f32.mxu0 %vm584_vm0, %v16252_v16 }
 0x12a   : > { %12937 = vmatmul.mubr.msk.f32.gmra.mrb[24].mxu0 %vm584_vm0, %v16254_v25 }
 0x12b   : > { %12939 = vmatprep.mubr.msk.f32.mxu0 %vm584_vm0, %v16342_v4 }
 0x12e   : > { %12940 = vmatmul.mubr.msk.f32.gmra.mrb[26].mxu0 %vm584_vm0, %v16348_v5 }
 0x12f   : > { %12942 = vmatprep.mubr.msk.f32.mxu0 %vm584_vm0, %v16350_v18 }
 0x132   : > { %12943 = vmatmul.mubr.msk.f32.gmra.mrb[28].mxu0 %vm584_vm0, %v16360_v28 }
 0x133   : > { %12945 = vmatprep.mubr.msk.f32.mxu0 %vm584_vm0, %v16362_v60 }
 0x136   : > { %12946 = vmatmul.mubr.msk.f32.gmra.mrb[30].mxu0 %vm584_vm0, %v16368_v10 }
 0x137   : > { %12950 = vmatprep.mubr.msk.f32.mxu0 %vm584_vm0, %v16017_v26  ;;  %v1451_v26 = vrot.slane %v16052_v45, 2  ;;  %v1456_v45 = vrot.slane %v16069_v52, 2 }
 0x139   : > { %v16416_v29 = vsel %vm1437_vm3, %v1454_v39, %v1456_v45  ;;  %v1466_v39 = vrot.slane %v16115_v11, 2  ;;  %v1468_v45 = vrot.slane %v16118_v13, 2 }
 0x13a   : > { %12951 = vmatmul.mubr.msk.f32.vlgmr.msra.gmra.mrb[0].mxu0 %vm584_vm0, %v16020_v27  ;;  %v16403_v27 = vsel %vm1437_vm3, %v1449_v20, %v1451_v26  ;;  %19512 = vst [vmem:[#allocation46_spill] sm:$0xff] %v16416_v29  ;;  %v1461_v20 = vrot.slane %v16096_v1, 2  ;;  %v1463_v26 = vrot.slane %v16098_v2, 2 }
 0x13b   : > { %12953 = vmatprep.mubr.msk.f32.mxu0 %vm584_vm0, %v16378_v31  ;;  %12999 = vmatpush3.msra.mxu0 %v1842_v17  ;;  %19510 = vst [vmem:[#allocation44_spill] sm:$0xff] %v16403_v27  ;;  %v1459_v17 = vrot.slane %v16078_v57, 2 }
 0x13c   : > { %13048 = vmatprep.subr.mxu0 %v16382_v54  ;;  %v16433_v1 = vsel %vm1437_vm3, %v1463_v26, %v1464_v62  ;;  %v1474_v26 = vrot.slane %v16156_v33, 2 }
 0x13d   : > { %v16420_v52 = vsel %vm1437_vm3, %v1458_v12, %v1459_v17  ;;  %19515 = vst [vmem:[#allocation49_spill] sm:$0xff] %v16433_v1  ;;  %v1469_v12 = vrot.slane %v16120_v14, 2 }
 0x13e   : > { %12954 = vmatmul.mubr.msk.f32.gmra.mrb[2].mxu0 %vm584_vm0, %v16389_v53  ;;  %19513 = vst [vmem:[#allocation47_spill] sm:$0xff] %v16420_v52 }
 0x13f   : > { %12956 = vmatprep.mubr.msk.f32.mxu0 %vm584_vm0, %v16393_v36  ;;  %v16446_v11 = vsel %vm1437_vm3, %v1468_v45, %v1469_v12  ;;  %v1479_v45 = vrot.slane %v16178_v49, 2 }
 0x140   : > { %19517 = vst [vmem:[#allocation51_spill] sm:$0xff] %v16446_v11 }
 0x142   : > { %12957 = vmatmul.mubr.msk.f32.gmra.mrb[4].mxu0 %vm584_vm0, %v16403_v27 }
 0x143   : > { %12959 = vmatprep.mubr.msk.f32.mxu0 %vm584_vm0, %v16407_v30  ;;  %v16429_v30 = vsel %vm1437_vm3, %v1459_v17, %v1461_v20  ;;  %v1471_v17 = vrot.slane %v16125_v15, 2  ;;  %v1473_v20 = vrot.slane %v16154_v32, 2 }
 0x144   : > { %19514 = vst [vmem:[#allocation48_spill] sm:$0xff] %v16429_v30 }
 0x145   : > { %v16459_v15 = vsel %vm1437_vm3, %v1473_v20, %v1474_v26  ;;  %v1484_v20 = vrot.slane %v16197_v9, 2 }
 0x146   : > { %12960 = vmatmul.mubr.msk.f32.gmra.mrb[6].mxu0 %vm584_vm0, %v16416_v29  ;;  %19519 = vst [vmem:[#allocation53_spill] sm:$0xff] %v16459_v15 }
 0x147   : > { %12962 = vmatprep.mubr.msk.f32.mxu0 %vm584_vm0, %v16420_v52  ;;  %v16442_v52 = vsel %vm1437_vm3, %v1464_v62, %v1466_v39  ;;  %v1476_v62 = vrot.slane %v16174_v42, 2  ;;  %v1478_v39 = vrot.slane %v16176_v48, 2 }
 0x148   : > { %19516 = vst [vmem:[#allocation50_spill] sm:$0xff] %v16442_v52 }
 0x149   : > { %v16472_v42 = vsel %vm1437_vm3, %v1478_v39, %v1479_v45  ;;  %v1489_v39 = vrot.slane %v16216_v23, 2 }
 0x14a   : > { %12963 = vmatmul.mubr.msk.f32.gmra.mrb[8].mxu0 %vm584_vm0, %v16429_v30  ;;  %19521 = vst [vmem:[#allocation55_spill] sm:$0xff] %v16472_v42 }
 0x14b   : > { %12965 = vmatprep.mubr.msk.f32.mxu0 %vm584_vm0, %v16433_v1  ;;  %v16455_v1 = vsel %vm1437_vm3, %v1469_v12, %v1471_v17  ;;  %v1481_v12 = vrot.slane %v16193_v63, 2  ;;  %v1483_v17 = vrot.slane %v16195_v7, 2 }
 0x14c   : > { %19518 = vst [vmem:[#allocation52_spill] sm:$0xff] %v16455_v1 }
 0x14d   : > { %v16485_v63 = vsel %vm1437_vm3, %v1483_v17, %v1484_v20  ;;  %v1494_v17 = vrot.slane %v16235_v41, 2 }
 0x14e   : > { %12966 = vmatmul.mubr.msk.f32.gmra.mrb[10].mxu0 %vm584_vm0, %v16442_v52  ;;  %19523 = vst [vmem:[#allocation57_spill] sm:$0xff] %v16485_v63 }
 0x14f   : > { %12968 = vmatprep.mubr.msk.f32.mxu0 %vm584_vm0, %v16446_v11  ;;  %v16468_v11 = vsel %vm1437_vm3, %v1474_v26, %v1476_v62  ;;  %v1486_v26 = vrot.slane %v16212_v21, 2  ;;  %v1488_v62 = vrot.slane %v16214_v22, 2 }
 0x150   : > { %19520 = vst [vmem:[#allocation54_spill] sm:$0xff] %v16468_v11 }
 0x151   : > { %v16498_v21 = vsel %vm1437_vm3, %v1488_v62, %v1489_v39  ;;  %v1499_v62 = vrot.slane %v16254_v25, 2 }
 0x152   : > { %12969 = vmatmul.mubr.msk.f32.gmra.mrb[12].mxu0 %vm584_vm0, %v16455_v1  ;;  %19525 = vst [vmem:[#allocation59_spill] sm:$0xff] %v16498_v21 }
 0x153   : > { %12971 = vmatprep.mubr.msk.f32.mxu0 %vm584_vm0, %v16459_v15  ;;  %v16481_v15 = vsel %vm1437_vm3, %v1479_v45, %v1481_v12  ;;  %v1491_v45 = vrot.slane %v16231_v38, 2  ;;  %v1493_v12 = vrot.slane %v16233_v40, 2 }
 0x154   : > { %19522 = vst [vmem:[#allocation56_spill] sm:$0xff] %v16481_v15 }
 0x155   : > { %v16511_v38 = vsel %vm1437_vm3, %v1493_v12, %v1494_v17  ;;  %v1504_v12 = vrot.slane %v16348_v5, 2 }
 0x156   : > { %12972 = vmatmul.mubr.msk.f32.gmra.mrb[14].mxu0 %vm584_vm0, %v16468_v11  ;;  %19527 = vst [vmem:[#allocation61_spill] sm:$0xff] %v16511_v38  ;;  %v1509_v11 = vrot.slane %v16360_v28, 2 }
 0x157   : > { %12974 = vmatprep.mubr.msk.f32.mxu0 %vm584_vm0, %v16472_v42  ;;  %v16494_v42 = vsel %vm1437_vm3, %v1484_v20, %v1486_v26  ;;  %v1496_v20 = vrot.slane %v16250_v0, 2  ;;  %v1498_v26 = vrot.slane %v16252_v16, 2 }
 0x158   : > { %19524 = vst [vmem:[#allocation58_spill] sm:$0xff] %v16494_v42 }
 0x159   : > { %v16524_v0 = vsel %vm1437_vm3, %v1498_v26, %v1499_v62 }
 0x15a   : > { %12975 = vmatmul.mubr.msk.f32.gmra.mrb[16].mxu0 %vm584_vm0, %v16481_v15  ;;  %19529 = vst [vmem:[#allocation63_spill] sm:$0xff] %v16524_v0  ;;  %v1508_v15 = vrot.slane %v16350_v18, 2 }
 0x15b   : > { %12977 = vmatprep.mubr.msk.f32.mxu0 %vm584_vm0, %v16485_v63  ;;  %v16507_v63 = vsel %vm1437_vm3, %v1489_v39, %v1491_v45  ;;  %v1501_v39 = vrot.slane %v16269_v55, 2  ;;  %v1503_v45 = vrot.slane %v16342_v4, 2 }
 0x15c   : > { %19526 = vst [vmem:[#allocation60_spill] sm:$0xff] %v16507_v63 }
 0x15d   : > { %v16535_v55 = vsel %vm1437_vm3, %v1499_v62, %v1501_v39  ;;  %v16538_v26 = vsel %vm1437_vm3, %v1503_v45, %v1504_v12  ;;  %v848_v62 = vrot.slane %v16360_v28, 1  ;;  %v16562_v45 = vsel %vm1437_vm3, %v1508_v15, %v1509_v11 }
 0x15e   : > { %12978 = vmatmul.mubr.msk.f32.gmra.mrb[18].mxu0 %vm584_vm0, %v16494_v42  ;;  %v714_v42 = vld [vmem:[#allocation2 + $0x148] sm:$0x3]  ;;  %19530 = vst [vmem:[#allocation64_spill] sm:$0xff] %v16535_v55  ;;  %19533 = vst [vmem:[#allocation67_spill] sm:$0xff] %v16562_v45  ;;  %v852_v15 = vrot.slane %v16362_v60, 1 }
 0x15f   : > { %12980 = vmatprep.mubr.msk.f32.mxu0 %vm584_vm0, %v16498_v21  ;;  %v16520_v21 = vsel %vm1437_vm3, %v1494_v17, %v1496_v20  ;;  %v1506_v17 = vrot.slane %v714_v42, 2  ;;  %v845_v20 = vrot.slane %v714_v42, 1  ;;  %v847_v42 = vrot.slane %v16350_v18, 1 }
 0x160   : > { %19528 = vst [vmem:[#allocation62_spill] sm:$0xff] %v16520_v21 }
 0x161   : > { %v16567_v30 = vsel %vm776_vm2, %v847_v42, %v848_v62 }
 0x162   : > { %12981 = vmatmul.mubr.msk.f32.gmra.mrb[20].mxu0 %vm584_vm0, %v16507_v63  ;;  %v842_v63 = vrot.slane %v16342_v4, 1  ;;  %19534 = vst [vmem:[#allocation68_spill] sm:$0xff] %v16567_v30 }
 0x163   : > { %12983 = vmatprep.mubr.msk.f32.mxu0 %vm584_vm0, %v16511_v38  ;;  %v843_v38 = vrot.slane %v16348_v5, 1 }
 0x165   : > { %v16543_v1 = vsel %vm776_vm2, %v842_v63, %v843_v38  ;;  %v16546_v52 = vsel %vm776_vm2, %v843_v38, %v845_v20  ;;  %v16559_v63 = vsel %vm1437_vm3, %v1504_v12, %v1506_v17  ;;  %v1513_v20 = vrot.slane %v16362_v60, 2 }
 0x166   : > { %12984 = vmatmul.mubr.msk.f32.gmra.mrb[22].mxu0 %vm584_vm0, %v16520_v21  ;;  %v717_v21 = vld [vmem:[#allocation2 + $0x160] sm:$0x3]  ;;  %19531 = vst [vmem:[#allocation65_spill] sm:$0xff] %v16543_v1  ;;  %12889 = vmatprep.mubr.msk.f32.mxu1 %vm584_vm0, %v16543_v1  ;;  %19532 = vst [vmem:[#allocation66_spill] sm:$0xff] %v16559_v63 }
 0x167   : > { %12986 = vmatprep.mubr.msk.f32.mxu0 %vm584_vm0, %v16524_v0  ;;  %12890 = vmatmul.mubr.msk.f32.vlgmr.msra.gmra.mrb[0].mxu1 %vm584_vm0, %v16546_v52  ;;  %v1511_v38 = vrot.slane %v717_v21, 2  ;;  %v850_v39 = vrot.slane %v717_v21, 1  ;;  %v720_v0 = vld [vmem:[#allocation2 + $0x178] sm:$0x3]  ;;  %v853_v21 = vrot.slane %v16368_v10, 1 }
 0x168   : > { %12892 = vmatprep.mubr.msk.f32.mxu1 %vm584_vm0, %v16567_v30  ;;  %v1516_v17 = vrot.slane %v720_v0, 2  ;;  %v855_v42 = vrot.slane %v720_v0, 1  ;;  %v2381_v0 = vld [vmem:[#allocation8 + $0x28] sm:$0xff] }
 0x169   : > { %v16570_v29 = vsel %vm776_vm2, %v848_v62, %v850_v39  ;;  %v16583_v12 = vsel %vm1437_vm3, %v1509_v11, %v1511_v38  ;;  %v16589_v39 = vsel %vm776_vm2, %v852_v15, %v853_v21  ;;  %v19540_v38 = vld [vmem:[#allocation32_spill] sm:$0xff]  ;;  %v19542_v15 = vld [vmem:[#allocation34_spill] sm:$0xff] }
 0x16a   : > { %12987 = vmatmul.mubr.msk.f32.gmra.mrb[24].mxu0 %vm584_vm0, %v16535_v55  ;;  %v1514_v55 = vrot.slane %v16368_v10, 2  ;;  %19536 = vst [vmem:[#allocation70_spill] sm:$0xff] %v16589_v39 }
 0x16b   : > { %12989 = vmatprep.mubr.msk.f32.mxu0 %vm584_vm0, %v16538_v26  ;;  %12893 = vmatmul.mubr.msk.f32.gmra.mrb[2].mxu1 %vm584_vm0, %v16570_v29 }
 0x16c   : > { %v16586_v62 = vsel %vm1437_vm3, %v1513_v20, %v1514_v55  ;;  %12895 = vmatprep.mubr.msk.f32.mxu1 %vm584_vm0, %v16589_v39  ;;  %v16603_v11 = vsel %vm1437_vm3, %v1514_v55, %v1516_v17  ;;  %v19539_v55 = vld [vmem:[#allocation31_spill] sm:$0xff]  ;;  %v19541_v20 = vld [vmem:[#allocation33_spill] sm:$0xff]  ;;  %v19544_v17 = vld [vmem:[#allocation36_spill] sm:$0xff] }
 0x16d   : > { %19535 = vst [vmem:[#allocation69_spill] sm:$0xff] %v16586_v62 }
 0x16e   : > { %12990 = vmatmul.mubr.msk.f32.gmra.mrb[26].mxu0 %vm584_vm0, %v16559_v63  ;;  %v16592_v63 = vsel %vm776_vm2, %v853_v21, %v855_v42  ;;  %v19543_v21 = vld [vmem:[#allocation35_spill] sm:$0xff]  ;;  %v19545_v42 = vld [vmem:[#allocation37_spill] sm:$0xff] }
 0x16f   : > { %12992 = vmatprep.mubr.msk.f32.mxu0 %vm584_vm0, %v16562_v45  ;;  %12896 = vmatmul.mubr.msk.f32.gmra.mrb[4].mxu1 %vm584_vm0, %v16592_v63 }
 0x172   : > { %12993 = vmatmul.mubr.msk.f32.gmra.mrb[28].mxu0 %vm584_vm0, %v16583_v12 }
 0x173   : > { %12995 = vmatprep.mubr.msk.f32.mxu0 %vm584_vm0, %v16586_v62 }
 0x176   : > { %12996 = vmatmul.mubr.msk.f32.gmra.mrb[30].mxu0 %vm584_vm0, %v16603_v11 }
 0x177   : > { %13000 = vmatprep.mubr.msk.f32.mxu0 %vm584_vm0, %v16034_v34  ;;  %v16666_v34 = vld [vmem:[#allocation2 + $0x180] sm:$0xff] }
 0x17a   : > { %13001 = vmatmul.mubr.msk.f32.vlgmr.msra.gmra.mrb[0].mxu0 %vm584_vm0, %v16036_v35  ;;  %v16672_v35 = vld [vmem:[#allocation2 + $0x188] sm:$0xff] }
 0x17b   : > { %13003 = vmatprep.mubr.msk.f32.mxu0 %vm584_vm0, %v16048_v43  ;;  %13049 = vmatpush3.msra.mxu0 %v16382_v54  ;;  %v2644_v54 = vld [vmem:[#allocation8 + $0x30] sm:$0xff] }
 0x17c   : > { %13098 = vmatprep.subr.mxu0 %v2381_v0 }
 0x17e   : > { %13004 = vmatmul.mubr.msk.f32.gmra.mrb[2].mxu0 %vm584_vm0, %v16050_v44 }
 0x17f   : > { %13006 = vmatprep.mubr.msk.f32.mxu0 %vm584_vm0, %v16065_v50 }
 0x182   : > { %13007 = vmatmul.mubr.msk.f32.gmra.mrb[4].mxu0 %vm584_vm0, %v16067_v51 }
 0x183   : > { %13009 = vmatprep.mubr.msk.f32.mxu0 %vm584_vm0, %v16076_v56 }
 0x186   : > { %13010 = vmatmul.mubr.msk.f32.gmra.mrb[6].mxu0 %vm584_vm0, %v16078_v57 }
 0x187   : > { %13012 = vmatprep.mubr.msk.f32.mxu0 %vm584_vm0, %v16098_v2 }
 0x18a   : > { %13013 = vmatmul.mubr.msk.f32.gmra.mrb[8].mxu0 %vm584_vm0, %v16100_v3 }
 0x18b   : > { %13015 = vmatprep.mubr.msk.f32.mxu0 %vm584_vm0, %v16118_v13 }
 0x18e   : > { %13016 = vmatmul.mubr.msk.f32.gmra.mrb[10].mxu0 %vm584_vm0, %v16120_v14 }
 0x18f   : > { %13018 = vmatprep.mubr.msk.f32.mxu0 %vm584_vm0, %v16154_v32 }
 0x192   : > { %13019 = vmatmul.mubr.msk.f32.gmra.mrb[12].mxu0 %vm584_vm0, %v16156_v33 }
 0x193   : > { %13021 = vmatprep.mubr.msk.f32.mxu0 %vm584_vm0, %v16176_v48 }
 0x196   : > { %13022 = vmatmul.mubr.msk.f32.gmra.mrb[14].mxu0 %vm584_vm0, %v16178_v49 }
 0x197   : > { %13024 = vmatprep.mubr.msk.f32.mxu0 %vm584_vm0, %v16195_v7 }
 0x19a   : > { %13025 = vmatmul.mubr.msk.f32.gmra.mrb[16].mxu0 %vm584_vm0, %v16197_v9 }
 0x19b   : > { %13027 = vmatprep.mubr.msk.f32.mxu0 %vm584_vm0, %v16214_v22 }
 0x19e   : > { %13028 = vmatmul.mubr.msk.f32.gmra.mrb[18].mxu0 %vm584_vm0, %v16216_v23 }
 0x19f   : > { %13030 = vmatprep.mubr.msk.f32.mxu0 %vm584_vm0, %v16233_v40 }
 0x1a2   : > { %13031 = vmatmul.mubr.msk.f32.gmra.mrb[20].mxu0 %vm584_vm0, %v16235_v41 }
 0x1a3   : > { %13033 = vmatprep.mubr.msk.f32.mxu0 %vm584_vm0, %v16252_v16 }
 0x1a6   : > { %13034 = vmatmul.mubr.msk.f32.gmra.mrb[22].mxu0 %vm584_vm0, %v16254_v25 }
 0x1a7   : > { %13036 = vmatprep.mubr.msk.f32.mxu0 %vm584_vm0, %v16342_v4 }
 0x1aa   : > { %13037 = vmatmul.mubr.msk.f32.gmra.mrb[24].mxu0 %vm584_vm0, %v16348_v5 }
 0x1ab   : > { %13039 = vmatprep.mubr.msk.f32.mxu0 %vm584_vm0, %v16350_v18 }
 0x1ae   : > { %13040 = vmatmul.mubr.msk.f32.gmra.mrb[26].mxu0 %vm584_vm0, %v16360_v28 }
 0x1af   : > { %13042 = vmatprep.mubr.msk.f32.mxu0 %vm584_vm0, %v16362_v60 }
 0x1b2   : > { %13043 = vmatmul.mubr.msk.f32.gmra.mrb[28].mxu0 %vm584_vm0, %v16368_v10 }
 0x1b3   : > { %13045 = vmatprep.mubr.msk.f32.mxu0 %vm584_vm0, %v16666_v34 }
 0x1b6   : > { %13046 = vmatmul.mubr.msk.f32.gmra.mrb[30].mxu0 %vm584_vm0, %v16672_v35 }
 0x1b7   : > { %13050 = vmatprep.mubr.msk.f32.mxu0 %vm584_vm0, %v16058_v46  ;;  %v19537_v46 = vld [vmem:[#allocation29_spill] sm:$0xff] }
 0x1ba   : > { %13051 = vmatmul.mubr.msk.f32.vlgmr.msra.gmra.mrb[0].mxu0 %vm584_vm0, %v16061_v47  ;;  %v19538_v47 = vld [vmem:[#allocation30_spill] sm:$0xff] }
 0x1bb   : > { %13053 = vmatprep.mubr.msk.f32.mxu0 %vm584_vm0, %v16083_v58  ;;  %13099 = vmatpush3.msra.mxu0 %v2381_v0  ;;  %v19546_v0 = vld [vmem:[#allocation38_spill] sm:$0xff] }
 0x1bc   : > { %13148 = vmatprep.subr.mxu0 %v2644_v54 }
 0x1be   : > { %13054 = vmatmul.mubr.msk.f32.gmra.mrb[2].mxu0 %vm584_vm0, %v16088_v59 }
 0x1bf   : > { %13056 = vmatprep.mubr.msk.f32.mxu0 %vm584_vm0, %v16092_v61 }
 0x1c2   : > { %13057 = vmatmul.mubr.msk.f32.gmra.mrb[4].mxu0 %vm584_vm0, %v16107_v6 }
 0x1c3   : > { %13059 = vmatprep.mubr.msk.f32.mxu0 %vm584_vm0, %v16111_v8 }
 0x1c6   : > { %13060 = vmatmul.mubr.msk.f32.gmra.mrb[6].mxu0 %vm584_vm0, %v16134_v19 }
 0x1c7   : > { %13062 = vmatprep.mubr.msk.f32.mxu0 %vm584_vm0, %v16144_v24 }
 0x1ca   : > { %13063 = vmatmul.mubr.msk.f32.gmra.mrb[8].mxu0 %vm584_vm0, %v16166_v37 }
 0x1cb   : > { %13065 = vmatprep.mubr.msk.f32.mxu0 %vm584_vm0, %v19537_v46 }
 0x1ce   : > { %13066 = vmatmul.mubr.msk.f32.gmra.mrb[10].mxu0 %vm584_vm0, %v19538_v47 }
 0x1cf   : > { %13068 = vmatprep.mubr.msk.f32.mxu0 %vm584_vm0, %v19539_v55  ;;  %v19547_v55 = vld [vmem:[#allocation39_spill] sm:$0xff] }
 0x1d2   : > { %13069 = vmatmul.mubr.msk.f32.gmra.mrb[12].mxu0 %vm584_vm0, %v19540_v38  ;;  %v19548_v38 = vld [vmem:[#allocation40_spill] sm:$0xff] }
 0x1d3   : > { %13071 = vmatprep.mubr.msk.f32.mxu0 %vm584_vm0, %v19541_v20  ;;  %v19549_v20 = vld [vmem:[#allocation41_spill] sm:$0xff] }
 0x1d6   : > { %13072 = vmatmul.mubr.msk.f32.gmra.mrb[14].mxu0 %vm584_vm0, %v19542_v15  ;;  %v19550_v15 = vld [vmem:[#allocation42_spill] sm:$0xff] }
 0x1d7   : > { %13074 = vmatprep.mubr.msk.f32.mxu0 %vm584_vm0, %v19543_v21 }
 0x1da   : > { %13075 = vmatmul.mubr.msk.f32.gmra.mrb[16].mxu0 %vm584_vm0, %v19544_v17 }
 0x1db   : > { %13077 = vmatprep.mubr.msk.f32.mxu0 %vm584_vm0, %v19545_v42 }
 0x1de   : > { %13078 = vmatmul.mubr.msk.f32.gmra.mrb[18].mxu0 %vm584_vm0, %v19546_v0  ;;  %v2108_v0 = vrot.slane %v16672_v35, 1 }
 0x1df   : > { %13080 = vmatprep.mubr.msk.f32.mxu0 %vm584_vm0, %v19547_v55  ;;  %v2107_v55 = vrot.slane %v16666_v34, 1 }
 0x1e2   : > { %13081 = vmatmul.mubr.msk.f32.gmra.mrb[20].mxu0 %vm584_vm0, %v19548_v38  ;;  %v723_v38 = vld [vmem:[#allocation2 + $0x190] sm:$0x3] }
 0x1e3   : > { %13083 = vmatprep.mubr.msk.f32.mxu0 %vm584_vm0, %v19549_v20 }
 0x1e6   : > { %13084 = vmatmul.mubr.msk.f32.gmra.mrb[22].mxu0 %vm584_vm0, %v19550_v15  ;;  %v2110_v15 = vrot.slane %v723_v38, 1 }
 0x1e7   : > { %13086 = vmatprep.mubr.msk.f32.mxu0 %vm584_vm0, %v16543_v1  ;;  %v16737_v1 = vsel %vm776_vm2, %v2107_v55, %v2108_v0  ;;  %v19551_v55 = vld [vmem:[#allocation45_spill] sm:$0xff] }
 0x1ea   : > { %13087 = vmatmul.mubr.msk.f32.gmra.mrb[24].mxu0 %vm584_vm0, %v16546_v52 }
 0x1eb   : > { %13089 = vmatprep.mubr.msk.f32.mxu0 %vm584_vm0, %v16567_v30  ;;  %v16744_v30 = vsel %vm776_vm2, %v2108_v0, %v2110_v15  ;;  %v19552_v15 = vld [vmem:[#allocation46_spill] sm:$0xff]  ;;  %v19553_v0 = vld [vmem:[#allocation47_spill] sm:$0xff] }
 0x1ee   : > { %13090 = vmatmul.mubr.msk.f32.gmra.mrb[26].mxu0 %vm584_vm0, %v16570_v29 }
 0x1ef   : > { %13092 = vmatprep.mubr.msk.f32.mxu0 %vm584_vm0, %v16589_v39  ;;  %v2915_v39 = vld [vmem:[#allocation8 + $0x38] sm:$0xff] }
 0x1f2   : > { %13093 = vmatmul.mubr.msk.f32.gmra.mrb[28].mxu0 %vm584_vm0, %v16592_v63 }
 0x1f3   : > { %13095 = vmatprep.mubr.msk.f32.mxu0 %vm584_vm0, %v16737_v1 }
 0x1f6   : > { %13096 = vmatmul.mubr.msk.f32.gmra.mrb[30].mxu0 %vm584_vm0, %v16744_v30 }
 0x1f7   : > { %13100 = vmatprep.mubr.msk.f32.mxu0 %vm584_vm0, %v16378_v31  ;;  %v19554_v31 = vld [vmem:[#allocation48_spill] sm:$0xff] }
 0x1fa   : > { %13101 = vmatmul.mubr.msk.f32.vlgmr.msra.gmra.mrb[0].mxu0 %vm584_vm0, %v16389_v53  ;;  %v19555_v53 = vld [vmem:[#allocation49_spill] sm:$0xff] }
 0x1fb   : > { %13103 = vmatprep.mubr.msk.f32.mxu0 %vm584_vm0, %v16393_v36  ;;  %13149 = vmatpush3.msra.mxu0 %v2644_v54  ;;  %v19556_v54 = vld [vmem:[#allocation50_spill] sm:$0xff]  ;;  %v19557_v36 = vld [vmem:[#allocation51_spill] sm:$0xff] }
 0x1fc   : > { %13198 = vmatprep.subr.mxu0 %v2915_v39 }
 0x1fe   : > { %13104 = vmatmul.mubr.msk.f32.gmra.mrb[2].mxu0 %vm584_vm0, %v16403_v27  ;;  %v19558_v27 = vld [vmem:[#allocation52_spill] sm:$0xff] }
 0x1ff   : > { %13106 = vmatprep.mubr.msk.f32.mxu0 %vm584_vm0, %v19551_v55  ;;  %v19559_v55 = vld [vmem:[#allocation53_spill] sm:$0xff] }
 0x202   : > { %13107 = vmatmul.mubr.msk.f32.gmra.mrb[4].mxu0 %vm584_vm0, %v19552_v15  ;;  %v19560_v15 = vld [vmem:[#allocation54_spill] sm:$0xff] }
 0x203   : > { %13109 = vmatprep.mubr.msk.f32.mxu0 %vm584_vm0, %v19553_v0  ;;  %v19561_v0 = vld [vmem:[#allocation55_spill] sm:$0xff] }
 0x206   : > { %13110 = vmatmul.mubr.msk.f32.gmra.mrb[6].mxu0 %vm584_vm0, %v19554_v31  ;;  %v19562_v31 = vld [vmem:[#allocation56_spill] sm:$0xff] }
 0x207   : > { %13112 = vmatprep.mubr.msk.f32.mxu0 %vm584_vm0, %v19555_v53  ;;  %v19563_v53 = vld [vmem:[#allocation57_spill] sm:$0xff] }
 0x20a   : > { %13113 = vmatmul.mubr.msk.f32.gmra.mrb[8].mxu0 %vm584_vm0, %v19556_v54  ;;  %v19564_v54 = vld [vmem:[#allocation58_spill] sm:$0xff] }
 0x20b   : > { %13115 = vmatprep.mubr.msk.f32.mxu0 %vm584_vm0, %v19557_v36  ;;  %v19565_v36 = vld [vmem:[#allocation59_spill] sm:$0xff] }
 0x20e   : > { %13116 = vmatmul.mubr.msk.f32.gmra.mrb[10].mxu0 %vm584_vm0, %v19558_v27  ;;  %v19566_v27 = vld [vmem:[#allocation60_spill] sm:$0xff] }
 0x20f   : > { %13118 = vmatprep.mubr.msk.f32.mxu0 %vm584_vm0, %v19559_v55  ;;  %v19567_v55 = vld [vmem:[#allocation61_spill] sm:$0xff] }
 0x212   : > { %13119 = vmatmul.mubr.msk.f32.gmra.mrb[12].mxu0 %vm584_vm0, %v19560_v15  ;;  %v19568_v15 = vld [vmem:[#allocation62_spill] sm:$0xff] }
 0x213   : > { %13121 = vmatprep.mubr.msk.f32.mxu0 %vm584_vm0, %v19561_v0  ;;  %v19569_v0 = vld [vmem:[#allocation63_spill] sm:$0xff] }
 0x216   : > { %13122 = vmatmul.mubr.msk.f32.gmra.mrb[14].mxu0 %vm584_vm0, %v19562_v31  ;;  %v19570_v31 = vld [vmem:[#allocation64_spill] sm:$0xff] }
 0x217   : > { %13124 = vmatprep.mubr.msk.f32.mxu0 %vm584_vm0, %v19563_v53 }
 0x21a   : > { %13125 = vmatmul.mubr.msk.f32.gmra.mrb[16].mxu0 %vm584_vm0, %v19564_v54  ;;  %v19571_v54 = vld [vmem:[#allocation66_spill] sm:$0xff] }
 0x21b   : > { %13127 = vmatprep.mubr.msk.f32.mxu0 %vm584_vm0, %v19565_v36 }
 0x21e   : > { %13128 = vmatmul.mubr.msk.f32.gmra.mrb[18].mxu0 %vm584_vm0, %v19566_v27  ;;  %v2376_v27 = vrot.slane %v16672_v35, 2 }
 0x21f   : > { %13130 = vmatprep.mubr.msk.f32.mxu0 %vm584_vm0, %v19567_v55  ;;  %v2375_v55 = vrot.slane %v16666_v34, 2 }
 0x222   : > { %13131 = vmatmul.mubr.msk.f32.gmra.mrb[20].mxu0 %vm584_vm0, %v19568_v15 }
 0x223   : > { %13133 = vmatprep.mubr.msk.f32.mxu0 %vm584_vm0, %v19569_v0  ;;  %v16809_v0 = vsel %vm1437_vm3, %v2375_v55, %v2376_v27 }
 0x226   : > { %13134 = vmatmul.mubr.msk.f32.gmra.mrb[22].mxu0 %vm584_vm0, %v19570_v31  ;;  %v2378_v31 = vrot.slane %v723_v38, 2 }
 0x227   : > { %13136 = vmatprep.mubr.msk.f32.mxu0 %vm584_vm0, %v16538_v26 }
 0x22a   : > { %13137 = vmatmul.mubr.msk.f32.gmra.mrb[24].mxu0 %vm584_vm0, %v19571_v54 }
 0x22b   : > { %13139 = vmatprep.mubr.msk.f32.mxu0 %vm584_vm0, %v16562_v45  ;;  %v16816_v45 = vsel %vm1437_vm3, %v2376_v27, %v2378_v31  ;;  %v19600_v27 = vld [vmem:[#allocation63_spill] sm:$0xff]  ;;  %v17045_v31 = vld [vmem:[#allocation11 + $0x10] sm:$0xff] }
 0x22e   : > { %13140 = vmatmul.mubr.msk.f32.gmra.mrb[26].mxu0 %vm584_vm0, %v16583_v12 }
 0x22f   : > { %13142 = vmatprep.mubr.msk.f32.mxu0 %vm584_vm0, %v16586_v62  ;;  %v3183_v62 = vld [vmem:[#allocation8 + $0x40] sm:$0xff] }
 0x232   : > { %13143 = vmatmul.mubr.msk.f32.gmra.mrb[28].mxu0 %vm584_vm0, %v16603_v11 }
 0x233   : > { %13145 = vmatprep.mubr.msk.f32.mxu0 %vm584_vm0, %v16809_v0 }
 0x236   : > { %13146 = vmatmul.mubr.msk.f32.gmra.mrb[30].mxu0 %vm584_vm0, %v16816_v45 }
 0x237   : > { %13150 = vmatprep.mubr.msk.f32.mxu0 %vm584_vm0, %v16048_v43  ;;  %v16878_v43 = vld [vmem:[#allocation2 + $0x198] sm:$0xff] }
 0x23a   : > { %13151 = vmatmul.mubr.msk.f32.vlgmr.msra.gmra.mrb[0].mxu0 %vm584_vm0, %v16050_v44  ;;  %v16884_v44 = vld [vmem:[#allocation2 + $0x1a0] sm:$0xff] }
 0x23b   : > { %13153 = vmatprep.mubr.msk.f32.mxu0 %vm584_vm0, %v16065_v50  ;;  %13199 = vmatpush3.msra.mxu0 %v2915_v39  ;;  %v19572_v50 = vld [vmem:[#allocation31_spill] sm:$0xff]  ;;  %v17022_v39 = vld [vmem:[#allocation3 + $0x8] sm:$0xff] }
 0x23c   : > { %13248 = vmatprep.subr.mxu0 %v3183_v62 }
 0x23e   : > { %13154 = vmatmul.mubr.msk.f32.gmra.mrb[2].mxu0 %vm584_vm0, %v16067_v51  ;;  %v19573_v51 = vld [vmem:[#allocation32_spill] sm:$0xff] }
 0x23f   : > { %13156 = vmatprep.mubr.msk.f32.mxu0 %vm584_vm0, %v16076_v56  ;;  %v19574_v56 = vld [vmem:[#allocation33_spill] sm:$0xff] }
 0x242   : > { %13157 = vmatmul.mubr.msk.f32.gmra.mrb[4].mxu0 %vm584_vm0, %v16078_v57  ;;  %v19575_v57 = vld [vmem:[#allocation34_spill] sm:$0xff] }
 0x243   : > { %13159 = vmatprep.mubr.msk.f32.mxu0 %vm584_vm0, %v16098_v2  ;;  %v19579_v2 = vld [vmem:[#allocation42_spill] sm:$0xff] }
 0x246   : > { %13160 = vmatmul.mubr.msk.f32.gmra.mrb[6].mxu0 %vm584_vm0, %v16100_v3  ;;  %v19580_v3 = vld [vmem:[#allocation65_spill] sm:$0xff] }
 0x247   : > { %13162 = vmatprep.mubr.msk.f32.mxu0 %vm584_vm0, %v16118_v13  ;;  %v2909_v13 = vrot.slane %v16878_v43, 1 }
 0x24a   : > { %13163 = vmatmul.mubr.msk.f32.gmra.mrb[8].mxu0 %vm584_vm0, %v16120_v14  ;;  %v2910_v14 = vrot.slane %v16884_v44, 1 }
 0x24b   : > { %13165 = vmatprep.mubr.msk.f32.mxu0 %vm584_vm0, %v16154_v32 }
 0x24c   : > { %v2911_v32 = vsel %vm776_vm2, %v2909_v13, %v2910_v14 }
 0x24e   : > { %13166 = vmatmul.mubr.msk.f32.gmra.mrb[10].mxu0 %vm584_vm0, %v16156_v33 }
 0x24f   : > { %13168 = vmatprep.mubr.msk.f32.mxu0 %vm584_vm0, %v16176_v48  ;;  %v19584_v48 = vld [vmem:[#allocation44_spill] sm:$0xff] }
 0x252   : > { %13169 = vmatmul.mubr.msk.f32.gmra.mrb[12].mxu0 %vm584_vm0, %v16178_v49  ;;  %v19585_v49 = vld [vmem:[#allocation45_spill] sm:$0xff] }
 0x253   : > { %13171 = vmatprep.mubr.msk.f32.mxu0 %vm584_vm0, %v16195_v7  ;;  %v19586_v7 = vld [vmem:[#allocation46_spill] sm:$0xff] }
 0x256   : > { %13172 = vmatmul.mubr.msk.f32.gmra.mrb[14].mxu0 %vm584_vm0, %v16197_v9  ;;  %v19587_v9 = vld [vmem:[#allocation47_spill] sm:$0xff] }
 0x257   : > { %13174 = vmatprep.mubr.msk.f32.mxu0 %vm584_vm0, %v16214_v22  ;;  %v19589_v22 = vld [vmem:[#allocation49_spill] sm:$0xff] }
 0x25a   : > { %13175 = vmatmul.mubr.msk.f32.gmra.mrb[16].mxu0 %vm584_vm0, %v16216_v23  ;;  %v19590_v23 = vld [vmem:[#allocation50_spill] sm:$0xff] }
 0x25b   : > { %13177 = vmatprep.mubr.msk.f32.mxu0 %vm584_vm0, %v16233_v40  ;;  %v19592_v40 = vld [vmem:[#allocation52_spill] sm:$0xff] }
 0x25e   : > { %13178 = vmatmul.mubr.msk.f32.gmra.mrb[18].mxu0 %vm584_vm0, %v16235_v41  ;;  %v19593_v41 = vld [vmem:[#allocation53_spill] sm:$0xff] }
 0x25f   : > { %13180 = vmatprep.mubr.msk.f32.mxu0 %vm584_vm0, %v16252_v16  ;;  %v19588_v16 = vld [vmem:[#allocation48_spill] sm:$0xff] }
 0x262   : > { %13181 = vmatmul.mubr.msk.f32.gmra.mrb[20].mxu0 %vm584_vm0, %v16254_v25  ;;  %v19591_v25 = vld [vmem:[#allocation51_spill] sm:$0xff] }
 0x263   : > { %13183 = vmatprep.mubr.msk.f32.mxu0 %vm584_vm0, %v16342_v4  ;;  %v19594_v4 = vld [vmem:[#allocation54_spill] sm:$0xff] }
 0x266   : > { %13184 = vmatmul.mubr.msk.f32.gmra.mrb[22].mxu0 %vm584_vm0, %v16348_v5  ;;  %v19595_v5 = vld [vmem:[#allocation55_spill] sm:$0xff] }
 0x267   : > { %13186 = vmatprep.mubr.msk.f32.mxu0 %vm584_vm0, %v16350_v18  ;;  %v19596_v18 = vld [vmem:[#allocation56_spill] sm:$0xff] }
 0x26a   : > { %13187 = vmatmul.mubr.msk.f32.gmra.mrb[24].mxu0 %vm584_vm0, %v16360_v28  ;;  %v19597_v28 = vld [vmem:[#allocation58_spill] sm:$0xff] }
 0x26b   : > { %13189 = vmatprep.mubr.msk.f32.mxu0 %vm584_vm0, %v16362_v60  ;;  %v19598_v60 = vld [vmem:[#allocation60_spill] sm:$0xff] }
 0x26e   : > { %13190 = vmatmul.mubr.msk.f32.gmra.mrb[26].mxu0 %vm584_vm0, %v16368_v10  ;;  %v19599_v10 = vld [vmem:[#allocation61_spill] sm:$0xff] }
 0x26f   : > { %13192 = vmatprep.mubr.msk.f32.mxu0 %vm584_vm0, %v16666_v34  ;;  %v3707_v34 = vrot.slane %v17022_v39, 1 }
 0x272   : > { %13193 = vmatmul.mubr.msk.f32.gmra.mrb[28].mxu0 %vm584_vm0, %v16672_v35  ;;  %v17026_v35 = vld [vmem:[#allocation3 + $0x10] sm:$0x3] }
 0x273   : > { %13195 = vmatprep.mubr.msk.f32.mxu0 %vm584_vm0, %v16878_v43 }
 0x276   : > { %13196 = vmatmul.mubr.msk.f32.gmra.mrb[30].mxu0 %vm584_vm0, %v16884_v44 }
 0x277   : > { %13200 = vmatprep.mubr.msk.f32.mxu0 %vm584_vm0, %v16083_v58  ;;  %v19576_v58 = vld [vmem:[#allocation38_spill] sm:$0xff] }
 0x27a   : > { %13201 = vmatmul.mubr.msk.f32.vlgmr.msra.gmra.mrb[0].mxu0 %vm584_vm0, %v16088_v59  ;;  %v19577_v59 = vld [vmem:[#allocation39_spill] sm:$0xff] }
 0x27b   : > { %13203 = vmatprep.mubr.msk.f32.mxu0 %vm584_vm0, %v16092_v61  ;;  %13249 = vmatpush3.msra.mxu0 %v3183_v62  ;;  %v19578_v61 = vld [vmem:[#allocation40_spill] sm:$0xff]  ;;  %v17020_v62 = vld [vmem:[#allocation3] sm:$0xff] }
 0x27e   : > { %13204 = vmatmul.mubr.msk.f32.gmra.mrb[2].mxu0 %vm584_vm0, %v16107_v6  ;;  %v19581_v6 = vld [vmem:[#allocation68_spill] sm:$0xff] }
 0x27f   : > { %13206 = vmatprep.mubr.msk.f32.mxu0 %vm584_vm0, %v16111_v8  ;;  %v19582_v8 = vld [vmem:[#allocation70_spill] sm:$0xff] }
 0x282   : > { %13207 = vmatmul.mubr.msk.f32.gmra.mrb[4].mxu0 %vm584_vm0, %v16134_v19  ;;  %v726_v19 = vld [vmem:[#allocation2 + $0x1a8] sm:$0x3] }
 0x283   : > { %13209 = vmatprep.mubr.msk.f32.mxu0 %vm584_vm0, %v16144_v24  ;;  %v2912_v24 = vrot.slane %v726_v19, 1 }
 0x285   : > { %v2913_v33 = vsel %vm776_vm2, %v2910_v14, %v2912_v24 }
 0x286   : > { %13210 = vmatmul.mubr.msk.f32.gmra.mrb[6].mxu0 %vm584_vm0, %v16166_v37  ;;  %v19583_v37 = vld [vmem:[#allocation43_spill] sm:$0xff] }
 0x287   : > { %13212 = vmatprep.mubr.msk.f32.mxu0 %vm584_vm0, %v19537_v46  ;;  %v3787_v46 = vld [vmem:[#allocation11 + $0x8] sm:$0xff] }
 0x288   : > { %13298 = vmatprep.subr.mxu1 %v3787_v46 }
 0x289   : > { %13299 = vmatpush3.msra.mxu1 %v3787_v46 }
 0x28a   : > { %13213 = vmatmul.mubr.msk.f32.gmra.mrb[8].mxu0 %vm584_vm0, %v19538_v47  ;;  %v3709_v47 = vrot.slane %v17026_v35, 1 }
 0x28b   : > { %13215 = vmatprep.mubr.msk.f32.mxu0 %vm584_vm0, %v19572_v50 }
 0x28c   : > { %v3710_v38 = vsel %vm776_vm2, %v3707_v34, %v3709_v47 }
 0x28e   : > { %13216 = vmatmul.mubr.msk.f32.gmra.mrb[10].mxu0 %vm584_vm0, %v19573_v51 }
 0x28f   : > { %13218 = vmatprep.mubr.msk.f32.mxu0 %vm584_vm0, %v19574_v56 }
 0x292   : > { %13219 = vmatmul.mubr.msk.f32.gmra.mrb[12].mxu0 %vm584_vm0, %v19575_v57 }
 0x293   : > { %13221 = vmatprep.mubr.msk.f32.mxu0 %vm584_vm0, %v19543_v21 }
 0x296   : > { %13222 = vmatmul.mubr.msk.f32.gmra.mrb[14].mxu0 %vm584_vm0, %v19544_v17  ;;  %v3657_v17 = vld [vmem:[#allocation11] sm:$0xff] }
 0x297   : > { %13224 = vmatprep.mubr.msk.f32.mxu0 %vm584_vm0, %v19545_v42  ;;  %13348 = vmatprep.subr.mxu1 %v3657_v17 }
 0x29a   : > { %13225 = vmatmul.mubr.msk.f32.gmra.mrb[16].mxu0 %vm584_vm0, %v19576_v58 }
 0x29b   : > { %13227 = vmatprep.mubr.msk.f32.mxu0 %vm584_vm0, %v19577_v59 }
 0x29e   : > { %13228 = vmatmul.mubr.msk.f32.gmra.mrb[18].mxu0 %vm584_vm0, %v19578_v61 }
 0x29f   : > { %13230 = vmatprep.mubr.msk.f32.mxu0 %vm584_vm0, %v19549_v20  ;;  %v17033_v20 = vpop.f32.mrb[0].mxu1 }
 0x2a0   : > { %v17035_v21 = vpop.f32.mrb[1].mxu1 }
 0x2a1   : > { %v17037_v42 = vpop.f32.mrb[2].mxu1 }
 0x2a2   : > { %13231 = vmatmul.mubr.msk.f32.gmra.mrb[20].mxu0 %vm584_vm0, %v19579_v2  ;;  %v17039_v55 = vpop.f32.mrb[3].mxu1 }
 0x2a3   : > { %13233 = vmatprep.mubr.msk.f32.mxu0 %vm584_vm0, %v19580_v3 }
 0x2a6   : > { %13234 = vmatmul.mubr.msk.f32.gmra.mrb[22].mxu0 %vm584_vm0, %v16546_v52  ;;  %v3177_v52 = vrot.slane %v16878_v43, 2 }
 0x2a7   : > { %13236 = vmatprep.mubr.msk.f32.mxu0 %vm584_vm0, %v19581_v6 }
 0x2aa   : > { %13237 = vmatmul.mubr.msk.f32.gmra.mrb[24].mxu0 %vm584_vm0, %v16570_v29  ;;  %v19603_v29 = vld [vmem:[#allocation69_spill] sm:$0xff] }
 0x2ab   : > { %13239 = vmatprep.mubr.msk.f32.mxu0 %vm584_vm0, %v19582_v8 }
 0x2ae   : > { %13240 = vmatmul.mubr.msk.f32.gmra.mrb[26].mxu0 %vm584_vm0, %v16592_v63 }
 0x2af   : > { %13242 = vmatprep.mubr.msk.f32.mxu0 %vm584_vm0, %v16737_v1  ;;  %v3178_v1 = vrot.slane %v16884_v44, 2 }
 0x2b1   : > { %v3179_v63 = vsel %vm1437_vm3, %v3177_v52, %v3178_v1 }
 0x2b2   : > { %13243 = vmatmul.mubr.msk.f32.gmra.mrb[28].mxu0 %vm584_vm0, %v16744_v30  ;;  %v19601_v30 = vld [vmem:[#allocation64_spill] sm:$0xff] }
 0x2b3   : > { %13245 = vmatprep.mubr.msk.f32.mxu0 %vm584_vm0, %v2911_v32 }
 0x2b6   : > { %13246 = vmatmul.mubr.msk.f32.gmra.mrb[30].mxu0 %vm584_vm0, %v2913_v33 }
 0x2b7   : > { %13250 = vmatprep.mubr.msk.f32.mxu0 %vm584_vm0, %v19583_v37 }
 0x2ba   : > { %13251 = vmatmul.mubr.msk.f32.vlgmr.msra.gmra.mrb[0].mxu0 %vm584_vm0, %v19584_v48 }
 0x2bb   : > { %13253 = vmatprep.mubr.msk.f32.mxu0 %vm584_vm0, %v19585_v49 }
 0x2be   : > { %13254 = vmatmul.mubr.msk.f32.gmra.mrb[2].mxu0 %vm584_vm0, %v19586_v7 }
 0x2bf   : > { %13256 = vmatprep.mubr.msk.f32.mxu0 %vm584_vm0, %v19587_v9 }
 0x2c2   : > { %13257 = vmatmul.mubr.msk.f32.gmra.mrb[4].mxu0 %vm584_vm0, %v19588_v16 }
 0x2c3   : > { %13259 = vmatprep.mubr.msk.f32.mxu0 %vm584_vm0, %v19589_v22 }
 0x2c6   : > { %13260 = vmatmul.mubr.msk.f32.gmra.mrb[6].mxu0 %vm584_vm0, %v19590_v23 }
 0x2c7   : > { %13262 = vmatprep.mubr.msk.f32.mxu0 %vm584_vm0, %v19591_v25 }
 0x2ca   : > { %13263 = vmatmul.mubr.msk.f32.gmra.mrb[8].mxu0 %vm584_vm0, %v19592_v40 }
 0x2cb   : > { %13265 = vmatprep.mubr.msk.f32.mxu0 %vm584_vm0, %v19593_v41 }
 0x2ce   : > { %13266 = vmatmul.mubr.msk.f32.gmra.mrb[10].mxu0 %vm584_vm0, %v19594_v4 }
 0x2cf   : > { %13268 = vmatprep.mubr.msk.f32.mxu0 %vm584_vm0, %v19595_v5 }
 0x2d2   : > { %13269 = vmatmul.mubr.msk.f32.gmra.mrb[12].mxu0 %vm584_vm0, %v19596_v18 }
 0x2d3   : > { %13271 = vmatprep.mubr.msk.f32.mxu0 %vm584_vm0, %v19563_v53  ;;  %v17051_v53 = vld [vmem:[%s19292_s2] ss:$0 sm:$0xff] }
 0x2d6   : > { %13272 = vmatmul.mubr.msk.f32.gmra.mrb[14].mxu0 %vm584_vm0, %v19597_v28 }
 0x2d7   : > { %13274 = vmatprep.mubr.msk.f32.mxu0 %vm584_vm0, %v19565_v36  ;;  %v19602_v36 = vld [vmem:[#allocation67_spill] sm:$0xff] }
 0x2da   : > { %13275 = vmatmul.mubr.msk.f32.gmra.mrb[16].mxu0 %vm584_vm0, %v19598_v60 }
 0x2db   : > { %13277 = vmatprep.mubr.msk.f32.mxu0 %vm584_vm0, %v19599_v10 }
 0x2de   : > { %13278 = vmatmul.mubr.msk.f32.gmra.mrb[18].mxu0 %vm584_vm0, %v19568_v15  ;;  %v17041_v15 = vpop.f32.mrb[4].mxu1 }
 0x2df   : > { %13280 = vmatprep.mubr.msk.f32.mxu0 %vm584_vm0, %v19600_v27 }
 0x2e2   : > { %13281 = vmatmul.mubr.msk.f32.gmra.mrb[20].mxu0 %vm584_vm0, %v19601_v30 }
 0x2e3   : > { %13283 = vmatprep.mubr.msk.f32.mxu0 %vm584_vm0, %v16538_v26  ;;  %v3180_v26 = vrot.slane %v726_v19, 2 }
 0x2e6   : > { %13284 = vmatmul.mubr.msk.f32.gmra.mrb[22].mxu0 %vm584_vm0, %v19571_v54 }
 0x2e7   : > { %13286 = vmatprep.mubr.msk.f32.mxu0 %vm584_vm0, %v19602_v36 }
 0x2ea   : > { %13287 = vmatmul.mubr.msk.f32.gmra.mrb[24].mxu0 %vm584_vm0, %v16583_v12  ;;  %v3181_v12 = vsel %vm1437_vm3, %v3178_v1, %v3180_v26 }
 0x2eb   : > { %13289 = vmatprep.mubr.msk.f32.mxu0 %vm584_vm0, %v19603_v29 }
 0x2ee   : > { %13290 = vmatmul.mubr.msk.f32.gmra.mrb[26].mxu0 %vm584_vm0, %v16603_v11  ;;  %v3706_v11 = vrot.slane %v17020_v62, 1 }
 0x2ef   : > { %13292 = vmatprep.mubr.msk.f32.mxu0 %vm584_vm0, %v16809_v0  ;;  %v17043_v0 = vpop.f32.mrb[5].mxu1 }
 0x2f2   : > { %13293 = vmatmul.mubr.msk.f32.gmra.mrb[28].mxu0 %vm584_vm0, %v16816_v45  ;;  %v3708_v45 = vsel %vm776_vm2, %v3706_v11, %v3707_v34 }
 0x2f3   : > { %13295 = vmatprep.mubr.msk.f32.mxu0 %vm584_vm0, %v3179_v63  ;;  %13300 = vmatprep.mubr.msk.f32.mxu1 %vm584_vm0, %v3708_v45 }
 0x2f4   : > { %13301 = vmatmul.mubr.msk.f32.vlgmr.msra.gmra.mrb[6].mxu1 %vm584_vm0, %v3710_v38 }
 0x2f5   : > { %13349 = vmatpush3.msra.mxu1 %v3657_v17 }
 0x2f6   : > { %13296 = vmatmul.mubr.msk.f32.gmra.mrb[30].mxu0 %vm584_vm0, %v3181_v12  ;;  %13398 = vmatprep.subr.mxu1 %v17045_v31 }
 0x38d   : > { %v13252_v54 = vpop.f32.mrb[0].mxu0 }
 0x38e   : > { %v3453_v43 = vadd.f32 %v13252_v54, %v17051_v53  ;;  %v3254_v44 = vpop.f32.mrb[1].mxu0 }
 0x38f   : > { %v3452_v50 = vadd.f32 %v17051_v53, %v3254_v44 }
 0x390   : > { %v3485_v51 = vmax.f32 %v3453_v43, 0.0 }
 0x391   : > { %v3484_v56 = vmax.f32 %v3452_v50, 0.0  ;;  %v13255_v57 = vpop.f32.mrb[2].mxu0 }
 0x392   : > { %3572 = vst.msk [vmem:[#allocation3 + $0x21] sm:$0xff] %vm584_vm0, %v3485_v51  ;;  %v3455_v58 = vadd.f32 %v13255_v57, %v17051_v53  ;;  %v3264_v59 = vpop.f32.mrb[3].mxu0 }
 0x393   : > { %3571 = vst.msk [vmem:[#allocation3 + $0x19] sm:$0xff] %vm584_vm0, %v3484_v56  ;;  %v3454_v61 = vadd.f32 %v17051_v53, %v3264_v59 }
 0x394   : > { %v3487_v2 = vmax.f32 %v3455_v58, 0.0 }
 0x395   : > { %v3486_v3 = vmax.f32 %v3454_v61, 0.0  ;;  %v13258_v6 = vpop.f32.mrb[4].mxu0 }
 0x396   : > { %3574 = vst.msk [vmem:[#allocation3 + $0x39] sm:$0xff] %vm584_vm0, %v3487_v2  ;;  %v3457_v8 = vadd.f32 %v13258_v6, %v17051_v53  ;;  %v3274_v13 = vpop.f32.mrb[5].mxu0 }
 0x397   : > { %3573 = vst.msk [vmem:[#allocation3 + $0x31] sm:$0xff] %vm584_vm0, %v3486_v3  ;;  %v3456_v14 = vadd.f32 %v17051_v53, %v3274_v13 }
 0x398   : > { %v3489_v19 = vmax.f32 %v3457_v8, 0.0 }
 0x399   : > { %v3488_v24 = vmax.f32 %v3456_v14, 0.0  ;;  %v13261_v32 = vpop.f32.mrb[6].mxu0  ;;  %v17063_v33 = vld [vmem:[#allocation3 + $0x28] sm:$0x3] }
 0x39a   : > { %3576 = vst.msk [vmem:[#allocation3 + $0x51] sm:$0xff] %vm584_vm0, %v3489_v19  ;;  %v3459_v37 = vadd.f32 %v13261_v32, %v17051_v53  ;;  %v3284_v48 = vpop.f32.mrb[7].mxu0  ;;  %v17067_v49 = vld [vmem:[#allocation3 + $0x18] sm:$0xff]  ;;  %v17069_v7 = vld [vmem:[#allocation3 + $0x20] sm:$0xff]  ;;  %v3714_v9 = vrot.slane %v17063_v33, 1 }
 0x39b   : > { %3575 = vst.msk [vmem:[#allocation3 + $0x49] sm:$0xff] %vm584_vm0, %v3488_v24  ;;  %v3458_v16 = vadd.f32 %v17051_v53, %v3284_v48  ;;  %v3711_v22 = vrot.slane %v17067_v49, 1  ;;  %v3712_v23 = vrot.slane %v17069_v7, 1 }
 0x39c   : > { %v3491_v25 = vmax.f32 %v3459_v37, 0.0 }
 0x39d   : > { %v3490_v40 = vmax.f32 %v3458_v16, 0.0  ;;  %v13264_v41 = vpop.f32.mrb[8].mxu0  ;;  %v17077_v4 = vsel %vm776_vm2, %v3711_v22, %v3712_v23  ;;  %v17080_v5 = vsel %vm776_vm2, %v3712_v23, %v3714_v9  ;;  %v17082_v18 = vld [vmem:[#allocation3 + $0x40] sm:$0x3] }
 0x39e   : > { %3578 = vst.msk [vmem:[#allocation3 + $0x69] sm:$0xff] %vm584_vm0, %v3491_v25  ;;  %v3461_v28 = vadd.f32 %v13264_v41, %v17051_v53  ;;  %v3294_v60 = vpop.f32.mrb[9].mxu0  ;;  %13303 = vmatprep.mubr.msk.f32.mxu1 %vm584_vm0, %v17077_v4  ;;  %v17088_v10 = vld [vmem:[#allocation3 + $0x30] sm:$0xff]  ;;  %v17090_v27 = vld [vmem:[#allocation3 + $0x38] sm:$0xff]  ;;  %v3719_v30 = vrot.slane %v17082_v18, 1 }
 0x39f   : > { %3577 = vst.msk [vmem:[#allocation3 + $0x61] sm:$0xff] %vm584_vm0, %v3490_v40  ;;  %v3460_v36 = vadd.f32 %v17051_v53, %v3294_v60  ;;  %13304 = vmatmul.mubr.msk.f32.gmra.mrb[8].mxu1 %vm584_vm0, %v17080_v5  ;;  %v3716_v29 = vrot.slane %v17088_v10, 1  ;;  %v3717_v52 = vrot.slane %v17090_v27, 1 }
 0x3a0   : > { %v3493_v1 = vmax.f32 %v3461_v28, 0.0 }
 0x3a1   : > { %v3492_v26 = vmax.f32 %v3460_v36, 0.0  ;;  %v13267_v63 = vpop.f32.mrb[10].mxu0  ;;  %v17100_v12 = vsel %vm776_vm2, %v3716_v29, %v3717_v52  ;;  %v17103_v11 = vsel %vm776_vm2, %v3717_v52, %v3719_v30  ;;  %v17105_v34 = vld [vmem:[#allocation3 + $0x58] sm:$0x3] }
 0x3a2   : > { %3580 = vst.msk [vmem:[#allocation3 + $0x81] sm:$0xff] %vm584_vm0, %v3493_v1  ;;  %v3463_v46 = vadd.f32 %v13267_v63, %v17051_v53  ;;  %v3304_v47 = vpop.f32.mrb[11].mxu0  ;;  %13306 = vmatprep.mubr.msk.f32.mxu1 %vm584_vm0, %v17100_v12  ;;  %v17111_v45 = vld [vmem:[#allocation3 + $0x48] sm:$0xff]  ;;  %v17113_v38 = vld [vmem:[#allocation3 + $0x50] sm:$0xff]  ;;  %v3724_v17 = vrot.slane %v17105_v34, 1 }
 0x3a3   : > { %3579 = vst.msk [vmem:[#allocation3 + $0x79] sm:$0xff] %vm584_vm0, %v3492_v26  ;;  %v3462_v54 = vadd.f32 %v17051_v53, %v3304_v47  ;;  %13307 = vmatmul.mubr.msk.f32.gmra.mrb[10].mxu1 %vm584_vm0, %v17103_v11  ;;  %v3721_v43 = vrot.slane %v17111_v45, 1  ;;  %v3722_v44 = vrot.slane %v17113_v38, 1 }
 0x3a4   : > { %v3495_v50 = vmax.f32 %v3463_v46, 0.0 }
 0x3a5   : > { %v3494_v51 = vmax.f32 %v3462_v54, 0.0  ;;  %v13270_v56 = vpop.f32.mrb[12].mxu0  ;;  %v17123_v57 = vsel %vm776_vm2, %v3721_v43, %v3722_v44  ;;  %v17126_v58 = vsel %vm776_vm2, %v3722_v44, %v3724_v17  ;;  %v17128_v59 = vld [vmem:[#allocation3 + $0x70] sm:$0x3] }
 0x3a6   : > { %19604 = vst [vmem:[#allocation29_spill] sm:$0xff] %v17126_v58  ;;  %3582 = vst.msk [vmem:[#allocation3 + $0x99] sm:$0xff] %vm584_vm0, %v3495_v50  ;;  %v3465_v61 = vadd.f32 %v13270_v56, %v17051_v53  ;;  %v3314_v2 = vpop.f32.mrb[13].mxu0  ;;  %13309 = vmatprep.mubr.msk.f32.mxu1 %vm584_vm0, %v17123_v57  ;;  %v17134_v3 = vld [vmem:[#allocation3 + $0x60] sm:$0xff]  ;;  %v17136_v6 = vld [vmem:[#allocation3 + $0x68] sm:$0xff]  ;;  %v3729_v8 = vrot.slane %v17128_v59, 1 }
 0x3a7   : > { %3581 = vst.msk [vmem:[#allocation3 + $0x91] sm:$0xff] %vm584_vm0, %v3494_v51  ;;  %v3464_v13 = vadd.f32 %v17051_v53, %v3314_v2  ;;  %13310 = vmatmul.mubr.msk.f32.gmra.mrb[12].mxu1 %vm584_vm0, %v17126_v58  ;;  %v3726_v14 = vrot.slane %v17134_v3, 1  ;;  %v3727_v19 = vrot.slane %v17136_v6, 1 }
 0x3a8   : > { %v3497_v24 = vmax.f32 %v3465_v61, 0.0 }
 0x3a9   : > { %v3496_v32 = vmax.f32 %v3464_v13, 0.0  ;;  %v13273_v37 = vpop.f32.mrb[14].mxu0  ;;  %v17146_v48 = vsel %vm776_vm2, %v3726_v14, %v3727_v19  ;;  %v17149_v9 = vsel %vm776_vm2, %v3727_v19, %v3729_v8  ;;  %v17151_v16 = vld [vmem:[#allocation3 + $0x88] sm:$0x3] }
 0x3aa   : > { %19605 = vst [vmem:[#allocation30_spill] sm:$0xff] %v17146_v48  ;;  %19606 = vst [vmem:[#allocation35_spill] sm:$0xff] %v17149_v9  ;;  %v3467_v22 = vadd.f32 %v13273_v37, %v17051_v53  ;;  %v3324_v23 = vpop.f32.mrb[15].mxu0  ;;  %13312 = vmatprep.mubr.msk.f32.mxu1 %vm584_vm0, %v17146_v48  ;;  %v17157_v25 = vld [vmem:[#allocation3 + $0x78] sm:$0xff]  ;;  %v17159_v40 = vld [vmem:[#allocation3 + $0x80] sm:$0xff]  ;;  %v3734_v41 = vrot.slane %v17151_v16, 1 }
 0x3ab   : > { %3584 = vst.msk [vmem:[#allocation3 + $0xb1] sm:$0xff] %vm584_vm0, %v3497_v24  ;;  %3583 = vst.msk [vmem:[#allocation3 + $0xa9] sm:$0xff] %vm584_vm0, %v3496_v32  ;;  %v3466_v28 = vadd.f32 %v17051_v53, %v3324_v23  ;;  %13313 = vmatmul.mubr.msk.f32.gmra.mrb[14].mxu1 %vm584_vm0, %v17149_v9  ;;  %v3731_v60 = vrot.slane %v17157_v25, 1  ;;  %v3732_v30 = vrot.slane %v17159_v40, 1 }
 0x3ac   : > { %v3499_v36 = vmax.f32 %v3467_v22, 0.0 }
 0x3ad   : > { %v3498_v29 = vmax.f32 %v3466_v28, 0.0  ;;  %v13276_v52 = vpop.f32.mrb[16].mxu0  ;;  %v17169_v1 = vsel %vm776_vm2, %v3731_v60, %v3732_v30  ;;  %v17172_v26 = vsel %vm776_vm2, %v3732_v30, %v3734_v41  ;;  %v17174_v63 = vld [vmem:[#allocation3 + $0xa0] sm:$0x3] }
 0x3ae   : > { %19607 = vst [vmem:[#allocation36_spill] sm:$0xff] %v17169_v1  ;;  %19608 = vst [vmem:[#allocation37_spill] sm:$0xff] %v17172_v26  ;;  %v3469_v46 = vadd.f32 %v13276_v52, %v17051_v53  ;;  %v3334_v47 = vpop.f32.mrb[17].mxu0  ;;  %13315 = vmatprep.mubr.msk.f32.mxu1 %vm584_vm0, %v17169_v1  ;;  %v17180_v17 = vld [vmem:[#allocation3 + $0x90] sm:$0xff]  ;;  %v17182_v54 = vld [vmem:[#allocation3 + $0x98] sm:$0xff]  ;;  %v3739_v43 = vrot.slane %v17174_v63, 1 }
 0x3af   : > { %3586 = vst.msk [vmem:[#allocation3 + $0xc9] sm:$0xff] %vm584_vm0, %v3499_v36  ;;  %3585 = vst.msk [vmem:[#allocation3 + $0xc1] sm:$0xff] %vm584_vm0, %v3498_v29  ;;  %v3468_v44 = vadd.f32 %v17051_v53, %v3334_v47  ;;  %13316 = vmatmul.mubr.msk.f32.gmra.mrb[16].mxu1 %vm584_vm0, %v17172_v26  ;;  %v3736_v50 = vrot.slane %v17180_v17, 1  ;;  %v3737_v51 = vrot.slane %v17182_v54, 1 }
 0x3b0   : > { %v3501_v56 = vmax.f32 %v3469_v46, 0.0 }
 0x3b1   : > { %v3500_v61 = vmax.f32 %v3468_v44, 0.0  ;;  %v13279_v2 = vpop.f32.mrb[18].mxu0  ;;  %v17192_v8 = vsel %vm776_vm2, %v3736_v50, %v3737_v51  ;;  %v17195_v13 = vsel %vm776_vm2, %v3737_v51, %v3739_v43 }
 0x3b2   : > { %19609 = vst [vmem:[#allocation41_spill] sm:$0xff] %v17192_v8  ;;  %19610 = vst [vmem:[#allocation57_spill] sm:$0xff] %v17195_v13  ;;  %v17197_v14 = vld [vmem:[#allocation3 + $0xb8] sm:$0x3]  ;;  %v3471_v19 = vadd.f32 %v13279_v2, %v17051_v53  ;;  %v3344_v24 = vpop.f32.mrb[19].mxu0  ;;  %13318 = vmatprep.mubr.msk.f32.mxu1 %vm584_vm0, %v17192_v8  ;;  %v17203_v32 = vld [vmem:[#allocation3 + $0xa8] sm:$0xff] }
 0x3b3   : > { %3588 = vst.msk [vmem:[#allocation3 + $0xe1] sm:$0xff] %vm584_vm0, %v3501_v56  ;;  %v17205_v37 = vld [vmem:[#allocation3 + $0xb0] sm:$0xff]  ;;  %v3744_v22 = vrot.slane %v17197_v14, 1  ;;  %3587 = vst.msk [vmem:[#allocation3 + $0xd9] sm:$0xff] %vm584_vm0, %v3500_v61  ;;  %v3470_v23 = vadd.f32 %v17051_v53, %v3344_v24  ;;  %13319 = vmatmul.mubr.msk.f32.gmra.mrb[18].mxu1 %vm584_vm0, %v17195_v13  ;;  %v3741_v41 = vrot.slane %v17203_v32, 1 }
 0x3b4   : > { %v3742_v28 = vrot.slane %v17205_v37, 1  ;;  %v3503_v60 = vmax.f32 %v3471_v19, 0.0 }
 0x3b5   : > { %v3502_v30 = vmax.f32 %v3470_v23, 0.0  ;;  %v13282_v36 = vpop.f32.mrb[20].mxu0 }
 0x3b6   : > { %v17215_v29 = vsel %vm776_vm2, %v3741_v41, %v3742_v28  ;;  %v17218_v52 = vsel %vm776_vm2, %v3742_v28, %v3744_v22  ;;  %v17220_v46 = vld [vmem:[#allocation3 + $0xd0] sm:$0x3]  ;;  %3590 = vst.msk [vmem:[#allocation3 + $0xf9] sm:$0xff] %vm584_vm0, %v3503_v60  ;;  %v3473_v47 = vadd.f32 %v13282_v36, %v17051_v53  ;;  %v3354_v43 = vpop.f32.mrb[21].mxu0  ;;  %v17226_v44 = vld [vmem:[#allocation3 + $0xc0] sm:$0xff]  ;;  %v17228_v50 = vld [vmem:[#allocation3 + $0xc8] sm:$0xff] }
 0x3b7   : > { %19611 = vst [vmem:[#allocation59_spill] sm:$0xff] %v17215_v29  ;;  %19612 = vst [vmem:[#allocation62_spill] sm:$0xff] %v17218_v52  ;;  %13321 = vmatprep.mubr.msk.f32.mxu1 %vm584_vm0, %v17215_v29  ;;  %v3749_v51 = vrot.slane %v17220_v46, 1  ;;  %v3472_v56 = vadd.f32 %v17051_v53, %v3354_v43  ;;  %v3746_v61 = vrot.slane %v17226_v44, 1  ;;  %v3747_v2 = vrot.slane %v17228_v50, 1 }
 0x3b8   : > { %3589 = vst.msk [vmem:[#allocation3 + $0xf1] sm:$0xff] %vm584_vm0, %v3502_v30  ;;  %13322 = vmatmul.mubr.msk.f32.gmra.mrb[20].mxu1 %vm584_vm0, %v17218_v52  ;;  %v3505_v19 = vmax.f32 %v3473_v47, 0.0 }
 0x3b9   : > { %v3504_v24 = vmax.f32 %v3472_v56, 0.0  ;;  %v13285_v22 = vpop.f32.mrb[22].mxu0  ;;  %v17238_v23 = vsel %vm776_vm2, %v3746_v61, %v3747_v2  ;;  %v17241_v41 = vsel %vm776_vm2, %v3747_v2, %v3749_v51 }
 0x3ba   : > { %19613 = vst [vmem:[#allocation66_spill] sm:$0xff] %v17238_v23  ;;  %19614 = vst [vmem:[#allocation31_spill] sm:$0xff] %v17241_v41  ;;  %v17243_v28 = vld [vmem:[#allocation3 + $0xe8] sm:$0x3]  ;;  %v3475_v60 = vadd.f32 %v13285_v22, %v17051_v53  ;;  %v3364_v30 = vpop.f32.mrb[23].mxu0  ;;  %13324 = vmatprep.mubr.msk.f32.mxu1 %vm584_vm0, %v17238_v23  ;;  %v17249_v36 = vld [vmem:[#allocation3 + $0xd8] sm:$0xff] }
 0x3bb   : > { %3592 = vst.msk [vmem:[#allocation3 + $0x111] sm:$0xff] %vm584_vm0, %v3505_v19  ;;  %v17251_v47 = vld [vmem:[#allocation3 + $0xe0] sm:$0xff]  ;;  %v3754_v43 = vrot.slane %v17243_v28, 1  ;;  %3591 = vst.msk [vmem:[#allocation3 + $0x109] sm:$0xff] %vm584_vm0, %v3504_v24  ;;  %v3474_v51 = vadd.f32 %v17051_v53, %v3364_v30  ;;  %v3751_v56 = vrot.slane %v17249_v36, 1 }
 0x3bc   : > { %13325 = vmatmul.mubr.msk.f32.gmra.mrb[22].mxu1 %vm584_vm0, %v17241_v41  ;;  %v3752_v61 = vrot.slane %v17251_v47, 1  ;;  %v3507_v2 = vmax.f32 %v3475_v60, 0.0 }
 0x3bd   : > { %v3506_v19 = vmax.f32 %v3474_v51, 0.0  ;;  %v13288_v22 = vpop.f32.mrb[24].mxu0  ;;  %v17266_v29 = vld [vmem:[#allocation3 + $0x100] sm:$0x3] }
 0x3be   : > { %v17261_v23 = vsel %vm776_vm2, %v3751_v56, %v3752_v61  ;;  %v17264_v52 = vsel %vm776_vm2, %v3752_v61, %v3754_v43  ;;  %3594 = vst.msk [vmem:[#allocation3 + $0x129] sm:$0xff] %vm584_vm0, %v3507_v2  ;;  %v3477_v24 = vadd.f32 %v13288_v22, %v17051_v53  ;;  %v3374_v30 = vpop.f32.mrb[25].mxu0  ;;  %v3759_v51 = vrot.slane %v17266_v29, 1 }
 0x3bf   : > { %19615 = vst [vmem:[#allocation32_spill] sm:$0xff] %v17261_v23  ;;  %19616 = vst [vmem:[#allocation33_spill] sm:$0xff] %v17264_v52  ;;  %13327 = vmatprep.mubr.msk.f32.mxu1 %vm584_vm0, %v17261_v23  ;;  %v17272_v41 = vld [vmem:[#allocation3 + $0xf0] sm:$0xff]  ;;  %v17274_v60 = vld [vmem:[#allocation3 + $0xf8] sm:$0xff]  ;;  %v3476_v43 = vadd.f32 %v17051_v53, %v3374_v30 }
 0x3c0   : > { %3593 = vst.msk [vmem:[#allocation3 + $0x121] sm:$0xff] %vm584_vm0, %v3506_v19  ;;  %13328 = vmatmul.mubr.msk.f32.gmra.mrb[24].mxu1 %vm584_vm0, %v17264_v52  ;;  %v3756_v56 = vrot.slane %v17272_v41, 1  ;;  %v3757_v61 = vrot.slane %v17274_v60, 1  ;;  %v3509_v2 = vmax.f32 %v3477_v24, 0.0 }
 0x3c1   : > { %v3508_v22 = vmax.f32 %v3476_v43, 0.0  ;;  %v13291_v23 = vpop.f32.mrb[26].mxu0 }
 0x3c2   : > { %v17284_v13 = vsel %vm776_vm2, %v3756_v56, %v3757_v61  ;;  %v17287_v8 = vsel %vm776_vm2, %v3757_v61, %v3759_v51  ;;  %v17289_v26 = vld [vmem:[#allocation3 + $0x118] sm:$0x3]  ;;  %3596 = vst.msk [vmem:[#allocation3 + $0x141] sm:$0xff] %vm584_vm0, %v3509_v2  ;;  %v14519_v19 = vadd.f32 %v13291_v23, %v17033_v20  ;;  %v3384_v30 = vpop.f32.mrb[27].mxu0  ;;  %v17295_v52 = vld [vmem:[#allocation3 + $0x108] sm:$0xff]  ;;  %v17297_v24 = vld [vmem:[#allocation3 + $0x110] sm:$0xff] }
 0x3c3   : > { %19617 = vst [vmem:[#allocation34_spill] sm:$0xff] %v17284_v13  ;;  %19618 = vst [vmem:[#allocation38_spill] sm:$0xff] %v17287_v8  ;;  %13330 = vmatprep.mubr.msk.f32.mxu1 %vm584_vm0, %v17284_v13  ;;  %v3764_v43 = vrot.slane %v17289_v26, 1  ;;  %v14520_v51 = vadd.f32 %v3384_v30, %v17035_v21  ;;  %v3761_v56 = vrot.slane %v17295_v52, 1  ;;  %v3762_v20 = vrot.slane %v17297_v24, 1 }
 0x3c4   : > { %3595 = vst.msk [vmem:[#allocation3 + $0x139] sm:$0xff] %vm584_vm0, %v3508_v22  ;;  %13331 = vmatmul.mubr.msk.f32.gmra.mrb[26].mxu1 %vm584_vm0, %v17287_v8  ;;  %v3479_v23 = vadd.f32 %v14519_v19, %v17051_v53 }
 0x3c5   : > { %v3478_v61 = vadd.f32 %v14520_v51, %v17051_v53  ;;  %v13294_v2 = vpop.f32.mrb[28].mxu0  ;;  %v17309_v13 = vsel %vm776_vm2, %v3761_v56, %v3762_v20  ;;  %v17312_v1 = vsel %vm776_vm2, %v3762_v20, %v3764_v43  ;;  %v17314_v22 = vld [vmem:[#allocation3 + $0x130] sm:$0x3] }
 0x3c6   : > { %19619 = vst [vmem:[#allocation39_spill] sm:$0xff] %v17309_v13  ;;  %19620 = vst [vmem:[#allocation40_spill] sm:$0xff] %v17312_v1  ;;  %v3511_v21 = vmax.f32 %v3479_v23, 0.0  ;;  %v14521_v30 = vadd.f32 %v13294_v2, %v17037_v42  ;;  %v3394_v8 = vpop.f32.mrb[29].mxu0  ;;  %13333 = vmatprep.mubr.msk.f32.mxu1 %vm584_vm0, %v17309_v13  ;;  %v3769_v51 = vrot.slane %v17314_v22, 1 }
 0x3c7   : > { %v17319_v9 = vld [vmem:[#allocation3 + $0x120] sm:$0xff]  ;;  %v17321_v19 = vld [vmem:[#allocation3 + $0x128] sm:$0xff]  ;;  %v3510_v56 = vmax.f32 %v3478_v61, 0.0  ;;  %v14522_v48 = vadd.f32 %v3394_v8, %v17039_v55 }
 0x3c8   : > { %13334 = vmatmul.mubr.msk.f32.gmra.mrb[28].mxu1 %vm584_vm0, %v17312_v1  ;;  %v3766_v43 = vrot.slane %v17319_v9, 1  ;;  %v3767_v42 = vrot.slane %v17321_v19, 1  ;;  %3598 = vst.msk [vmem:[#allocation3 + $0x159] sm:$0xff] %vm584_vm0, %v3511_v21  ;;  %v3481_v20 = vadd.f32 %v14521_v30, %v17051_v53 }
 0x3c9   : > { %3597 = vst.msk [vmem:[#allocation3 + $0x151] sm:$0xff] %vm584_vm0, %v3510_v56  ;;  %v3480_v23 = vadd.f32 %v14522_v48, %v17051_v53  ;;  %v13297_v2 = vpop.f32.mrb[30].mxu0  ;;  %v17339_v8 = vld [vmem:[#allocation3 + $0x148] sm:$0x3] }
 0x3ca   : > { %v17334_v61 = vsel %vm776_vm2, %v3766_v43, %v3767_v42  ;;  %v17337_v55 = vsel %vm776_vm2, %v3767_v42, %v3769_v51  ;;  %v3513_v1 = vmax.f32 %v3481_v20, 0.0  ;;  %v14523_v13 = vadd.f32 %v13297_v2, %v17041_v15  ;;  %v3404_v58 = vpop.f32.mrb[31].mxu0 }
 0x3cb   : > { %19621 = vst [vmem:[#allocation42_spill] sm:$0xff] %v17334_v61  ;;  %19622 = vst [vmem:[#allocation65_spill] sm:$0xff] %v17337_v55  ;;  %13336 = vmatprep.mubr.msk.f32.mxu1 %vm584_vm0, %v17334_v61  ;;  %v17344_v21 = vld [vmem:[#allocation3 + $0x138] sm:$0xff]  ;;  %v17346_v30 = vld [vmem:[#allocation3 + $0x140] sm:$0xff]  ;;  %v3774_v48 = vrot.slane %v17339_v8, 1  ;;  %v3512_v56 = vmax.f32 %v3480_v23, 0.0  ;;  %v14524_v43 = vadd.f32 %v3404_v58, %v17043_v0 }
 0x3cc   : > { %13337 = vmatmul.mubr.msk.f32.gmra.mrb[30].mxu1 %vm584_vm0, %v17337_v55  ;;  %v3771_v51 = vrot.slane %v17344_v21, 1  ;;  %v3772_v15 = vrot.slane %v17346_v30, 1  ;;  %3600 = vst.msk [vmem:[#allocation3 + $0x171] sm:$0xff] %vm584_vm0, %v3513_v1  ;;  %v3483_v42 = vadd.f32 %v14523_v13, %v17051_v53 }
 0x3cd   : > { %3599 = vst.msk [vmem:[#allocation3 + $0x169] sm:$0xff] %vm584_vm0, %v3512_v56  ;;  %v3482_v20 = vadd.f32 %v14524_v43, %v17051_v53 }
 0x3ce   : > { %v17359_v2 = vsel %vm776_vm2, %v3771_v51, %v3772_v15  ;;  %v17362_v0 = vsel %vm776_vm2, %v3772_v15, %v3774_v48  ;;  %v3515_v58 = vmax.f32 %v3483_v42, 0.0 }
 0x3cf   : > { %19623 = vst [vmem:[#allocation68_spill] sm:$0xff] %v17359_v2  ;;  %19624 = vst [vmem:[#allocation70_spill] sm:$0xff] %v17362_v0  ;;  %13339 = vmatprep.mubr.msk.f32.mxu1 %vm584_vm0, %v17359_v2  ;;  %v3514_v23 = vmax.f32 %v3482_v20, 0.0  ;;  %v17368_v1 = vld [vmem:[#allocation3 + $0x160] sm:$0x3]  ;;  %v4377_v2 = vrot.slane %v17090_v27, 2 }
 0x3d0   : > { %13340 = vmatmul.mubr.msk.f32.gmra.mrb[32].mxu1 %vm584_vm0, %v17362_v0  ;;  %3602 = vst.msk [vmem:[#allocation3 + $0x189] sm:$0xff] %vm584_vm0, %v3515_v58  ;;  %v17371_v13 = vld [vmem:[#allocation3 + $0x150] sm:$0xff]  ;;  %v17373_v53 = vld [vmem:[#allocation3 + $0x158] sm:$0xff]  ;;  %v3779_v56 = vrot.slane %v17368_v1, 1 }
 0x3d1   : > { %3601 = vst.msk [vmem:[#allocation3 + $0x181] sm:$0xff] %vm584_vm0, %v3514_v23  ;;  %v3776_v48 = vrot.slane %v17371_v13, 1  ;;  %v3777_v43 = vrot.slane %v17373_v53, 1 }
 0x3d3   : > { %v17380_v51 = vsel %vm776_vm2, %v3776_v48, %v3777_v43  ;;  %v17383_v15 = vsel %vm776_vm2, %v3777_v43, %v3779_v56  ;;  %v17385_v42 = vld [vmem:[#allocation3 + $0x178] sm:$0x3] }
 0x3d4   : > { %19625 = vst [vmem:[#allocation43_spill] sm:$0xff] %v17380_v51  ;;  %19626 = vst [vmem:[#allocation44_spill] sm:$0xff] %v17383_v15  ;;  %13342 = vmatprep.mubr.msk.f32.mxu1 %vm584_vm0, %v17380_v51  ;;  %v17389_v20 = vld [vmem:[#allocation3 + $0x168] sm:$0xff]  ;;  %v17391_v58 = vld [vmem:[#allocation3 + $0x170] sm:$0xff]  ;;  %v3784_v23 = vrot.slane %v17385_v42, 1 }
 0x3d5   : > { %13343 = vmatmul.mubr.msk.f32.gmra.mrb[34].mxu1 %vm584_vm0, %v17383_v15  ;;  %v3781_v48 = vrot.slane %v17389_v20, 1  ;;  %v3782_v0 = vrot.slane %v17391_v58, 1  ;;  %v4770_v15 = vld [vmem:[#allocation11 + $0x18] sm:$0xff]  ;;  %v17482_v51 = vld [vmem:[#allocation11 + $0x20] sm:$0xff] }
 0x3d7   : > { %v17399_v56 = vsel %vm776_vm2, %v3781_v48, %v3782_v0  ;;  %v17402_v43 = vsel %vm776_vm2, %v3782_v0, %v3784_v23  ;;  %v4367_v0 = vrot.slane %v17022_v39, 2  ;;  %v4369_v23 = vrot.slane %v17026_v35, 2 }
 0x3d8   : > { %19627 = vst [vmem:[#allocation45_spill] sm:$0xff] %v17399_v56  ;;  %19628 = vst [vmem:[#allocation46_spill] sm:$0xff] %v17402_v43  ;;  %13345 = vmatprep.mubr.msk.f32.mxu1 %vm584_vm0, %v17399_v56  ;;  %v4372_v56 = vrot.slane %v17069_v7, 2 }
 0x3d9   : > { %13346 = vmatmul.mubr.msk.f32.gmra.mrb[36].mxu1 %vm584_vm0, %v17402_v43  ;;  %v4371_v43 = vrot.slane %v17067_v49, 2 }
 0x3da   : > { %13350 = vmatprep.mubr.msk.f32.mxu1 %vm584_vm0, %v17020_v62 }
 0x3db   : > { %v17486_v35 = vsel %vm1437_vm3, %v4371_v43, %v4372_v56 }
 0x3dd   : > { %13351 = vmatmul.mubr.msk.f32.vlgmr.msra.gmra.mrb[6].mxu1 %vm584_vm0, %v17022_v39  ;;  %v4374_v39 = vrot.slane %v17063_v33, 2  ;;  %v4379_v33 = vrot.slane %v17082_v18, 2 }
 0x3de   : > { %13353 = vmatprep.mubr.msk.f32.mxu1 %vm584_vm0, %v17067_v49  ;;  %13399 = vmatpush3.msra.mxu1 %v17045_v31  ;;  %v4366_v31 = vrot.slane %v17020_v62, 2  ;;  %v4370_v62 = vsel %vm1437_vm3, %v4367_v0, %v4369_v23  ;;  %v4381_v23 = vrot.slane %v17111_v45, 2 }
 0x3df   : > { %13448 = vmatprep.subr.mxu1 %v4770_v15 }
 0x3e0   : > { %v4368_v48 = vsel %vm1437_vm3, %v4366_v31, %v4367_v0  ;;  %v4376_v31 = vrot.slane %v17088_v10, 2  ;;  %v17494_v0 = vsel %vm1437_vm3, %v4372_v56, %v4374_v39  ;;  %v4384_v56 = vrot.slane %v17105_v34, 2 }
 0x3e1   : > { %13354 = vmatmul.mubr.msk.f32.gmra.mrb[8].mxu1 %vm584_vm0, %v17069_v7  ;;  %v4387_v39 = vrot.slane %v17136_v6, 2 }
 0x3e2   : > { %13356 = vmatprep.mubr.msk.f32.mxu1 %vm584_vm0, %v17088_v10  ;;  %v17500_v43 = vsel %vm1437_vm3, %v4376_v31, %v4377_v2 }
 0x3e5   : > { %13357 = vmatmul.mubr.msk.f32.gmra.mrb[10].mxu1 %vm584_vm0, %v17090_v27 }
 0x3e6   : > { %13359 = vmatprep.mubr.msk.f32.mxu1 %vm584_vm0, %v17111_v45 }
 0x3e9   : > { %13360 = vmatmul.mubr.msk.f32.gmra.mrb[12].mxu1 %vm584_vm0, %v17113_v38 }
 0x3ea   : > { %13362 = vmatprep.mubr.msk.f32.mxu1 %vm584_vm0, %v17134_v3 }
 0x3ed   : > { %13363 = vmatmul.mubr.msk.f32.gmra.mrb[14].mxu1 %vm584_vm0, %v17136_v6 }
 0x3ee   : > { %13365 = vmatprep.mubr.msk.f32.mxu1 %vm584_vm0, %v17157_v25 }
 0x3f1   : > { %13366 = vmatmul.mubr.msk.f32.gmra.mrb[16].mxu1 %vm584_vm0, %v17159_v40 }
 0x3f2   : > { %13368 = vmatprep.mubr.msk.f32.mxu1 %vm584_vm0, %v17180_v17 }
 0x3f5   : > { %13369 = vmatmul.mubr.msk.f32.gmra.mrb[18].mxu1 %vm584_vm0, %v17182_v54 }
 0x3f6   : > { %13371 = vmatprep.mubr.msk.f32.mxu1 %vm584_vm0, %v17203_v32 }
 0x3f9   : > { %13372 = vmatmul.mubr.msk.f32.gmra.mrb[20].mxu1 %vm584_vm0, %v17205_v37 }
 0x3fa   : > { %13374 = vmatprep.mubr.msk.f32.mxu1 %vm584_vm0, %v17226_v44 }
 0x3fd   : > { %13375 = vmatmul.mubr.msk.f32.gmra.mrb[22].mxu1 %vm584_vm0, %v17228_v50 }
 0x3fe   : > { %13377 = vmatprep.mubr.msk.f32.mxu1 %vm584_vm0, %v17249_v36 }
 0x401   : > { %13378 = vmatmul.mubr.msk.f32.gmra.mrb[24].mxu1 %vm584_vm0, %v17251_v47 }
 0x402   : > { %13380 = vmatprep.mubr.msk.f32.mxu1 %vm584_vm0, %v17272_v41 }
 0x405   : > { %13381 = vmatmul.mubr.msk.f32.gmra.mrb[26].mxu1 %vm584_vm0, %v17274_v60 }
 0x406   : > { %13383 = vmatprep.mubr.msk.f32.mxu1 %vm584_vm0, %v17295_v52 }
 0x409   : > { %13384 = vmatmul.mubr.msk.f32.gmra.mrb[28].mxu1 %vm584_vm0, %v17297_v24 }
 0x40a   : > { %13386 = vmatprep.mubr.msk.f32.mxu1 %vm584_vm0, %v17319_v9 }
 0x40d   : > { %13387 = vmatmul.mubr.msk.f32.gmra.mrb[30].mxu1 %vm584_vm0, %v17321_v19 }
 0x40e   : > { %13389 = vmatprep.mubr.msk.f32.mxu1 %vm584_vm0, %v17344_v21 }
 0x411   : > { %13390 = vmatmul.mubr.msk.f32.gmra.mrb[32].mxu1 %vm584_vm0, %v17346_v30 }
 0x412   : > { %13392 = vmatprep.mubr.msk.f32.mxu1 %vm584_vm0, %v17371_v13 }
 0x415   : > { %13393 = vmatmul.mubr.msk.f32.gmra.mrb[34].mxu1 %vm584_vm0, %v17373_v53 }
 0x416   : > { %13395 = vmatprep.mubr.msk.f32.mxu1 %vm584_vm0, %v17389_v20 }
 0x419   : > { %13396 = vmatmul.mubr.msk.f32.gmra.mrb[36].mxu1 %vm584_vm0, %v17391_v58 }
 0x41a   : > { %13400 = vmatprep.mubr.msk.f32.mxu1 %vm584_vm0, %v4368_v48  ;;  %v4382_v48 = vrot.slane %v17113_v38, 2 }
 0x41c   : > { %v17513_v18 = vsel %vm1437_vm3, %v4381_v23, %v4382_v48  ;;  %v17520_v31 = vsel %vm1437_vm3, %v4382_v48, %v4384_v56  ;;  %v4392_v23 = vrot.slane %v17159_v40, 2  ;;  %v4394_v48 = vrot.slane %v17151_v16, 2 }
 0x41d   : > { %13401 = vmatmul.mubr.msk.f32.vlgmr.msra.gmra.mrb[6].mxu1 %vm584_vm0, %v4370_v62  ;;  %19629 = vst [vmem:[#allocation47_spill] sm:$0xff] %v17513_v18  ;;  %v4386_v62 = vrot.slane %v17134_v3, 2  ;;  %v4396_v56 = vrot.slane %v17180_v17, 2 }
 0x41e   : > { %13403 = vmatprep.mubr.msk.f32.mxu1 %vm584_vm0, %v17486_v35  ;;  %13449 = vmatpush3.msra.mxu1 %v4770_v15  ;;  %v17507_v15 = vsel %vm1437_vm3, %v4377_v2, %v4379_v33  ;;  %v4389_v2 = vrot.slane %v17128_v59, 2  ;;  %v4391_v33 = vrot.slane %v17157_v25, 2 }
 0x41f   : > { %13498 = vmatprep.subr.mxu1 %v17482_v51  ;;  %v17526_v34 = vsel %vm1437_vm3, %v4386_v62, %v4387_v39  ;;  %v4397_v62 = vrot.slane %v17182_v54, 2 }
 0x420   : > { %19630 = vst [vmem:[#allocation48_spill] sm:$0xff] %v17526_v34  ;;  %v17539_v59 = vsel %vm1437_vm3, %v4391_v33, %v4392_v23  ;;  %v4402_v33 = vrot.slane %v17205_v37, 2 }
 0x421   : > { %13404 = vmatmul.mubr.msk.f32.gmra.mrb[8].mxu1 %vm584_vm0, %v17494_v0  ;;  %19631 = vst [vmem:[#allocation49_spill] sm:$0xff] %v17539_v59  ;;  %v17552_v16 = vsel %vm1437_vm3, %v4396_v56, %v4397_v62  ;;  %v4407_v56 = vrot.slane %v17228_v50, 2 }
 0x422   : > { %13406 = vmatprep.mubr.msk.f32.mxu1 %vm584_vm0, %v17500_v43  ;;  %19632 = vst [vmem:[#allocation50_spill] sm:$0xff] %v17552_v16 }
 0x425   : > { %13407 = vmatmul.mubr.msk.f32.gmra.mrb[10].mxu1 %vm584_vm0, %v17507_v15 }
 0x426   : > { %13409 = vmatprep.mubr.msk.f32.mxu1 %vm584_vm0, %v17513_v18  ;;  %v17533_v18 = vsel %vm1437_vm3, %v4387_v39, %v4389_v2  ;;  %v4399_v39 = vrot.slane %v17174_v63, 2  ;;  %v4401_v2 = vrot.slane %v17203_v32, 2 }
 0x428   : > { %v17565_v63 = vsel %vm1437_vm3, %v4401_v2, %v4402_v33  ;;  %v4412_v2 = vrot.slane %v17251_v47, 2 }
 0x429   : > { %13410 = vmatmul.mubr.msk.f32.gmra.mrb[12].mxu1 %vm584_vm0, %v17520_v31  ;;  %19633 = vst [vmem:[#allocation51_spill] sm:$0xff] %v17565_v63 }
 0x42a   : > { %13412 = vmatprep.mubr.msk.f32.mxu1 %vm584_vm0, %v17526_v34  ;;  %v17546_v34 = vsel %vm1437_vm3, %v4392_v23, %v4394_v48  ;;  %v4404_v23 = vrot.slane %v17197_v14, 2  ;;  %v4406_v48 = vrot.slane %v17226_v44, 2 }
 0x42c   : > { %v17578_v14 = vsel %vm1437_vm3, %v4406_v48, %v4407_v56  ;;  %v4417_v48 = vrot.slane %v17274_v60, 2 }
 0x42d   : > { %13413 = vmatmul.mubr.msk.f32.gmra.mrb[14].mxu1 %vm584_vm0, %v17533_v18  ;;  %19634 = vst [vmem:[#allocation52_spill] sm:$0xff] %v17578_v14 }
 0x42e   : > { %13415 = vmatprep.mubr.msk.f32.mxu1 %vm584_vm0, %v17539_v59  ;;  %v17559_v59 = vsel %vm1437_vm3, %v4397_v62, %v4399_v39  ;;  %v4409_v62 = vrot.slane %v17220_v46, 2  ;;  %v4411_v39 = vrot.slane %v17249_v36, 2 }
 0x430   : > { %v17591_v46 = vsel %vm1437_vm3, %v4411_v39, %v4412_v2  ;;  %v4422_v39 = vrot.slane %v17297_v24, 2 }
 0x431   : > { %13416 = vmatmul.mubr.msk.f32.gmra.mrb[16].mxu1 %vm584_vm0, %v17546_v34  ;;  %19635 = vst [vmem:[#allocation53_spill] sm:$0xff] %v17591_v46 }
 0x432   : > { %13418 = vmatprep.mubr.msk.f32.mxu1 %vm584_vm0, %v17552_v16  ;;  %v17572_v16 = vsel %vm1437_vm3, %v4402_v33, %v4404_v23  ;;  %v4414_v33 = vrot.slane %v17243_v28, 2  ;;  %v4416_v23 = vrot.slane %v17272_v41, 2 }
 0x434   : > { %v17604_v28 = vsel %vm1437_vm3, %v4416_v23, %v4417_v48  ;;  %v4427_v23 = vrot.slane %v17321_v19, 2 }
 0x435   : > { %13419 = vmatmul.mubr.msk.f32.gmra.mrb[18].mxu1 %vm584_vm0, %v17559_v59  ;;  %19636 = vst [vmem:[#allocation54_spill] sm:$0xff] %v17604_v28 }
 0x436   : > { %13421 = vmatprep.mubr.msk.f32.mxu1 %vm584_vm0, %v17565_v63  ;;  %v17585_v63 = vsel %vm1437_vm3, %v4407_v56, %v4409_v62  ;;  %v4419_v56 = vrot.slane %v17266_v29, 2  ;;  %v4421_v62 = vrot.slane %v17295_v52, 2 }
 0x438   : > { %v17617_v29 = vsel %vm1437_vm3, %v4421_v62, %v4422_v39  ;;  %v4432_v62 = vrot.slane %v17346_v30, 2 }
 0x439   : > { %13422 = vmatmul.mubr.msk.f32.gmra.mrb[20].mxu1 %vm584_vm0, %v17572_v16  ;;  %19638 = vst [vmem:[#allocation56_spill] sm:$0xff] %v17617_v29 }
 0x43a   : > { %13424 = vmatprep.mubr.msk.f32.mxu1 %vm584_vm0, %v17578_v14  ;;  %v17598_v14 = vsel %vm1437_vm3, %v4412_v2, %v4414_v33  ;;  %v4424_v2 = vrot.slane %v17289_v26, 2  ;;  %v4426_v33 = vrot.slane %v17319_v9, 2 }
 0x43c   : > { %v17630_v26 = vsel %vm1437_vm3, %v4426_v33, %v4427_v23  ;;  %v4437_v33 = vrot.slane %v17373_v53, 2 }
 0x43d   : > { %13425 = vmatmul.mubr.msk.f32.gmra.mrb[22].mxu1 %vm584_vm0, %v17585_v63  ;;  %19639 = vst [vmem:[#allocation58_spill] sm:$0xff] %v17630_v26 }
 0x43e   : > { %13427 = vmatprep.mubr.msk.f32.mxu1 %vm584_vm0, %v17591_v46  ;;  %v17611_v46 = vsel %vm1437_vm3, %v4417_v48, %v4419_v56  ;;  %v4429_v48 = vrot.slane %v17314_v22, 2  ;;  %v4431_v56 = vrot.slane %v17344_v21, 2 }
 0x43f   : > { %19637 = vst [vmem:[#allocation55_spill] sm:$0xff] %v17611_v46 }
 0x440   : > { %v17643_v22 = vsel %vm1437_vm3, %v4431_v56, %v4432_v62  ;;  %v4442_v56 = vrot.slane %v17391_v58, 2 }
 0x441   : > { %13428 = vmatmul.mubr.msk.f32.gmra.mrb[24].mxu1 %vm584_vm0, %v17598_v14  ;;  %19641 = vst [vmem:[#allocation61_spill] sm:$0xff] %v17643_v22 }
 0x442   : > { %13430 = vmatprep.mubr.msk.f32.mxu1 %vm584_vm0, %v17604_v28  ;;  %v17624_v28 = vsel %vm1437_vm3, %v4422_v39, %v4424_v2  ;;  %v4434_v39 = vrot.slane %v17339_v8, 2  ;;  %v4436_v2 = vrot.slane %v17371_v13, 2 }
 0x444   : > { %v17656_v8 = vsel %vm1437_vm3, %v4436_v2, %v4437_v33  ;;  %v5309_v2 = vld [vmem:[#allocation11 + $0x28] sm:$0xff] }
 0x445   : > { %13431 = vmatmul.mubr.msk.f32.gmra.mrb[26].mxu1 %vm584_vm0, %v17611_v46  ;;  %19642 = vst [vmem:[#allocation63_spill] sm:$0xff] %v17656_v8 }
 0x446   : > { %13433 = vmatprep.mubr.msk.f32.mxu1 %vm584_vm0, %v17617_v29  ;;  %v17637_v29 = vsel %vm1437_vm3, %v4427_v23, %v4429_v48  ;;  %v4439_v23 = vrot.slane %v17368_v1, 2  ;;  %v4441_v48 = vrot.slane %v17389_v20, 2 }
 0x447   : > { %19640 = vst [vmem:[#allocation60_spill] sm:$0xff] %v17637_v29 }
 0x448   : > { %v17669_v1 = vsel %vm1437_vm3, %v4441_v48, %v4442_v56  ;;  %v19649_v48 = vld [vmem:[#allocation41_spill] sm:$0xff] }
 0x449   : > { %13434 = vmatmul.mubr.msk.f32.gmra.mrb[28].mxu1 %vm584_vm0, %v17624_v28  ;;  %19643 = vst [vmem:[#allocation64_spill] sm:$0xff] %v17669_v1 }
 0x44a   : > { %13436 = vmatprep.mubr.msk.f32.mxu1 %vm584_vm0, %v17630_v26  ;;  %v17650_v26 = vsel %vm1437_vm3, %v4432_v62, %v4434_v39  ;;  %v4444_v62 = vrot.slane %v17385_v42, 2  ;;  %v19644_v42 = vld [vmem:[#allocation29_spill] sm:$0xff] }
 0x44c   : > { %v17674_v39 = vsel %vm1437_vm3, %v4442_v56, %v4444_v62  ;;  %v19650_v56 = vld [vmem:[#allocation57_spill] sm:$0xff]  ;;  %v19651_v62 = vld [vmem:[#allocation59_spill] sm:$0xff] }
 0x44d   : > { %13437 = vmatmul.mubr.msk.f32.gmra.mrb[30].mxu1 %vm584_vm0, %v17637_v29 }
 0x44e   : > { %13439 = vmatprep.mubr.msk.f32.mxu1 %vm584_vm0, %v17643_v22  ;;  %v17663_v22 = vsel %vm1437_vm3, %v4437_v33, %v4439_v23  ;;  %v19645_v33 = vld [vmem:[#allocation30_spill] sm:$0xff]  ;;  %v19648_v23 = vld [vmem:[#allocation37_spill] sm:$0xff] }
 0x451   : > { %13440 = vmatmul.mubr.msk.f32.gmra.mrb[32].mxu1 %vm584_vm0, %v17650_v26 }
 0x452   : > { %13442 = vmatprep.mubr.msk.f32.mxu1 %vm584_vm0, %v17656_v8 }
 0x455   : > { %13443 = vmatmul.mubr.msk.f32.gmra.mrb[34].mxu1 %vm584_vm0, %v17663_v22 }
 0x456   : > { %13445 = vmatprep.mubr.msk.f32.mxu1 %vm584_vm0, %v17669_v1 }
 0x459   : > { %13446 = vmatmul.mubr.msk.f32.gmra.mrb[36].mxu1 %vm584_vm0, %v17674_v39 }
 0x45a   : > { %13450 = vmatprep.mubr.msk.f32.mxu1 %vm584_vm0, %v17067_v49  ;;  %v17739_v49 = vld [vmem:[#allocation3 + $0x180] sm:$0xff] }
 0x45d   : > { %13451 = vmatmul.mubr.msk.f32.vlgmr.msra.gmra.mrb[6].mxu1 %vm584_vm0, %v17069_v7  ;;  %v17743_v7 = vld [vmem:[#allocation3 + $0x188] sm:$0xff] }
 0x45e   : > { %13453 = vmatprep.mubr.msk.f32.mxu1 %vm584_vm0, %v17088_v10  ;;  %13499 = vmatpush3.msra.mxu1 %v17482_v51  ;;  %v5572_v51 = vld [vmem:[#allocation11 + $0x30] sm:$0xff] }
 0x45f   : > { %13548 = vmatprep.subr.mxu1 %v5309_v2 }
 0x461   : > { %13454 = vmatmul.mubr.msk.f32.gmra.mrb[8].mxu1 %vm584_vm0, %v17090_v27 }
 0x462   : > { %13456 = vmatprep.mubr.msk.f32.mxu1 %vm584_vm0, %v17111_v45 }
 0x465   : > { %13457 = vmatmul.mubr.msk.f32.gmra.mrb[10].mxu1 %vm584_vm0, %v17113_v38 }
 0x466   : > { %13459 = vmatprep.mubr.msk.f32.mxu1 %vm584_vm0, %v17134_v3 }
 0x469   : > { %13460 = vmatmul.mubr.msk.f32.gmra.mrb[12].mxu1 %vm584_vm0, %v17136_v6 }
 0x46a   : > { %13462 = vmatprep.mubr.msk.f32.mxu1 %vm584_vm0, %v17157_v25 }
 0x46d   : > { %13463 = vmatmul.mubr.msk.f32.gmra.mrb[14].mxu1 %vm584_vm0, %v17159_v40 }
 0x46e   : > { %13465 = vmatprep.mubr.msk.f32.mxu1 %vm584_vm0, %v17180_v17 }
 0x471   : > { %13466 = vmatmul.mubr.msk.f32.gmra.mrb[16].mxu1 %vm584_vm0, %v17182_v54 }
 0x472   : > { %13468 = vmatprep.mubr.msk.f32.mxu1 %vm584_vm0, %v17203_v32 }
 0x475   : > { %13469 = vmatmul.mubr.msk.f32.gmra.mrb[18].mxu1 %vm584_vm0, %v17205_v37 }
 0x476   : > { %13471 = vmatprep.mubr.msk.f32.mxu1 %vm584_vm0, %v17226_v44 }
 0x479   : > { %13472 = vmatmul.mubr.msk.f32.gmra.mrb[20].mxu1 %vm584_vm0, %v17228_v50 }
 0x47a   : > { %13474 = vmatprep.mubr.msk.f32.mxu1 %vm584_vm0, %v17249_v36 }
 0x47d   : > { %13475 = vmatmul.mubr.msk.f32.gmra.mrb[22].mxu1 %vm584_vm0, %v17251_v47 }
 0x47e   : > { %13477 = vmatprep.mubr.msk.f32.mxu1 %vm584_vm0, %v17272_v41 }
 0x481   : > { %13478 = vmatmul.mubr.msk.f32.gmra.mrb[24].mxu1 %vm584_vm0, %v17274_v60 }
 0x482   : > { %13480 = vmatprep.mubr.msk.f32.mxu1 %vm584_vm0, %v17295_v52 }
 0x485   : > { %13481 = vmatmul.mubr.msk.f32.gmra.mrb[26].mxu1 %vm584_vm0, %v17297_v24 }
 0x486   : > { %13483 = vmatprep.mubr.msk.f32.mxu1 %vm584_vm0, %v17319_v9 }
 0x489   : > { %13484 = vmatmul.mubr.msk.f32.gmra.mrb[28].mxu1 %vm584_vm0, %v17321_v19 }
 0x48a   : > { %13486 = vmatprep.mubr.msk.f32.mxu1 %vm584_vm0, %v17344_v21 }
 0x48d   : > { %13487 = vmatmul.mubr.msk.f32.gmra.mrb[30].mxu1 %vm584_vm0, %v17346_v30 }
 0x48e   : > { %13489 = vmatprep.mubr.msk.f32.mxu1 %vm584_vm0, %v17371_v13 }
 0x491   : > { %13490 = vmatmul.mubr.msk.f32.gmra.mrb[32].mxu1 %vm584_vm0, %v17373_v53 }
 0x492   : > { %13492 = vmatprep.mubr.msk.f32.mxu1 %vm584_vm0, %v17389_v20 }
 0x495   : > { %13493 = vmatmul.mubr.msk.f32.gmra.mrb[34].mxu1 %vm584_vm0, %v17391_v58 }
 0x496   : > { %13495 = vmatprep.mubr.msk.f32.mxu1 %vm584_vm0, %v17739_v49 }
 0x499   : > { %13496 = vmatmul.mubr.msk.f32.gmra.mrb[36].mxu1 %vm584_vm0, %v17743_v7 }
 0x49a   : > { %13500 = vmatprep.mubr.msk.f32.mxu1 %vm584_vm0, %v17077_v4  ;;  %v19646_v4 = vld [vmem:[#allocation35_spill] sm:$0xff] }
 0x49d   : > { %13501 = vmatmul.mubr.msk.f32.vlgmr.msra.gmra.mrb[6].mxu1 %vm584_vm0, %v17080_v5  ;;  %v19647_v5 = vld [vmem:[#allocation36_spill] sm:$0xff] }
 0x49e   : > { %13503 = vmatprep.mubr.msk.f32.mxu1 %vm584_vm0, %v17100_v12  ;;  %13549 = vmatpush3.msra.mxu1 %v5309_v2  ;;  %v19652_v2 = vld [vmem:[#allocation62_spill] sm:$0xff] }
 0x49f   : > { %13598 = vmatprep.subr.mxu1 %v5572_v51 }
 0x4a1   : > { %13504 = vmatmul.mubr.msk.f32.gmra.mrb[8].mxu1 %vm584_vm0, %v17103_v11 }
 0x4a2   : > { %13506 = vmatprep.mubr.msk.f32.mxu1 %vm584_vm0, %v17123_v57 }
 0x4a5   : > { %13507 = vmatmul.mubr.msk.f32.gmra.mrb[10].mxu1 %vm584_vm0, %v19644_v42 }
 0x4a6   : > { %13509 = vmatprep.mubr.msk.f32.mxu1 %vm584_vm0, %v19645_v33  ;;  %v19653_v33 = vld [vmem:[#allocation66_spill] sm:$0xff] }
 0x4a9   : > { %13510 = vmatmul.mubr.msk.f32.gmra.mrb[12].mxu1 %vm584_vm0, %v19646_v4  ;;  %v19654_v4 = vld [vmem:[#allocation31_spill] sm:$0xff] }
 0x4aa   : > { %13512 = vmatprep.mubr.msk.f32.mxu1 %vm584_vm0, %v19647_v5  ;;  %v19655_v5 = vld [vmem:[#allocation32_spill] sm:$0xff] }
 0x4ad   : > { %13513 = vmatmul.mubr.msk.f32.gmra.mrb[14].mxu1 %vm584_vm0, %v19648_v23  ;;  %v19656_v23 = vld [vmem:[#allocation33_spill] sm:$0xff] }
 0x4ae   : > { %13515 = vmatprep.mubr.msk.f32.mxu1 %vm584_vm0, %v19649_v48  ;;  %v19657_v48 = vld [vmem:[#allocation34_spill] sm:$0xff] }
 0x4b1   : > { %13516 = vmatmul.mubr.msk.f32.gmra.mrb[16].mxu1 %vm584_vm0, %v19650_v56  ;;  %v19658_v56 = vld [vmem:[#allocation38_spill] sm:$0xff] }
 0x4b2   : > { %13518 = vmatprep.mubr.msk.f32.mxu1 %vm584_vm0, %v19651_v62  ;;  %v19659_v62 = vld [vmem:[#allocation39_spill] sm:$0xff] }
 0x4b5   : > { %13519 = vmatmul.mubr.msk.f32.gmra.mrb[18].mxu1 %vm584_vm0, %v19652_v2  ;;  %v19660_v2 = vld [vmem:[#allocation40_spill] sm:$0xff] }
 0x4b6   : > { %13521 = vmatprep.mubr.msk.f32.mxu1 %vm584_vm0, %v19653_v33  ;;  %v19666_v33 = vld [vmem:[#allocation46_spill] sm:$0xff] }
 0x4b9   : > { %13522 = vmatmul.mubr.msk.f32.gmra.mrb[20].mxu1 %vm584_vm0, %v19654_v4  ;;  %v19665_v4 = vld [vmem:[#allocation45_spill] sm:$0xff] }
 0x4ba   : > { %13524 = vmatprep.mubr.msk.f32.mxu1 %vm584_vm0, %v19655_v5  ;;  %v19661_v5 = vld [vmem:[#allocation68_spill] sm:$0xff] }
 0x4bd   : > { %13525 = vmatmul.mubr.msk.f32.gmra.mrb[22].mxu1 %vm584_vm0, %v19656_v23  ;;  %v19662_v23 = vld [vmem:[#allocation70_spill] sm:$0xff] }
 0x4be   : > { %13527 = vmatprep.mubr.msk.f32.mxu1 %vm584_vm0, %v19657_v48  ;;  %v19663_v48 = vld [vmem:[#allocation43_spill] sm:$0xff] }
 0x4c1   : > { %13528 = vmatmul.mubr.msk.f32.gmra.mrb[24].mxu1 %vm584_vm0, %v19658_v56  ;;  %v5036_v56 = vrot.slane %v17743_v7, 1 }
 0x4c2   : > { %13530 = vmatprep.mubr.msk.f32.mxu1 %vm584_vm0, %v19659_v62  ;;  %v5035_v62 = vrot.slane %v17739_v49, 1 }
 0x4c5   : > { %13531 = vmatmul.mubr.msk.f32.gmra.mrb[26].mxu1 %vm584_vm0, %v19660_v2  ;;  %v19664_v2 = vld [vmem:[#allocation44_spill] sm:$0xff] }
 0x4c6   : > { %13533 = vmatprep.mubr.msk.f32.mxu1 %vm584_vm0, %v17334_v61  ;;  %v3653_v61 = vld [vmem:[#allocation3 + $0x190] sm:$0x3] }
 0x4c9   : > { %13534 = vmatmul.mubr.msk.f32.gmra.mrb[28].mxu1 %vm584_vm0, %v17337_v55  ;;  %v5038_v55 = vrot.slane %v3653_v61, 1 }
 0x4ca   : > { %13536 = vmatprep.mubr.msk.f32.mxu1 %vm584_vm0, %v19661_v5 }
 0x4cd   : > { %13537 = vmatmul.mubr.msk.f32.gmra.mrb[30].mxu1 %vm584_vm0, %v19662_v23  ;;  %v17810_v23 = vsel %vm776_vm2, %v5035_v62, %v5036_v56  ;;  %v19672_v62 = vld [vmem:[#allocation52_spill] sm:$0xff] }
 0x4ce   : > { %13539 = vmatprep.mubr.msk.f32.mxu1 %vm584_vm0, %v19663_v48  ;;  %v17815_v48 = vsel %vm776_vm2, %v5036_v56, %v5038_v55  ;;  %v19667_v55 = vld [vmem:[#allocation47_spill] sm:$0xff]  ;;  %v19668_v56 = vld [vmem:[#allocation48_spill] sm:$0xff] }
 0x4d1   : > { %13540 = vmatmul.mubr.msk.f32.gmra.mrb[32].mxu1 %vm584_vm0, %v19664_v2 }
 0x4d2   : > { %13542 = vmatprep.mubr.msk.f32.mxu1 %vm584_vm0, %v19665_v4  ;;  %v5843_v4 = vld [vmem:[#allocation11 + $0x38] sm:$0xff] }
 0x4d5   : > { %13543 = vmatmul.mubr.msk.f32.gmra.mrb[34].mxu1 %vm584_vm0, %v19666_v33 }
 0x4d6   : > { %13545 = vmatprep.mubr.msk.f32.mxu1 %vm584_vm0, %v17810_v23 }
 0x4d9   : > { %13546 = vmatmul.mubr.msk.f32.gmra.mrb[36].mxu1 %vm584_vm0, %v17815_v48 }
 0x4da   : > { %13550 = vmatprep.mubr.msk.f32.mxu1 %vm584_vm0, %v17486_v35  ;;  %v19669_v35 = vld [vmem:[#allocation49_spill] sm:$0xff] }
 0x4dd   : > { %13551 = vmatmul.mubr.msk.f32.vlgmr.msra.gmra.mrb[6].mxu1 %vm584_vm0, %v17494_v0  ;;  %v19670_v0 = vld [vmem:[#allocation50_spill] sm:$0xff] }
 0x4de   : > { %13553 = vmatprep.mubr.msk.f32.mxu1 %vm584_vm0, %v17500_v43  ;;  %13599 = vmatpush3.msra.mxu1 %v5572_v51  ;;  %v19671_v51 = vld [vmem:[#allocation51_spill] sm:$0xff] }
 0x4df   : > { %13648 = vmatprep.subr.mxu1 %v5843_v4 }
 0x4e1   : > { %13554 = vmatmul.mubr.msk.f32.gmra.mrb[8].mxu1 %vm584_vm0, %v17507_v15 }
 0x4e2   : > { %13556 = vmatprep.mubr.msk.f32.mxu1 %vm584_vm0, %v19667_v55 }
 0x4e5   : > { %13557 = vmatmul.mubr.msk.f32.gmra.mrb[10].mxu1 %vm584_vm0, %v17520_v31 }
 0x4e6   : > { %13559 = vmatprep.mubr.msk.f32.mxu1 %vm584_vm0, %v19668_v56 }
 0x4e9   : > { %13560 = vmatmul.mubr.msk.f32.gmra.mrb[12].mxu1 %vm584_vm0, %v17533_v18 }
 0x4ea   : > { %13562 = vmatprep.mubr.msk.f32.mxu1 %vm584_vm0, %v19669_v35  ;;  %v19673_v35 = vld [vmem:[#allocation53_spill] sm:$0xff] }
 0x4ed   : > { %13563 = vmatmul.mubr.msk.f32.gmra.mrb[14].mxu1 %vm584_vm0, %v17546_v34 }
 0x4ee   : > { %13565 = vmatprep.mubr.msk.f32.mxu1 %vm584_vm0, %v19670_v0  ;;  %v19674_v0 = vld [vmem:[#allocation54_spill] sm:$0xff] }
 0x4f1   : > { %13566 = vmatmul.mubr.msk.f32.gmra.mrb[16].mxu1 %vm584_vm0, %v17559_v59 }
 0x4f2   : > { %13568 = vmatprep.mubr.msk.f32.mxu1 %vm584_vm0, %v19671_v51  ;;  %v19675_v51 = vld [vmem:[#allocation56_spill] sm:$0xff] }
 0x4f5   : > { %13569 = vmatmul.mubr.msk.f32.gmra.mrb[18].mxu1 %vm584_vm0, %v17572_v16 }
 0x4f6   : > { %13571 = vmatprep.mubr.msk.f32.mxu1 %vm584_vm0, %v19672_v62  ;;  %v19676_v62 = vld [vmem:[#allocation58_spill] sm:$0xff] }
 0x4f9   : > { %13572 = vmatmul.mubr.msk.f32.gmra.mrb[20].mxu1 %vm584_vm0, %v17585_v63 }
 0x4fa   : > { %13574 = vmatprep.mubr.msk.f32.mxu1 %vm584_vm0, %v19673_v35  ;;  %v19677_v35 = vld [vmem:[#allocation61_spill] sm:$0xff] }
 0x4fd   : > { %13575 = vmatmul.mubr.msk.f32.gmra.mrb[22].mxu1 %vm584_vm0, %v17598_v14 }
 0x4fe   : > { %13577 = vmatprep.mubr.msk.f32.mxu1 %vm584_vm0, %v19674_v0 }
 0x501   : > { %13578 = vmatmul.mubr.msk.f32.gmra.mrb[24].mxu1 %vm584_vm0, %v17611_v46  ;;  %v5304_v46 = vrot.slane %v17743_v7, 2 }
 0x502   : > { %13580 = vmatprep.mubr.msk.f32.mxu1 %vm584_vm0, %v19675_v51  ;;  %v5303_v51 = vrot.slane %v17739_v49, 2 }
 0x505   : > { %13581 = vmatmul.mubr.msk.f32.gmra.mrb[26].mxu1 %vm584_vm0, %v17624_v28 }
 0x506   : > { %13583 = vmatprep.mubr.msk.f32.mxu1 %vm584_vm0, %v19676_v62 }
 0x509   : > { %13584 = vmatmul.mubr.msk.f32.gmra.mrb[28].mxu1 %vm584_vm0, %v17637_v29  ;;  %v5306_v29 = vrot.slane %v3653_v61, 2  ;;  %v3656_v61 = vld [vmem:[#allocation3 + $0x1a8] sm:$0x3] }
 0x50a   : > { %13586 = vmatprep.mubr.msk.f32.mxu1 %vm584_vm0, %v19677_v35  ;;  %v17882_v35 = vsel %vm1437_vm3, %v5303_v51, %v5304_v46 }
 0x50d   : > { %13587 = vmatmul.mubr.msk.f32.gmra.mrb[30].mxu1 %vm584_vm0, %v17650_v26 }
 0x50e   : > { %13589 = vmatprep.mubr.msk.f32.mxu1 %vm584_vm0, %v17656_v8  ;;  %v17887_v8 = vsel %vm1437_vm3, %v5304_v46, %v5306_v29 }
 0x511   : > { %13590 = vmatmul.mubr.msk.f32.gmra.mrb[32].mxu1 %vm584_vm0, %v17663_v22 }
 0x512   : > { %13592 = vmatprep.mubr.msk.f32.mxu1 %vm584_vm0, %v17669_v1  ;;  %v6111_v1 = vld [vmem:[#allocation11 + $0x40] sm:$0xff] }
 0x515   : > { %13593 = vmatmul.mubr.msk.f32.gmra.mrb[34].mxu1 %vm584_vm0, %v17674_v39 }
 0x516   : > { %13595 = vmatprep.mubr.msk.f32.mxu1 %vm584_vm0, %v17882_v35 }
 0x519   : > { %13596 = vmatmul.mubr.msk.f32.gmra.mrb[36].mxu1 %vm584_vm0, %v17887_v8 }
 0x51a   : > { %13600 = vmatprep.mubr.msk.f32.mxu1 %vm584_vm0, %v17088_v10  ;;  %v17949_v10 = vld [vmem:[#allocation3 + $0x198] sm:$0xff] }
 0x51d   : > { %13601 = vmatmul.mubr.msk.f32.vlgmr.msra.gmra.mrb[6].mxu1 %vm584_vm0, %v17090_v27  ;;  %v17955_v27 = vld [vmem:[#allocation3 + $0x1a0] sm:$0xff] }
 0x51e   : > { %13603 = vmatprep.mubr.msk.f32.mxu1 %vm584_vm0, %v17111_v45  ;;  %13649 = vmatpush3.msra.mxu1 %v5843_v4  ;;  %v19678_v45 = vld [vmem:[#allocation30_spill] sm:$0xff]  ;;  %v6106_v46 = vrot.slane %v17955_v27, 2 }
 0x51f   : > { %13698 = vmatprep.subr.mxu1 %v6111_v1 }
 0x521   : > { %13604 = vmatmul.mubr.msk.f32.gmra.mrb[8].mxu1 %vm584_vm0, %v17113_v38  ;;  %v19679_v38 = vld [vmem:[#allocation35_spill] sm:$0xff] }
 0x522   : > { %13606 = vmatprep.mubr.msk.f32.mxu1 %vm584_vm0, %v17134_v3  ;;  %v19680_v3 = vld [vmem:[#allocation36_spill] sm:$0xff] }
 0x525   : > { %13607 = vmatmul.mubr.msk.f32.gmra.mrb[10].mxu1 %vm584_vm0, %v17136_v6  ;;  %v19684_v6 = vld [vmem:[#allocation59_spill] sm:$0xff] }
 0x526   : > { %13609 = vmatprep.mubr.msk.f32.mxu1 %vm584_vm0, %v17157_v25  ;;  %v19686_v25 = vld [vmem:[#allocation66_spill] sm:$0xff] }
 0x529   : > { %13610 = vmatmul.mubr.msk.f32.gmra.mrb[12].mxu1 %vm584_vm0, %v17159_v40  ;;  %v19687_v40 = vld [vmem:[#allocation31_spill] sm:$0xff] }
 0x52a   : > { %13612 = vmatprep.mubr.msk.f32.mxu1 %vm584_vm0, %v17180_v17  ;;  %v19688_v17 = vld [vmem:[#allocation32_spill] sm:$0xff] }
 0x52d   : > { %13613 = vmatmul.mubr.msk.f32.gmra.mrb[14].mxu1 %vm584_vm0, %v17182_v54  ;;  %v19689_v54 = vld [vmem:[#allocation33_spill] sm:$0xff] }
 0x52e   : > { %13615 = vmatprep.mubr.msk.f32.mxu1 %vm584_vm0, %v17203_v32  ;;  %v19690_v32 = vld [vmem:[#allocation34_spill] sm:$0xff] }
 0x531   : > { %13616 = vmatmul.mubr.msk.f32.gmra.mrb[16].mxu1 %vm584_vm0, %v17205_v37  ;;  %v19691_v37 = vld [vmem:[#allocation38_spill] sm:$0xff] }
 0x532   : > { %13618 = vmatprep.mubr.msk.f32.mxu1 %vm584_vm0, %v17226_v44  ;;  %v19693_v44 = vld [vmem:[#allocation40_spill] sm:$0xff] }
 0x535   : > { %13619 = vmatmul.mubr.msk.f32.gmra.mrb[18].mxu1 %vm584_vm0, %v17228_v50  ;;  %v19694_v50 = vld [vmem:[#allocation42_spill] sm:$0xff] }
 0x536   : > { %13621 = vmatprep.mubr.msk.f32.mxu1 %vm584_vm0, %v17249_v36  ;;  %v19696_v36 = vld [vmem:[#allocation70_spill] sm:$0xff] }
 0x539   : > { %13622 = vmatmul.mubr.msk.f32.gmra.mrb[20].mxu1 %vm584_vm0, %v17251_v47  ;;  %v19697_v47 = vld [vmem:[#allocation43_spill] sm:$0xff] }
 0x53a   : > { %13624 = vmatprep.mubr.msk.f32.mxu1 %vm584_vm0, %v17272_v41  ;;  %v19695_v41 = vld [vmem:[#allocation65_spill] sm:$0xff] }
 0x53d   : > { %13625 = vmatmul.mubr.msk.f32.gmra.mrb[22].mxu1 %vm584_vm0, %v17274_v60  ;;  %v19698_v60 = vld [vmem:[#allocation45_spill] sm:$0xff] }
 0x53e   : > { %13627 = vmatprep.mubr.msk.f32.mxu1 %vm584_vm0, %v17295_v52  ;;  %v19692_v52 = vld [vmem:[#allocation39_spill] sm:$0xff] }
 0x541   : > { %13628 = vmatmul.mubr.msk.f32.gmra.mrb[24].mxu1 %vm584_vm0, %v17297_v24  ;;  %v5837_v24 = vrot.slane %v17949_v10, 1 }
 0x542   : > { %13630 = vmatprep.mubr.msk.f32.mxu1 %vm584_vm0, %v17319_v9  ;;  %v19685_v9 = vld [vmem:[#allocation62_spill] sm:$0xff] }
 0x545   : > { %13631 = vmatmul.mubr.msk.f32.gmra.mrb[26].mxu1 %vm584_vm0, %v17321_v19  ;;  %v5838_v19 = vrot.slane %v17955_v27, 1 }
 0x546   : > { %13633 = vmatprep.mubr.msk.f32.mxu1 %vm584_vm0, %v17344_v21  ;;  %v5840_v21 = vrot.slane %v3656_v61, 1 }
 0x549   : > { %13634 = vmatmul.mubr.msk.f32.gmra.mrb[28].mxu1 %vm584_vm0, %v17346_v30  ;;  %v5839_v30 = vsel %vm776_vm2, %v5837_v24, %v5838_v19 }
 0x54a   : > { %13636 = vmatprep.mubr.msk.f32.mxu1 %vm584_vm0, %v17371_v13  ;;  %v5841_v13 = vsel %vm776_vm2, %v5838_v19, %v5840_v21 }
 0x54d   : > { %13637 = vmatmul.mubr.msk.f32.gmra.mrb[30].mxu1 %vm584_vm0, %v17373_v53  ;;  %v19699_v53 = vld [vmem:[#allocation49_spill] sm:$0xff] }
 0x54e   : > { %13639 = vmatprep.mubr.msk.f32.mxu1 %vm584_vm0, %v17389_v20  ;;  %v19700_v20 = vld [vmem:[#allocation50_spill] sm:$0xff] }
 0x551   : > { %13640 = vmatmul.mubr.msk.f32.gmra.mrb[32].mxu1 %vm584_vm0, %v17391_v58  ;;  %v19701_v58 = vld [vmem:[#allocation51_spill] sm:$0xff] }
 0x552   : > { %13642 = vmatprep.mubr.msk.f32.mxu1 %vm584_vm0, %v17739_v49 }
 0x555   : > { %13643 = vmatmul.mubr.msk.f32.gmra.mrb[34].mxu1 %vm584_vm0, %v17743_v7 }
 0x556   : > { %13645 = vmatprep.mubr.msk.f32.mxu1 %vm584_vm0, %v17949_v10 }
 0x559   : > { %13646 = vmatmul.mubr.msk.f32.gmra.mrb[36].mxu1 %vm584_vm0, %v17955_v27 }
 0x55a   : > { %13650 = vmatprep.mubr.msk.f32.mxu1 %vm584_vm0, %v17100_v12  ;;  %v19681_v12 = vld [vmem:[#allocation37_spill] sm:$0xff] }
 0x55d   : > { %13651 = vmatmul.mubr.msk.f32.vlgmr.msra.gmra.mrb[6].mxu1 %vm584_vm0, %v17103_v11  ;;  %v19682_v11 = vld [vmem:[#allocation41_spill] sm:$0xff] }
 0x55e   : > { %13653 = vmatprep.mubr.msk.f32.mxu1 %vm584_vm0, %v17123_v57  ;;  %13699 = vmatpush3.msra.mxu1 %v6111_v1  ;;  %v19683_v57 = vld [vmem:[#allocation57_spill] sm:$0xff]  ;;  %v11603_v1 = vld [vmem:[%s19295_s5 + $0x10] sm:$0xff] }
 0x561   : > { %13654 = vmatmul.mubr.msk.f32.gmra.mrb[8].mxu1 %vm584_vm0, %v19644_v42 }
 0x562   : > { %13656 = vmatprep.mubr.msk.f32.mxu1 %vm584_vm0, %v19678_v45 }
 0x565   : > { %13657 = vmatmul.mubr.msk.f32.gmra.mrb[10].mxu1 %vm584_vm0, %v19679_v38 }
 0x566   : > { %13659 = vmatprep.mubr.msk.f32.mxu1 %vm584_vm0, %v19680_v3 }
 0x569   : > { %13660 = vmatmul.mubr.msk.f32.gmra.mrb[12].mxu1 %vm584_vm0, %v19681_v12 }
 0x56a   : > { %13662 = vmatprep.mubr.msk.f32.mxu1 %vm584_vm0, %v19682_v11 }
 0x56d   : > { %13663 = vmatmul.mubr.msk.f32.gmra.mrb[14].mxu1 %vm584_vm0, %v19683_v57 }
 0x56e   : > { %13665 = vmatprep.mubr.msk.f32.mxu1 %vm584_vm0, %v19684_v6 }
 0x571   : > { %13666 = vmatmul.mubr.msk.f32.gmra.mrb[16].mxu1 %vm584_vm0, %v19685_v9 }
 0x572   : > { %13668 = vmatprep.mubr.msk.f32.mxu1 %vm584_vm0, %v19686_v25 }
 0x575   : > { %13669 = vmatmul.mubr.msk.f32.gmra.mrb[18].mxu1 %vm584_vm0, %v19687_v40 }
 0x576   : > { %13671 = vmatprep.mubr.msk.f32.mxu1 %vm584_vm0, %v19688_v17 }
 0x579   : > { %13672 = vmatmul.mubr.msk.f32.gmra.mrb[20].mxu1 %vm584_vm0, %v19689_v54 }
 0x57a   : > { %13674 = vmatprep.mubr.msk.f32.mxu1 %vm584_vm0, %v19690_v32 }
 0x57d   : > { %13675 = vmatmul.mubr.msk.f32.gmra.mrb[22].mxu1 %vm584_vm0, %v19691_v37 }
 0x57e   : > { %13677 = vmatprep.mubr.msk.f32.mxu1 %vm584_vm0, %v19692_v52 }
 0x581   : > { %13678 = vmatmul.mubr.msk.f32.gmra.mrb[24].mxu1 %vm584_vm0, %v19693_v44 }
 0x582   : > { %13680 = vmatprep.mubr.msk.f32.mxu1 %vm584_vm0, %v19694_v50 }
 0x585   : > { %13681 = vmatmul.mubr.msk.f32.gmra.mrb[26].mxu1 %vm584_vm0, %v19695_v41 }
 0x586   : > { %13683 = vmatprep.mubr.msk.f32.mxu1 %vm584_vm0, %v19661_v5 }
 0x589   : > { %13684 = vmatmul.mubr.msk.f32.gmra.mrb[28].mxu1 %vm584_vm0, %v19696_v36 }
 0x58a   : > { %13686 = vmatprep.mubr.msk.f32.mxu1 %vm584_vm0, %v19697_v47 }
 0x58d   : > { %13687 = vmatmul.mubr.msk.f32.gmra.mrb[30].mxu1 %vm584_vm0, %v19664_v2 }
 0x58e   : > { %13689 = vmatprep.mubr.msk.f32.mxu1 %vm584_vm0, %v19698_v60 }
 0x591   : > { %13690 = vmatmul.mubr.msk.f32.gmra.mrb[32].mxu1 %vm584_vm0, %v19666_v33 }
 0x592   : > { %13692 = vmatprep.mubr.msk.f32.mxu1 %vm584_vm0, %v17810_v23 }
 0x595   : > { %13693 = vmatmul.mubr.msk.f32.gmra.mrb[34].mxu1 %vm584_vm0, %v17815_v48 }
 0x596   : > { %13695 = vmatprep.mubr.msk.f32.mxu1 %vm584_vm0, %v5839_v30 }
 0x599   : > { %13696 = vmatmul.mubr.msk.f32.gmra.mrb[36].mxu1 %vm584_vm0, %v5841_v13 }
 0x59a   : > { %13700 = vmatprep.mubr.msk.f32.mxu1 %vm584_vm0, %v17500_v43  ;;  %v19702_v43 = vld [vmem:[#allocation52_spill] sm:$0xff] }
 0x59d   : > { %13701 = vmatmul.mubr.msk.f32.vlgmr.msra.gmra.mrb[6].mxu1 %vm584_vm0, %v17507_v15  ;;  %v19703_v15 = vld [vmem:[#allocation53_spill] sm:$0xff] }
 0x59e   : > { %13703 = vmatprep.mubr.msk.f32.mxu1 %vm584_vm0, %v19667_v55 }
 0x5a1   : > { %13704 = vmatmul.mubr.msk.f32.gmra.mrb[8].mxu1 %vm584_vm0, %v17520_v31  ;;  %v19705_v31 = vld [vmem:[#allocation56_spill] sm:$0xff] }
 0x5a2   : > { %13706 = vmatprep.mubr.msk.f32.mxu1 %vm584_vm0, %v19668_v56 }
 0x5a5   : > { %13707 = vmatmul.mubr.msk.f32.gmra.mrb[10].mxu1 %vm584_vm0, %v17533_v18  ;;  %v19704_v18 = vld [vmem:[#allocation55_spill] sm:$0xff] }
 0x5a6   : > { %13709 = vmatprep.mubr.msk.f32.mxu1 %vm584_vm0, %v19699_v53 }
 0x5a9   : > { %13710 = vmatmul.mubr.msk.f32.gmra.mrb[12].mxu1 %vm584_vm0, %v17546_v34  ;;  %v19706_v34 = vld [vmem:[#allocation60_spill] sm:$0xff] }
 0x5aa   : > { %13712 = vmatprep.mubr.msk.f32.mxu1 %vm584_vm0, %v19700_v20 }
 0x5ad   : > { %13713 = vmatmul.mubr.msk.f32.gmra.mrb[14].mxu1 %vm584_vm0, %v17559_v59  ;;  %v19707_v59 = vld [vmem:[#allocation61_spill] sm:$0xff] }
 0x5ae   : > { %13715 = vmatprep.mubr.msk.f32.mxu1 %vm584_vm0, %v19701_v58 }
 0x5b1   : > { %13716 = vmatmul.mubr.msk.f32.gmra.mrb[16].mxu1 %vm584_vm0, %v17572_v16  ;;  %v19708_v16 = vld [vmem:[#allocation63_spill] sm:$0xff] }
 0x5b2   : > { %13718 = vmatprep.mubr.msk.f32.mxu1 %vm584_vm0, %v19702_v43 }
 0x5b5   : > { %13719 = vmatmul.mubr.msk.f32.gmra.mrb[18].mxu1 %vm584_vm0, %v17585_v63  ;;  %v19709_v63 = vld [vmem:[#allocation64_spill] sm:$0xff] }
 0x5b6   : > { %13721 = vmatprep.mubr.msk.f32.mxu1 %vm584_vm0, %v19703_v15 }
 0x5b9   : > { %13722 = vmatmul.mubr.msk.f32.gmra.mrb[20].mxu1 %vm584_vm0, %v17598_v14  ;;  %v6105_v14 = vrot.slane %v17949_v10, 2 }
 0x5ba   : > { %13724 = vmatprep.mubr.msk.f32.mxu1 %vm584_vm0, %v19674_v0 }
 0x5bb   : > { %v6107_v29 = vsel %vm1437_vm3, %v6105_v14, %v6106_v46 }
 0x5bd   : > { %13725 = vmatmul.mubr.msk.f32.gmra.mrb[22].mxu1 %vm584_vm0, %v19704_v18 }
 0x5be   : > { %13727 = vmatprep.mubr.msk.f32.mxu1 %vm584_vm0, %v19705_v31 }
 0x5c1   : > { %13728 = vmatmul.mubr.msk.f32.gmra.mrb[24].mxu1 %vm584_vm0, %v17624_v28  ;;  %v6108_v28 = vrot.slane %v3656_v61, 2 }
 0x5c2   : > { %13730 = vmatprep.mubr.msk.f32.mxu1 %vm584_vm0, %v19676_v62 }
 0x5c5   : > { %13731 = vmatmul.mubr.msk.f32.gmra.mrb[26].mxu1 %vm584_vm0, %v19706_v34 }
 0x5c6   : > { %13733 = vmatprep.mubr.msk.f32.mxu1 %vm584_vm0, %v19707_v59 }
 0x5c9   : > { %13734 = vmatmul.mubr.msk.f32.gmra.mrb[28].mxu1 %vm584_vm0, %v17650_v26  ;;  %v6109_v26 = vsel %vm1437_vm3, %v6106_v46, %v6108_v28 }
 0x5ca   : > { %13736 = vmatprep.mubr.msk.f32.mxu1 %vm584_vm0, %v19708_v16 }
 0x5cd   : > { %13737 = vmatmul.mubr.msk.f32.gmra.mrb[30].mxu1 %vm584_vm0, %v17663_v22  ;;  %v6445_v22 = vld [vmem:[#allocation14 + $0x8] sm:$0xff] }
 0x5ce   : > { %13739 = vmatprep.mubr.msk.f32.mxu1 %vm584_vm0, %v19709_v63  ;;  %6524 = vmatprep.mubr.f32.mxu0 %v6445_v22 }
 0x5d1   : > { %13740 = vmatmul.mubr.msk.f32.gmra.mrb[32].mxu1 %vm584_vm0, %v17674_v39  ;;  %v11604_v39 = vld [vmem:[%s19295_s5 + $0x18] sm:$0xff] }
 0x5d2   : > { %13742 = vmatprep.mubr.msk.f32.mxu1 %vm584_vm0, %v17882_v35  ;;  %v14285_v49 = vpack.c.bf16 %v11604_v39, %v11603_v1 }
 0x5d4   : > { %14286 = vmatprep.subr.bf16.mxu1 %v14285_v49 }
 0x5d5   : > { %13743 = vmatmul.mubr.msk.f32.gmra.mrb[34].mxu1 %vm584_vm0, %v17887_v8  ;;  %v18100_v8 = vld [vmem:[%s19294_s4] ss:$0 sm:$0xff] }
 0x5d6   : > { %13745 = vmatprep.mubr.msk.f32.mxu1 %vm584_vm0, %v6107_v29  ;;  %14288 = vmatpush3.bf16.msra.mxu1 %v14285_v49 }
 0x5d9   : > { %13746 = vmatmul.mubr.msk.f32.gmra.mrb[36].mxu1 %vm584_vm0, %v6109_v26  ;;  %vm10888_vm0 = vcmask 519168  }
 0x670   : > { %v13702_v7 = vpop.f32.mrb[6].mxu1 }
 0x671   : > { %v6381_v42 = vadd.f32 %v13702_v7, %v18100_v8  ;;  %v6182_v33 = vpop.f32.mrb[7].mxu1 }
 0x672   : > { %v6380_v4 = vadd.f32 %v18100_v8, %v6182_v33 }
 0x673   : > { %v6413_v5 = vmax.f32 %v6381_v42, 0.0 }
 0x674   : > { %v6412_v23 = vmax.f32 %v6380_v4, 0.0  ;;  %v13705_v48 = vpop.f32.mrb[8].mxu1 }
 0x675   : > { %v6383_v2 = vadd.f32 %v13705_v48, %v18100_v8  ;;  %v6192_v55 = vpop.f32.mrb[9].mxu1 }
 0x676   : > { %v18105_v56 = vpack.c.bf16 %v6413_v5, %v6412_v23  ;;  %v6382_v35 = vadd.f32 %v18100_v8, %v6192_v55 }
 0x677   : > { %v6415_v0 = vmax.f32 %v6383_v2, 0.0 }
 0x678   : > { %v6414_v51 = vmax.f32 %v6382_v35, 0.0  ;;  %v13708_v62 = vpop.f32.mrb[10].mxu1 }
 0x679   : > { %v6385_v10 = vadd.f32 %v13708_v62, %v18100_v8  ;;  %v6202_v27 = vpop.f32.mrb[11].mxu1 }
 0x67a   : > { %v18109_v45 = vpack.c.bf16 %v6415_v0, %v6414_v51  ;;  %v6384_v38 = vadd.f32 %v18100_v8, %v6202_v27 }
 0x67b   : > { %v6417_v3 = vmax.f32 %v6385_v10, 0.0 }
 0x67c   : > { %v6416_v12 = vmax.f32 %v6384_v38, 0.0  ;;  %v13711_v11 = vpop.f32.mrb[12].mxu1 }
 0x67d   : > { %v6387_v57 = vadd.f32 %v13711_v11, %v18100_v8  ;;  %v6212_v6 = vpop.f32.mrb[13].mxu1 }
 0x67e   : > { %v18113_v9 = vpack.c.bf16 %v6417_v3, %v6416_v12  ;;  %v6386_v25 = vadd.f32 %v18100_v8, %v6212_v6 }
 0x67f   : > { %v6419_v40 = vmax.f32 %v6387_v57, 0.0 }
 0x680   : > { %v6418_v17 = vmax.f32 %v6386_v25, 0.0  ;;  %v13714_v54 = vpop.f32.mrb[14].mxu1 }
 0x681   : > { %v6389_v32 = vadd.f32 %v13714_v54, %v18100_v8  ;;  %v6222_v37 = vpop.f32.mrb[15].mxu1 }
 0x682   : > { %v18117_v52 = vpack.c.bf16 %v6419_v40, %v6418_v17  ;;  %v6388_v44 = vadd.f32 %v18100_v8, %v6222_v37 }
 0x683   : > { %v6421_v50 = vmax.f32 %v6389_v32, 0.0 }
 0x684   : > { %v6420_v41 = vmax.f32 %v6388_v44, 0.0  ;;  %v13717_v36 = vpop.f32.mrb[16].mxu1 }
 0x685   : > { %v6391_v47 = vadd.f32 %v13717_v36, %v18100_v8  ;;  %v6232_v60 = vpop.f32.mrb[17].mxu1 }
 0x686   : > { %v18121_v24 = vpack.c.bf16 %v6421_v50, %v6420_v41  ;;  %v6390_v19 = vadd.f32 %v18100_v8, %v6232_v60 }
 0x687   : > { %v6423_v61 = vmax.f32 %v6391_v47, 0.0 }
 0x688   : > { %v6422_v21 = vmax.f32 %v6390_v19, 0.0  ;;  %v13720_v30 = vpop.f32.mrb[18].mxu1 }
 0x689   : > { %v6393_v13 = vadd.f32 %v13720_v30, %v18100_v8  ;;  %v6242_v53 = vpop.f32.mrb[19].mxu1 }
 0x68a   : > { %v18125_v20 = vpack.c.bf16 %v6423_v61, %v6422_v21  ;;  %v6392_v58 = vadd.f32 %v18100_v8, %v6242_v53 }
 0x68b   : > { %v6425_v43 = vmax.f32 %v6393_v13, 0.0 }
 0x68c   : > { %v6424_v15 = vmax.f32 %v6392_v58, 0.0  ;;  %v13723_v18 = vpop.f32.mrb[20].mxu1 }
 0x68d   : > { %v6395_v31 = vadd.f32 %v13723_v18, %v18100_v8  ;;  %v6252_v34 = vpop.f32.mrb[21].mxu1 }
 0x68e   : > { %v18129_v59 = vpack.c.bf16 %v6425_v43, %v6424_v15  ;;  %v6394_v16 = vadd.f32 %v18100_v8, %v6252_v34  ;;  %v6444_v34 = vld [vmem:[#allocation14] sm:$0xff] }
 0x68f   : > { %v6427_v63 = vmax.f32 %v6395_v31, 0.0 }
 0x690   : > { %v6426_v14 = vmax.f32 %v6394_v16, 0.0  ;;  %v13726_v46 = vpop.f32.mrb[22].mxu1  ;;  %v6447_v16 = vld [vmem:[#allocation14 + $0x18] sm:$0xff] }
 0x691   : > { %v6397_v28 = vadd.f32 %v13726_v46, %v18100_v8  ;;  %v6262_v29 = vpop.f32.mrb[23].mxu1  ;;  %v6451_v46 = vld [vmem:[#allocation14 + $0x38] sm:$0xff] }
 0x692   : > { %v18133_v26 = vpack.c.bf16 %v6427_v63, %v6426_v14  ;;  %v6396_v22 = vadd.f32 %v18100_v8, %v6262_v29  ;;  %v6446_v63 = vld [vmem:[#allocation14 + $0x10] sm:$0xff]  ;;  %v6449_v14 = vld [vmem:[#allocation14 + $0x28] sm:$0xff]  ;;  %v6455_v29 = vld [vmem:[#allocation14 + $0x58] sm:$0xff] }
 0x693   : > { %v6429_v1 = vmax.f32 %v6397_v28, 0.0  ;;  %v6453_v28 = vld [vmem:[#allocation14 + $0x48] sm:$0xff] }
 0x694   : > { %v6428_v39 = vmax.f32 %v6396_v22, 0.0  ;;  %v13729_v49 = vpop.f32.mrb[24].mxu1  ;;  %v6457_v22 = vld [vmem:[#allocation14 + $0x68] sm:$0xff] }
 0x695   : > { %v6399_v7 = vadd.f32 %v13729_v49, %v18100_v8  ;;  %v6272_v42 = vpop.f32.mrb[25].mxu1  ;;  %v6458_v49 = vld [vmem:[#allocation14 + $0x70] sm:$0xff] }
 0x696   : > { %v14253_v33 = vpack.c.bf16 %v6429_v1, %v6428_v39  ;;  %v6398_v4 = vadd.f32 %v18100_v8, %v6272_v42  ;;  %v6456_v1 = vld [vmem:[#allocation14 + $0x60] sm:$0xff]  ;;  %v6459_v39 = vld [vmem:[#allocation14 + $0x78] sm:$0xff] }
 0x697   : > { %v6431_v5 = vmax.f32 %v6399_v7, 0.0  ;;  %v19710_v7 = vmov 0.0  }
 0x698   : > { %v6430_v23 = vmax.f32 %v6398_v4, 0.0  ;;  %v13732_v48 = vpop.f32.mrb[26].mxu1  ;;  %14254 = vmatprep.subr.bf16.mxu0 %v14253_v33  ;;  %6569 = vst.msk [vmem:[#allocation4 + $0x10] sm:$0xff] %vm6565_vm4, %v19710_v7  ;;  %6566 = vst.msk [vmem:[#allocation4] sm:$0xff] %vm6565_vm4, %v19710_v7 }
 0x699   : > { %v6401_v2 = vadd.f32 %v13732_v48, %v18100_v8  ;;  %v6282_v55 = vpop.f32.mrb[27].mxu1  ;;  %14256 = vmatpush3.bf16.msra.mxu0 %v18105_v56  ;;  %6570 = vst.msk [vmem:[#allocation4 + $0x18] sm:$0x3] %vm6567_vm5, %v19710_v7  ;;  %6568 = vst.msk [vmem:[#allocation4 + $0x8] sm:$0x3] %vm6567_vm5, %v19710_v7  ;;  %v6616_v48 = vld [vmem:[%s19295_s5] sm:$0xff] }
 0x69a   : > { %v14257_v35 = vpack.c.bf16 %v6431_v5, %v6430_v23  ;;  %v6400_v0 = vadd.f32 %v18100_v8, %v6282_v55  ;;  %6571 = vst.msk [vmem:[#allocation4 + $0x20] sm:$0xff] %vm6565_vm4, %v19710_v7  ;;  %6573 = vst.msk [vmem:[#allocation4 + $0x30] sm:$0xff] %vm6565_vm4, %v19710_v7 }
 0x69b   : > { %v6433_v51 = vmax.f32 %v6401_v2, 0.0  ;;  %6572 = vst.msk [vmem:[#allocation4 + $0x28] sm:$0x3] %vm6567_vm5, %v19710_v7  ;;  %6574 = vst.msk [vmem:[#allocation4 + $0x38] sm:$0x3] %vm6567_vm5, %v19710_v7  ;;  %v6617_v2 = vld [vmem:[%s19295_s5 + $0x8] sm:$0xff] }
 0x69c   : > { %v6432_v62 = vmax.f32 %v6400_v0, 0.0  ;;  %v13735_v10 = vpop.f32.mrb[28].mxu1  ;;  %14258 = vmatprep.subr.bf16.mxu0 %v14257_v35  ;;  %6575 = vst.msk [vmem:[#allocation4 + $0x40] sm:$0xff] %vm6565_vm4, %v19710_v7  ;;  %6577 = vst.msk [vmem:[#allocation4 + $0x50] sm:$0xff] %vm6565_vm4, %v19710_v7  ;;  %v14289_v55 = vpack.c.bf16 %v6617_v2, %v6616_v48 }
 0x69d   : > { %v6403_v27 = vadd.f32 %v13735_v10, %v18100_v8  ;;  %v6292_v38 = vpop.f32.mrb[29].mxu1  ;;  %14260 = vmatpush3.bf16.msra.mxu0 %v18109_v45  ;;  %6576 = vst.msk [vmem:[#allocation4 + $0x48] sm:$0x3] %vm6567_vm5, %v19710_v7  ;;  %6578 = vst.msk [vmem:[#allocation4 + $0x58] sm:$0x3] %vm6567_vm5, %v19710_v7 }
 0x69e   : > { %v14261_v3 = vpack.c.bf16 %v6433_v51, %v6432_v62  ;;  %v6402_v12 = vadd.f32 %v18100_v8, %v6292_v38  ;;  %6579 = vst.msk [vmem:[#allocation4 + $0x60] sm:$0xff] %vm6565_vm4, %v19710_v7  ;;  %6581 = vst.msk [vmem:[#allocation4 + $0x70] sm:$0xff] %vm6565_vm4, %v19710_v7  ;;  %14290 = vmatprep.subr.bf16.mxu1 %v14289_v55 }
 0x69f   : > { %v6435_v11 = vmax.f32 %v6403_v27, 0.0  ;;  %6580 = vst.msk [vmem:[#allocation4 + $0x68] sm:$0x3] %vm6567_vm5, %v19710_v7  ;;  %6582 = vst.msk [vmem:[#allocation4 + $0x78] sm:$0x3] %vm6567_vm5, %v19710_v7  ;;  %v18238_v42 = vld [vmem:[#allocation4] sm:$0xff] }
 0x6a0   : > { %v6434_v57 = vmax.f32 %v6402_v12, 0.0  ;;  %v13738_v6 = vpop.f32.mrb[30].mxu1  ;;  %14262 = vmatprep.subr.bf16.mxu0 %v14261_v3  ;;  %6583 = vst.msk [vmem:[#allocation4 + $0x80] sm:$0xff] %vm6565_vm4, %v19710_v7  ;;  %6585 = vst.msk [vmem:[#allocation4 + $0x90] sm:$0xff] %vm6565_vm4, %v19710_v7  ;;  %v18240_v33 = vld [vmem:[#allocation4 + $0x8] sm:$0x3] }
 0x6a1   : > { %v6405_v56 = vadd.f32 %v13738_v6, %v18100_v8  ;;  %v6302_v25 = vpop.f32.mrb[31].mxu1  ;;  %14264 = vmatpush3.bf16.msra.mxu0 %v18113_v9  ;;  %6584 = vst.msk [vmem:[#allocation4 + $0x88] sm:$0x3] %vm6567_vm5, %v19710_v7  ;;  %6586 = vst.msk [vmem:[#allocation4 + $0x98] sm:$0x3] %vm6567_vm5, %v19710_v7  ;;  %v6634_v4 = vrot.slane %v18238_v42, 1 }
 0x6a2   : > { %v14265_v40 = vpack.c.bf16 %v6435_v11, %v6434_v57  ;;  %v6404_v17 = vadd.f32 %v18100_v8, %v6302_v25  ;;  %7806 = vst.msk [vmem:[#allocation5] sm:$0xff] %vm6565_vm4, %v19710_v7  ;;  %7808 = vst.msk [vmem:[#allocation5 + $0x10] sm:$0xff] %vm6565_vm4, %v19710_v7  ;;  %v6635_v5 = vrot.slane %v18240_v33, 1  ;;  %v11621_v11 = vld [vmem:[%s19295_s5 + $0x20] sm:$0xff]  ;;  %v11622_v57 = vld [vmem:[%s19295_s5 + $0x28] sm:$0xff] }
 0x6a3   : > { %v6437_v54 = vmax.f32 %v6405_v56, 0.0  ;;  %7807 = vst.msk [vmem:[#allocation5 + $0x8] sm:$0x3] %vm6567_vm5, %v19710_v7  ;;  %7809 = vst.msk [vmem:[#allocation5 + $0x18] sm:$0x3] %vm6567_vm5, %v19710_v7 }
 0x6a4   : > { %v6436_v32 = vmax.f32 %v6404_v17, 0.0  ;;  %v13741_v37 = vpop.f32.mrb[32].mxu1  ;;  %14266 = vmatprep.subr.bf16.mxu0 %v14265_v40  ;;  %7810 = vst.msk [vmem:[#allocation5 + $0x20] sm:$0xff] %vm6565_vm4, %v19710_v7  ;;  %7812 = vst.msk [vmem:[#allocation5 + $0x30] sm:$0xff] %vm6565_vm4, %v19710_v7  ;;  %v6636_v23 = vsel %vm776_vm2, %v6634_v4, %v6635_v5 }
 0x6a5   : > { %v6407_v45 = vadd.f32 %v13741_v37, %v18100_v8  ;;  %v6312_v44 = vpop.f32.mrb[33].mxu1  ;;  %14268 = vmatpush3.bf16.msra.mxu0 %v18117_v52  ;;  %7811 = vst.msk [vmem:[#allocation5 + $0x28] sm:$0x3] %vm6567_vm5, %v19710_v7  ;;  %7813 = vst.msk [vmem:[#allocation5 + $0x38] sm:$0x3] %vm6567_vm5, %v19710_v7  ;;  %13752 = vmatprep.mubr.msk.f32.mxu1 %vm6565_vm4, %v6636_v23 }
 0x6a6   : > { %v14269_v50 = vpack.c.bf16 %v6437_v54, %v6436_v32  ;;  %v6406_v41 = vadd.f32 %v18100_v8, %v6312_v44  ;;  %7814 = vst.msk [vmem:[#allocation5 + $0x40] sm:$0xff] %vm6565_vm4, %v19710_v7  ;;  %7816 = vst.msk [vmem:[#allocation5 + $0x50] sm:$0xff] %vm6565_vm4, %v19710_v7  ;;  %v18267_v32 = vpack.c.bf16 %v11622_v57, %v11621_v11  ;;  %v11641_v11 = vld [vmem:[%s19295_s5 + $0x40] sm:$0xff] }
 0x6a7   : > { %v6439_v36 = vmax.f32 %v6407_v45, 0.0  ;;  %7815 = vst.msk [vmem:[#allocation5 + $0x48] sm:$0x3] %vm6567_vm5, %v19710_v7  ;;  %7817 = vst.msk [vmem:[#allocation5 + $0x58] sm:$0x3] %vm6567_vm5, %v19710_v7 }
 0x6a8   : > { %v6438_v47 = vmax.f32 %v6406_v41, 0.0  ;;  %v13744_v60 = vpop.f32.mrb[34].mxu1  ;;  %14270 = vmatprep.subr.bf16.mxu0 %v14269_v50  ;;  %7818 = vst.msk [vmem:[#allocation5 + $0x60] sm:$0xff] %vm6565_vm4, %v19710_v7  ;;  %7820 = vst.msk [vmem:[#allocation5 + $0x70] sm:$0xff] %vm6565_vm4, %v19710_v7 }
 0x6a9   : > { %v6409_v9 = vadd.f32 %v13744_v60, %v18100_v8  ;;  %v6322_v19 = vpop.f32.mrb[35].mxu1  ;;  %14272 = vmatpush3.bf16.msra.mxu0 %v18121_v24  ;;  %7819 = vst.msk [vmem:[#allocation5 + $0x68] sm:$0x3] %vm6567_vm5, %v19710_v7  ;;  %7821 = vst.msk [vmem:[#allocation5 + $0x78] sm:$0x3] %vm6567_vm5, %v19710_v7 }
 0x6aa   : > { %v14273_v61 = vpack.c.bf16 %v6439_v36, %v6438_v47  ;;  %v6408_v21 = vadd.f32 %v18100_v8, %v6322_v19  ;;  %7822 = vst.msk [vmem:[#allocation5 + $0x80] sm:$0xff] %vm6565_vm4, %v19710_v7  ;;  %7824 = vst.msk [vmem:[#allocation5 + $0x90] sm:$0xff] %vm6565_vm4, %v19710_v7 }
 0x6ab   : > { %v6441_v30 = vmax.f32 %v6409_v9, 0.0  ;;  %7823 = vst.msk [vmem:[#allocation5 + $0x88] sm:$0x3] %vm6567_vm5, %v19710_v7  ;;  %7825 = vst.msk [vmem:[#allocation5 + $0x98] sm:$0x3] %vm6567_vm5, %v19710_v7 }
 0x6ac   : > { %v6440_v13 = vmax.f32 %v6408_v21, 0.0  ;;  %v13747_v53 = vpop.f32.mrb[36].mxu1  ;;  %14274 = vmatprep.subr.bf16.mxu0 %v14273_v61  ;;  %9139 = vst.msk [vmem:[#allocation6 + $0x18] sm:$0x3f] %vm9135_vm7, %v19710_v7  ;;  %9140 = vst.msk [vmem:[#allocation6 + $0x20] sm:$0x3f] %vm9135_vm7, %v19710_v7 }
 0x6ad   : > { %v6411_v52 = vadd.f32 %v13747_v53, %v18100_v8  ;;  %v6332_v58 = vpop.f32.mrb[37].mxu1  ;;  %14276 = vmatpush3.bf16.msra.mxu0 %v18125_v20  ;;  %v6448_v20 = vld [vmem:[#allocation14 + $0x20] sm:$0xff]  ;;  %9136 = vst.msk [vmem:[#allocation6] sm:$0x3f] %vm9135_vm7, %v19710_v7  ;;  %9137 = vst.msk [vmem:[#allocation6 + $0x8] sm:$0x3f] %vm9135_vm7, %v19710_v7 }
 0x6ae   : > { %v14277_v43 = vpack.c.bf16 %v6441_v30, %v6440_v13  ;;  %v6410_v15 = vadd.f32 %v18100_v8, %v6332_v58  ;;  %v6450_v8 = vld [vmem:[#allocation14 + $0x30] sm:$0xff]  ;;  %9138 = vst.msk [vmem:[#allocation6 + $0x10] sm:$0x3f] %vm9135_vm7, %v19710_v7  ;;  %9141 = vst.msk [vmem:[#allocation6 + $0x28] sm:$0x3f] %vm9135_vm7, %v19710_v7 }
 0x6af   : > { %v6443_v18 = vmax.f32 %v6411_v52, 0.0  ;;  %10016 = vst.msk [vmem:[#allocation7] sm:$0x3f] %vm9135_vm7, %v19710_v7  ;;  %10017 = vst.msk [vmem:[#allocation7 + $0x8] sm:$0x3f] %vm9135_vm7, %v19710_v7 }
 0x6b0   : > { %v6442_v31 = vmax.f32 %v6410_v15, 0.0  ;;  %14278 = vmatprep.subr.bf16.mxu0 %v14277_v43  ;;  %10018 = vst.msk [vmem:[#allocation7 + $0x10] sm:$0x3f] %vm9135_vm7, %v19710_v7  ;;  %10019 = vst.msk [vmem:[#allocation7 + $0x18] sm:$0x3f] %vm9135_vm7, %v19710_v7 }
 0x6b1   : > { %14280 = vmatpush3.bf16.msra.mxu0 %v18129_v59  ;;  %v6452_v59 = vld [vmem:[#allocation14 + $0x40] sm:$0xff]  ;;  %10020 = vst.msk [vmem:[#allocation7 + $0x20] sm:$0x3f] %vm9135_vm7, %v19710_v7  ;;  %10021 = vst.msk [vmem:[#allocation7 + $0x28] sm:$0x3f] %vm9135_vm7, %v19710_v7 }
 0x6b2   : > { %v14281_v24 = vpack.c.bf16 %v6443_v18, %v6442_v31  ;;  %v9154_v7 = vld [vmem:[%s19299_s9] sm:$0xff] }
 0x6b4   : > { %14282 = vmatprep.subr.bf16.mxu0 %v14281_v24 }
 0x6b5   : > { %14284 = vmatpush3.bf16.msra.mxu0 %v18133_v26  ;;  %v6454_v26 = vld [vmem:[#allocation14 + $0x50] sm:$0xff] }
 0x6b8   : > { %6525 = vmatmul.mubr.f32.vlgmr.msra.gmra.mrb[32].mxu0 %v6444_v34 }
 0x6b9   : > { %6529 = vmatprep.mubr.f32.mxu0 %v6447_v16 }
 0x6bc   : > { %6530 = vmatmul.mubr.f32.gmra.mrb[34].mxu0 %v6446_v63 }
 0x6bd   : > { %6534 = vmatprep.mubr.f32.mxu0 %v6449_v14 }
 0x6c0   : > { %6535 = vmatmul.mubr.f32.gmra.mrb[36].mxu0 %v6448_v20 }
 0x6c1   : > { %6539 = vmatprep.mubr.f32.mxu0 %v6451_v46 }
 0x6c4   : > { %6540 = vmatmul.mubr.f32.gmra.mrb[38].mxu0 %v6450_v8 }
 0x6c5   : > { %6544 = vmatprep.mubr.f32.mxu0 %v6453_v28 }
 0x6c8   : > { %6545 = vmatmul.mubr.f32.gmra.mrb[40].mxu0 %v6452_v59 }
 0x6c9   : > { %6549 = vmatprep.mubr.f32.mxu0 %v6455_v29 }
 0x6cc   : > { %6550 = vmatmul.mubr.f32.gmra.mrb[42].mxu0 %v6454_v26 }
 0x6cd   : > { %6554 = vmatprep.mubr.f32.mxu0 %v6457_v22 }
 0x6d0   : > { %6555 = vmatmul.mubr.f32.gmra.mrb[44].mxu0 %v6456_v1 }
 0x6d1   : > { %6559 = vmatprep.mubr.f32.mxu0 %v6459_v39 }
 0x6d4   : > { %6560 = vmatmul.mubr.f32.gmra.mrb[46].mxu0 %v6458_v49 }
 0x78b   : > { %v12526_v35 = vpop.f32.mrb[32].mxu0 }
 0x78c   : > { %v12527_v0 = vpop.f32.mrb[33].mxu0 }
 0x78d   : > { %v12528_v51 = vadd.f32 %v12527_v0, %v12526_v35  ;;  %v11631_v0 = vld [vmem:[%s19295_s5 + $0x30] sm:$0xff] }
 0x78f   : > { %6588 = vst.msk [vmem:[#allocation4 + $0x11] sm:$0xff] %vm6565_vm4, %v12528_v51  ;;  %v12529_v62 = vpop.f32.mrb[34].mxu0  ;;  %v11632_v51 = vld [vmem:[%s19295_s5 + $0x38] sm:$0xff] }
 0x790   : > { %v12530_v10 = vpop.f32.mrb[35].mxu0 }
 0x791   : > { %v12531_v27 = vadd.f32 %v12530_v10, %v12529_v62  ;;  %v14297_v62 = vpack.c.bf16 %v11632_v51, %v11631_v0  ;;  %v6903_v10 = vrot.slane %v18238_v42, 2 }
 0x793   : > { %6589 = vst.msk [vmem:[#allocation4 + $0x21] sm:$0xff] %vm6565_vm4, %v12531_v27  ;;  %v12532_v38 = vpop.f32.mrb[36].mxu0  ;;  %v6904_v27 = vrot.slane %v18240_v33, 2 }
 0x794   : > { %v12533_v3 = vpop.f32.mrb[37].mxu0 }
 0x795   : > { %v12534_v12 = vadd.f32 %v12533_v3, %v12532_v38  ;;  %v6905_v38 = vsel %vm1437_vm3, %v6903_v10, %v6904_v27  ;;  %v7855_v10 = vld [vmem:[#allocation13] sm:$0xff]  ;;  %v7856_v27 = vld [vmem:[#allocation13 + $0x8] sm:$0xff] }
 0x796   : > { %v18260_v6 = vld [vmem:[#allocation4 + $0x10] sm:$0xff]  ;;  %v18262_v56 = vld [vmem:[#allocation4 + $0x18] sm:$0x3] }
 0x797   : > { %6590 = vst.msk [vmem:[#allocation4 + $0x31] sm:$0xff] %vm6565_vm4, %v12534_v12  ;;  %v12535_v25 = vpop.f32.mrb[38].mxu0  ;;  %v6637_v40 = vrot.slane %v18260_v6, 1  ;;  %v6638_v17 = vrot.slane %v18262_v56, 1  ;;  %v6906_v3 = vrot.slane %v18260_v6, 2  ;;  %v6907_v12 = vrot.slane %v18262_v56, 2 }
 0x798   : > { %v12536_v54 = vpop.f32.mrb[39].mxu0 }
 0x799   : > { %v12537_v37 = vadd.f32 %v12536_v54, %v12535_v25  ;;  %v18270_v45 = vsel %vm776_vm2, %v6637_v40, %v6638_v17  ;;  %v6908_v56 = vsel %vm1437_vm3, %v6906_v3, %v6907_v12  ;;  %v11691_v3 = vld [vmem:[%s19296_s6] ss:$0 sm:$0xff] }
 0x79a   : > { %13753 = vmatmul.mubr.msk.f32.vlgmr.msra.gmra.mrb[38].mxu1 %vm6565_vm4, %v18270_v45  ;;  %v18274_v44 = vld [vmem:[#allocation4 + $0x20] sm:$0xff]  ;;  %v18276_v50 = vld [vmem:[#allocation4 + $0x28] sm:$0x3] }
 0x79b   : > { %6591 = vst.msk [vmem:[#allocation4 + $0x41] sm:$0xff] %vm6565_vm4, %v12537_v37  ;;  %v12538_v41 = vpop.f32.mrb[40].mxu0  ;;  %v6640_v36 = vrot.slane %v18274_v44, 1  ;;  %v6641_v47 = vrot.slane %v18276_v50, 1  ;;  %14292 = vmatpush3.bf16.msra.mxu1 %v14289_v55  ;;  %v6909_v33 = vrot.slane %v18274_v44, 2  ;;  %v6910_v57 = vrot.slane %v18276_v50, 2 }
 0x79c   : > { %v12539_v60 = vpop.f32.mrb[41].mxu0  ;;  %14294 = vmatprep.subr.bf16.mxu1 %v18267_v32 }
 0x79d   : > { %v12540_v9 = vadd.f32 %v12539_v60, %v12538_v41  ;;  %v18283_v19 = vsel %vm776_vm2, %v6640_v36, %v6641_v47  ;;  %v18382_v54 = vsel %vm1437_vm3, %v6909_v33, %v6910_v57 }
 0x79e   : > { %13755 = vmatprep.mubr.msk.f32.mxu1 %vm6565_vm4, %v18283_v19  ;;  %v18287_v61 = vld [vmem:[#allocation4 + $0x30] sm:$0xff]  ;;  %v18289_v21 = vld [vmem:[#allocation4 + $0x38] sm:$0x3] }
 0x79f   : > { %6592 = vst.msk [vmem:[#allocation4 + $0x51] sm:$0xff] %vm6565_vm4, %v12540_v9  ;;  %v12541_v30 = vpop.f32.mrb[42].mxu0  ;;  %v6643_v13 = vrot.slane %v18287_v61, 1  ;;  %v6644_v53 = vrot.slane %v18289_v21, 1  ;;  %v6912_v40 = vrot.slane %v18287_v61, 2  ;;  %v6913_v17 = vrot.slane %v18289_v21, 2 }
 0x7a0   : > { %v12542_v52 = vpop.f32.mrb[43].mxu0 }
 0x7a1   : > { %v12543_v58 = vadd.f32 %v12542_v52, %v12541_v30  ;;  %v18295_v43 = vsel %vm776_vm2, %v6643_v13, %v6644_v53  ;;  %v18389_v50 = vsel %vm1437_vm3, %v6912_v40, %v6913_v17 }
 0x7a2   : > { %13756 = vmatmul.mubr.msk.f32.gmra.mrb[40].mxu1 %vm6565_vm4, %v18295_v43  ;;  %v18299_v15 = vld [vmem:[#allocation4 + $0x40] sm:$0xff]  ;;  %v18301_v18 = vld [vmem:[#allocation4 + $0x48] sm:$0x3] }
 0x7a3   : > { %6593 = vst.msk [vmem:[#allocation4 + $0x61] sm:$0xff] %vm6565_vm4, %v12543_v58  ;;  %v12544_v31 = vpop.f32.mrb[44].mxu0  ;;  %v6646_v24 = vrot.slane %v18299_v15, 1  ;;  %v6647_v34 = vrot.slane %v18301_v18, 1  ;;  %v6916_v37 = vrot.slane %v18301_v18, 2  ;;  %v11651_v58 = vld [vmem:[%s19295_s5 + $0x50] sm:$0xff] }
 0x7a4   : > { %v12545_v16 = vpop.f32.mrb[45].mxu0  ;;  %v11652_v18 = vld [vmem:[%s19295_s5 + $0x58] sm:$0xff] }
 0x7a5   : > { %v12546_v63 = vadd.f32 %v12545_v16, %v12544_v31  ;;  %v18307_v14 = vsel %vm776_vm2, %v6646_v24, %v6647_v34  ;;  %v14305_v31 = vpack.c.bf16 %v11652_v18, %v11651_v58  ;;  %v11661_v24 = vld [vmem:[%s19295_s5 + $0x60] sm:$0xff]  ;;  %v11662_v34 = vld [vmem:[%s19295_s5 + $0x68] sm:$0xff] }
 0x7a6   : > { %13758 = vmatprep.mubr.msk.f32.mxu1 %vm6565_vm4, %v18307_v14  ;;  %v18311_v20 = vld [vmem:[#allocation4 + $0x50] sm:$0xff]  ;;  %v18313_v46 = vld [vmem:[#allocation4 + $0x58] sm:$0x3]  ;;  %v14309_v16 = vpack.c.bf16 %v11662_v34, %v11661_v24 }
 0x7a7   : > { %6594 = vst.msk [vmem:[#allocation4 + $0x71] sm:$0xff] %vm6565_vm4, %v12546_v63  ;;  %v6649_v8 = vrot.slane %v18311_v20, 1  ;;  %v6650_v28 = vrot.slane %v18313_v46, 1  ;;  %v12547_v59 = vpop.f32.mrb[46].mxu0  ;;  %v6918_v41 = vrot.slane %v18311_v20, 2  ;;  %v6919_v36 = vrot.slane %v18313_v46, 2 }
 0x7a8   : > { %v12548_v29 = vpop.f32.mrb[47].mxu0 }
 0x7a9   : > { %v18319_v26 = vsel %vm776_vm2, %v6649_v8, %v6650_v28  ;;  %v12549_v22 = vadd.f32 %v12548_v29, %v12547_v59  ;;  %v18402_v21 = vsel %vm1437_vm3, %v6918_v41, %v6919_v36  ;;  %v11671_v28 = vld [vmem:[%s19295_s5 + $0x70] sm:$0xff]  ;;  %v11672_v59 = vld [vmem:[%s19295_s5 + $0x78] sm:$0xff] }
 0x7aa   : > { %13759 = vmatmul.mubr.msk.f32.gmra.mrb[42].mxu1 %vm6565_vm4, %v18319_v26  ;;  %v18323_v1 = vld [vmem:[#allocation4 + $0x60] sm:$0xff]  ;;  %v6609_v39 = vld [vmem:[#allocation4 + $0x68] sm:$0x3]  ;;  %v14313_v29 = vpack.c.bf16 %v11672_v59, %v11671_v28 }
 0x7ab   : > { %v6652_v49 = vrot.slane %v18323_v1, 1  ;;  %v6653_v4 = vrot.slane %v6609_v39, 1  ;;  %6595 = vst.msk [vmem:[#allocation4 + $0x81] sm:$0xff] %vm6565_vm4, %v12549_v22  ;;  %v6921_v60 = vrot.slane %v18323_v1, 2  ;;  %v6922_v9 = vrot.slane %v6609_v39, 2 }
 0x7ad   : > { %v18328_v5 = vsel %vm776_vm2, %v6652_v49, %v6653_v4  ;;  %v18408_v53 = vsel %vm1437_vm3, %v6921_v60, %v6922_v9  ;;  %v11681_v4 = vld [vmem:[%s19295_s5 + $0x80] sm:$0xff]  ;;  %v8167_v9 = vld [vmem:[#allocation13 + $0x20] sm:$0xff] }
 0x7ae   : > { %13761 = vmatprep.mubr.msk.f32.mxu1 %vm6565_vm4, %v18328_v5  ;;  %v18332_v23 = vld [vmem:[#allocation4 + $0x70] sm:$0xff]  ;;  %v6611_v48 = vld [vmem:[#allocation4 + $0x78] sm:$0x3] }
 0x7af   : > { %v6655_v2 = vrot.slane %v18332_v23, 1  ;;  %v6656_v55 = vrot.slane %v6611_v48, 1  ;;  %v6924_v30 = vrot.slane %v18332_v23, 2  ;;  %v6925_v13 = vrot.slane %v6611_v48, 2  ;;  %v11682_v48 = vld [vmem:[%s19295_s5 + $0x88] sm:$0xff] }
 0x7b1   : > { %v18336_v35 = vsel %vm776_vm2, %v6655_v2, %v6656_v55  ;;  %v18413_v52 = vsel %vm1437_vm3, %v6924_v30, %v6925_v13  ;;  %v14317_v2 = vpack.c.bf16 %v11682_v48, %v11681_v4  ;;  %v18531_v55 = vld [vmem:[#allocation5] sm:$0xff] }
 0x7b2   : > { %13762 = vmatmul.mubr.msk.f32.gmra.mrb[44].mxu1 %vm6565_vm4, %v18336_v35  ;;  %v6613_v63 = vld [vmem:[#allocation4 + $0x88] sm:$0x3]  ;;  %v7873_v0 = vrot.slane %v18531_v55, 1 }
 0x7b3   : > { %13768 = vmatprep.mubr.msk.f32.mxu1 %vm6565_vm4, %v18238_v42  ;;  %v11642_v42 = vld [vmem:[%s19295_s5 + $0x48] sm:$0xff]  ;;  %v7180_v8 = vrot.slane %v6613_v63, 1  ;;  %v7301_v39 = vrot.slane %v6613_v63, 2 }
 0x7b4   : > { %v14301_v25 = vpack.c.bf16 %v11642_v42, %v11641_v11 }
 0x7b6   : > { %13769 = vmatmul.mubr.msk.f32.vlgmr.msra.gmra.mrb[38].mxu1 %vm6565_vm4, %v18260_v6 }
 0x7b7   : > { %13771 = vmatprep.mubr.msk.f32.mxu1 %vm6565_vm4, %v18274_v44  ;;  %14296 = vmatpush3.bf16.msra.mxu1 %v18267_v32  ;;  %v6915_v32 = vrot.slane %v18299_v15, 2 }
 0x7b8   : > { %14298 = vmatprep.subr.bf16.mxu1 %v14297_v62 }
 0x7b9   : > { %v18396_v47 = vsel %vm1437_vm3, %v6915_v32, %v6916_v37 }
 0x7ba   : > { %13772 = vmatmul.mubr.msk.f32.gmra.mrb[40].mxu1 %vm6565_vm4, %v18287_v61 }
 0x7bb   : > { %13774 = vmatprep.mubr.msk.f32.mxu1 %vm6565_vm4, %v18299_v15 }
 0x7be   : > { %13775 = vmatmul.mubr.msk.f32.gmra.mrb[42].mxu1 %vm6565_vm4, %v18311_v20 }
 0x7bf   : > { %13777 = vmatprep.mubr.msk.f32.mxu1 %vm6565_vm4, %v18323_v1 }
 0x7c2   : > { %13778 = vmatmul.mubr.msk.f32.gmra.mrb[44].mxu1 %vm6565_vm4, %v18332_v23 }
 0x7c3   : > { %13784 = vmatprep.mubr.msk.f32.mxu1 %vm6565_vm4, %v6905_v38  ;;  %v14325_v38 = vpack.c.bf16 %v7856_v27, %v7855_v10 }
 0x7c6   : > { %13785 = vmatmul.mubr.msk.f32.vlgmr.msra.gmra.mrb[38].mxu1 %vm6565_vm4, %v6908_v56 }
 0x7c7   : > { %13787 = vmatprep.mubr.msk.f32.mxu1 %vm6565_vm4, %v18382_v54  ;;  %14300 = vmatpush3.bf16.msra.mxu1 %v14297_v62 }
 0x7c8   : > { %14302 = vmatprep.subr.bf16.mxu1 %v14301_v25 }
 0x7ca   : > { %13788 = vmatmul.mubr.msk.f32.gmra.mrb[40].mxu1 %vm6565_vm4, %v18389_v50 }
 0x7cb   : > { %13790 = vmatprep.mubr.msk.f32.mxu1 %vm6565_vm4, %v18396_v47 }
 0x7ce   : > { %13791 = vmatmul.mubr.msk.f32.gmra.mrb[42].mxu1 %vm6565_vm4, %v18402_v21 }
 0x7cf   : > { %13793 = vmatprep.mubr.msk.f32.mxu1 %vm6565_vm4, %v18408_v53 }
 0x7d2   : > { %13794 = vmatmul.mubr.msk.f32.gmra.mrb[44].mxu1 %vm6565_vm4, %v18413_v52 }
 0x7d3   : > { %13800 = vmatprep.mubr.msk.f32.mxu1 %vm6565_vm4, %v18260_v6  ;;  %v6612_v6 = vld [vmem:[#allocation4 + $0x80] sm:$0xff] }
 0x7d4   : > { %v7179_v46 = vrot.slane %v6612_v6, 1  ;;  %v7300_v22 = vrot.slane %v6612_v6, 2 }
 0x7d6   : > { %13801 = vmatmul.mubr.msk.f32.vlgmr.msra.gmra.mrb[38].mxu1 %vm6565_vm4, %v18274_v44  ;;  %v7302_v49 = vsel %vm1437_vm3, %v7300_v22, %v7301_v39 }
 0x7d7   : > { %13803 = vmatprep.mubr.msk.f32.mxu1 %vm6565_vm4, %v18287_v61  ;;  %14304 = vmatpush3.bf16.msra.mxu1 %v14301_v25 }
 0x7d8   : > { %14306 = vmatprep.subr.bf16.mxu1 %v14305_v31 }
 0x7da   : > { %13804 = vmatmul.mubr.msk.f32.gmra.mrb[40].mxu1 %vm6565_vm4, %v18299_v15 }
 0x7db   : > { %13806 = vmatprep.mubr.msk.f32.mxu1 %vm6565_vm4, %v18311_v20 }
 0x7de   : > { %13807 = vmatmul.mubr.msk.f32.gmra.mrb[42].mxu1 %vm6565_vm4, %v18323_v1 }
 0x7df   : > { %13809 = vmatprep.mubr.msk.f32.mxu1 %vm6565_vm4, %v18332_v23 }
 0x7e2   : > { %13810 = vmatmul.mubr.msk.f32.gmra.mrb[44].mxu1 %vm6565_vm4, %v6612_v6 }
 0x7e3   : > { %13816 = vmatprep.mubr.msk.f32.mxu1 %vm6565_vm4, %v18270_v45  ;;  %v7181_v45 = vsel %vm776_vm2, %v7179_v46, %v7180_v8 }
 0x7e6   : > { %13817 = vmatmul.mubr.msk.f32.vlgmr.msra.gmra.mrb[38].mxu1 %vm6565_vm4, %v18283_v19 }
 0x7e7   : > { %13819 = vmatprep.mubr.msk.f32.mxu1 %vm6565_vm4, %v18295_v43  ;;  %14308 = vmatpush3.bf16.msra.mxu1 %v14305_v31 }
 0x7e8   : > { %14310 = vmatprep.subr.bf16.mxu1 %v14309_v16 }
 0x7ea   : > { %13820 = vmatmul.mubr.msk.f32.gmra.mrb[40].mxu1 %vm6565_vm4, %v18307_v14 }
 0x7eb   : > { %13822 = vmatprep.mubr.msk.f32.mxu1 %vm6565_vm4, %v18319_v26 }
 0x7ee   : > { %13823 = vmatmul.mubr.msk.f32.gmra.mrb[42].mxu1 %vm6565_vm4, %v18328_v5 }
 0x7ef   : > { %13825 = vmatprep.mubr.msk.f32.mxu1 %vm6565_vm4, %v18336_v35 }
 0x7f2   : > { %13826 = vmatmul.mubr.msk.f32.gmra.mrb[44].mxu1 %vm6565_vm4, %v7181_v45 }
 0x7f3   : > { %13832 = vmatprep.mubr.msk.f32.mxu1 %vm6565_vm4, %v6908_v56 }
 0x7f6   : > { %13833 = vmatmul.mubr.msk.f32.vlgmr.msra.gmra.mrb[38].mxu1 %vm6565_vm4, %v18382_v54 }
 0x7f7   : > { %13835 = vmatprep.mubr.msk.f32.mxu1 %vm6565_vm4, %v18389_v50  ;;  %14312 = vmatpush3.bf16.msra.mxu1 %v14309_v16 }
 0x7f8   : > { %14314 = vmatprep.subr.bf16.mxu1 %v14313_v29 }
 0x7fa   : > { %13836 = vmatmul.mubr.msk.f32.gmra.mrb[40].mxu1 %vm6565_vm4, %v18396_v47 }
 0x7fb   : > { %13838 = vmatprep.mubr.msk.f32.mxu1 %vm6565_vm4, %v18402_v21 }
 0x7fe   : > { %13839 = vmatmul.mubr.msk.f32.gmra.mrb[42].mxu1 %vm6565_vm4, %v18408_v53 }
 0x7ff   : > { %13841 = vmatprep.mubr.msk.f32.mxu1 %vm6565_vm4, %v18413_v52 }
 0x802   : > { %13842 = vmatmul.mubr.msk.f32.gmra.mrb[44].mxu1 %vm6565_vm4, %v7302_v49 }
 0x803   : > { %13848 = vmatprep.mubr.msk.f32.mxu1 %vm6565_vm4, %v18274_v44  ;;  %v6614_v44 = vld [vmem:[#allocation4 + $0x90] sm:$0xff] }
 0x806   : > { %13849 = vmatmul.mubr.msk.f32.vlgmr.msra.gmra.mrb[38].mxu1 %vm6565_vm4, %v18287_v61  ;;  %v6615_v61 = vld [vmem:[#allocation4 + $0x98] sm:$0x3] }
 0x807   : > { %13851 = vmatprep.mubr.msk.f32.mxu1 %vm6565_vm4, %v18299_v15  ;;  %14316 = vmatpush3.bf16.msra.mxu1 %v14313_v29  ;;  %v7541_v15 = vrot.slane %v6614_v44, 1 }
 0x808   : > { %14318 = vmatprep.subr.bf16.mxu1 %v14317_v2 }
 0x80a   : > { %13852 = vmatmul.mubr.msk.f32.gmra.mrb[40].mxu1 %vm6565_vm4, %v18311_v20  ;;  %v7542_v20 = vrot.slane %v6615_v61, 1 }
 0x80b   : > { %13854 = vmatprep.mubr.msk.f32.mxu1 %vm6565_vm4, %v18323_v1  ;;  %v7898_v1 = vld [vmem:[#allocation13 + $0x10] sm:$0xff] }
 0x80e   : > { %13855 = vmatmul.mubr.msk.f32.gmra.mrb[42].mxu1 %vm6565_vm4, %v18332_v23 }
 0x80f   : > { %13857 = vmatprep.mubr.msk.f32.mxu1 %vm6565_vm4, %v6612_v6 }
 0x812   : > { %13858 = vmatmul.mubr.msk.f32.gmra.mrb[44].mxu1 %vm6565_vm4, %v6614_v44 }
 0x813   : > { %13864 = vmatprep.mubr.msk.f32.mxu1 %vm6565_vm4, %v18283_v19  ;;  %v7543_v19 = vsel %vm776_vm2, %v7541_v15, %v7542_v20 }
 0x816   : > { %13865 = vmatmul.mubr.msk.f32.vlgmr.msra.gmra.mrb[38].mxu1 %vm6565_vm4, %v18295_v43  ;;  %v7662_v43 = vrot.slane %v6614_v44, 2 }
 0x817   : > { %13867 = vmatprep.mubr.msk.f32.mxu1 %vm6565_vm4, %v18307_v14  ;;  %14320 = vmatpush3.bf16.msra.mxu1 %v14317_v2  ;;  %v7663_v14 = vrot.slane %v6615_v61, 2 }
 0x81a   : > { %13868 = vmatmul.mubr.msk.f32.gmra.mrb[40].mxu1 %vm6565_vm4, %v18319_v26  ;;  %v7664_v26 = vsel %vm1437_vm3, %v7662_v43, %v7663_v14 }
 0x81b   : > { %13870 = vmatprep.mubr.msk.f32.mxu1 %vm6565_vm4, %v18328_v5  ;;  %v7899_v5 = vld [vmem:[#allocation13 + $0x18] sm:$0xff] }
 0x81c   : > { %v14321_v23 = vpack.c.bf16 %v7899_v5, %v7898_v1 }
 0x81e   : > { %13871 = vmatmul.mubr.msk.f32.gmra.mrb[42].mxu1 %vm6565_vm4, %v18336_v35  ;;  %v18533_v35 = vld [vmem:[#allocation5 + $0x8] sm:$0x3]  ;;  %14322 = vmatprep.subr.bf16.mxu0 %v14321_v23 }
 0x81f   : > { %13873 = vmatprep.mubr.msk.f32.mxu1 %vm6565_vm4, %v7181_v45  ;;  %v7874_v51 = vrot.slane %v18533_v35, 1  ;;  %14324 = vmatpush3.bf16.msra.mxu0 %v14321_v23 }
 0x820   : > { %14326 = vmatprep.subr.bf16.mxu0 %v14325_v38 }
 0x821   : > { %v7875_v62 = vsel %vm776_vm2, %v7873_v0, %v7874_v51 }
 0x822   : > { %13874 = vmatmul.mubr.msk.f32.gmra.mrb[44].mxu1 %vm6565_vm4, %v7543_v19  ;;  %13896 = vmatprep.mubr.msk.f32.mxu0 %vm6565_vm4, %v7875_v62 }
 0x823   : > { %13880 = vmatprep.mubr.msk.f32.mxu1 %vm6565_vm4, %v18382_v54 }
 0x826   : > { %13881 = vmatmul.mubr.msk.f32.vlgmr.msra.gmra.mrb[38].mxu1 %vm6565_vm4, %v18389_v50 }
 0x827   : > { %13883 = vmatprep.mubr.msk.f32.mxu1 %vm6565_vm4, %v18396_v47 }
 0x82a   : > { %13884 = vmatmul.mubr.msk.f32.gmra.mrb[40].mxu1 %vm6565_vm4, %v18402_v21 }
 0x82b   : > { %13886 = vmatprep.mubr.msk.f32.mxu1 %vm6565_vm4, %v18408_v53 }
 0x82e   : > { %13887 = vmatmul.mubr.msk.f32.gmra.mrb[42].mxu1 %vm6565_vm4, %v18413_v52  ;;  %v8168_v52 = vld [vmem:[#allocation13 + $0x28] sm:$0xff] }
 0x82f   : > { %13889 = vmatprep.mubr.msk.f32.mxu1 %vm6565_vm4, %v7302_v49  ;;  %v14329_v45 = vpack.c.bf16 %v8168_v52, %v8167_v9 }
 0x832   : > { %13890 = vmatmul.mubr.msk.f32.gmra.mrb[44].mxu1 %vm6565_vm4, %v7664_v26 }
 0x8f9   : > { %v13882_v12 = vpop.f32.mrb[38].mxu1 }
 0x8fa   : > { %v7791_v11 = vadd.f32 %v13882_v12, %v11691_v3  ;;  %v7736_v42 = vpop.f32.mrb[39].mxu1 }
 0x8fb   : > { %v7790_v33 = vadd.f32 %v11691_v3, %v7736_v42  ;;  %v8300_v42 = vld [vmem:[#allocation13 + $0x38] sm:$0xff] }
 0x8fc   : > { %v7799_v57 = vmax.f32 %v7791_v11, 0.0  ;;  %v8299_v11 = vld [vmem:[#allocation13 + $0x30] sm:$0xff] }
 0x8fd   : > { %v7798_v25 = vmax.f32 %v7790_v33, 0.0  ;;  %v13885_v56 = vpop.f32.mrb[40].mxu1  ;;  %v14333_v33 = vpack.c.bf16 %v8300_v42, %v8299_v11 }
 0x8fe   : > { %7828 = vst.msk [vmem:[#allocation5 + $0x21] sm:$0xff] %vm6565_vm4, %v7799_v57  ;;  %v7793_v40 = vadd.f32 %v13885_v56, %v11691_v3  ;;  %v7746_v17 = vpop.f32.mrb[41].mxu1  ;;  %v8142_v57 = vrot.slane %v18531_v55, 2 }
 0x8ff   : > { %7827 = vst.msk [vmem:[#allocation5 + $0x11] sm:$0xff] %vm6565_vm4, %v7798_v25  ;;  %v7792_v54 = vadd.f32 %v11691_v3, %v7746_v17  ;;  %v8143_v25 = vrot.slane %v18533_v35, 2 }
 0x900   : > { %v7801_v32 = vmax.f32 %v7793_v40, 0.0 }
 0x901   : > { %v7800_v37 = vmax.f32 %v7792_v54, 0.0  ;;  %v13888_v50 = vpop.f32.mrb[42].mxu1  ;;  %v8144_v56 = vsel %vm1437_vm3, %v8142_v57, %v8143_v25  ;;  %v8422_v54 = vld [vmem:[#allocation13 + $0x40] sm:$0xff] }
 0x902   : > { %7830 = vst.msk [vmem:[#allocation5 + $0x41] sm:$0xff] %vm6565_vm4, %v7801_v32  ;;  %v7795_v41 = vadd.f32 %v13888_v50, %v11691_v3  ;;  %v7756_v36 = vpop.f32.mrb[43].mxu1  ;;  %v8423_v32 = vld [vmem:[#allocation13 + $0x48] sm:$0xff] }
 0x903   : > { %7829 = vst.msk [vmem:[#allocation5 + $0x31] sm:$0xff] %vm6565_vm4, %v7800_v37  ;;  %v7794_v47 = vadd.f32 %v11691_v3, %v7756_v36  ;;  %v14337_v37 = vpack.c.bf16 %v8423_v32, %v8422_v54 }
 0x904   : > { %v7803_v60 = vmax.f32 %v7795_v41, 0.0 }
 0x905   : > { %v7802_v21 = vmax.f32 %v7794_v47, 0.0  ;;  %v13891_v30 = vpop.f32.mrb[44].mxu1  ;;  %v18546_v13 = vld [vmem:[#allocation5 + $0x20] sm:$0xff]  ;;  %v18548_v53 = vld [vmem:[#allocation5 + $0x28] sm:$0x3] }
 0x906   : > { %7832 = vst.msk [vmem:[#allocation5 + $0x61] sm:$0xff] %vm6565_vm4, %v7803_v60  ;;  %v7797_v58 = vadd.f32 %v13891_v30, %v11691_v3  ;;  %v7766_v18 = vpop.f32.mrb[45].mxu1  ;;  %v18551_v31 = vld [vmem:[#allocation5 + $0x10] sm:$0xff]  ;;  %v18553_v6 = vld [vmem:[#allocation5 + $0x18] sm:$0x3]  ;;  %v7879_v24 = vrot.slane %v18546_v13, 1 }
 0x907   : > { %v7880_v34 = vrot.slane %v18548_v53, 1  ;;  %7831 = vst.msk [vmem:[#allocation5 + $0x51] sm:$0xff] %vm6565_vm4, %v7802_v21  ;;  %v7796_v16 = vadd.f32 %v11691_v3, %v7766_v18  ;;  %v7876_v63 = vrot.slane %v18551_v31, 1  ;;  %v7877_v46 = vrot.slane %v18553_v6, 1 }
 0x908   : > { %v7805_v8 = vmax.f32 %v7797_v58, 0.0  ;;  %v8145_v40 = vrot.slane %v18551_v31, 2  ;;  %v8146_v17 = vrot.slane %v18553_v6, 2  ;;  %v8149_v35 = vrot.slane %v18548_v53, 2 }
 0x909   : > { %v7804_v28 = vmax.f32 %v7796_v16, 0.0  ;;  %v18561_v59 = vsel %vm776_vm2, %v7876_v63, %v7877_v46  ;;  %v18563_v29 = vld [vmem:[#allocation5 + $0x40] sm:$0xff]  ;;  %v18565_v22 = vld [vmem:[#allocation5 + $0x48] sm:$0x3]  ;;  %v18571_v39 = vsel %vm776_vm2, %v7879_v24, %v7880_v34 }
 0x90a   : > { %7834 = vst.msk [vmem:[#allocation5 + $0x81] sm:$0xff] %vm6565_vm4, %v7805_v8  ;;  %13897 = vmatmul.mubr.msk.f32.vlgmr.msra.gmra.mrb[48].mxu0 %vm6565_vm4, %v18561_v59  ;;  %v18573_v49 = vld [vmem:[#allocation5 + $0x30] sm:$0xff]  ;;  %v18575_v4 = vld [vmem:[#allocation5 + $0x38] sm:$0x3]  ;;  %v7885_v48 = vrot.slane %v18563_v29, 1  ;;  %v7886_v2 = vrot.slane %v18565_v22, 1  ;;  %v8147_v50 = vsel %vm1437_vm3, %v8145_v40, %v8146_v17 }
 0x90b   : > { %7833 = vst.msk [vmem:[#allocation5 + $0x71] sm:$0xff] %vm6565_vm4, %v7804_v28  ;;  %13899 = vmatprep.mubr.msk.f32.mxu0 %vm6565_vm4, %v18571_v39  ;;  %v7882_v44 = vrot.slane %v18573_v49, 1  ;;  %v7883_v61 = vrot.slane %v18575_v4, 1  ;;  %14328 = vmatpush3.bf16.msra.mxu0 %v14325_v38  ;;  %v8151_v41 = vrot.slane %v18573_v49, 2  ;;  %v8152_v36 = vrot.slane %v18575_v4, 2  ;;  %v8543_v46 = vld [vmem:[#allocation13 + $0x50] sm:$0xff] }
 0x90c   : > { %14330 = vmatprep.subr.bf16.mxu0 %v14329_v45  ;;  %v18594_v43 = vsel %vm776_vm2, %v7885_v48, %v7886_v2  ;;  %v8154_v60 = vrot.slane %v18563_v29, 2  ;;  %v8155_v9 = vrot.slane %v18565_v22, 2  ;;  %v8544_v8 = vld [vmem:[#allocation13 + $0x58] sm:$0xff]  ;;  %v8661_v28 = vld [vmem:[#allocation13 + $0x60] sm:$0xff]  ;;  %v8662_v22 = vld [vmem:[#allocation13 + $0x68] sm:$0xff] }
 0x90d   : > { %v18585_v15 = vsel %vm776_vm2, %v7882_v44, %v7883_v61  ;;  %v18587_v20 = vld [vmem:[#allocation5 + $0x60] sm:$0xff]  ;;  %v18589_v19 = vld [vmem:[#allocation5 + $0x68] sm:$0x3]  ;;  %v18657_v21 = vsel %vm1437_vm3, %v8151_v41, %v8152_v36  ;;  %v14345_v4 = vpack.c.bf16 %v8662_v22, %v8661_v28 }
 0x90e   : > { %13900 = vmatmul.mubr.msk.f32.gmra.mrb[50].mxu0 %vm6565_vm4, %v18585_v15  ;;  %v18596_v14 = vld [vmem:[#allocation5 + $0x50] sm:$0xff]  ;;  %v7846_v26 = vld [vmem:[#allocation5 + $0x58] sm:$0x3]  ;;  %v7891_v1 = vrot.slane %v18587_v20, 1  ;;  %v7892_v5 = vrot.slane %v18589_v19, 1  ;;  %v18663_v52 = vsel %vm1437_vm3, %v8154_v60, %v8155_v9  ;;  %v8160_v58 = vrot.slane %v18587_v20, 2 }
 0x90f   : > { %13902 = vmatprep.mubr.msk.f32.mxu0 %vm6565_vm4, %v18594_v43  ;;  %v7888_v23 = vrot.slane %v18596_v14, 1  ;;  %v7889_v0 = vrot.slane %v7846_v26, 1  ;;  %v8157_v30 = vrot.slane %v18596_v14, 2  ;;  %v8158_v53 = vrot.slane %v7846_v26, 2  ;;  %v8784_v61 = vld [vmem:[#allocation13 + $0x70] sm:$0xff] }
 0x910   : > { %v18609_v62 = vsel %vm776_vm2, %v7891_v1, %v7892_v5  ;;  %v8161_v18 = vrot.slane %v18589_v19, 2  ;;  %v8785_v19 = vld [vmem:[#allocation13 + $0x78] sm:$0xff]  ;;  %v9148_v22 = vld [vmem:[#allocation6] sm:$0x3f] }
 0x911   : > { %v18604_v51 = vsel %vm776_vm2, %v7888_v23, %v7889_v0  ;;  %v18670_v6 = vsel %vm1437_vm3, %v8157_v30, %v8158_v53  ;;  %v7852_v48 = vld [vmem:[#allocation5 + $0x88] sm:$0x3]  ;;  %v14349_v26 = vpack.c.bf16 %v8785_v19, %v8784_v61  ;;  %v8905_v0 = vld [vmem:[#allocation13 + $0x80] sm:$0xff] }
 0x912   : > { %13903 = vmatmul.mubr.msk.f32.gmra.mrb[52].mxu0 %vm6565_vm4, %v18604_v51  ;;  %v18611_v10 = vld [vmem:[#allocation5 + $0x70] sm:$0xff]  ;;  %v7850_v27 = vld [vmem:[#allocation5 + $0x78] sm:$0x3]  ;;  %v18676_v16 = vsel %vm1437_vm3, %v8160_v58, %v8161_v18  ;;  %v8419_v44 = vrot.slane %v7852_v48, 1  ;;  %v8540_v5 = vrot.slane %v7852_v48, 2 }
 0x913   : > { %13905 = vmatprep.mubr.msk.f32.mxu0 %vm6565_vm4, %v18609_v62  ;;  %v7894_v38 = vrot.slane %v18611_v10, 1  ;;  %v7895_v3 = vrot.slane %v7850_v27, 1  ;;  %v8163_v24 = vrot.slane %v18611_v10, 2  ;;  %v8164_v34 = vrot.slane %v7850_v27, 2  ;;  %v8906_v27 = vld [vmem:[#allocation13 + $0x88] sm:$0xff] }
 0x915   : > { %v18617_v12 = vsel %vm776_vm2, %v7894_v38, %v7895_v3  ;;  %v18681_v63 = vsel %vm1437_vm3, %v8163_v24, %v8164_v34  ;;  %v14353_v38 = vpack.c.bf16 %v8906_v27, %v8905_v0  ;;  %v11771_v24 = vld [vmem:[%s19299_s9 + $0x20] sm:$0xff]  ;;  %v11772_v34 = vld [vmem:[%s19299_s9 + $0x28] sm:$0xff] }
 0x916   : > { %13906 = vmatmul.mubr.msk.f32.gmra.mrb[54].mxu0 %vm6565_vm4, %v18617_v12 }
 0x917   : > { %13912 = vmatprep.mubr.msk.f32.mxu0 %vm6565_vm4, %v18531_v55  ;;  %v8148_v55 = vrot.slane %v18546_v13, 2 }
 0x919   : > { %v18650_v47 = vsel %vm1437_vm3, %v8148_v55, %v8149_v35 }
 0x91a   : > { %13913 = vmatmul.mubr.msk.f32.vlgmr.msra.gmra.mrb[48].mxu0 %vm6565_vm4, %v18551_v31 }
 0x91b   : > { %13915 = vmatprep.mubr.msk.f32.mxu0 %vm6565_vm4, %v18546_v13  ;;  %14332 = vmatpush3.bf16.msra.mxu0 %v14329_v45  ;;  %v14341_v45 = vpack.c.bf16 %v8544_v8, %v8543_v46  ;;  %v11774_v46 = vld [vmem:[%s19299_s9 + $0x38] sm:$0xff] }
 0x91c   : > { %14334 = vmatprep.subr.bf16.mxu0 %v14333_v33 }
 0x91e   : > { %13916 = vmatmul.mubr.msk.f32.gmra.mrb[50].mxu0 %vm6565_vm4, %v18573_v49 }
 0x91f   : > { %13918 = vmatprep.mubr.msk.f32.mxu0 %vm6565_vm4, %v18563_v29 }
 0x922   : > { %13919 = vmatmul.mubr.msk.f32.gmra.mrb[52].mxu0 %vm6565_vm4, %v18596_v14 }
 0x923   : > { %13921 = vmatprep.mubr.msk.f32.mxu0 %vm6565_vm4, %v18587_v20 }
 0x926   : > { %13922 = vmatmul.mubr.msk.f32.gmra.mrb[54].mxu0 %vm6565_vm4, %v18611_v10 }
 0x927   : > { %13928 = vmatprep.mubr.msk.f32.mxu0 %vm6565_vm4, %v8144_v56 }
 0x92a   : > { %13929 = vmatmul.mubr.msk.f32.vlgmr.msra.gmra.mrb[48].mxu0 %vm6565_vm4, %v8147_v50 }
 0x92b   : > { %13931 = vmatprep.mubr.msk.f32.mxu0 %vm6565_vm4, %v18650_v47  ;;  %14336 = vmatpush3.bf16.msra.mxu0 %v14333_v33 }
 0x92c   : > { %14338 = vmatprep.subr.bf16.mxu0 %v14337_v37 }
 0x92e   : > { %13932 = vmatmul.mubr.msk.f32.gmra.mrb[50].mxu0 %vm6565_vm4, %v18657_v21 }
 0x92f   : > { %13934 = vmatprep.mubr.msk.f32.mxu0 %vm6565_vm4, %v18663_v52 }
 0x932   : > { %13935 = vmatmul.mubr.msk.f32.gmra.mrb[52].mxu0 %vm6565_vm4, %v18670_v6 }
 0x933   : > { %13937 = vmatprep.mubr.msk.f32.mxu0 %vm6565_vm4, %v18676_v16 }
 0x936   : > { %13938 = vmatmul.mubr.msk.f32.gmra.mrb[54].mxu0 %vm6565_vm4, %v18681_v63 }
 0x937   : > { %13944 = vmatprep.mubr.msk.f32.mxu0 %vm6565_vm4, %v18551_v31  ;;  %v7851_v31 = vld [vmem:[#allocation5 + $0x80] sm:$0xff] }
 0x938   : > { %v8418_v2 = vrot.slane %v7851_v31, 1  ;;  %v8539_v1 = vrot.slane %v7851_v31, 2 }
 0x93a   : > { %13945 = vmatmul.mubr.msk.f32.vlgmr.msra.gmra.mrb[48].mxu0 %vm6565_vm4, %v18546_v13  ;;  %v8541_v23 = vsel %vm1437_vm3, %v8539_v1, %v8540_v5 }
 0x93b   : > { %13947 = vmatprep.mubr.msk.f32.mxu0 %vm6565_vm4, %v18573_v49  ;;  %14340 = vmatpush3.bf16.msra.mxu0 %v14337_v37 }
 0x93c   : > { %14342 = vmatprep.subr.bf16.mxu0 %v14341_v45 }
 0x93e   : > { %13948 = vmatmul.mubr.msk.f32.gmra.mrb[50].mxu0 %vm6565_vm4, %v18563_v29 }
 0x93f   : > { %13950 = vmatprep.mubr.msk.f32.mxu0 %vm6565_vm4, %v18596_v14 }
 0x942   : > { %13951 = vmatmul.mubr.msk.f32.gmra.mrb[52].mxu0 %vm6565_vm4, %v18587_v20 }
 0x943   : > { %13953 = vmatprep.mubr.msk.f32.mxu0 %vm6565_vm4, %v18611_v10 }
 0x946   : > { %13954 = vmatmul.mubr.msk.f32.gmra.mrb[54].mxu0 %vm6565_vm4, %v7851_v31 }
 0x947   : > { %13960 = vmatprep.mubr.msk.f32.mxu0 %vm6565_vm4, %v18561_v59  ;;  %v8420_v59 = vsel %vm776_vm2, %v8418_v2, %v8419_v44  ;;  %v9162_v44 = vcombine.high %v9148_v22, %v9148_v22 }
 0x949   : > { %v9171_v61 = vrot.slane %v9162_v44, 5 }
 0x94a   : > { %13961 = vmatmul.mubr.msk.f32.vlgmr.msra.gmra.mrb[48].mxu0 %vm6565_vm4, %v18571_v39 }
 0x94b   : > { %13963 = vmatprep.mubr.msk.f32.mxu0 %vm6565_vm4, %v18585_v15  ;;  %14344 = vmatpush3.bf16.msra.mxu0 %v14341_v45  ;;  %v9155_v45 = vld [vmem:[%s19299_s9 + $0x8] sm:$0xff] }
 0x94c   : > { %14346 = vmatprep.subr.bf16.mxu0 %v14345_v4 }
 0x94e   : > { %13964 = vmatmul.mubr.msk.f32.gmra.mrb[50].mxu0 %vm6565_vm4, %v18594_v43 }
 0x94f   : > { %13966 = vmatprep.mubr.msk.f32.mxu0 %vm6565_vm4, %v18604_v51 }
 0x952   : > { %13967 = vmatmul.mubr.msk.f32.gmra.mrb[52].mxu0 %vm6565_vm4, %v18609_v62 }
 0x953   : > { %13969 = vmatprep.mubr.msk.f32.mxu0 %vm6565_vm4, %v18617_v12 }
 0x956   : > { %13970 = vmatmul.mubr.msk.f32.gmra.mrb[54].mxu0 %vm6565_vm4, %v8420_v59 }
 0x957   : > { %13976 = vmatprep.mubr.msk.f32.mxu0 %vm6565_vm4, %v8147_v50 }
 0x95a   : > { %13977 = vmatmul.mubr.msk.f32.vlgmr.msra.gmra.mrb[48].mxu0 %vm6565_vm4, %v18650_v47 }
 0x95b   : > { %13979 = vmatprep.mubr.msk.f32.mxu0 %vm6565_vm4, %v18657_v21  ;;  %14348 = vmatpush3.bf16.msra.mxu0 %v14345_v4 }
 0x95c   : > { %14350 = vmatprep.subr.bf16.mxu0 %v14349_v26 }
 0x95e   : > { %13980 = vmatmul.mubr.msk.f32.gmra.mrb[50].mxu0 %vm6565_vm4, %v18663_v52 }
 0x95f   : > { %13982 = vmatprep.mubr.msk.f32.mxu0 %vm6565_vm4, %v18670_v6 }
 0x962   : > { %13983 = vmatmul.mubr.msk.f32.gmra.mrb[52].mxu0 %vm6565_vm4, %v18676_v16 }
 0x963   : > { %13985 = vmatprep.mubr.msk.f32.mxu0 %vm6565_vm4, %v18681_v63 }
 0x966   : > { %13986 = vmatmul.mubr.msk.f32.gmra.mrb[54].mxu0 %vm6565_vm4, %v8541_v23 }
 0x967   : > { %13992 = vmatprep.mubr.msk.f32.mxu0 %vm6565_vm4, %v18546_v13  ;;  %v7853_v13 = vld [vmem:[#allocation5 + $0x90] sm:$0xff] }
 0x96a   : > { %13993 = vmatmul.mubr.msk.f32.vlgmr.msra.gmra.mrb[48].mxu0 %vm6565_vm4, %v18573_v49  ;;  %v8780_v49 = vrot.slane %v7853_v13, 1 }
 0x96b   : > { %13995 = vmatprep.mubr.msk.f32.mxu0 %vm6565_vm4, %v18563_v29  ;;  %14352 = vmatpush3.bf16.msra.mxu0 %v14349_v26  ;;  %v7854_v29 = vld [vmem:[#allocation5 + $0x98] sm:$0x3] }
 0x96c   : > { %14354 = vmatprep.subr.bf16.mxu0 %v14353_v38 }
 0x96e   : > { %13996 = vmatmul.mubr.msk.f32.gmra.mrb[50].mxu0 %vm6565_vm4, %v18596_v14 }
 0x96f   : > { %13998 = vmatprep.mubr.msk.f32.mxu0 %vm6565_vm4, %v18587_v20  ;;  %v8781_v20 = vrot.slane %v7854_v29, 1 }
 0x972   : > { %13999 = vmatmul.mubr.msk.f32.gmra.mrb[52].mxu0 %vm6565_vm4, %v18611_v10 }
 0x973   : > { %14001 = vmatprep.mubr.msk.f32.mxu0 %vm6565_vm4, %v7851_v31  ;;  %v14381_v31 = vpack.c.bf16 %v9155_v45, %v9154_v7  ;;  %v11797_v7 = vld [vmem:[%s19299_s9 + $0x88] sm:$0xff] }
 0x976   : > { %14002 = vmatmul.mubr.msk.f32.gmra.mrb[54].mxu0 %vm6565_vm4, %v7853_v13 }
 0x977   : > { %14008 = vmatprep.mubr.msk.f32.mxu0 %vm6565_vm4, %v18571_v39  ;;  %v8782_v39 = vsel %vm776_vm2, %v8780_v49, %v8781_v20 }
 0x97a   : > { %14009 = vmatmul.mubr.msk.f32.vlgmr.msra.gmra.mrb[48].mxu0 %vm6565_vm4, %v18585_v15  ;;  %v8901_v15 = vrot.slane %v7853_v13, 2 }
 0x97b   : > { %14011 = vmatprep.mubr.msk.f32.mxu0 %vm6565_vm4, %v18594_v43  ;;  %14356 = vmatpush3.bf16.msra.mxu0 %v14353_v38  ;;  %v8902_v43 = vrot.slane %v7854_v29, 2 }
 0x97d   : > { %v8903_v14 = vsel %vm1437_vm3, %v8901_v15, %v8902_v43 }
 0x97e   : > { %14012 = vmatmul.mubr.msk.f32.gmra.mrb[50].mxu0 %vm6565_vm4, %v18604_v51  ;;  %v9045_v51 = vld [vmem:[%s19304_s14] sm:$0xff] }
 0x97f   : > { %14014 = vmatprep.mubr.msk.f32.mxu0 %vm6565_vm4, %v18609_v62  ;;  %14052 = vmatprep.mubr.msk.f32.mxu1 %vm9047_vm6, %v9045_v51  ;;  %v11764_v62 = vld [vmem:[%s19298_s8] ss:$0 sm:$0xff]  ;;  %v9157_v51 = vld [vmem:[%s19299_s9 + $0x18] sm:$0xff] }
 0x982   : > { %14015 = vmatmul.mubr.msk.f32.gmra.mrb[52].mxu0 %vm6565_vm4, %v18617_v12 }
 0x983   : > { %14017 = vmatprep.mubr.msk.f32.mxu0 %vm6565_vm4, %v8420_v59  ;;  %v11767_v59 = vrot.slane %v9148_v22, 9 }
 0x985   : > { %v9172_v0 = vsel %vm18820_vm11, %v11767_v59, %v9171_v61  ;;  %v11803_v61 = vld [vmem:[%s19299_s9 + $0xa0] sm:$0xff] }
 0x986   : > { %14018 = vmatmul.mubr.msk.f32.gmra.mrb[54].mxu0 %vm6565_vm4, %v8782_v39 }
 0x987   : > { %14024 = vmatprep.mubr.msk.f32.mxu0 %vm6565_vm4, %v18650_v47 }
 0x98a   : > { %14025 = vmatmul.mubr.msk.f32.vlgmr.msra.gmra.mrb[48].mxu0 %vm6565_vm4, %v18657_v21 }
 0x98b   : > { %14027 = vmatprep.mubr.msk.f32.mxu0 %vm6565_vm4, %v18663_v52 }
 0x98e   : > { %14028 = vmatmul.mubr.msk.f32.gmra.mrb[50].mxu0 %vm6565_vm4, %v18670_v6  ;;  %v9046_v6 = vld [vmem:[%s19304_s14 + $0x8] sm:$0xff] }
 0x98f   : > { %14030 = vmatprep.mubr.msk.f32.mxu0 %vm6565_vm4, %v18676_v16  ;;  %v11773_v16 = vld [vmem:[%s19299_s9 + $0x30] sm:$0xff] }
 0x990   : > { %v14377_v8 = vpack.c.bf16 %v11774_v46, %v11773_v16 }
 0x992   : > { %14031 = vmatmul.mubr.msk.f32.gmra.mrb[52].mxu0 %vm6565_vm4, %v18681_v63  ;;  %v14373_v63 = vpack.c.bf16 %v11772_v34, %v11771_v24  ;;  %v11792_v24 = vld [vmem:[%s19299_s9 + $0x78] sm:$0xff] }
 0x993   : > { %14033 = vmatprep.mubr.msk.f32.mxu0 %vm6565_vm4, %v8541_v23 }
 0x996   : > { %14034 = vmatmul.mubr.msk.f32.gmra.mrb[54].mxu0 %vm6565_vm4, %v8903_v14  ;;  %v9156_v14 = vld [vmem:[%s19299_s9 + $0x10] sm:$0xff] }
 0xa5d   : > { %v14026_v10 = vpop.f32.mrb[48].mxu0 }
 0xa5e   : > { %v9030_v3 = vadd.f32 %v14026_v10, %v11764_v62  ;;  %v8975_v12 = vpop.f32.mrb[49].mxu0 }
 0xa5f   : > { %v9029_v11 = vadd.f32 %v11764_v62, %v8975_v12 }
 0xa60   : > { %v9038_v42 = vmax.f32 %v9030_v3, 0.0 }
 0xa61   : > { %v9037_v33 = vmax.f32 %v9029_v11, 0.0  ;;  %v14029_v57 = vpop.f32.mrb[50].mxu0  ;;  %v14385_v11 = vpack.c.bf16 %v9157_v51, %v9156_v14  ;;  %v11811_v51 = vld [vmem:[%s19299_s9 + $0xd0] sm:$0xff] }
 0xa62   : > { %v9032_v25 = vadd.f32 %v14029_v57, %v11764_v62  ;;  %v8985_v56 = vpop.f32.mrb[51].mxu0  ;;  %v11784_v57 = vld [vmem:[%s19299_s9 + $0x48] sm:$0xff] }
 0xa63   : > { %v14357_v40 = vpack.c.bf16 %v9038_v42, %v9037_v33  ;;  %v9031_v17 = vadd.f32 %v11764_v62, %v8985_v56  ;;  %v11783_v33 = vld [vmem:[%s19299_s9 + $0x40] sm:$0xff]  ;;  %v9358_v56 = vrot.slane %v9162_v44, 6 }
 0xa64   : > { %v9040_v54 = vmax.f32 %v9032_v25, 0.0  ;;  %v11779_v25 = vrot.slane %v9148_v22, 10 }
 0xa65   : > { %v9039_v32 = vmax.f32 %v9031_v17, 0.0  ;;  %v14032_v55 = vpop.f32.mrb[52].mxu0  ;;  %14358 = vmatprep.subr.bf16.mxu1 %v14357_v40 }
 0xa66   : > { %v9034_v35 = vadd.f32 %v14032_v55, %v11764_v62  ;;  %v8995_v37 = vpop.f32.mrb[53].mxu0  ;;  %14360 = vmatpush3.bf16.msra.mxu1 %v14357_v40  ;;  %v11785_v55 = vld [vmem:[%s19299_s9 + $0x50] sm:$0xff] }
 0xa67   : > { %v14361_v50 = vpack.c.bf16 %v9040_v54, %v9039_v32  ;;  %v9033_v41 = vadd.f32 %v11764_v62, %v8995_v37  ;;  %v14389_v54 = vpack.c.bf16 %v11784_v57, %v11783_v33  ;;  %v9359_v37 = vsel %vm18875_vm15, %v11779_v25, %v9358_v56  ;;  %v9153_v33 = vld [vmem:[#allocation6 + $0x28] sm:$0x3f]  ;;  %v11818_v25 = vld [vmem:[%s19299_s9 + $0xf0] sm:$0xff]  ;;  %v11819_v56 = vld [vmem:[%s19299_s9 + $0xf8] sm:$0xff] }
 0xa68   : > { %v9042_v36 = vmax.f32 %v9034_v35, 0.0  ;;  %v11786_v35 = vld [vmem:[%s19299_s9 + $0x58] sm:$0xff] }
 0xa69   : > { %v9041_v47 = vmax.f32 %v9033_v41, 0.0  ;;  %v14035_v60 = vpop.f32.mrb[54].mxu0  ;;  %14362 = vmatprep.subr.bf16.mxu1 %v14361_v50 }
 0xa6a   : > { %v9036_v9 = vadd.f32 %v14035_v60, %v11764_v62  ;;  %v9005_v21 = vpop.f32.mrb[55].mxu0  ;;  %14364 = vmatpush3.bf16.msra.mxu1 %v14361_v50 }
 0xa6b   : > { %v14365_v30 = vpack.c.bf16 %v9042_v36, %v9041_v47  ;;  %v9035_v53 = vadd.f32 %v11764_v62, %v9005_v21  ;;  %v14393_v36 = vpack.c.bf16 %v11786_v35, %v11785_v55  ;;  %v11790_v21 = vld [vmem:[%s19299_s9 + $0x68] sm:$0xff]  ;;  %v11815_v55 = vrot.slane %v9153_v33, 9 }
 0xa6c   : > { %v9044_v52 = vmax.f32 %v9036_v9, 0.0  ;;  %v11789_v9 = vld [vmem:[%s19299_s9 + $0x60] sm:$0xff] }
 0xa6d   : > { %v9043_v58 = vmax.f32 %v9035_v53, 0.0  ;;  %14366 = vmatprep.subr.bf16.mxu1 %v14365_v30 }
 0xa6e   : > { %14368 = vmatpush3.bf16.msra.mxu1 %v14365_v30 }
 0xa6f   : > { %v14369_v18 = vpack.c.bf16 %v9044_v52, %v9043_v58  ;;  %v14397_v52 = vpack.c.bf16 %v11790_v21, %v11789_v9 }
 0xa71   : > { %14370 = vmatprep.subr.bf16.mxu1 %v14369_v18 }
 0xa72   : > { %14372 = vmatpush3.bf16.msra.mxu1 %v14369_v18 }
 0xa73   : > { %14374 = vmatprep.subr.bf16.mxu1 %v14373_v63 }
 0xa75   : > { %14053 = vmatmul.mubr.msk.f32.vlgmr.msra.gmra.mrb[46].mxu1 %vm9047_vm6, %v9046_v6  ;;  %v11791_v6 = vld [vmem:[%s19299_s9 + $0x70] sm:$0xff] }
 0xa76   : > { %14376 = vmatpush3.bf16.msra.mxu1 %v14373_v63  ;;  %v14401_v63 = vpack.c.bf16 %v11792_v24, %v11791_v6  ;;  %v11836_v6 = vld [vmem:[%s19301_s11 + $0x30] sm:$0xff] }
 0xa77   : > { %14378 = vmatprep.subr.bf16.mxu1 %v14377_v8 }
 0xa7a   : > { %14380 = vmatpush3.bf16.msra.mxu1 %v14377_v8  ;;  %v11796_v8 = vld [vmem:[%s19299_s9 + $0x80] sm:$0xff] }
 0xa7b   : > { %14382 = vmatprep.subr.bf16.mxu1 %v14381_v31 }
 0xb48   : > { %v14054_v28 = vpop.f32.mrb[46].mxu1 }
 0xb49   : > { %v9132_v4 = vcombine.high %v14054_v28, %v14054_v28  ;;  %9146 = vst.msk [vmem:[#allocation6 + $0x19] sm:$0xf] %vm9143_vm8, %v14054_v28  ;;  %v9120_v48 = vpop.f32.mrb[47].mxu1  ;;  %v11798_v28 = vld [vmem:[%s19299_s9 + $0x90] sm:$0xff] }
 0xb4a   : > { %v9131_v2 = vcombine.high %v9120_v48, %v9120_v48  ;;  %9144 = vst.msk [vmem:[#allocation6 + $0x9] sm:$0xf] %vm9143_vm8, %v9120_v48 }
 0xb4b   : > { %9147 = vst.msk [vmem:[#allocation6 + $0x21] sm:$0xf] %vm9143_vm8, %v9132_v4 }
 0xb4c   : > { %9145 = vst.msk [vmem:[#allocation6 + $0x11] sm:$0xf] %vm9143_vm8, %v9131_v2 }
 0xb50   : > { %v18824_v26 = vld [vmem:[#allocation6 + $0x18] sm:$0x3f] }
 0xb51   : > { %v18826_v1 = vld [vmem:[#allocation6 + $0x8] sm:$0x3f]  ;;  %v9165_v5 = vcombine.high %v18824_v26, %v18824_v26  ;;  %v11770_v43 = vrot.slane %v18824_v26, 9  ;;  %v11782_v18 = vrot.slane %v18824_v26, 10 }
 0xb52   : > { %v9163_v23 = vcombine.high %v18826_v1, %v18826_v1  ;;  %v11768_v38 = vrot.slane %v18826_v1, 9  ;;  %v9272_v42 = vcombine.low %v9148_v22, %v18826_v1  ;;  %v11780_v32 = vrot.slane %v18826_v1, 10  ;;  %v18930_v45 = vld [vmem:[#allocation6 + $0x20] sm:$0x3f]  ;;  %v11799_v22 = vld [vmem:[%s19299_s9 + $0x98] sm:$0xff] }
 0xb53   : > { %v18834_v27 = vld [vmem:[#allocation6 + $0x10] sm:$0x3f]  ;;  %v9183_v49 = vrot.slane %v9165_v5, 5  ;;  %v9370_v53 = vrot.slane %v9165_v5, 6  ;;  %v9549_v4 = vcombine.high %v18930_v45, %v18930_v45  ;;  %v9467_v48 = vcombine.low %v18824_v26, %v18930_v45 }
 0xb54   : > { %v9175_v13 = vrot.slane %v9163_v23, 5  ;;  %v9164_v29 = vcombine.high %v18834_v27, %v18834_v27  ;;  %v11769_v39 = vrot.slane %v18834_v27, 9  ;;  %v9362_v40 = vrot.slane %v9163_v23, 6 }
 0xb55   : > { %v18858_v3 = vsel %vm18820_vm11, %v11770_v43, %v9183_v49  ;;  %v18894_v41 = vcombine.low %v18834_v27, %v18824_v26  ;;  %v11781_v30 = vrot.slane %v18834_v27, 10  ;;  %v9371_v34 = vsel %vm18875_vm15, %v11782_v18, %v9370_v53  ;;  %v11835_v18 = vld [vmem:[%s19301_s11 + $0x28] sm:$0xff] }
 0xb56   : > { %v18841_v20 = vsel %vm18820_vm11, %v11768_v38, %v9175_v13  ;;  %v9179_v15 = vrot.slane %v9164_v29, 5  ;;  %v18890_v50 = vsel %vm18875_vm15, %v11780_v32, %v9362_v40  ;;  %v9366_v60 = vrot.slane %v9164_v29, 6 }
 0xb57   : > { %v9190_v62 = vcombine.low %v9172_v0, %v18841_v20  ;;  %v9377_v47 = vcombine.low %v9359_v37, %v18890_v50  ;;  %v9466_v46 = vcombine.low %v18826_v1, %v18834_v27  ;;  %v14409_v2 = vpack.c.bf16 %v11799_v22, %v11798_v28  ;;  %v11804_v1 = vld [vmem:[%s19299_s9 + $0xa8] sm:$0xff]  ;;  %v11805_v0 = vld [vmem:[%s19299_s9 + $0xb0] sm:$0xff]  ;;  %v11806_v27 = vld [vmem:[%s19299_s9 + $0xb8] sm:$0xff] }
 0xb58   : > { %v18854_v10 = vsel %vm18820_vm11, %v11769_v39, %v9179_v15  ;;  %v9367_v58 = vsel %vm18875_vm15, %v11781_v30, %v9366_v60  ;;  %v9552_v59 = vrot.slane %v9549_v4, 5  ;;  %v11795_v26 = vrot.slane %v18930_v45, 9  ;;  %v11810_v39 = vld [vmem:[%s19299_s9 + $0xc8] sm:$0xff]  ;;  %v11823_v37 = vld [vmem:[%s19299_s9 + $0x100] sm:$0xff]  ;;  %v11826_v60 = vld [vmem:[%s19299_s9 + $0x118] sm:$0xff] }
 0xb59   : > { %14063 = vmatprep.mubr.msk.f32.mxu1 %vm9192_vm12, %v9190_v62  ;;  %v18863_v12 = vcombine.low %v18854_v10, %v18858_v3  ;;  %v18918_v16 = vcombine.low %v9367_v58, %v9371_v34  ;;  %v9559_v44 = vcombine.low %v18841_v20, %v18854_v10  ;;  %v14413_v5 = vpack.c.bf16 %v11804_v1, %v11803_v61  ;;  %v11809_v20 = vld [vmem:[%s19299_s9 + $0xc0] sm:$0xff]  ;;  %v11812_v62 = vld [vmem:[%s19299_s9 + $0xd8] sm:$0xff] }
 0xb5a   : > { %v9553_v23 = vsel %vm18820_vm11, %v11795_v26, %v9552_v59  ;;  %v14417_v13 = vpack.c.bf16 %v11806_v27, %v11805_v0  ;;  %v9651_v29 = vcombine.low %v18890_v50, %v9367_v58  ;;  %v9644_v49 = vrot.slane %v9549_v4, 6  ;;  %v11824_v50 = vld [vmem:[%s19299_s9 + $0x108] sm:$0xff]  ;;  %v11834_v58 = vld [vmem:[%s19301_s11 + $0x20] sm:$0xff] }
 0xb5b   : > { %14064 = vmatmul.mubr.msk.f32.vlgmr.msra.gmra.mrb[48].mxu1 %vm9192_vm12, %v18863_v12  ;;  %v9560_v38 = vcombine.low %v18858_v3, %v9553_v23  ;;  %v11802_v15 = vrot.slane %v18930_v45, 10  ;;  %v14421_v43 = vpack.c.bf16 %v11810_v39, %v11809_v20  ;;  %v14425_v3 = vpack.c.bf16 %v11812_v62, %v11811_v51  ;;  %v10035_v62 = vld [vmem:[%s19301_s11 + $0x10] sm:$0xff] }
 0xb5c   : > { %14384 = vmatpush3.bf16.msra.mxu1 %v14381_v31  ;;  %14074 = vmatprep.mubr.msk.f32.mxu1 %vm9192_vm12, %v9272_v42  ;;  %v14405_v31 = vpack.c.bf16 %v11797_v7, %v11796_v8  ;;  %v11817_v42 = vld [vmem:[%s19299_s9 + $0xe8] sm:$0xff]  ;;  %v9820_v40 = vcombine.high %v9153_v33, %v9153_v33  ;;  %v14433_v32 = vpack.c.bf16 %v11819_v56, %v11818_v25  ;;  %v11822_v30 = vrot.slane %v9153_v33, 10  ;;  %v11829_v7 = vld [vmem:[%s19715_s12] ss:$0 sm:$0xff]  ;;  %s10907_s12 = sshll.u32 %s546_s23, 4  ;;  %s19242_s12 = int_to_ptr.vmem [resolvable:$true] %s10907_s12 }
 0xb5d   : > { %14386 = vmatprep.subr.bf16.mxu1 %v14385_v11  ;;  %v9645_v14 = vsel %vm18875_vm15, %v11802_v15, %v9644_v49  ;;  %v14445_v24 = vpack.c.bf16 %v11835_v18, %v11834_v58  ;;  %v11846_v56 = vld [vmem:[%s19301_s11 + $0x40] sm:$0xff]  ;;  %s15412_s22 = scalar_lea.vmem %s19242_s12, 256  ;;  %p15419_p6 = scmp.lt.s32.totalorder %s19242_s12, %s15417_s20 }
 0xb5e   : > { %v9652_v10 = vcombine.low %v9371_v34, %v9645_v14  ;;  %v9823_v35 = vrot.slane %v9820_v40, 5  ;;  %v9912_v53 = vrot.slane %v9820_v40, 6  ;;  %v11837_v34 = vld [vmem:[%s19301_s11 + $0x38] sm:$0xff]  ;;  %v11847_v40 = vld [vmem:[%s19301_s11 + $0x48] sm:$0xff]  ;;  %p15413_p8 = scmp.ne.s32.totalorder %s19242_s12, %s15412_s22  ;;  %p15420_p9 = scmp.lt.s32.totalorder %s15418_s24, %s15412_s22 }
 0xb5f   : > { %14446 = vmatprep.subr.bf16.mxu0 %v14445_v24 }
 0xb60   : > { %14388 = vmatpush3.bf16.msra.mxu1 %v14385_v11  ;;  %v11816_v11 = vld [vmem:[%s19299_s9 + $0xe0] sm:$0xff]  ;;  %14448 = vmatpush3.bf16.msra.mxu0 %v14445_v24  ;;  %p15414_p13 = pnand %p15413_p8, %p19720_p11  ;;  %p15421_p5 = por %p15420_p9, %p15419_p6 }
 0xb61   : > { %14390 = vmatprep.subr.bf16.mxu1 %v14389_v54  ;;  %v14429_v57 = vpack.c.bf16 %v11817_v42, %v11816_v11 }
 0xb62   : > { %p15415_p1 = pneg %p15414_p13 }
 0xb63   : > { %14075 = vmatmul.mubr.msk.f32.vlgmr.msra.gmra.mrb[48].mxu1 %vm9192_vm12, %v18894_v41 }
 0xb64   : > { %14392 = vmatpush3.bf16.msra.mxu1 %v14389_v54  ;;  %14085 = vmatprep.mubr.msk.f32.mxu1 %vm9192_vm12, %v9377_v47  ;;  %v9740_v54 = vcombine.low %v18930_v45, %v9153_v33  ;;  %v11825_v47 = vld [vmem:[%s19299_s9 + $0x110] sm:$0xff]  ;;  %p15422_p10 = pnand %p15421_p5, %p15415_p1 }
 0xb65   : > { %14394 = vmatprep.subr.bf16.mxu1 %v14393_v36  ;;  %v14441_v21 = vpack.c.bf16 %v11826_v60, %v11825_v47 }
 0xb68   : > { %14396 = vmatpush3.bf16.msra.mxu1 %v14393_v36  ;;  %v9824_v36 = vsel %vm18820_vm11, %v11815_v55, %v9823_v35  ;;  %v14461_v35 = vpack.c.bf16 %v11847_v40, %v11846_v56  ;;  %v10032_v56 = vld [vmem:[#allocation7 + $0x28] sm:$0x3f] }
 0xb69   : > { %14398 = vmatprep.subr.bf16.mxu1 %v14397_v52  ;;  %v9830_v9 = vcombine.low %v9553_v23, %v9824_v36 }
 0xb6b   : > { %14086 = vmatmul.mubr.msk.f32.vlgmr.msra.gmra.mrb[48].mxu1 %vm9192_vm12, %v18918_v16 }
 0xb6c   : > { %14400 = vmatpush3.bf16.msra.mxu1 %v14397_v52  ;;  %14096 = vmatprep.mubr.msk.f32.mxu1 %vm9192_vm12, %v9466_v46  ;;  %v10034_v46 = vld [vmem:[%s19301_s11 + $0x8] sm:$0xff] }
 0xb6d   : > { %14402 = vmatprep.subr.bf16.mxu1 %v14401_v63 }
 0xb70   : > { %14404 = vmatpush3.bf16.msra.mxu1 %v14401_v63  ;;  %v10033_v63 = vld [vmem:[%s19301_s11] sm:$0xff] }
 0xb71   : > { %14406 = vmatprep.subr.bf16.mxu1 %v14405_v31  ;;  %v14453_v8 = vpack.c.bf16 %v10034_v46, %v10033_v63 }
 0xb73   : > { %14097 = vmatmul.mubr.msk.f32.vlgmr.msra.gmra.mrb[48].mxu1 %vm9192_vm12, %v9467_v48 }
 0xb74   : > { %14408 = vmatpush3.bf16.msra.mxu1 %v14405_v31  ;;  %14107 = vmatprep.mubr.msk.f32.mxu1 %vm9192_vm12, %v9559_v44 }
 0xb75   : > { %14410 = vmatprep.subr.bf16.mxu1 %v14409_v2 }
 0xb78   : > { %14412 = vmatpush3.bf16.msra.mxu1 %v14409_v2  ;;  %v10027_v2 = vld [vmem:[#allocation7] sm:$0x3f] }
 0xb79   : > { %14414 = vmatprep.subr.bf16.mxu1 %v14413_v5  ;;  %v10041_v61 = vcombine.high %v10027_v2, %v10027_v2  ;;  %v11830_v1 = vrot.slane %v10027_v2, 9 }
 0xb7b   : > { %14108 = vmatmul.mubr.msk.f32.vlgmr.msra.gmra.mrb[48].mxu1 %vm9192_vm12, %v9560_v38  ;;  %v10047_v26 = vrot.slane %v10041_v61, 5 }
 0xb7c   : > { %14416 = vmatpush3.bf16.msra.mxu1 %v14413_v5  ;;  %14118 = vmatprep.mubr.msk.f32.mxu1 %vm9192_vm12, %v9651_v29 }
 0xb7d   : > { %14418 = vmatprep.subr.bf16.mxu1 %v14417_v13  ;;  %v10048_v38 = vsel %vm18820_vm11, %v11830_v1, %v10047_v26  ;;  %v11866_v26 = vld [vmem:[%s19301_s11 + $0xa0] sm:$0xff] }
 0xb80   : > { %14420 = vmatpush3.bf16.msra.mxu1 %v14417_v13 }
 0xb81   : > { %14422 = vmatprep.subr.bf16.mxu1 %v14421_v43 }
 0xb83   : > { %14119 = vmatmul.mubr.msk.f32.vlgmr.msra.gmra.mrb[48].mxu1 %vm9192_vm12, %v9652_v10  ;;  %v10036_v10 = vld [vmem:[%s19301_s11 + $0x18] sm:$0xff] }
 0xb84   : > { %14424 = vmatpush3.bf16.msra.mxu1 %v14421_v43  ;;  %14129 = vmatprep.mubr.msk.f32.mxu1 %vm9192_vm12, %v18894_v41  ;;  %v14437_v41 = vpack.c.bf16 %v11824_v50, %v11823_v37  ;;  %v11848_v50 = vld [vmem:[%s19301_s11 + $0x50] sm:$0xff] }
 0xb85   : > { %14426 = vmatprep.subr.bf16.mxu1 %v14425_v3 }
 0xb88   : > { %14428 = vmatpush3.bf16.msra.mxu1 %v14425_v3 }
 0xb89   : > { %14430 = vmatprep.subr.bf16.mxu1 %v14429_v57 }
 0xb8b   : > { %14130 = vmatmul.mubr.msk.f32.vlgmr.msra.gmra.mrb[48].mxu1 %vm9192_vm12, %v9740_v54  ;;  %v11842_v54 = vrot.slane %v10027_v2, 10 }
 0xb8c   : > { %14432 = vmatpush3.bf16.msra.mxu1 %v14429_v57  ;;  %14140 = vmatprep.mubr.msk.f32.mxu1 %vm9192_vm12, %v18863_v12  ;;  %v9913_v12 = vsel %vm18875_vm15, %v11822_v30, %v9912_v53  ;;  %v14457_v57 = vpack.c.bf16 %v10036_v10, %v10035_v62  ;;  %v11852_v53 = vld [vmem:[%s19301_s11 + $0x60] sm:$0xff]  ;;  %v11874_v10 = vld [vmem:[%s19301_s11 + $0xd0] sm:$0xff] }
 0xb8d   : > { %14434 = vmatprep.subr.bf16.mxu1 %v14433_v32  ;;  %v9919_v52 = vcombine.low %v9645_v14, %v9913_v12  ;;  %v11853_v12 = vld [vmem:[%s19301_s11 + $0x68] sm:$0xff] }
 0xb8e   : > { %v14469_v18 = vpack.c.bf16 %v11853_v12, %v11852_v53 }
 0xb90   : > { %14436 = vmatpush3.bf16.msra.mxu1 %v14433_v32  ;;  %v10230_v32 = vrot.slane %v10041_v61, 6 }
 0xb91   : > { %14438 = vmatprep.subr.bf16.mxu1 %v14437_v41 }
 0xb92   : > { %v10231_v36 = vsel %vm18875_vm15, %v11842_v54, %v10230_v32  ;;  %v11881_v54 = vld [vmem:[%s19301_s11 + $0xf0] sm:$0xff]  ;;  %v11882_v32 = vld [vmem:[%s19301_s11 + $0xf8] sm:$0xff] }
 0xb93   : > { %14141 = vmatmul.mubr.msk.f32.vlgmr.msra.gmra.mrb[48].mxu1 %vm9192_vm12, %v9830_v9 }
 0xb94   : > { %14440 = vmatpush3.bf16.msra.mxu1 %v14437_v41  ;;  %14151 = vmatprep.mubr.msk.f32.mxu1 %vm9192_vm12, %v18918_v16  ;;  %v14449_v16 = vpack.c.bf16 %v11837_v34, %v11836_v6  ;;  %v11849_v41 = vld [vmem:[%s19301_s11 + $0x58] sm:$0xff]  ;;  %v11854_v34 = vld [vmem:[%s19301_s11 + $0x70] sm:$0xff] }
 0xb95   : > { %14442 = vmatprep.subr.bf16.mxu1 %v14441_v21  ;;  %v14465_v9 = vpack.c.bf16 %v11849_v41, %v11848_v50  ;;  %v11878_v50 = vrot.slane %v10032_v56, 9 }
 0xb96   : > { %14450 = vmatprep.subr.bf16.mxu0 %v14449_v16 }
 0xb97   : > { %14452 = vmatpush3.bf16.msra.mxu0 %v14449_v16  ;;  %v11855_v16 = vld [vmem:[%s19301_s11 + $0x78] sm:$0xff] }
 0xb98   : > { %14444 = vmatpush3.bf16.msra.mxu1 %v14441_v21  ;;  %14454 = vmatprep.subr.bf16.mxu0 %v14453_v8 }
 0xb9b   : > { %14152 = vmatmul.mubr.msk.f32.vlgmr.msra.gmra.mrb[48].mxu1 %vm9192_vm12, %v9919_v52 }
 0xc6e   : > { %v14153_v45 = vpop.f32.mrb[48].mxu1 }
 0xc6f   : > { %v10007_v31 = vadd.f32 %v14153_v45, %v11829_v7  ;;  %v9988_v28 = vpop.f32.mrb[49].mxu1  ;;  %v11859_v45 = vld [vmem:[%s19301_s11 + $0x80] sm:$0xff] }
 0xc70   : > { %v10006_v22 = vadd.f32 %v11829_v7, %v9988_v28 }
 0xc71   : > { %v10009_v4 = vmax.f32 %v10007_v31, 0.0  ;;  %v11860_v31 = vld [vmem:[%s19301_s11 + $0x88] sm:$0xff] }
 0xc72   : > { %v10008_v48 = vmax.f32 %v10006_v22, 0.0  ;;  %v14477_v22 = vpack.c.bf16 %v11860_v31, %v11859_v45 }
 0xc73   : > { %v10013_v44 = vcombine.high %v10009_v4, %v10009_v4  ;;  %10025 = vst.msk [vmem:[#allocation7 + $0x19] sm:$0xf] %vm9143_vm8, %v10009_v4  ;;  %v11861_v4 = vld [vmem:[%s19301_s11 + $0x90] sm:$0xff] }
 0xc74   : > { %v10012_v59 = vcombine.high %v10008_v48, %v10008_v48  ;;  %10023 = vst.msk [vmem:[#allocation7 + $0x9] sm:$0xf] %vm9143_vm8, %v10008_v48  ;;  %v11862_v48 = vld [vmem:[%s19301_s11 + $0x98] sm:$0xff] }
 0xc75   : > { %10026 = vst.msk [vmem:[#allocation7 + $0x21] sm:$0xf] %vm9143_vm8, %v10013_v44 }
 0xc76   : > { %10024 = vst.msk [vmem:[#allocation7 + $0x11] sm:$0xf] %vm9143_vm8, %v10012_v59  ;;  %v14481_v59 = vpack.c.bf16 %v11862_v48, %v11861_v4 }
 0xc7a   : > { %v19045_v5 = vld [vmem:[#allocation7 + $0x18] sm:$0x3f] }
 0xc7b   : > { %v19047_v23 = vld [vmem:[#allocation7 + $0x8] sm:$0x3f]  ;;  %v10044_v0 = vcombine.high %v19045_v5, %v19045_v5  ;;  %v11833_v51 = vrot.slane %v19045_v5, 9  ;;  %v11845_v24 = vrot.slane %v19045_v5, 10 }
 0xc7c   : > { %v10042_v27 = vcombine.high %v19047_v23, %v19047_v23  ;;  %v11831_v29 = vrot.slane %v19047_v23, 9  ;;  %v10147_v25 = vcombine.low %v10027_v2, %v19047_v23  ;;  %v11843_v37 = vrot.slane %v19047_v23, 10  ;;  %v19147_v28 = vld [vmem:[#allocation7 + $0x20] sm:$0x3f] }
 0xc7d   : > { %v19055_v13 = vld [vmem:[#allocation7 + $0x10] sm:$0x3f]  ;;  %v10059_v39 = vrot.slane %v10044_v0, 5  ;;  %v10242_v58 = vrot.slane %v10044_v0, 6  ;;  %v10421_v2 = vcombine.high %v19147_v28, %v19147_v28  ;;  %v10339_v44 = vcombine.low %v19045_v5, %v19147_v28 }
 0xc7e   : > { %v10051_v49 = vrot.slane %v10042_v27, 5  ;;  %v10043_v20 = vcombine.high %v19055_v13, %v19055_v13  ;;  %v11832_v43 = vrot.slane %v19055_v13, 9  ;;  %v10234_v55 = vrot.slane %v10042_v27, 6 }
 0xc7f   : > { %v19079_v42 = vsel %vm18820_vm11, %v11833_v51, %v10059_v39  ;;  %v19111_v60 = vcombine.low %v19055_v13, %v19045_v5  ;;  %v11844_v52 = vrot.slane %v19055_v13, 10  ;;  %v10243_v63 = vsel %vm18875_vm15, %v11845_v24, %v10242_v58 }
 0xc80   : > { %v19062_v15 = vsel %vm18820_vm11, %v11831_v29, %v10051_v49  ;;  %v10055_v14 = vrot.slane %v10043_v20, 5  ;;  %v19107_v47 = vsel %vm18875_vm15, %v11843_v37, %v10234_v55  ;;  %v10238_v30 = vrot.slane %v10043_v20, 6 }
 0xc81   : > { %v10066_v3 = vcombine.low %v10048_v38, %v19062_v15  ;;  %v10249_v21 = vcombine.low %v10231_v36, %v19107_v47  ;;  %v10338_v7 = vcombine.low %v19047_v23, %v19055_v13  ;;  %v10424_v1 = vrot.slane %v10421_v2, 5  ;;  %v11867_v23 = vld [vmem:[%s19301_s11 + $0xa8] sm:$0xff]  ;;  %v11868_v38 = vld [vmem:[%s19301_s11 + $0xb0] sm:$0xff]  ;;  %v11869_v13 = vld [vmem:[%s19301_s11 + $0xb8] sm:$0xff] }
 0xc82   : > { %v19075_v11 = vsel %vm18820_vm11, %v11832_v43, %v10055_v14  ;;  %v10239_v6 = vsel %vm18875_vm15, %v11844_v52, %v10238_v30  ;;  %v11858_v5 = vrot.slane %v19147_v28, 9  ;;  %v14485_v0 = vpack.c.bf16 %v11867_v23, %v11866_v26  ;;  %v11873_v43 = vld [vmem:[%s19301_s11 + $0xc8] sm:$0xff]  ;;  %v11886_v36 = vld [vmem:[%s19301_s11 + $0x100] sm:$0xff]  ;;  %v11889_v30 = vld [vmem:[%s19301_s11 + $0x118] sm:$0xff] }
 0xc83   : > { %14162 = vmatprep.mubr.msk.f32.mxu0 %vm9192_vm12, %v10066_v3  ;;  %v19084_v33 = vcombine.low %v19075_v11, %v19079_v42  ;;  %v19135_v46 = vcombine.low %v10239_v6, %v10243_v63  ;;  %v10431_v61 = vcombine.low %v19062_v15, %v19075_v11  ;;  %v14489_v49 = vpack.c.bf16 %v11869_v13, %v11868_v38  ;;  %v11872_v15 = vld [vmem:[%s19301_s11 + $0xc0] sm:$0xff]  ;;  %v11875_v3 = vld [vmem:[%s19301_s11 + $0xd8] sm:$0xff] }
 0xc84   : > { %v10425_v27 = vsel %vm18820_vm11, %v11858_v5, %v10424_v1  ;;  %v10523_v20 = vcombine.low %v19107_v47, %v10239_v6  ;;  %v10516_v39 = vrot.slane %v10421_v2, 6  ;;  %v11865_v14 = vrot.slane %v19147_v28, 10  ;;  %v11887_v47 = vld [vmem:[%s19301_s11 + $0x108] sm:$0xff] }
 0xc85   : > { %14163 = vmatmul.mubr.msk.f32.vlgmr.msra.gmra.mrb[56].mxu0 %vm9192_vm12, %v19084_v33  ;;  %v10432_v29 = vcombine.low %v19079_v42, %v10425_v27  ;;  %v14493_v51 = vpack.c.bf16 %v11873_v43, %v11872_v15  ;;  %v14497_v42 = vpack.c.bf16 %v11875_v3, %v11874_v10  ;;  %v10692_v55 = vcombine.high %v10032_v56, %v10032_v56 }
 0xc86   : > { %14456 = vmatpush3.bf16.msra.mxu0 %v14453_v8  ;;  %14173 = vmatprep.mubr.msk.f32.mxu0 %vm9192_vm12, %v10147_v25  ;;  %v14473_v8 = vpack.c.bf16 %v11855_v16, %v11854_v34  ;;  %v10517_v62 = vsel %vm18875_vm15, %v11865_v14, %v10516_v39  ;;  %v11880_v25 = vld [vmem:[%s19301_s11 + $0xe8] sm:$0xff]  ;;  %v14505_v37 = vpack.c.bf16 %v11882_v32, %v11881_v54  ;;  %v11885_v52 = vrot.slane %v10032_v56, 10 }
 0xc87   : > { %14458 = vmatprep.subr.bf16.mxu0 %v14457_v57  ;;  %v10524_v11 = vcombine.low %v10243_v63, %v10517_v62  ;;  %v10695_v41 = vrot.slane %v10692_v55, 5 }
 0xc8a   : > { %14460 = vmatpush3.bf16.msra.mxu0 %v14457_v57  ;;  %v11879_v57 = vld [vmem:[%s19301_s11 + $0xe0] sm:$0xff] }
 0xc8b   : > { %14462 = vmatprep.subr.bf16.mxu0 %v14461_v35  ;;  %v14501_v40 = vpack.c.bf16 %v11880_v25, %v11879_v57 }
 0xc8d   : > { %14174 = vmatmul.mubr.msk.f32.vlgmr.msra.gmra.mrb[56].mxu0 %vm9192_vm12, %v19111_v60 }
 0xc8e   : > { %14464 = vmatpush3.bf16.msra.mxu0 %v14461_v35  ;;  %14184 = vmatprep.mubr.msk.f32.mxu0 %vm9192_vm12, %v10249_v21  ;;  %v10612_v35 = vcombine.low %v19147_v28, %v10032_v56  ;;  %v11888_v21 = vld [vmem:[%s19301_s11 + $0x110] sm:$0xff] }
 0xc8f   : > { %14466 = vmatprep.subr.bf16.mxu0 %v14465_v9  ;;  %v14513_v12 = vpack.c.bf16 %v11889_v30, %v11888_v21 }
 0xc92   : > { %14468 = vmatpush3.bf16.msra.mxu0 %v14465_v9  ;;  %v10696_v9 = vsel %vm18820_vm11, %v11878_v50, %v10695_v41 }
 0xc93   : > { %14470 = vmatprep.subr.bf16.mxu0 %v14469_v18  ;;  %v10702_v53 = vcombine.low %v10425_v27, %v10696_v9 }
 0xc95   : > { %14185 = vmatmul.mubr.msk.f32.vlgmr.msra.gmra.mrb[56].mxu0 %vm9192_vm12, %v19135_v46 }
 0xc96   : > { %14472 = vmatpush3.bf16.msra.mxu0 %v14469_v18  ;;  %14195 = vmatprep.mubr.msk.f32.mxu0 %vm9192_vm12, %v10338_v7  ;;  %v11892_v18 = vld [vmem:[%s19717_s30] ss:$0 sm:$0xff] }
 0xc97   : > { %14474 = vmatprep.subr.bf16.mxu0 %v14473_v8 }
 0xc9a   : > { %14476 = vmatpush3.bf16.msra.mxu0 %v14473_v8 }
 0xc9b   : > { %14478 = vmatprep.subr.bf16.mxu0 %v14477_v22 }
 0xc9d   : > { %14196 = vmatmul.mubr.msk.f32.vlgmr.msra.gmra.mrb[56].mxu0 %vm9192_vm12, %v10339_v44 }
 0xc9e   : > { %14480 = vmatpush3.bf16.msra.mxu0 %v14477_v22  ;;  %14206 = vmatprep.mubr.msk.f32.mxu0 %vm9192_vm12, %v10431_v61 }
 0xc9f   : > { %14482 = vmatprep.subr.bf16.mxu0 %v14481_v59 }
 0xca2   : > { %14484 = vmatpush3.bf16.msra.mxu0 %v14481_v59 }
 0xca3   : > { %14486 = vmatprep.subr.bf16.mxu0 %v14485_v0 }
 0xca5   : > { %14207 = vmatmul.mubr.msk.f32.vlgmr.msra.gmra.mrb[56].mxu0 %vm9192_vm12, %v10432_v29 }
 0xca6   : > { %14488 = vmatpush3.bf16.msra.mxu0 %v14485_v0  ;;  %14217 = vmatprep.mubr.msk.f32.mxu0 %vm9192_vm12, %v10523_v20 }
 0xca7   : > { %14490 = vmatprep.subr.bf16.mxu0 %v14489_v49 }
 0xcaa   : > { %14492 = vmatpush3.bf16.msra.mxu0 %v14489_v49 }
 0xcab   : > { %14494 = vmatprep.subr.bf16.mxu0 %v14493_v51 }
 0xcad   : > { %14218 = vmatmul.mubr.msk.f32.vlgmr.msra.gmra.mrb[56].mxu0 %vm9192_vm12, %v10524_v11 }
 0xcae   : > { %14496 = vmatpush3.bf16.msra.mxu0 %v14493_v51  ;;  %14228 = vmatprep.mubr.msk.f32.mxu0 %vm9192_vm12, %v19111_v60  ;;  %v14509_v60 = vpack.c.bf16 %v11887_v47, %v11886_v36 }
 0xcaf   : > { %14498 = vmatprep.subr.bf16.mxu0 %v14497_v42 }
 0xcb2   : > { %14500 = vmatpush3.bf16.msra.mxu0 %v14497_v42 }
 0xcb3   : > { %14502 = vmatprep.subr.bf16.mxu0 %v14501_v40 }
 0xcb5   : > { %14229 = vmatmul.mubr.msk.f32.vlgmr.msra.gmra.mrb[56].mxu0 %vm9192_vm12, %v10612_v35 }
 0xcb6   : > { %14504 = vmatpush3.bf16.msra.mxu0 %v14501_v40  ;;  %14239 = vmatprep.mubr.msk.f32.mxu0 %vm9192_vm12, %v19084_v33  ;;  %v10784_v33 = vrot.slane %v10692_v55, 6 }
 0xcb7   : > { %14506 = vmatprep.subr.bf16.mxu0 %v14505_v37 }
 0xcb8   : > { %v10785_v19 = vsel %vm18875_vm15, %v11885_v52, %v10784_v33 }
 0xcb9   : > { %v10791_v58 = vcombine.low %v10517_v62, %v10785_v19 }
 0xcba   : > { %14508 = vmatpush3.bf16.msra.mxu0 %v14505_v37 }
 0xcbb   : > { %14510 = vmatprep.subr.bf16.mxu0 %v14509_v60 }
 0xcbd   : > { %14240 = vmatmul.mubr.msk.f32.vlgmr.msra.gmra.mrb[56].mxu0 %vm9192_vm12, %v10702_v53 }
 0xcbe   : > { %14512 = vmatpush3.bf16.msra.mxu0 %v14509_v60  ;;  %14250 = vmatprep.mubr.msk.f32.mxu0 %vm9192_vm12, %v19135_v46 }
 0xcbf   : > { %14514 = vmatprep.subr.bf16.mxu0 %v14513_v12 }
 0xcc2   : > { %14516 = vmatpush3.bf16.msra.mxu0 %v14513_v12 }
 0xcc5   : > { %14251 = vmatmul.mubr.msk.f32.vlgmr.msra.gmra.mrb[56].mxu0 %vm9192_vm12, %v10791_v58 }
 0xd98   : > { %v14252_v6 = vpop.f32.mrb[56].mxu0 }
 0xd99   : > { %v10879_v24 = vadd.f32 %v14252_v6, %v11892_v18  ;;  %v10860_v34 = vpop.f32.mrb[57].mxu0 }
 0xd9a   : > { %v10878_v16 = vadd.f32 %v11892_v18, %v10860_v34 }
 0xd9b   : > { %v10881_v17 = vmax.f32 %v10879_v24, 0.0 }
 0xd9c   : > { %v10880_v63 = vmax.f32 %v10878_v16, 0.0 }
 0xd9d   : > { %v10885_v46 = vcombine.high %v10881_v17, %v10881_v17  ;;  %10891 = vst.msk [vmem:[%s546_s23 + $0x8] sm:$0xf] %vm10888_vm0, %v10881_v17 }
 0xd9e   : > { %v10884_v8 = vcombine.high %v10880_v63, %v10880_v63  ;;  %10889 = vst.msk [vmem:[%s546_s23] sm:$0xf] %vm10888_vm0, %v10880_v63 }
 0xd9f   : > { %10892 = vst.msk [vmem:[%s546_s23 + $0xc] sm:$0xf] %vm10888_vm0, %v10885_v46 }
 0xda0   : > { %10890 = vst.msk [vmem:[%s546_s23 + $0x4] sm:$0xf] %vm10888_vm0, %v10884_v8 }
 0xda1   : > { %15425 = shalt.err (!%p15422_p10)
}
 0xda2   : > { %s15426_s18 = scalar_lea.hbm %s19247_s27, 256  ;;  %s15430_s15 = scalar_lea.hbm %s19719_s25, 512 }
 0xda3   : > { %p15427_p0 = scmp.ne.s32.totalorder %s19247_s27, %s15426_s18  ;;  %p15431_p4 = scmp.lt.u32.totalorder %s19247_s27, %s19719_s25 }
 0xda4   : > { %p15432_p12 = scmp.lt.u32.totalorder %s15430_s15, %s15426_s18  ;;  %p15434_p8 = scmp.lt.u32.totalorder %s15426_s18, %s19247_s27 }
 0xda5   : > { %p15428_p2 = pnand %p15427_p0, %p19720_p11 }
 0xda6   : > { %p15433_p7 = por %p15432_p12, %p15431_p4 }
 0xda7   : > { %p15429_p3 = pneg %p15428_p2 }
 0xda8   : > { %p15435_p13 = por %p15434_p8, %p15433_p7 }
 0xdaa   : > { %p15436_p1 = pnand %p15435_p13, %p15429_p3 }
 0xdac   : > { %15439 = shalt.err (!%p15436_p1)
}
 0xdad   : > { %s15498_s28 = smov 64   ;;  %s15499_s29 = smov 4  }
 0xdae   : > { %15207 = dma.vmem_to_hbm [thread:$0]  (%p19720_p11), %s19242_s12, 256, %s19247_s27, %s19249_s21, %s15498_s28, %s15498_s28, %s15499_s29  }
 0xdaf PF: > { %s19721_s16 = sld [smem:[#allocation24_spill]]  ;;  %s19722_s22 = sld [smem:[#allocation21_spill]] }
 0xdb0   : > { %s19723_s17 = sld [smem:[#allocation28_spill]] }
 0xdb5   : > { %p15234_p6 = scmp.ge.s32.totalorder %s19721_s16, 2  ;;  %s10922_s20 = sand.u32 1, %s19722_s22  }
 0xdb6   : > { %p19724_p9 = scmp.ne.s32.totalorder %s19723_s17, 0  ;;  %s10923_s24 = scalar_lea.sflag [#allocation10], %s10922_s20 }
 0xdb8   : > { %p15223_p5 = pnand %p15234_p6, %p19724_p9 }
 0xdba   : > { %15469 = dma.done.wait (!%p15223_p5), %s10923_s24, 256  }
 0xdbb   : > { %15471 = vsyncadd (!%p15223_p5), %s10923_s24, 4294967040  ;;  %s19725_s21 = sld [smem:[#allocation25_spill]]  ;;  %s19726_s18 = sld [smem:[#allocation22_spill]] }
 0xdbc   : > { %s19727_s19 = sld [smem:[#allocation23_spill]]  ;;  %s19728_s20 = sld [smem:[#allocation26_spill]] }
 0xdc1   : > { %p28_p10 = scmp.ge.s32.totalorder %s19725_s21, 4  }
 0xdc3   :  { %30 = sbr.rel (!%p28_p10) target bundleno = 10 (0xa), region = 186 }
 0xdca   :  { %10928 = vsyncpa [#allocation9], 1 }
 0xdcb   :  { %10930 = vsyncpa [#allocation9 + $0x1], 1 }
 0xdcc   :  { %10931 = vsyncpa [#allocation12], 1 }
 0xdcd   :  { %10932 = vsyncpa [#allocation15], 1 }
 0xdce   :  { %10933 = vsyncpa [#allocation10], 1 }
 0xdcf   :  { %10935 = vsyncpa [#allocation10 + $0x1], 1 }

</bundles_post_ra>
